<compile_context>
chip_gen: v7x
topology: tpu7x:2x2x1
jax: 0.10.0
libtpu: 0.0.40
codegen_flags: <defaults>
</compile_context>

<pallas_src>
import functools

import jax
import jax.numpy as jnp
from jax.experimental import pallas as pl
from jax.experimental.pallas import tpu as pltpu

LEAK = 0.2
BN_EPS = 1e-5
STRIDES = (2, 2, 2, 1, 1)
TM_MAX = 256          # M-tile rows (256-512 recommended; 256 keeps v5e happy)


def _round_up(x, m):
    return ((x + m - 1) // m) * m


# ---------------------------------------------------------------- kernels ---
def _conv_kernel(a_ref, w_ref, b_ref, y_ref, *stat_refs,
                 apply_lrelu, m_valid, tm):
    """One M-tile of im2col conv: bf16 [TM,K] @ bf16 [K,Cout] + bias.

    Optionally fuses LeakyReLU (layer 0) and/or emits per-tile BatchNorm
    partial statistics (sum, sum-of-squares per channel) as extra outputs.
    """
    acc = jnp.dot(a_ref[...], w_ref[...], preferred_element_type=jnp.float32)
    acc = acc + b_ref[...]

    if stat_refs:                           # BN layers: per-tile partial stats
        sum_ref, sq_ref = stat_refs
        rows = pl.program_id(0) * tm + jax.lax.broadcasted_iota(
            jnp.int32, (tm, 1), 0)
        mask = rows < m_valid               # ignore M-padding rows
        xm = jnp.where(mask, acc, 0.0)
        s = jnp.sum(xm, axis=0, keepdims=True)        # (1, C)
        q = jnp.sum(xm * xm, axis=0, keepdims=True)   # (1, C)
        c = s.shape[-1]
        sum_ref[...] = jnp.broadcast_to(s[None], (1, 8, c))
        sq_ref[...] = jnp.broadcast_to(q[None], (1, 8, c))

    if apply_lrelu:
        acc = jnp.where(acc >= 0, acc, LEAK * acc)
    y_ref[...] = acc.astype(y_ref.dtype)


def _bn_apply_kernel(x_ref, scale_ref, shift_ref, o_ref):
    """Apply precomputed batch-stats affine (BatchNorm) + LeakyReLU(0.2)."""
    y = x_ref[...].astype(jnp.float32) * scale_ref[...] + shift_ref[...]
    o_ref[...] = jnp.where(y >= 0, y, LEAK * y).astype(o_ref.dtype)


# --------------------------------------------------------------- wrappers ---
def _pallas_conv(a, w, b, *, apply_lrelu, want_stats, m_valid, out_dtype):
    m_pad, k = a.shape
    cout = w.shape[1]
    tm = min(TM_MAX, m_pad)
    n_tiles = pl.cdiv(m_pad, tm)

    kernel = functools.partial(_conv_kernel, apply_lrelu=apply_lrelu,
                               m_valid=m_valid, tm=tm)

    out_shape = [jax.ShapeDtypeStruct((m_pad, cout), out_dtype)]
    out_specs = [pl.BlockSpec((tm, cout), lambda i: (i, 0))]
    if want_stats:
        out_shape += [jax.ShapeDtypeStruct((n_tiles, 8, cout), jnp.float32),
                      jax.ShapeDtypeStruct((n_tiles, 8, cout), jnp.float32)]
        out_specs += [pl.BlockSpec((1, 8, cout), lambda i: (i, 0, 0)),
                      pl.BlockSpec((1, 8, cout), lambda i: (i, 0, 0))]

    cost = pl.CostEstimate(
        flops=2 * m_pad * k * cout,
        transcendentals=0,
        bytes_accessed=int(m_pad * k * a.dtype.itemsize
                           + k * cout * w.dtype.itemsize
                           + m_pad * cout * jnp.dtype(out_dtype).itemsize))

    return pl.pallas_call(
        kernel,
        out_shape=tuple(out_shape),
        grid=(n_tiles,),
        in_specs=[
            pl.BlockSpec((tm, k), lambda i: (i, 0)),        # patches: tile M
            pl.BlockSpec((k, cout), lambda i: (0, 0)),      # weights: resident
            pl.BlockSpec((1, cout), lambda i: (0, 0)),      # bias
        ],
        out_specs=tuple(out_specs),
        compiler_params=pltpu.CompilerParams(
            dimension_semantics=("parallel",)),
        cost_estimate=cost,
    )(a, w, b)


def _pallas_bn_apply(x, scale, shift):
    m_pad, c = x.shape
    tm = min(TM_MAX, m_pad)
    return pl.pallas_call(
        _bn_apply_kernel,
        out_shape=jax.ShapeDtypeStruct((m_pad, c), jnp.bfloat16),
        grid=(pl.cdiv(m_pad, tm),),
        in_specs=[pl.BlockSpec((tm, c), lambda i: (i, 0)),
                  pl.BlockSpec((1, c), lambda i: (0, 0)),
                  pl.BlockSpec((1, c), lambda i: (0, 0))],
        out_specs=pl.BlockSpec((tm, c), lambda i: (i, 0)),
        compiler_params=pltpu.CompilerParams(
            dimension_semantics=("parallel",)),
    )(x, scale, shift)


def _im2col_nhwc(x, k, stride, pad):
    """x: [N, H, W, C] -> patches [N*Ho*Wo, k*k*C] (K ordered kh, kw, C)."""
    n, h, w, c = x.shape
    xp = jnp.pad(x, ((0, 0), (pad, pad), (pad, pad), (0, 0)))
    ho = (h + 2 * pad - k) // stride + 1
    wo = (w + 2 * pad - k) // stride + 1
    cols = []
    for i in range(k):
        for j in range(k):
            cols.append(xp[:, i:i + stride * (ho - 1) + 1:stride,
                           j:j + stride * (wo - 1) + 1:stride, :])
    col = jnp.concatenate(cols, axis=-1)          # [N, Ho, Wo, k*k*C]
    return col.reshape(n * ho * wo, k * k * c), n, ho, wo


def patchgan_forward(x, params):
    """x: [N, in_chan, H, W] (NCHW).  Returns patch scores [N, 1, Ho, Wo]."""
    n_layers = len(params)
    h = x.transpose(0, 2, 3, 1).astype(jnp.bfloat16)   # NHWC slab, bf16
    for idx, p in enumerate(params):
        cout, cin, kh, kw = p["w"].shape
        col, n, ho, wo = _im2col_nhwc(h, kh, STRIDES[idx], 1)
        m = col.shape[0]
        m_pad = _round_up(m, 8)
        if m_pad != m:
            col = jnp.pad(col, ((0, m_pad - m), (0, 0)))

        w2 = p["w"].transpose(2, 3, 1, 0).reshape(kh * kw * cin, cout)
        w2 = w2.astype(jnp.bfloat16)
        b2 = p["b"].reshape(1, cout).astype(jnp.float32)

        is_last = idx == n_layers - 1
        has_bn = "gamma" in p
        res = _pallas_conv(col, w2, b2,
                           apply_lrelu=(idx == 0),
                           want_stats=has_bn,
                           m_valid=m,
                           out_dtype=jnp.float32 if is_last else jnp.bfloat16)

        if has_bn:                       # layers 1..3: BatchNorm + LeakyReLU
            y, ssum, ssq = res
            ssum = ssum[:, 0, :].sum(axis=0)         # (Cout,)
            ssq = ssq[:, 0, :].sum(axis=0)
            mean = ssum / m
            var = jnp.maximum(ssq / m - mean * mean, 0.0)   # biased batch var
            scale = p["gamma"] * jax.lax.rsqrt(var + BN_EPS)
            shift = p["beta"] - mean * scale
            y = _pallas_bn_apply(y, scale.reshape(1, cout),
                                 shift.reshape(1, cout))
        else:
            y = res[0]

        h = y[:m].reshape(n, ho, wo, cout)
    return h.transpose(0, 3, 1, 2)                   # back to NCHW


# ---------------------------------------------------------- reference/init ---
def reference_forward(x, params):
    """Pure-JAX reference (f32 lax.conv) for correctness checking."""
    for idx, p in enumerate(params):
        s = STRIDES[idx]
        y = jax.lax.conv_general_dilated(
            x, p["w"], (s, s), ((1, 1), (1, 1)),
            dimension_numbers=("NCHW", "OIHW", "NCHW"),
            precision=jax.lax.Precision.HIGHEST)
        y = y + p["b"].reshape(1, -1, 1, 1)
        if idx == 0:
            y = jnp.where(y >= 0, y, LEAK * y)
        elif "gamma" in p:
            mean = jnp.mean(y, axis=(0, 2, 3), keepdims=True)
            var = jnp.mean((y - mean) ** 2, axis=(0, 2, 3), keepdims=True)
            y = (y - mean) * jax.lax.rsqrt(var + BN_EPS)
            y = y * p["gamma"].reshape(1, -1, 1, 1) + p["beta"].reshape(1, -1, 1, 1)
            y = jnp.where(y >= 0, y, LEAK * y)
        x = y
    return x


def init_params(key, in_chan=6, fst_filters=64, out_chan=1):
    chans = [in_chan, fst_filters, fst_filters * 2, fst_filters * 4,
             fst_filters * 8, out_chan]
    params = []
    for n in range(5):
        ci, co = chans[n], chans[n + 1]
        key, kw, kb = jax.random.split(key, 3)
        # weights_init: N(0, 0.02); Conv2d bias keeps default U(-1/sqrt(fan_in), .)
        w = 0.02 * jax.random.normal(kw, (co, ci, 4, 4), jnp.float32)
        bound = 1.0 / float(jnp.sqrt(ci * 16.0))
        b = jax.random.uniform(kb, (co,), jnp.float32, -bound, bound)
        p = {"w": w, "b": b}
        if n in (1, 2, 3):   # BatchNorm layers (affine init: gamma=1, beta=0)
            p["gamma"] = jnp.ones((co,), jnp.float32)
            p["beta"] = jnp.zeros((co,), jnp.float32)
        params.append(p)
    return params


if __name__ == "__main__":
    key = jax.random.PRNGKey(0)
    kx, kp = jax.random.split(key)
    # Small but valid PatchGAN input: img_size=32, in_chan = 3 (cond) + 3 (img).
    x = jax.random.normal(kx, (2, 6, 32, 32), jnp.float32)
    params = init_params(kp)

    fwd = jax.jit(patchgan_forward)
    out = jax.block_until_ready(fwd(x, params))
    assert out.shape == (2, 1, 2, 2), out.shape

    ref = jax.block_until_ready(reference_forward(x, params))
    # Tolerance admits the bf16 MXU path (f32 accumulation, bf16 slabs).
    assert jnp.allclose(out.astype(jnp.float32), ref, rtol=2e-2, atol=2e-2), (
        float(jnp.max(jnp.abs(out.astype(jnp.float32) - ref))))

    print("KERNEL_OK")
</pallas_src>

<mosaic_0001>
module attributes {stable_mosaic.version = 11 : i64} {
  func.func @_conv_kernel(%arg0: i32, %arg1: memref<256x96xbf16, #tpu.memory_space<vmem>>, %arg2: memref<96x64xbf16, #tpu.memory_space<vmem>>, %arg3: memref<1x64xf32, #tpu.memory_space<vmem>>, %arg4: memref<256x64xbf16, #tpu.memory_space<vmem>>) attributes {dimension_semantics = [#tpu.dimension_semantics<parallel>], iteration_bounds = array<i64: 2>, scalar_prefetch = 0 : i64, scratch_operands = 0 : i64, tpu.core_type = #tpu.core_type<tc>, window_params = [{transform_indices = @transform_0, window_bounds = array<i64: 256, 96>}, {pipeline_mode = #tpu.pipeline_mode<synchronous>, transform_indices = @transform_1, window_bounds = array<i64: 96, 64>}, {pipeline_mode = #tpu.pipeline_mode<synchronous>, transform_indices = @transform_2, window_bounds = array<i64: 1, 64>}, {transform_indices = @transform_3, window_bounds = array<i64: 256, 64>}]} {
    %c0 = arith.constant 0 : index
    %c0_0 = arith.constant 0 : index
    %0 = vector.load %arg1[%c0, %c0_0] : memref<256x96xbf16, #tpu.memory_space<vmem>>, vector<256x96xbf16>
    %c0_1 = arith.constant 0 : index
    %c0_2 = arith.constant 0 : index
    %1 = vector.load %arg2[%c0_1, %c0_2] : memref<96x64xbf16, #tpu.memory_space<vmem>>, vector<96x64xbf16>
    %cst = arith.constant dense<0.000000e+00> : vector<256x64xf32>
    %2 = tpu.matmul %0, %1, %cst {dimension_numbers = #tpu.dot_dimension_numbers<[1], [0], [0], [1], [0, 0, 1, 1], [], []>} : vector<256x96xbf16>, vector<96x64xbf16>, vector<256x64xf32> -> vector<256x64xf32>
    %c0_3 = arith.constant 0 : index
    %c0_4 = arith.constant 0 : index
    %3 = vector.load %arg3[%c0_3, %c0_4] : memref<1x64xf32, #tpu.memory_space<vmem>>, vector<1x64xf32>
    %4 = vector.broadcast %3 : vector<1x64xf32> to vector<256x64xf32>
    %5 = arith.addf %2, %4 : vector<256x64xf32>
    %cst_5 = arith.constant 0.000000e+00 : f32
    %6 = vector.broadcast %cst_5 : f32 to vector<256x64xf32>
    %7 = arith.cmpf oge, %5, %6 : vector<256x64xf32>
    %cst_6 = arith.constant 2.000000e-01 : f32
    %8 = vector.broadcast %cst_6 : f32 to vector<256x64xf32>
    %9 = arith.mulf %8, %5 : vector<256x64xf32>
    %10 = arith.select %7, %5, %9 : vector<256x64xi1>, vector<256x64xf32>
    %11 = arith.truncf %10 : vector<256x64xf32> to vector<256x64xbf16>
    %c0_7 = arith.constant 0 : index
    %c0_8 = arith.constant 0 : index
    %12 = vector.load %arg4[%c0_7, %c0_8] : memref<256x64xbf16, #tpu.memory_space<vmem>>, vector<256x64xbf16>
    tpu.vector_store %arg4[%c0_7, %c0_8], %11 {strides = array<i32>} : memref<256x64xbf16, #tpu.memory_space<vmem>>, vector<256x64xbf16>,
    return
  }
  func.func @transform_0(%arg0: i32) -> (i32, i32) {
    %c0_i32 = arith.constant 0 : i32
    %c0_i32_0 = arith.constant 0 : i32
    return %arg0, %c0_i32 : i32, i32
  }
  func.func @transform_1(%arg0: i32) -> (i32, i32) {
    %c0_i32 = arith.constant 0 : i32
    %c0_i32_0 = arith.constant 0 : i32
    %c0_i32_1 = arith.constant 0 : i32
    return %c0_i32, %c0_i32_0 : i32, i32
  }
  func.func @transform_2(%arg0: i32) -> (i32, i32) {
    %c0_i32 = arith.constant 0 : i32
    %c0_i32_0 = arith.constant 0 : i32
    %c0_i32_1 = arith.constant 0 : i32
    return %c0_i32, %c0_i32_0 : i32, i32
  }
  func.func @transform_3(%arg0: i32) -> (i32, i32) {
    %c0_i32 = arith.constant 0 : i32
    %c0_i32_0 = arith.constant 0 : i32
    return %arg0, %c0_i32 : i32, i32
  }
}

module attributes {stable_mosaic.version = 11 : i64} {
  func.func @_conv_kernel(%arg0: i32, %arg1: memref<128x1024xbf16, #tpu.memory_space<vmem>>, %arg2: memref<1024x128xbf16, #tpu.memory_space<vmem>>, %arg3: memref<1x128xf32, #tpu.memory_space<vmem>>, %arg4: memref<128x128xbf16, #tpu.memory_space<vmem>>, %arg5: memref<1x8x128xf32, #tpu.memory_space<vmem>>, %arg6: memref<1x8x128xf32, #tpu.memory_space<vmem>>) attributes {dimension_semantics = [#tpu.dimension_semantics<parallel>], iteration_bounds = array<i64: 1>, scalar_prefetch = 0 : i64, scratch_operands = 0 : i64, tpu.core_type = #tpu.core_type<tc>, window_params = [{transform_indices = @transform_0, window_bounds = array<i64: 128, 1024>}, {pipeline_mode = #tpu.pipeline_mode<synchronous>, transform_indices = @transform_1, window_bounds = array<i64: 1024, 128>}, {pipeline_mode = #tpu.pipeline_mode<synchronous>, transform_indices = @transform_2, window_bounds = array<i64: 1, 128>}, {transform_indices = @transform_3, window_bounds = array<i64: 128, 128>}, {transform_indices = @transform_4, window_bounds = array<i64: 1, 8, 128>}, {transform_indices = @transform_5, window_bounds = array<i64: 1, 8, 128>}]} {
    %c0 = arith.constant 0 : index
    %c0_0 = arith.constant 0 : index
    %0 = vector.load %arg1[%c0, %c0_0] : memref<128x1024xbf16, #tpu.memory_space<vmem>>, vector<128x1024xbf16>
    %c0_1 = arith.constant 0 : index
    %c0_2 = arith.constant 0 : index
    %1 = vector.load %arg2[%c0_1, %c0_2] : memref<1024x128xbf16, #tpu.memory_space<vmem>>, vector<1024x128xbf16>
    %cst = arith.constant dense<0.000000e+00> : vector<128x128xf32>
    %2 = tpu.matmul %0, %1, %cst {dimension_numbers = #tpu.dot_dimension_numbers<[1], [0], [0], [1], [0, 0, 1, 1], [], []>} : vector<128x1024xbf16>, vector<1024x128xbf16>, vector<128x128xf32> -> vector<128x128xf32>
    %c0_3 = arith.constant 0 : index
    %c0_4 = arith.constant 0 : index
    %3 = vector.load %arg3[%c0_3, %c0_4] : memref<1x128xf32, #tpu.memory_space<vmem>>, vector<1x128xf32>
    %4 = vector.broadcast %3 : vector<1x128xf32> to vector<128x128xf32>
    %5 = arith.addf %2, %4 : vector<128x128xf32>
    %c128_i32 = arith.constant 128 : i32
    %6 = arith.muli %arg0, %c128_i32 : i32
    %7 = tpu.iota {dimensions = array<i32: 0>} : vector<128x1xi32>
    %8 = vector.broadcast %6 : i32 to vector<128x1xi32>
    %9 = arith.addi %8, %7 : vector<128x1xi32>
    %c128_i32_5 = arith.constant 128 : i32
    %10 = vector.broadcast %c128_i32_5 : i32 to vector<128x1xi32>
    %11 = arith.cmpi slt, %9, %10 : vector<128x1xi32>
    %cst_6 = arith.constant 0.000000e+00 : f32
    %12 = vector.shape_cast %11 : vector<128x1xi1> to vector<128x1xi1>
    %13 = vector.broadcast %12 : vector<128x1xi1> to vector<128x128xi1>
    %14 = vector.broadcast %cst_6 : f32 to vector<128x128xf32>
    %15 = arith.select %13, %5, %14 : vector<128x128xi1>, vector<128x128xf32>
    %cst_7 = arith.constant dense<0.000000e+00> : vector<128xf32>
    %16 = vector.multi_reduction <add>, %15, %cst_7 [0] : vector<128x128xf32> to vector<128xf32>
    %17 = vector.shape_cast %16 : vector<128xf32> to vector<1x128xf32>
    %18 = arith.mulf %15, %15 : vector<128x128xf32>
    %cst_8 = arith.constant dense<0.000000e+00> : vector<128xf32>
    %19 = vector.multi_reduction <add>, %18, %cst_8 [0] : vector<128x128xf32> to vector<128xf32>
    %20 = vector.shape_cast %19 : vector<128xf32> to vector<1x128xf32>
    %21 = vector.shape_cast %17 : vector<1x128xf32> to vector<1x1x128xf32>
    %22 = vector.shape_cast %21 : vector<1x1x128xf32> to vector<1x1x128xf32>
    %23 = vector.broadcast %22 : vector<1x1x128xf32> to vector<1x8x128xf32>
    %c0_9 = arith.constant 0 : index
    %c0_10 = arith.constant 0 : index
    %c0_11 = arith.constant 0 : index
    %24 = vector.load %arg5[%c0_9, %c0_10, %c0_11] : memref<1x8x128xf32, #tpu.memory_space<vmem>>, vector<1x8x128xf32>
    tpu.vector_store %arg5[%c0_9, %c0_10, %c0_11], %23 {strides = array<i32>} : memref<1x8x128xf32, #tpu.memory_space<vmem>>, vector<1x8x128xf32>,
    %25 = vector.shape_cast %20 : vector<1x128xf32> to vector<1x1x128xf32>
    %26 = vector.shape_cast %25 : vector<1x1x128xf32> to vector<1x1x128xf32>
    %27 = vector.broadcast %26 : vector<1x1x128xf32> to vector<1x8x128xf32>
    %c0_12 = arith.constant 0 : index
    %c0_13 = arith.constant 0 : index
    %c0_14 = arith.constant 0 : index
    %28 = vector.load %arg6[%c0_12, %c0_13, %c0_14] : memref<1x8x128xf32, #tpu.memory_space<vmem>>, vector<1x8x128xf32>
    tpu.vector_store %arg6[%c0_12, %c0_13, %c0_14], %27 {strides = array<i32>} : memref<1x8x128xf32, #tpu.memory_space<vmem>>, vector<1x8x128xf32>,
    %29 = arith.truncf %5 : vector<128x128xf32> to vector<128x128xbf16>
    %c0_15 = arith.constant 0 : index
    %c0_16 = arith.constant 0 : index
    %30 = vector.load %arg4[%c0_15, %c0_16] : memref<128x128xbf16, #tpu.memory_space<vmem>>, vector<128x128xbf16>
    tpu.vector_store %arg4[%c0_15, %c0_16], %29 {strides = array<i32>} : memref<128x128xbf16, #tpu.memory_space<vmem>>, vector<128x128xbf16>,
    return
  }
  func.func @transform_0(%arg0: i32) -> (i32, i32) {
    %c0_i32 = arith.constant 0 : i32
    %c0_i32_0 = arith.constant 0 : i32
    return %arg0, %c0_i32 : i32, i32
  }
  func.func @transform_1(%arg0: i32) -> (i32, i32) {
    %c0_i32 = arith.constant 0 : i32
    %c0_i32_0 = arith.constant 0 : i32
    %c0_i32_1 = arith.constant 0 : i32
    return %c0_i32, %c0_i32_0 : i32, i32
  }
  func.func @transform_2(%arg0: i32) -> (i32, i32) {
    %c0_i32 = arith.constant 0 : i32
    %c0_i32_0 = arith.constant 0 : i32
    %c0_i32_1 = arith.constant 0 : i32
    return %c0_i32, %c0_i32_0 : i32, i32
  }
  func.func @transform_3(%arg0: i32) -> (i32, i32) {
    %c0_i32 = arith.constant 0 : i32
    %c0_i32_0 = arith.constant 0 : i32
    return %arg0, %c0_i32 : i32, i32
  }
  func.func @transform_4(%arg0: i32) -> (i32, i32, i32) {
    %c0_i32 = arith.constant 0 : i32
    %c0_i32_0 = arith.constant 0 : i32
    %c0_i32_1 = arith.constant 0 : i32
    return %arg0, %c0_i32, %c0_i32_0 : i32, i32, i32
  }
  func.func @transform_5(%arg0: i32) -> (i32, i32, i32) {
    %c0_i32 = arith.constant 0 : i32
    %c0_i32_0 = arith.constant 0 : i32
    %c0_i32_1 = arith.constant 0 : i32
    return %arg0, %c0_i32, %c0_i32_0 : i32, i32, i32
  }
}

module attributes {stable_mosaic.version = 11 : i64} {
  func.func @_bn_apply_kernel(%arg0: i32, %arg1: memref<128x128xbf16, #tpu.memory_space<vmem>>, %arg2: memref<1x128xf32, #tpu.memory_space<vmem>>, %arg3: memref<1x128xf32, #tpu.memory_space<vmem>>, %arg4: memref<128x128xbf16, #tpu.memory_space<vmem>>) attributes {dimension_semantics = [#tpu.dimension_semantics<parallel>], iteration_bounds = array<i64: 1>, scalar_prefetch = 0 : i64, scratch_operands = 0 : i64, tpu.core_type = #tpu.core_type<tc>, window_params = [{transform_indices = @transform_0, window_bounds = array<i64: 128, 128>}, {pipeline_mode = #tpu.pipeline_mode<synchronous>, transform_indices = @transform_1, window_bounds = array<i64: 1, 128>}, {pipeline_mode = #tpu.pipeline_mode<synchronous>, transform_indices = @transform_2, window_bounds = array<i64: 1, 128>}, {transform_indices = @transform_3, window_bounds = array<i64: 128, 128>}]} {
    %c0 = arith.constant 0 : index
    %c0_0 = arith.constant 0 : index
    %0 = vector.load %arg1[%c0, %c0_0] : memref<128x128xbf16, #tpu.memory_space<vmem>>, vector<128x128xbf16>
    %1 = arith.extf %0 : vector<128x128xbf16> to vector<128x128xf32>
    %c0_1 = arith.constant 0 : index
    %c0_2 = arith.constant 0 : index
    %2 = vector.load %arg2[%c0_1, %c0_2] : memref<1x128xf32, #tpu.memory_space<vmem>>, vector<1x128xf32>
    %3 = vector.broadcast %2 : vector<1x128xf32> to vector<128x128xf32>
    %4 = arith.mulf %1, %3 : vector<128x128xf32>
    %c0_3 = arith.constant 0 : index
    %c0_4 = arith.constant 0 : index
    %5 = vector.load %arg3[%c0_3, %c0_4] : memref<1x128xf32, #tpu.memory_space<vmem>>, vector<1x128xf32>
    %6 = vector.broadcast %5 : vector<1x128xf32> to vector<128x128xf32>
    %7 = arith.addf %4, %6 : vector<128x128xf32>
    %cst = arith.constant 0.000000e+00 : f32
    %8 = vector.broadcast %cst : f32 to vector<128x128xf32>
    %9 = arith.cmpf oge, %7, %8 : vector<128x128xf32>
    %cst_5 = arith.constant 2.000000e-01 : f32
    %10 = vector.broadcast %cst_5 : f32 to vector<128x128xf32>
    %11 = arith.mulf %10, %7 : vector<128x128xf32>
    %12 = arith.select %9, %7, %11 : vector<128x128xi1>, vector<128x128xf32>
    %13 = arith.truncf %12 : vector<128x128xf32> to vector<128x128xbf16>
    %c0_6 = arith.constant 0 : index
    %c0_7 = arith.constant 0 : index
    %14 = vector.load %arg4[%c0_6, %c0_7] : memref<128x128xbf16, #tpu.memory_space<vmem>>, vector<128x128xbf16>
    tpu.vector_store %arg4[%c0_6, %c0_7], %13 {strides = array<i32>} : memref<128x128xbf16, #tpu.memory_space<vmem>>, vector<128x128xbf16>,
    return
  }
  func.func @transform_0(%arg0: i32) -> (i32, i32) {
    %c0_i32 = arith.constant 0 : i32
    %c0_i32_0 = arith.constant 0 : i32
    return %arg0, %c0_i32 : i32, i32
  }
  func.func @transform_1(%arg0: i32) -> (i32, i32) {
    %c0_i32 = arith.constant 0 : i32
    %c0_i32_0 = arith.constant 0 : i32
    %c0_i32_1 = arith.constant 0 : i32
    return %c0_i32, %c0_i32_0 : i32, i32
  }
  func.func @transform_2(%arg0: i32) -> (i32, i32) {
    %c0_i32 = arith.constant 0 : i32
    %c0_i32_0 = arith.constant 0 : i32
    %c0_i32_1 = arith.constant 0 : i32
    return %c0_i32, %c0_i32_0 : i32, i32
  }
  func.func @transform_3(%arg0: i32) -> (i32, i32) {
    %c0_i32 = arith.constant 0 : i32
    %c0_i32_0 = arith.constant 0 : i32
    return %arg0, %c0_i32 : i32, i32
  }
}

module attributes {stable_mosaic.version = 11 : i64} {
  func.func @_conv_kernel(%arg0: i32, %arg1: memref<32x2048xbf16, #tpu.memory_space<vmem>>, %arg2: memref<2048x256xbf16, #tpu.memory_space<vmem>>, %arg3: memref<1x256xf32, #tpu.memory_space<vmem>>, %arg4: memref<32x256xbf16, #tpu.memory_space<vmem>>, %arg5: memref<1x8x256xf32, #tpu.memory_space<vmem>>, %arg6: memref<1x8x256xf32, #tpu.memory_space<vmem>>) attributes {dimension_semantics = [#tpu.dimension_semantics<parallel>], iteration_bounds = array<i64: 1>, scalar_prefetch = 0 : i64, scratch_operands = 0 : i64, tpu.core_type = #tpu.core_type<tc>, window_params = [{transform_indices = @transform_0, window_bounds = array<i64: 32, 2048>}, {pipeline_mode = #tpu.pipeline_mode<synchronous>, transform_indices = @transform_1, window_bounds = array<i64: 2048, 256>}, {pipeline_mode = #tpu.pipeline_mode<synchronous>, transform_indices = @transform_2, window_bounds = array<i64: 1, 256>}, {transform_indices = @transform_3, window_bounds = array<i64: 32, 256>}, {transform_indices = @transform_4, window_bounds = array<i64: 1, 8, 256>}, {transform_indices = @transform_5, window_bounds = array<i64: 1, 8, 256>}]} {
    %c0 = arith.constant 0 : index
    %c0_0 = arith.constant 0 : index
    %0 = vector.load %arg1[%c0, %c0_0] : memref<32x2048xbf16, #tpu.memory_space<vmem>>, vector<32x2048xbf16>
    %c0_1 = arith.constant 0 : index
    %c0_2 = arith.constant 0 : index
    %1 = vector.load %arg2[%c0_1, %c0_2] : memref<2048x256xbf16, #tpu.memory_space<vmem>>, vector<2048x256xbf16>
    %cst = arith.constant dense<0.000000e+00> : vector<32x256xf32>
    %2 = tpu.matmul %0, %1, %cst {dimension_numbers = #tpu.dot_dimension_numbers<[1], [0], [0], [1], [0, 0, 1, 1], [], []>} : vector<32x2048xbf16>, vector<2048x256xbf16>, vector<32x256xf32> -> vector<32x256xf32>
    %c0_3 = arith.constant 0 : index
    %c0_4 = arith.constant 0 : index
    %3 = vector.load %arg3[%c0_3, %c0_4] : memref<1x256xf32, #tpu.memory_space<vmem>>, vector<1x256xf32>
    %4 = vector.broadcast %3 : vector<1x256xf32> to vector<32x256xf32>
    %5 = arith.addf %2, %4 : vector<32x256xf32>
    %c32_i32 = arith.constant 32 : i32
    %6 = arith.muli %arg0, %c32_i32 : i32
    %7 = tpu.iota {dimensions = array<i32: 0>} : vector<32x1xi32>
    %8 = vector.broadcast %6 : i32 to vector<32x1xi32>
    %9 = arith.addi %8, %7 : vector<32x1xi32>
    %c32_i32_5 = arith.constant 32 : i32
    %10 = vector.broadcast %c32_i32_5 : i32 to vector<32x1xi32>
    %11 = arith.cmpi slt, %9, %10 : vector<32x1xi32>
    %cst_6 = arith.constant 0.000000e+00 : f32
    %12 = vector.shape_cast %11 : vector<32x1xi1> to vector<32x1xi1>
    %13 = vector.broadcast %12 : vector<32x1xi1> to vector<32x256xi1>
    %14 = vector.broadcast %cst_6 : f32 to vector<32x256xf32>
    %15 = arith.select %13, %5, %14 : vector<32x256xi1>, vector<32x256xf32>
    %cst_7 = arith.constant dense<0.000000e+00> : vector<256xf32>
    %16 = vector.multi_reduction <add>, %15, %cst_7 [0] : vector<32x256xf32> to vector<256xf32>
    %17 = vector.shape_cast %16 : vector<256xf32> to vector<1x256xf32>
    %18 = arith.mulf %15, %15 : vector<32x256xf32>
    %cst_8 = arith.constant dense<0.000000e+00> : vector<256xf32>
    %19 = vector.multi_reduction <add>, %18, %cst_8 [0] : vector<32x256xf32> to vector<256xf32>
    %20 = vector.shape_cast %19 : vector<256xf32> to vector<1x256xf32>
    %21 = vector.shape_cast %17 : vector<1x256xf32> to vector<1x1x256xf32>
    %22 = vector.shape_cast %21 : vector<1x1x256xf32> to vector<1x1x256xf32>
    %23 = vector.broadcast %22 : vector<1x1x256xf32> to vector<1x8x256xf32>
    %c0_9 = arith.constant 0 : index
    %c0_10 = arith.constant 0 : index
    %c0_11 = arith.constant 0 : index
    %24 = vector.load %arg5[%c0_9, %c0_10, %c0_11] : memref<1x8x256xf32, #tpu.memory_space<vmem>>, vector<1x8x256xf32>
    tpu.vector_store %arg5[%c0_9, %c0_10, %c0_11], %23 {strides = array<i32>} : memref<1x8x256xf32, #tpu.memory_space<vmem>>, vector<1x8x256xf32>,
    %25 = vector.shape_cast %20 : vector<1x256xf32> to vector<1x1x256xf32>
    %26 = vector.shape_cast %25 : vector<1x1x256xf32> to vector<1x1x256xf32>
    %27 = vector.broadcast %26 : vector<1x1x256xf32> to vector<1x8x256xf32>
    %c0_12 = arith.constant 0 : index
    %c0_13 = arith.constant 0 : index
    %c0_14 = arith.constant 0 : index
    %28 = vector.load %arg6[%c0_12, %c0_13, %c0_14] : memref<1x8x256xf32, #tpu.memory_space<vmem>>, vector<1x8x256xf32>
    tpu.vector_store %arg6[%c0_12, %c0_13, %c0_14], %27 {strides = array<i32>} : memref<1x8x256xf32, #tpu.memory_space<vmem>>, vector<1x8x256xf32>,
    %29 = arith.truncf %5 : vector<32x256xf32> to vector<32x256xbf16>
    %c0_15 = arith.constant 0 : index
    %c0_16 = arith.constant 0 : index
    %30 = vector.load %arg4[%c0_15, %c0_16] : memref<32x256xbf16, #tpu.memory_space<vmem>>, vector<32x256xbf16>
    tpu.vector_store %arg4[%c0_15, %c0_16], %29 {strides = array<i32>} : memref<32x256xbf16, #tpu.memory_space<vmem>>, vector<32x256xbf16>,
    return
  }
  func.func @transform_0(%arg0: i32) -> (i32, i32) {
    %c0_i32 = arith.constant 0 : i32
    %c0_i32_0 = arith.constant 0 : i32
    return %arg0, %c0_i32 : i32, i32
  }
  func.func @transform_1(%arg0: i32) -> (i32, i32) {
    %c0_i32 = arith.constant 0 : i32
    %c0_i32_0 = arith.constant 0 : i32
    %c0_i32_1 = arith.constant 0 : i32
    return %c0_i32, %c0_i32_0 : i32, i32
  }
  func.func @transform_2(%arg0: i32) -> (i32, i32) {
    %c0_i32 = arith.constant 0 : i32
    %c0_i32_0 = arith.constant 0 : i32
    %c0_i32_1 = arith.constant 0 : i32
    return %c0_i32, %c0_i32_0 : i32, i32
  }
  func.func @transform_3(%arg0: i32) -> (i32, i32) {
    %c0_i32 = arith.constant 0 : i32
    %c0_i32_0 = arith.constant 0 : i32
    return %arg0, %c0_i32 : i32, i32
  }
  func.func @transform_4(%arg0: i32) -> (i32, i32, i32) {
    %c0_i32 = arith.constant 0 : i32
    %c0_i32_0 = arith.constant 0 : i32
    %c0_i32_1 = arith.constant 0 : i32
    return %arg0, %c0_i32, %c0_i32_0 : i32, i32, i32
  }
  func.func @transform_5(%arg0: i32) -> (i32, i32, i32) {
    %c0_i32 = arith.constant 0 : i32
    %c0_i32_0 = arith.constant 0 : i32
    %c0_i32_1 = arith.constant 0 : i32
    return %arg0, %c0_i32, %c0_i32_0 : i32, i32, i32
  }
}

module attributes {stable_mosaic.version = 11 : i64} {
  func.func @_bn_apply_kernel(%arg0: i32, %arg1: memref<32x256xbf16, #tpu.memory_space<vmem>>, %arg2: memref<1x256xf32, #tpu.memory_space<vmem>>, %arg3: memref<1x256xf32, #tpu.memory_space<vmem>>, %arg4: memref<32x256xbf16, #tpu.memory_space<vmem>>) attributes {dimension_semantics = [#tpu.dimension_semantics<parallel>], iteration_bounds = array<i64: 1>, scalar_prefetch = 0 : i64, scratch_operands = 0 : i64, tpu.core_type = #tpu.core_type<tc>, window_params = [{transform_indices = @transform_0, window_bounds = array<i64: 32, 256>}, {pipeline_mode = #tpu.pipeline_mode<synchronous>, transform_indices = @transform_1, window_bounds = array<i64: 1, 256>}, {pipeline_mode = #tpu.pipeline_mode<synchronous>, transform_indices = @transform_2, window_bounds = array<i64: 1, 256>}, {transform_indices = @transform_3, window_bounds = array<i64: 32, 256>}]} {
    %c0 = arith.constant 0 : index
    %c0_0 = arith.constant 0 : index
    %0 = vector.load %arg1[%c0, %c0_0] : memref<32x256xbf16, #tpu.memory_space<vmem>>, vector<32x256xbf16>
    %1 = arith.extf %0 : vector<32x256xbf16> to vector<32x256xf32>
    %c0_1 = arith.constant 0 : index
    %c0_2 = arith.constant 0 : index
    %2 = vector.load %arg2[%c0_1, %c0_2] : memref<1x256xf32, #tpu.memory_space<vmem>>, vector<1x256xf32>
    %3 = vector.broadcast %2 : vector<1x256xf32> to vector<32x256xf32>
    %4 = arith.mulf %1, %3 : vector<32x256xf32>
    %c0_3 = arith.constant 0 : index
    %c0_4 = arith.constant 0 : index
    %5 = vector.load %arg3[%c0_3, %c0_4] : memref<1x256xf32, #tpu.memory_space<vmem>>, vector<1x256xf32>
    %6 = vector.broadcast %5 : vector<1x256xf32> to vector<32x256xf32>
    %7 = arith.addf %4, %6 : vector<32x256xf32>
    %cst = arith.constant 0.000000e+00 : f32
    %8 = vector.broadcast %cst : f32 to vector<32x256xf32>
    %9 = arith.cmpf oge, %7, %8 : vector<32x256xf32>
    %cst_5 = arith.constant 2.000000e-01 : f32
    %10 = vector.broadcast %cst_5 : f32 to vector<32x256xf32>
    %11 = arith.mulf %10, %7 : vector<32x256xf32>
    %12 = arith.select %9, %7, %11 : vector<32x256xi1>, vector<32x256xf32>
    %13 = arith.truncf %12 : vector<32x256xf32> to vector<32x256xbf16>
    %c0_6 = arith.constant 0 : index
    %c0_7 = arith.constant 0 : index
    %14 = vector.load %arg4[%c0_6, %c0_7] : memref<32x256xbf16, #tpu.memory_space<vmem>>, vector<32x256xbf16>
    tpu.vector_store %arg4[%c0_6, %c0_7], %13 {strides = array<i32>} : memref<32x256xbf16, #tpu.memory_space<vmem>>, vector<32x256xbf16>,
    return
  }
  func.func @transform_0(%arg0: i32) -> (i32, i32) {
    %c0_i32 = arith.constant 0 : i32
    %c0_i32_0 = arith.constant 0 : i32
    return %arg0, %c0_i32 : i32, i32
  }
  func.func @transform_1(%arg0: i32) -> (i32, i32) {
    %c0_i32 = arith.constant 0 : i32
    %c0_i32_0 = arith.constant 0 : i32
    %c0_i32_1 = arith.constant 0 : i32
    return %c0_i32, %c0_i32_0 : i32, i32
  }
  func.func @transform_2(%arg0: i32) -> (i32, i32) {
    %c0_i32 = arith.constant 0 : i32
    %c0_i32_0 = arith.constant 0 : i32
    %c0_i32_1 = arith.constant 0 : i32
    return %c0_i32, %c0_i32_0 : i32, i32
  }
  func.func @transform_3(%arg0: i32) -> (i32, i32) {
    %c0_i32 = arith.constant 0 : i32
    %c0_i32_0 = arith.constant 0 : i32
    return %arg0, %c0_i32 : i32, i32
  }
}

module attributes {stable_mosaic.version = 11 : i64} {
  func.func @_conv_kernel(%arg0: i32, %arg1: memref<24x4096xbf16, #tpu.memory_space<vmem>>, %arg2: memref<4096x512xbf16, #tpu.memory_space<vmem>>, %arg3: memref<1x512xf32, #tpu.memory_space<vmem>>, %arg4: memref<24x512xbf16, #tpu.memory_space<vmem>>, %arg5: memref<1x8x512xf32, #tpu.memory_space<vmem>>, %arg6: memref<1x8x512xf32, #tpu.memory_space<vmem>>) attributes {dimension_semantics = [#tpu.dimension_semantics<parallel>], iteration_bounds = array<i64: 1>, scalar_prefetch = 0 : i64, scratch_operands = 0 : i64, tpu.core_type = #tpu.core_type<tc>, window_params = [{transform_indices = @transform_0, window_bounds = array<i64: 24, 4096>}, {pipeline_mode = #tpu.pipeline_mode<synchronous>, transform_indices = @transform_1, window_bounds = array<i64: 4096, 512>}, {pipeline_mode = #tpu.pipeline_mode<synchronous>, transform_indices = @transform_2, window_bounds = array<i64: 1, 512>}, {transform_indices = @transform_3, window_bounds = array<i64: 24, 512>}, {transform_indices = @transform_4, window_bounds = array<i64: 1, 8, 512>}, {transform_indices = @transform_5, window_bounds = array<i64: 1, 8, 512>}]} {
    %c0 = arith.constant 0 : index
    %c0_0 = arith.constant 0 : index
    %0 = vector.load %arg1[%c0, %c0_0] : memref<24x4096xbf16, #tpu.memory_space<vmem>>, vector<24x4096xbf16>
    %c0_1 = arith.constant 0 : index
    %c0_2 = arith.constant 0 : index
    %1 = vector.load %arg2[%c0_1, %c0_2] : memref<4096x512xbf16, #tpu.memory_space<vmem>>, vector<4096x512xbf16>
    %cst = arith.constant dense<0.000000e+00> : vector<24x512xf32>
    %2 = tpu.matmul %0, %1, %cst {dimension_numbers = #tpu.dot_dimension_numbers<[1], [0], [0], [1], [0, 0, 1, 1], [], []>} : vector<24x4096xbf16>, vector<4096x512xbf16>, vector<24x512xf32> -> vector<24x512xf32>
    %c0_3 = arith.constant 0 : index
    %c0_4 = arith.constant 0 : index
    %3 = vector.load %arg3[%c0_3, %c0_4] : memref<1x512xf32, #tpu.memory_space<vmem>>, vector<1x512xf32>
    %4 = vector.broadcast %3 : vector<1x512xf32> to vector<24x512xf32>
    %5 = arith.addf %2, %4 : vector<24x512xf32>
    %c24_i32 = arith.constant 24 : i32
    %6 = arith.muli %arg0, %c24_i32 : i32
    %7 = tpu.iota {dimensions = array<i32: 0>} : vector<24x1xi32>
    %8 = vector.broadcast %6 : i32 to vector<24x1xi32>
    %9 = arith.addi %8, %7 : vector<24x1xi32>
    %c18_i32 = arith.constant 18 : i32
    %10 = vector.broadcast %c18_i32 : i32 to vector<24x1xi32>
    %11 = arith.cmpi slt, %9, %10 : vector<24x1xi32>
    %cst_5 = arith.constant 0.000000e+00 : f32
    %12 = vector.shape_cast %11 : vector<24x1xi1> to vector<24x1xi1>
    %13 = vector.broadcast %12 : vector<24x1xi1> to vector<24x512xi1>
    %14 = vector.broadcast %cst_5 : f32 to vector<24x512xf32>
    %15 = arith.select %13, %5, %14 : vector<24x512xi1>, vector<24x512xf32>
    %cst_6 = arith.constant dense<0.000000e+00> : vector<512xf32>
    %16 = vector.multi_reduction <add>, %15, %cst_6 [0] : vector<24x512xf32> to vector<512xf32>
    %17 = vector.shape_cast %16 : vector<512xf32> to vector<1x512xf32>
    %18 = arith.mulf %15, %15 : vector<24x512xf32>
    %cst_7 = arith.constant dense<0.000000e+00> : vector<512xf32>
    %19 = vector.multi_reduction <add>, %18, %cst_7 [0] : vector<24x512xf32> to vector<512xf32>
    %20 = vector.shape_cast %19 : vector<512xf32> to vector<1x512xf32>
    %21 = vector.shape_cast %17 : vector<1x512xf32> to vector<1x1x512xf32>
    %22 = vector.shape_cast %21 : vector<1x1x512xf32> to vector<1x1x512xf32>
    %23 = vector.broadcast %22 : vector<1x1x512xf32> to vector<1x8x512xf32>
    %c0_8 = arith.constant 0 : index
    %c0_9 = arith.constant 0 : index
    %c0_10 = arith.constant 0 : index
    %24 = vector.load %arg5[%c0_8, %c0_9, %c0_10] : memref<1x8x512xf32, #tpu.memory_space<vmem>>, vector<1x8x512xf32>
    tpu.vector_store %arg5[%c0_8, %c0_9, %c0_10], %23 {strides = array<i32>} : memref<1x8x512xf32, #tpu.memory_space<vmem>>, vector<1x8x512xf32>,
    %25 = vector.shape_cast %20 : vector<1x512xf32> to vector<1x1x512xf32>
    %26 = vector.shape_cast %25 : vector<1x1x512xf32> to vector<1x1x512xf32>
    %27 = vector.broadcast %26 : vector<1x1x512xf32> to vector<1x8x512xf32>
    %c0_11 = arith.constant 0 : index
    %c0_12 = arith.constant 0 : index
    %c0_13 = arith.constant 0 : index
    %28 = vector.load %arg6[%c0_11, %c0_12, %c0_13] : memref<1x8x512xf32, #tpu.memory_space<vmem>>, vector<1x8x512xf32>
    tpu.vector_store %arg6[%c0_11, %c0_12, %c0_13], %27 {strides = array<i32>} : memref<1x8x512xf32, #tpu.memory_space<vmem>>, vector<1x8x512xf32>,
    %29 = arith.truncf %5 : vector<24x512xf32> to vector<24x512xbf16>
    %c0_14 = arith.constant 0 : index
    %c0_15 = arith.constant 0 : index
    %30 = vector.load %arg4[%c0_14, %c0_15] : memref<24x512xbf16, #tpu.memory_space<vmem>>, vector<24x512xbf16>
    tpu.vector_store %arg4[%c0_14, %c0_15], %29 {strides = array<i32>} : memref<24x512xbf16, #tpu.memory_space<vmem>>, vector<24x512xbf16>,
    return
  }
  func.func @transform_0(%arg0: i32) -> (i32, i32) {
    %c0_i32 = arith.constant 0 : i32
    %c0_i32_0 = arith.constant 0 : i32
    return %arg0, %c0_i32 : i32, i32
  }
  func.func @transform_1(%arg0: i32) -> (i32, i32) {
    %c0_i32 = arith.constant 0 : i32
    %c0_i32_0 = arith.constant 0 : i32
    %c0_i32_1 = arith.constant 0 : i32
    return %c0_i32, %c0_i32_0 : i32, i32
  }
  func.func @transform_2(%arg0: i32) -> (i32, i32) {
    %c0_i32 = arith.constant 0 : i32
    %c0_i32_0 = arith.constant 0 : i32
    %c0_i32_1 = arith.constant 0 : i32
    return %c0_i32, %c0_i32_0 : i32, i32
  }
  func.func @transform_3(%arg0: i32) -> (i32, i32) {
    %c0_i32 = arith.constant 0 : i32
    %c0_i32_0 = arith.constant 0 : i32
    return %arg0, %c0_i32 : i32, i32
  }
  func.func @transform_4(%arg0: i32) -> (i32, i32, i32) {
    %c0_i32 = arith.constant 0 : i32
    %c0_i32_0 = arith.constant 0 : i32
    %c0_i32_1 = arith.constant 0 : i32
    return %arg0, %c0_i32, %c0_i32_0 : i32, i32, i32
  }
  func.func @transform_5(%arg0: i32) -> (i32, i32, i32) {
    %c0_i32 = arith.constant 0 : i32
    %c0_i32_0 = arith.constant 0 : i32
    %c0_i32_1 = arith.constant 0 : i32
    return %arg0, %c0_i32, %c0_i32_0 : i32, i32, i32
  }
}

module attributes {stable_mosaic.version = 11 : i64} {
  func.func @_bn_apply_kernel(%arg0: i32, %arg1: memref<24x512xbf16, #tpu.memory_space<vmem>>, %arg2: memref<1x512xf32, #tpu.memory_space<vmem>>, %arg3: memref<1x512xf32, #tpu.memory_space<vmem>>, %arg4: memref<24x512xbf16, #tpu.memory_space<vmem>>) attributes {dimension_semantics = [#tpu.dimension_semantics<parallel>], iteration_bounds = array<i64: 1>, scalar_prefetch = 0 : i64, scratch_operands = 0 : i64, tpu.core_type = #tpu.core_type<tc>, window_params = [{transform_indices = @transform_0, window_bounds = array<i64: 24, 512>}, {pipeline_mode = #tpu.pipeline_mode<synchronous>, transform_indices = @transform_1, window_bounds = array<i64: 1, 512>}, {pipeline_mode = #tpu.pipeline_mode<synchronous>, transform_indices = @transform_2, window_bounds = array<i64: 1, 512>}, {transform_indices = @transform_3, window_bounds = array<i64: 24, 512>}]} {
    %c0 = arith.constant 0 : index
    %c0_0 = arith.constant 0 : index
    %0 = vector.load %arg1[%c0, %c0_0] : memref<24x512xbf16, #tpu.memory_space<vmem>>, vector<24x512xbf16>
    %1 = arith.extf %0 : vector<24x512xbf16> to vector<24x512xf32>
    %c0_1 = arith.constant 0 : index
    %c0_2 = arith.constant 0 : index
    %2 = vector.load %arg2[%c0_1, %c0_2] : memref<1x512xf32, #tpu.memory_space<vmem>>, vector<1x512xf32>
    %3 = vector.broadcast %2 : vector<1x512xf32> to vector<24x512xf32>
    %4 = arith.mulf %1, %3 : vector<24x512xf32>
    %c0_3 = arith.constant 0 : index
    %c0_4 = arith.constant 0 : index
    %5 = vector.load %arg3[%c0_3, %c0_4] : memref<1x512xf32, #tpu.memory_space<vmem>>, vector<1x512xf32>
    %6 = vector.broadcast %5 : vector<1x512xf32> to vector<24x512xf32>
    %7 = arith.addf %4, %6 : vector<24x512xf32>
    %cst = arith.constant 0.000000e+00 : f32
    %8 = vector.broadcast %cst : f32 to vector<24x512xf32>
    %9 = arith.cmpf oge, %7, %8 : vector<24x512xf32>
    %cst_5 = arith.constant 2.000000e-01 : f32
    %10 = vector.broadcast %cst_5 : f32 to vector<24x512xf32>
    %11 = arith.mulf %10, %7 : vector<24x512xf32>
    %12 = arith.select %9, %7, %11 : vector<24x512xi1>, vector<24x512xf32>
    %13 = arith.truncf %12 : vector<24x512xf32> to vector<24x512xbf16>
    %c0_6 = arith.constant 0 : index
    %c0_7 = arith.constant 0 : index
    %14 = vector.load %arg4[%c0_6, %c0_7] : memref<24x512xbf16, #tpu.memory_space<vmem>>, vector<24x512xbf16>
    tpu.vector_store %arg4[%c0_6, %c0_7], %13 {strides = array<i32>} : memref<24x512xbf16, #tpu.memory_space<vmem>>, vector<24x512xbf16>,
    return
  }
  func.func @transform_0(%arg0: i32) -> (i32, i32) {
    %c0_i32 = arith.constant 0 : i32
    %c0_i32_0 = arith.constant 0 : i32
    return %arg0, %c0_i32 : i32, i32
  }
  func.func @transform_1(%arg0: i32) -> (i32, i32) {
    %c0_i32 = arith.constant 0 : i32
    %c0_i32_0 = arith.constant 0 : i32
    %c0_i32_1 = arith.constant 0 : i32
    return %c0_i32, %c0_i32_0 : i32, i32
  }
  func.func @transform_2(%arg0: i32) -> (i32, i32) {
    %c0_i32 = arith.constant 0 : i32
    %c0_i32_0 = arith.constant 0 : i32
    %c0_i32_1 = arith.constant 0 : i32
    return %c0_i32, %c0_i32_0 : i32, i32
  }
  func.func @transform_3(%arg0: i32) -> (i32, i32) {
    %c0_i32 = arith.constant 0 : i32
    %c0_i32_0 = arith.constant 0 : i32
    return %arg0, %c0_i32 : i32, i32
  }
}

module attributes {stable_mosaic.version = 11 : i64} {
  func.func @_conv_kernel(%arg0: i32, %arg1: memref<8x8192xbf16, #tpu.memory_space<vmem>>, %arg2: memref<8192x1xbf16, #tpu.memory_space<vmem>>, %arg3: memref<1x1xf32, #tpu.memory_space<vmem>>, %arg4: memref<8x1xf32, #tpu.memory_space<vmem>>) attributes {dimension_semantics = [#tpu.dimension_semantics<parallel>], iteration_bounds = array<i64: 1>, scalar_prefetch = 0 : i64, scratch_operands = 0 : i64, tpu.core_type = #tpu.core_type<tc>, window_params = [{transform_indices = @transform_0, window_bounds = array<i64: 8, 8192>}, {pipeline_mode = #tpu.pipeline_mode<synchronous>, transform_indices = @transform_1, window_bounds = array<i64: 8192, 1>}, {pipeline_mode = #tpu.pipeline_mode<synchronous>, transform_indices = @transform_2, window_bounds = array<i64: 1, 1>}, {transform_indices = @transform_3, window_bounds = array<i64: 8, 1>}]} {
    %c0 = arith.constant 0 : index
    %c0_0 = arith.constant 0 : index
    %0 = vector.load %arg1[%c0, %c0_0] : memref<8x8192xbf16, #tpu.memory_space<vmem>>, vector<8x8192xbf16>
    %c0_1 = arith.constant 0 : index
    %c0_2 = arith.constant 0 : index
    %1 = vector.load %arg2[%c0_1, %c0_2] : memref<8192x1xbf16, #tpu.memory_space<vmem>>, vector<8192x1xbf16>
    %cst = arith.constant dense<0.000000e+00> : vector<8x1xf32>
    %2 = tpu.matmul %0, %1, %cst {dimension_numbers = #tpu.dot_dimension_numbers<[1], [0], [0], [1], [0, 0, 1, 1], [], []>} : vector<8x8192xbf16>, vector<8192x1xbf16>, vector<8x1xf32> -> vector<8x1xf32>
    %c0_3 = arith.constant 0 : index
    %c0_4 = arith.constant 0 : index
    %3 = vector.load %arg3[%c0_3, %c0_4] : memref<1x1xf32, #tpu.memory_space<vmem>>, vector<1x1xf32>
    %4 = vector.broadcast %3 : vector<1x1xf32> to vector<8x1xf32>
    %5 = arith.addf %2, %4 : vector<8x1xf32>
    %c0_5 = arith.constant 0 : index
    %c0_6 = arith.constant 0 : index
    %6 = vector.load %arg4[%c0_5, %c0_6] : memref<8x1xf32, #tpu.memory_space<vmem>>, vector<8x1xf32>
    tpu.vector_store %arg4[%c0_5, %c0_6], %5 {strides = array<i32>} : memref<8x1xf32, #tpu.memory_space<vmem>>, vector<8x1xf32>,
    return
  }
  func.func @transform_0(%arg0: i32) -> (i32, i32) {
    %c0_i32 = arith.constant 0 : i32
    %c0_i32_0 = arith.constant 0 : i32
    return %arg0, %c0_i32 : i32, i32
  }
  func.func @transform_1(%arg0: i32) -> (i32, i32) {
    %c0_i32 = arith.constant 0 : i32
    %c0_i32_0 = arith.constant 0 : i32
    %c0_i32_1 = arith.constant 0 : i32
    return %c0_i32, %c0_i32_0 : i32, i32
  }
  func.func @transform_2(%arg0: i32) -> (i32, i32) {
    %c0_i32 = arith.constant 0 : i32
    %c0_i32_0 = arith.constant 0 : i32
    %c0_i32_1 = arith.constant 0 : i32
    return %c0_i32, %c0_i32_0 : i32, i32
  }
  func.func @transform_3(%arg0: i32) -> (i32, i32) {
    %c0_i32 = arith.constant 0 : i32
    %c0_i32_0 = arith.constant 0 : i32
    return %arg0, %c0_i32 : i32, i32
  }
}

</mosaic_0001>

<bundles_post_ra>
// kernel: patchgan_forward.8
= control target key start
LH: loop header
LB: loop body
LE: loop exit
PB: predicated region body
PF: predicated region fallthrough
CT: control target
= control target key end

     0   :  { %s1115_s12 = smov 0   ;;  %s1295_s0 = inlined_call_operand.vmem [shape: bf16[512,96], index: 0, kind: input, shape index: {}]   ;;  %s1296_s1 = inlined_call_operand.vmem [shape: bf16[96,64], index: 1, kind: input, shape index: {}]   ;;  %s1297_s2 = inlined_call_operand.vmem [shape: f32[1,64], index: 2, kind: input, shape index: {}]   ;;  %s1298_s3 = inlined_call_operand.vmem [shape: bf16[512,64], index: 3, kind: output, shape index: {}]  }
   0x1 LB: > { %s865_s13 = sadd.s32 4294967295, %s1093_s12   ;;  %p869_p0 = scmp.ge.s32.totalorder %s1093_s12, 1  ;;  %s1093_s12 = sphi %s1115_s12, %s13_s12  }
   0x2   : > { %p138_p1 = scmp.lt.s32.totalorder %s1093_s12, 3 }
   0x4   : > { %p139_p2 = pnand %p869_p0, %p138_p1 }
   0x5   : > { %v1065_v0 = vld [vmem:[%s1296_s1] sm:$0xff] (!%p139_p2)   ;;  %s870_s16 = sshll.u32 (!%p139_p2), %s865_s13, 5  ;;  %v1066_v1 = vld [vmem:[%s1296_s1 + $0x8] sm:$0xff] (!%p139_p2)   ;;  %v1067_v2 = vld [vmem:[%s1296_s1 + $0x10] sm:$0xff] (!%p139_p2)   ;;  %vm342_vm0 = vcmask (!%p139_p2), 785408   ;;  %vm776_vm1 = vcmask (!%p139_p2), 519168  }
   0x6   : > { %142 = sbr.rel (%p139_p2) target bundleno = 288 (0x120), region = 32  ;;  %p163_p3 = scmp.lt.s32.totalorder (!%p139_p2), %s870_s16, 63  ;;  %1001 = vmatprep.subr.bf16.mxu0 (!%p139_p2), %v1065_v0  ;;  %1045 = vmatprep.subr.bf16.mxu1 (!%p139_p2), %v1065_v0  ;;  %v1068_v3 = vld [vmem:[%s1296_s1 + $0x18] sm:$0xff] (!%p139_p2)   ;;  %v1069_v6 = vld [vmem:[%s1296_s1 + $0x20] sm:$0xff] (!%p139_p2)   ;;  %v1070_v7 = vld [vmem:[%s1296_s1 + $0x28] sm:$0xff] (!%p139_p2)  }
   0x7   : > { %1002 = vmatpush3.bf16.msra.mxu0 (!%p139_p2), %v1065_v0  ;;  %1051 = vmatpush3.bf16.msra.mxu1 (!%p139_p2), %v1065_v0  ;;  %v1186_v22 = vld [vmem:[%s1297_s2] ss:$0 sm:$0xff] (!%p139_p2) }
   0x8   : > { %1003 = vmatprep.subr.bf16.mxu0 (!%p139_p2), %v1066_v1  ;;  %1046 = vmatprep.subr.bf16.mxu1 (!%p139_p2), %v1066_v1 }
   0xb   : > { %1004 = vmatpush3.bf16.msra.mxu0 (!%p139_p2), %v1066_v1  ;;  %1052 = vmatpush3.bf16.msra.mxu1 (!%p139_p2), %v1066_v1 }
   0xc   : > { %1005 = vmatprep.subr.bf16.mxu0 (!%p139_p2), %v1067_v2  ;;  %1047 = vmatprep.subr.bf16.mxu1 (!%p139_p2), %v1067_v2 }
   0xd   : > { %s1300_s16 = smov (!%p163_p3, %s870_s16), 63 }
   0xe   : > { %s871_s21 = sshll.u32 %s1300_s16, 2 }
   0xf   : > { %s1143_s26 = scalar_lea.vmem %s1295_s0, %s871_s21  ;;  %1006 = vmatpush3.bf16.msra.mxu0 %v1067_v2  ;;  %1053 = vmatpush3.bf16.msra.mxu1 %v1067_v2  ;;  %s1197_s8 = scalar_lea.vmem %s1298_s3, %s871_s21 }
  0x10   : > { %v1071_v4 = vld [vmem:[%s1143_s26] sm:$0xff]   ;;  %1007 = vmatprep.subr.bf16.mxu0 %v1068_v3  ;;  %1048 = vmatprep.subr.bf16.mxu1 %v1068_v3  ;;  %v1073_v8 = vld [vmem:[%s1143_s26 + $0x8] sm:$0xff]   ;;  %v1075_v10 = vld [vmem:[%s1143_s26 + $0x10] sm:$0xff]  }
  0x11   : > { %v1072_v5 = vld [vmem:[%s1143_s26 + $0x40] sm:$0xff]   ;;  %1013 = vmatprep.mubr.msk.bf16.mxu0 %vm342_vm0, %v1071_v4  ;;  %v1074_v9 = vld [vmem:[%s1143_s26 + $0x48] sm:$0xff]   ;;  %v1076_v11 = vld [vmem:[%s1143_s26 + $0x50] sm:$0xff]  }
  0x12   : > { %1029 = vmatprep.mubr.msk.bf16.mxu1 %vm342_vm0, %v1072_v5  ;;  %v1077_v12 = vld [vmem:[%s1143_s26 + $0x18] sm:$0xff]   ;;  %v1079_v14 = vld [vmem:[%s1143_s26 + $0x20] sm:$0xff]   ;;  %v1081_v16 = vld [vmem:[%s1143_s26 + $0x28] sm:$0xff]  }
  0x13   : > { %1008 = vmatpush3.bf16.msra.mxu0 %v1068_v3  ;;  %1054 = vmatpush3.bf16.msra.mxu1 %v1068_v3  ;;  %v1078_v13 = vld [vmem:[%s1143_s26 + $0x58] sm:$0xff]   ;;  %v1080_v15 = vld [vmem:[%s1143_s26 + $0x60] sm:$0xff]   ;;  %v1082_v17 = vld [vmem:[%s1143_s26 + $0x68] sm:$0xff]  }
  0x14   : > { %1009 = vmatprep.subr.bf16.mxu0 %v1069_v6  ;;  %1049 = vmatprep.subr.bf16.mxu1 %v1069_v6  ;;  %v1083_v18 = vld [vmem:[%s1143_s26 + $0x30] sm:$0xff]   ;;  %v1085_v20 = vld [vmem:[%s1143_s26 + $0x38] sm:$0xff]  }
  0x15   : > { %v1084_v19 = vld [vmem:[%s1143_s26 + $0x70] sm:$0xff]   ;;  %v1086_v21 = vld [vmem:[%s1143_s26 + $0x78] sm:$0xff]  }
  0x17   : > { %1010 = vmatpush3.bf16.msra.mxu0 %v1069_v6  ;;  %1055 = vmatpush3.bf16.msra.mxu1 %v1069_v6 }
  0x18   : > { %1011 = vmatprep.subr.bf16.mxu0 %v1070_v7  ;;  %1050 = vmatprep.subr.bf16.mxu1 %v1070_v7 }
  0x1b   : > { %1012 = vmatpush3.bf16.msra.mxu0 %v1070_v7  ;;  %1056 = vmatpush3.bf16.msra.mxu1 %v1070_v7 }
  0x1e   : > { %1014 = vmatmul.mubr.msk.bf16.vlgmr.msra.gmra.mrb[0].mxu0 %vm342_vm0, %v1073_v8  ;;  %1030 = vmatmul.mubr.msk.bf16.vlgmr.msra.gmra.mrb[0].mxu1 %vm342_vm0, %v1074_v9 }
  0x1f   : > { %1017 = vmatprep.mubr.msk.bf16.mxu0 %vm342_vm0, %v1075_v10  ;;  %1033 = vmatprep.mubr.msk.bf16.mxu1 %vm342_vm0, %v1076_v11 }
  0x26   : > { %1018 = vmatmul.mubr.msk.bf16.gmra.mrb[4].mxu0 %vm342_vm0, %v1077_v12  ;;  %1034 = vmatmul.mubr.msk.bf16.gmra.mrb[4].mxu1 %vm342_vm0, %v1078_v13 }
  0x27   : > { %1021 = vmatprep.mubr.msk.bf16.mxu0 %vm342_vm0, %v1079_v14  ;;  %1037 = vmatprep.mubr.msk.bf16.mxu1 %vm342_vm0, %v1080_v15 }
  0x2e   : > { %1022 = vmatmul.mubr.msk.bf16.gmra.mrb[8].mxu0 %vm342_vm0, %v1081_v16  ;;  %1038 = vmatmul.mubr.msk.bf16.gmra.mrb[8].mxu1 %vm342_vm0, %v1082_v17 }
  0x2f   : > { %1025 = vmatprep.mubr.msk.bf16.mxu0 %vm342_vm0, %v1083_v18  ;;  %1041 = vmatprep.mubr.msk.bf16.mxu1 %vm342_vm0, %v1084_v19 }
  0x36   : > { %1026 = vmatmul.mubr.msk.bf16.gmra.mrb[12].mxu0 %vm342_vm0, %v1085_v20  ;;  %1042 = vmatmul.mubr.msk.bf16.gmra.mrb[12].mxu1 %vm342_vm0, %v1086_v21 }
  0xf1   : > { %v1015_v23 = vpop.f32.mrb[0].mxu0  ;;  %v1031_v24 = vpop.f32.mrb[0].mxu1 }
  0xf2   : > { %v434_v25 = vadd.f32 %v1015_v23, %v1186_v22  ;;  %v498_v26 = vadd.f32 %v1031_v24, %v1186_v22  ;;  %v425_v27 = vpop.f32.mrb[1].mxu0  ;;  %v489_v28 = vpop.f32.mrb[1].mxu1 }
  0xf3   : > { %v426_v29 = vadd.f32 %v1186_v22, %v425_v27  ;;  %v490_v30 = vadd.f32 %v1186_v22, %v489_v28  ;;  %v1016_v31 = vpop.f32.mrb[2].mxu0  ;;  %v1032_v32 = vpop.f32.mrb[2].mxu1 }
  0xf4   : > { %vm554_vm2 = vcmp.ge.f32.partialorder %v434_v25, 0.0  ;;  %v586_v33 = vmul.f32 0.2, %v434_v25  ;;  %vm570_vm3 = vcmp.ge.f32.partialorder %v498_v26, 0.0  ;;  %v602_v34 = vmul.f32 0.2, %v498_v26 }
  0xf5   : > { %vm552_vm4 = vcmp.ge.f32.partialorder %v426_v29, 0.0  ;;  %v584_v35 = vmul.f32 0.2, %v426_v29  ;;  %vm568_vm5 = vcmp.ge.f32.partialorder %v490_v30, 0.0  ;;  %v600_v36 = vmul.f32 0.2, %v490_v30 }
  0xf6   : > { %v618_v37 = vsel %vm554_vm2, %v434_v25, %v586_v33  ;;  %v634_v38 = vsel %vm570_vm3, %v498_v26, %v602_v34  ;;  %v437_v39 = vadd.f32 %v1016_v31, %v1186_v22  ;;  %v501_v40 = vadd.f32 %v1032_v32, %v1186_v22  ;;  %v428_v41 = vpop.f32.mrb[3].mxu0  ;;  %v492_v42 = vpop.f32.mrb[3].mxu1 }
  0xf7   : > { %v949_v43 = vpack.c.bf16 %v618_v37, %v618_v37  ;;  %v965_v44 = vpack.c.bf16 %v634_v38, %v634_v38  ;;  %v616_v45 = vsel %vm552_vm4, %v426_v29, %v584_v35  ;;  %v632_v46 = vsel %vm568_vm5, %v490_v30, %v600_v36 }
  0xf8   : > { %v947_v47 = vpack.c.bf16 %v616_v45, %v616_v45  ;;  %v963_v48 = vpack.c.bf16 %v632_v46, %v632_v46  ;;  %vm555_vm6 = vcmp.ge.f32.partialorder %v437_v39, 0.0  ;;  %v587_v49 = vmul.f32 0.2, %v437_v39 }
  0xf9   : > { %779 = vst.msk [vmem:[%s1197_s8 + $0x8] sm:$0xf] %vm776_vm1, %v949_v43  ;;  %795 = vst.msk [vmem:[%s1197_s8 + $0x48] sm:$0xf] %vm776_vm1, %v965_v44  ;;  %vm571_vm7 = vcmp.ge.f32.partialorder %v501_v40, 0.0  ;;  %v429_v51 = vadd.f32 %v1186_v22, %v428_v41  ;;  %v493_v52 = vadd.f32 %v1186_v22, %v492_v42  ;;  %v1019_v53 = vpop.f32.mrb[4].mxu0 }
  0xfa   : > { %v603_v50 = vmul.f32 0.2, %v501_v40  ;;  %v1035_v54 = vpop.f32.mrb[4].mxu1  ;;  %777 = vst.msk [vmem:[%s1197_s8] sm:$0xf] %vm776_vm1, %v947_v47  ;;  %v619_v55 = vsel %vm555_vm6, %v437_v39, %v587_v49  ;;  %v450_v56 = vadd.f32 %v1019_v53, %v1186_v22  ;;  %v441_v58 = vpop.f32.mrb[5].mxu0 }
  0xfb   : > { %793 = vst.msk [vmem:[%s1197_s8 + $0x40] sm:$0xf] %vm776_vm1, %v963_v48  ;;  %v514_v57 = vadd.f32 %v1035_v54, %v1186_v22  ;;  %v505_v59 = vpop.f32.mrb[5].mxu1  ;;  %v950_v60 = vpack.c.bf16 %v619_v55, %v619_v55  ;;  %vm553_vm8 = vcmp.ge.f32.partialorder %v429_v51, 0.0  ;;  %v585_v62 = vmul.f32 0.2, %v429_v51 }
  0xfc   : > { %v635_v61 = vsel %vm571_vm7, %v501_v40, %v603_v50  ;;  %v1020_v63 = vpop.f32.mrb[6].mxu0  ;;  %v1036_v0 = vpop.f32.mrb[6].mxu1  ;;  %vm569_vm9 = vcmp.ge.f32.partialorder %v493_v52, 0.0  ;;  %v601_v2 = vmul.f32 0.2, %v493_v52  ;;  %vm558_vm10 = vcmp.ge.f32.partialorder %v450_v56, 0.0 }
  0xfd   : > { %v966_v1 = vpack.c.bf16 %v635_v61, %v635_v61  ;;  %v444_v3 = vpop.f32.mrb[7].mxu0  ;;  %v508_v4 = vpop.f32.mrb[7].mxu1  ;;  %780 = vst.msk [vmem:[%s1197_s8 + $0xc] sm:$0xf] %vm776_vm1, %v950_v60  ;;  %v617_v5 = vsel %vm553_vm8, %v429_v51, %v585_v62  ;;  %v590_v6 = vmul.f32 0.2, %v450_v56  ;;  %v442_v10 = vadd.f32 %v1186_v22, %v441_v58 }
  0xfe   : > { %vm574_vm11 = vcmp.ge.f32.partialorder %v514_v57, 0.0  ;;  %v606_v7 = vmul.f32 0.2, %v514_v57  ;;  %v948_v8 = vpack.c.bf16 %v617_v5, %v617_v5  ;;  %v633_v9 = vsel %vm569_vm9, %v493_v52, %v601_v2 }
  0xff   : > { %796 = vst.msk [vmem:[%s1197_s8 + $0x4c] sm:$0xf] %vm776_vm1, %v966_v1  ;;  %v506_v11 = vadd.f32 %v1186_v22, %v505_v59  ;;  %v964_v12 = vpack.c.bf16 %v633_v9, %v633_v9  ;;  %v622_v13 = vsel %vm558_vm10, %v450_v56, %v590_v6  ;;  %v453_v15 = vadd.f32 %v1020_v63, %v1186_v22 }
 0x100   : > { %v638_v14 = vsel %vm574_vm11, %v514_v57, %v606_v7  ;;  %778 = vst.msk [vmem:[%s1197_s8 + $0x4] sm:$0xf] %vm776_vm1, %v948_v8  ;;  %v953_v16 = vpack.c.bf16 %v622_v13, %v622_v13  ;;  %vm556_vm12 = vcmp.ge.f32.partialorder %v442_v10, 0.0  ;;  %v588_v18 = vmul.f32 0.2, %v442_v10 }
 0x101   : > { %v969_v17 = vpack.c.bf16 %v638_v14, %v638_v14  ;;  %794 = vst.msk [vmem:[%s1197_s8 + $0x44] sm:$0xf] %vm776_vm1, %v964_v12  ;;  %vm572_vm13 = vcmp.ge.f32.partialorder %v506_v11, 0.0  ;;  %v604_v19 = vmul.f32 0.2, %v506_v11  ;;  %vm559_vm14 = vcmp.ge.f32.partialorder %v453_v15, 0.0 }
 0x102   : > { %v591_v20 = vmul.f32 0.2, %v453_v15  ;;  %783 = vst.msk [vmem:[%s1197_s8 + $0x18] sm:$0xf] %vm776_vm1, %v953_v16  ;;  %v620_v21 = vsel %vm556_vm12, %v442_v10, %v588_v18  ;;  %v517_v23 = vadd.f32 %v1036_v0, %v1186_v22  ;;  %v445_v24 = vadd.f32 %v1186_v22, %v444_v3  ;;  %v1023_v26 = vpop.f32.mrb[8].mxu0  ;;  %v1039_v27 = vpop.f32.mrb[8].mxu1 }
 0x103   : > { %799 = vst.msk [vmem:[%s1197_s8 + $0x58] sm:$0xf] %vm776_vm1, %v969_v17  ;;  %v509_v25 = vadd.f32 %v1186_v22, %v508_v4  ;;  %v951_v28 = vpack.c.bf16 %v620_v21, %v620_v21  ;;  %v636_v29 = vsel %vm572_vm13, %v506_v11, %v604_v19  ;;  %v466_v31 = vadd.f32 %v1023_v26, %v1186_v22  ;;  %v457_v32 = vpop.f32.mrb[9].mxu0  ;;  %v521_v33 = vpop.f32.mrb[9].mxu1 }
 0x104   : > { %v623_v30 = vsel %vm559_vm14, %v453_v15, %v591_v20  ;;  %v967_v34 = vpack.c.bf16 %v636_v29, %v636_v29  ;;  %vm575_vm15 = vcmp.ge.f32.partialorder %v517_v23, 0.0  ;;  %v607_v36 = vmul.f32 0.2, %v517_v23  ;;  %v1024_v37 = vpop.f32.mrb[10].mxu0  ;;  %v1040_v38 = vpop.f32.mrb[10].mxu1 }
 0x105   : > { %v954_v35 = vpack.c.bf16 %v623_v30, %v623_v30  ;;  %781 = vst.msk [vmem:[%s1197_s8 + $0x10] sm:$0xf] %vm776_vm1, %v951_v28  ;;  %vm557_vm0 = vcmp.ge.f32.partialorder %v445_v24, 0.0  ;;  %v589_v39 = vmul.f32 0.2, %v445_v24  ;;  %vm573_vm2 = vcmp.ge.f32.partialorder %v509_v25, 0.0 }
 0x106   : > { %v605_v40 = vmul.f32 0.2, %v509_v25  ;;  %797 = vst.msk [vmem:[%s1197_s8 + $0x50] sm:$0xf] %vm776_vm1, %v967_v34  ;;  %v639_v41 = vsel %vm575_vm15, %v517_v23, %v607_v36  ;;  %vm562_vm3 = vcmp.ge.f32.partialorder %v466_v31, 0.0  ;;  %v530_v43 = vadd.f32 %v1039_v27, %v1186_v22  ;;  %v460_v44 = vpop.f32.mrb[11].mxu0 }
 0x107   : > { %784 = vst.msk [vmem:[%s1197_s8 + $0x1c] sm:$0xf] %vm776_vm1, %v954_v35  ;;  %v594_v42 = vmul.f32 0.2, %v466_v31  ;;  %v524_v45 = vpop.f32.mrb[11].mxu1  ;;  %v970_v46 = vpack.c.bf16 %v639_v41, %v639_v41  ;;  %v621_v47 = vsel %vm557_vm0, %v445_v24, %v589_v39  ;;  %v458_v49 = vadd.f32 %v1186_v22, %v457_v32 }
 0x108   : > { %v637_v48 = vsel %vm573_vm2, %v509_v25, %v605_v40  ;;  %v952_v50 = vpack.c.bf16 %v621_v47, %v621_v47  ;;  %vm578_vm4 = vcmp.ge.f32.partialorder %v530_v43, 0.0  ;;  %v610_v54 = vmul.f32 0.2, %v530_v43 }
 0x109   : > { %v968_v51 = vpack.c.bf16 %v637_v48, %v637_v48  ;;  %v626_v52 = vsel %vm562_vm3, %v466_v31, %v594_v42  ;;  %800 = vst.msk [vmem:[%s1197_s8 + $0x5c] sm:$0xf] %vm776_vm1, %v970_v46  ;;  %vm560_vm5 = vcmp.ge.f32.partialorder %v458_v49, 0.0  ;;  %v592_v55 = vmul.f32 0.2, %v458_v49  ;;  %v1027_v56 = vpop.f32.mrb[12].mxu0 }
 0x10a   : > { %v957_v53 = vpack.c.bf16 %v626_v52, %v626_v52  ;;  %782 = vst.msk [vmem:[%s1197_s8 + $0x14] sm:$0xf] %vm776_vm1, %v952_v50  ;;  %v522_v57 = vadd.f32 %v1186_v22, %v521_v33  ;;  %v469_v58 = vadd.f32 %v1024_v37, %v1186_v22  ;;  %v533_v59 = vadd.f32 %v1040_v38, %v1186_v22  ;;  %v1043_v61 = vpop.f32.mrb[12].mxu1  ;;  %v473_v62 = vpop.f32.mrb[13].mxu0 }
 0x10b   : > { %798 = vst.msk [vmem:[%s1197_s8 + $0x54] sm:$0xf] %vm776_vm1, %v968_v51  ;;  %v461_v60 = vadd.f32 %v1186_v22, %v460_v44  ;;  %v642_v63 = vsel %vm578_vm4, %v530_v43, %v610_v54  ;;  %v624_v0 = vsel %vm560_vm5, %v458_v49, %v592_v55  ;;  %v525_v1 = vadd.f32 %v1186_v22, %v524_v45  ;;  %v537_v3 = vpop.f32.mrb[13].mxu1  ;;  %v1028_v4 = vpop.f32.mrb[14].mxu0 }
 0x10c   : > { %787 = vst.msk [vmem:[%s1197_s8 + $0x28] sm:$0xf] %vm776_vm1, %v957_v53  ;;  %v482_v2 = vadd.f32 %v1027_v56, %v1186_v22  ;;  %v973_v5 = vpack.c.bf16 %v642_v63, %v642_v63  ;;  %v955_v6 = vpack.c.bf16 %v624_v0, %v624_v0  ;;  %vm576_vm6 = vcmp.ge.f32.partialorder %v522_v57, 0.0  ;;  %v1044_v8 = vpop.f32.mrb[14].mxu1  ;;  %v476_v9 = vpop.f32.mrb[15].mxu0 }
 0x10d   : > { %v608_v7 = vmul.f32 0.2, %v522_v57  ;;  %vm563_vm7 = vcmp.ge.f32.partialorder %v469_v58, 0.0  ;;  %v595_v10 = vmul.f32 0.2, %v469_v58  ;;  %vm579_vm8 = vcmp.ge.f32.partialorder %v533_v59, 0.0 }
 0x10e   : > { %v611_v11 = vmul.f32 0.2, %v533_v59  ;;  %803 = vst.msk [vmem:[%s1197_s8 + $0x68] sm:$0xf] %vm776_vm1, %v973_v5  ;;  %785 = vst.msk [vmem:[%s1197_s8 + $0x20] sm:$0xf] %vm776_vm1, %v955_v6  ;;  %v546_v26 = vadd.f32 %v1043_v61, %v1186_v22  ;;  %v474_v28 = vadd.f32 %v1186_v22, %v473_v62  ;;  %v538_v29 = vadd.f32 %v1186_v22, %v537_v3 }
 0x10f   : > { %v640_v12 = vsel %vm576_vm6, %v522_v57, %v608_v7  ;;  %vm561_vm9 = vcmp.ge.f32.partialorder %v461_v60, 0.0  ;;  %v593_v13 = vmul.f32 0.2, %v461_v60  ;;  %vm577_vm10 = vcmp.ge.f32.partialorder %v525_v1, 0.0  ;;  %v540_v14 = vpop.f32.mrb[15].mxu1 }
 0x110   : > { %v971_v15 = vpack.c.bf16 %v640_v12, %v640_v12  ;;  %v627_v16 = vsel %vm563_vm7, %v469_v58, %v595_v10  ;;  %v643_v17 = vsel %vm579_vm8, %v533_v59, %v611_v11  ;;  %v609_v18 = vmul.f32 0.2, %v525_v1 }
 0x111   : > { %v958_v19 = vpack.c.bf16 %v627_v16, %v627_v16  ;;  %v974_v20 = vpack.c.bf16 %v643_v17, %v643_v17  ;;  %v625_v21 = vsel %vm561_vm9, %v461_v60, %v593_v13  ;;  %vm566_vm11 = vcmp.ge.f32.partialorder %v482_v2, 0.0 }
 0x112   : > { %801 = vst.msk [vmem:[%s1197_s8 + $0x60] sm:$0xf] %vm776_vm1, %v971_v15  ;;  %v956_v23 = vpack.c.bf16 %v625_v21, %v625_v21  ;;  %v641_v24 = vsel %vm577_vm10, %v525_v1, %v609_v18  ;;  %v598_v25 = vmul.f32 0.2, %v482_v2  ;;  %v485_v30 = vadd.f32 %v1028_v4, %v1186_v22 }
 0x113   : > { %788 = vst.msk [vmem:[%s1197_s8 + $0x2c] sm:$0xf] %vm776_vm1, %v958_v19  ;;  %804 = vst.msk [vmem:[%s1197_s8 + $0x6c] sm:$0xf] %vm776_vm1, %v974_v20  ;;  %v972_v27 = vpack.c.bf16 %v641_v24, %v641_v24  ;;  %vm582_vm12 = vcmp.ge.f32.partialorder %v546_v26, 0.0  ;;  %v549_v33 = vadd.f32 %v1044_v8, %v1186_v22  ;;  %vm564_vm13 = vcmp.ge.f32.partialorder %v474_v28, 0.0 }
 0x114   : > { %786 = vst.msk [vmem:[%s1197_s8 + $0x24] sm:$0xf] %vm776_vm1, %v956_v23  ;;  %v630_v31 = vsel %vm566_vm11, %v482_v2, %v598_v25  ;;  %v614_v32 = vmul.f32 0.2, %v546_v26  ;;  %v596_v35 = vmul.f32 0.2, %v474_v28  ;;  %v477_v45 = vadd.f32 %v1186_v22, %v476_v9 }
 0x115   : > { %802 = vst.msk [vmem:[%s1197_s8 + $0x64] sm:$0xf] %vm776_vm1, %v972_v27  ;;  %v961_v34 = vpack.c.bf16 %v630_v31, %v630_v31  ;;  %vm580_vm14 = vcmp.ge.f32.partialorder %v538_v29, 0.0  ;;  %v612_v37 = vmul.f32 0.2, %v538_v29  ;;  %vm567_vm15 = vcmp.ge.f32.partialorder %v485_v30, 0.0 }
 0x116   : > { %v646_v36 = vsel %vm582_vm12, %v546_v26, %v614_v32  ;;  %v599_v38 = vmul.f32 0.2, %v485_v30  ;;  %v628_v40 = vsel %vm564_vm13, %v474_v28, %v596_v35  ;;  %vm583_vm0 = vcmp.ge.f32.partialorder %v549_v33, 0.0 }
 0x117   : > { %791 = vst.msk [vmem:[%s1197_s8 + $0x38] sm:$0xf] %vm776_vm1, %v961_v34  ;;  %v977_v39 = vpack.c.bf16 %v646_v36, %v646_v36  ;;  %v615_v41 = vmul.f32 0.2, %v549_v33  ;;  %v959_v42 = vpack.c.bf16 %v628_v40, %v628_v40  ;;  %v644_v43 = vsel %vm580_vm14, %v538_v29, %v612_v37 }
 0x118   : > { %v631_v44 = vsel %vm567_vm15, %v485_v30, %v599_v38  ;;  %v975_v46 = vpack.c.bf16 %v644_v43, %v644_v43  ;;  %v541_v49 = vadd.f32 %v1186_v22, %v540_v14  ;;  %vm565_vm2 = vcmp.ge.f32.partialorder %v477_v45, 0.0 }
 0x119   : > { %807 = vst.msk [vmem:[%s1197_s8 + $0x78] sm:$0xf] %vm776_vm1, %v977_v39  ;;  %v962_v47 = vpack.c.bf16 %v631_v44, %v631_v44  ;;  %v647_v48 = vsel %vm583_vm0, %v549_v33, %v615_v41  ;;  %789 = vst.msk [vmem:[%s1197_s8 + $0x30] sm:$0xf] %vm776_vm1, %v959_v42  ;;  %v597_v51 = vmul.f32 0.2, %v477_v45 }
 0x11a   : > { %v978_v50 = vpack.c.bf16 %v647_v48, %v647_v48  ;;  %805 = vst.msk [vmem:[%s1197_s8 + $0x70] sm:$0xf] %vm776_vm1, %v975_v46  ;;  %vm581_vm3 = vcmp.ge.f32.partialorder %v541_v49, 0.0  ;;  %v613_v52 = vmul.f32 0.2, %v541_v49 }
 0x11b   : > { %792 = vst.msk [vmem:[%s1197_s8 + $0x3c] sm:$0xf] %vm776_vm1, %v962_v47  ;;  %v629_v53 = vsel %vm565_vm2, %v477_v45, %v597_v51 }
 0x11c   : > { %808 = vst.msk [vmem:[%s1197_s8 + $0x7c] sm:$0xf] %vm776_vm1, %v978_v50  ;;  %v960_v54 = vpack.c.bf16 %v629_v53, %v629_v53  ;;  %v645_v55 = vsel %vm581_vm3, %v541_v49, %v613_v52 }
 0x11d   : > { %v976_v56 = vpack.c.bf16 %v645_v55, %v645_v55 }
 0x11e   : > { %790 = vst.msk [vmem:[%s1197_s8 + $0x34] sm:$0xf] %vm776_vm1, %v960_v54 }
 0x11f   : > { %806 = vst.msk [vmem:[%s1197_s8 + $0x74] sm:$0xf] %vm776_vm1, %v976_v56 }
 0x120 PF: > { %s13_s12 = sadd.s32 1, %s1093_s12  }
 0x121   : > { %p10_p4 = scmp.ge.s32.totalorder %s13_s12, 4  }
 0x123   :  { %12 = sbr.rel (!%p10_p4) target bundleno = 1 (0x1), region = 62 }

// kernel: patchgan_forward.10
= control target key start
LH: loop header
LB: loop body
LE: loop exit
PB: predicated region body
PF: predicated region fallthrough
CT: control target
= control target key end

     0   :  { %s455_s0 = inlined_call_operand.vmem [shape: bf16[128,128], index: 0, kind: input, shape index: {}]   ;;  %s456_s1 = inlined_call_operand.vmem [shape: f32[1,128], index: 1, kind: input, shape index: {}]   ;;  %s457_s2 = inlined_call_operand.vmem [shape: f32[1,128], index: 2, kind: input, shape index: {}]   ;;  %s458_s3 = inlined_call_operand.vmem [shape: bf16[128,128], index: 3, kind: output, shape index: {}]  }
   0x1   :  { %v259_v0 = vld [vmem:[%s455_s0] sm:$0xff]   ;;  %v330_v4 = vld [vmem:[%s455_s0 + $0x8] sm:$0xff]   ;;  %v331_v5 = vld [vmem:[%s455_s0 + $0x10] sm:$0xff]  }
   0x2   :  { %v370_v1 = vld [vmem:[%s456_s1] ss:$0 sm:$0xff]  ;;  %v260_v2 = vunpack.c.l.bf16 %v259_v0  ;;  %v261_v3 = vunpack.c.h.bf16 %v259_v0  ;;  %v332_v6 = vld [vmem:[%s455_s0 + $0x18] sm:$0xff]   ;;  %v264_v8 = vunpack.c.l.bf16 %v330_v4  ;;  %v265_v9 = vunpack.c.h.bf16 %v330_v4  ;;  %v334_v35 = vld [vmem:[%s455_s0 + $0x28] sm:$0xff]  }
   0x3   :  { %v384_v7 = vld [vmem:[%s457_s2] ss:$0 sm:$0xff]  ;;  %v268_v10 = vunpack.c.l.bf16 %v331_v5  ;;  %v269_v11 = vunpack.c.h.bf16 %v331_v5  ;;  %v272_v14 = vunpack.c.l.bf16 %v332_v6  ;;  %v273_v15 = vunpack.c.h.bf16 %v332_v6  ;;  %v335_v48 = vld [vmem:[%s455_s0 + $0x30] sm:$0xff]   ;;  %v336_v4 = vld [vmem:[%s455_s0 + $0x38] sm:$0xff]  }
   0x4   :  { %v53_v12 = vmul.f32 %v260_v2, %v370_v1  ;;  %v54_v13 = vmul.f32 %v261_v3, %v370_v1  ;;  %v55_v16 = vmul.f32 %v264_v8, %v370_v1  ;;  %v56_v17 = vmul.f32 %v265_v9, %v370_v1  ;;  %v333_v34 = vld [vmem:[%s455_s0 + $0x20] sm:$0xff]  }
   0x5   :  { %v57_v18 = vmul.f32 %v268_v10, %v370_v1  ;;  %v58_v19 = vmul.f32 %v269_v11, %v370_v1  ;;  %v59_v22 = vmul.f32 %v272_v14, %v370_v1  ;;  %v60_v23 = vmul.f32 %v273_v15, %v370_v1 }
   0x6   :  { %v76_v20 = vadd.f32 %v384_v7, %v53_v12  ;;  %v77_v21 = vadd.f32 %v384_v7, %v54_v13  ;;  %v78_v24 = vadd.f32 %v384_v7, %v55_v16  ;;  %v79_v25 = vadd.f32 %v384_v7, %v56_v17 }
   0x7   :  { %v80_v26 = vadd.f32 %v384_v7, %v57_v18  ;;  %v81_v27 = vadd.f32 %v384_v7, %v58_v19  ;;  %v82_v42 = vadd.f32 %v384_v7, %v59_v22  ;;  %v83_v43 = vadd.f32 %v384_v7, %v60_v23 }
   0x8   :  { %vm92_vm0 = vcmp.ge.f32.partialorder %v76_v20, 0.0  ;;  %vm93_vm1 = vcmp.ge.f32.partialorder %v77_v21, 0.0  ;;  %v108_v28 = vmul.f32 0.2, %v76_v20  ;;  %v109_v29 = vmul.f32 0.2, %v77_v21 }
   0x9   :  { %vm94_vm2 = vcmp.ge.f32.partialorder %v78_v24, 0.0  ;;  %vm95_vm3 = vcmp.ge.f32.partialorder %v79_v25, 0.0  ;;  %v110_v30 = vmul.f32 0.2, %v78_v24  ;;  %v111_v31 = vmul.f32 0.2, %v79_v25 }
   0xa   :  { %v124_v32 = vsel %vm92_vm0, %v76_v20, %v108_v28  ;;  %v125_v33 = vsel %vm93_vm1, %v77_v21, %v109_v29  ;;  %vm96_vm4 = vcmp.ge.f32.partialorder %v80_v26, 0.0  ;;  %vm97_vm5 = vcmp.ge.f32.partialorder %v81_v27, 0.0 }
   0xb   :  { %v293_v36 = vpack.c.bf16 %v125_v33, %v124_v32  ;;  %v126_v37 = vsel %vm94_vm2, %v78_v24, %v110_v30  ;;  %v127_v38 = vsel %vm95_vm3, %v79_v25, %v111_v31  ;;  %v112_v39 = vmul.f32 0.2, %v80_v26 }
   0xc   :  { %v298_v40 = vpack.c.bf16 %v127_v38, %v126_v37  ;;  %v113_v41 = vmul.f32 0.2, %v81_v27  ;;  %v276_v45 = vunpack.c.l.bf16 %v333_v34  ;;  %v277_v46 = vunpack.c.h.bf16 %v333_v34 }
   0xd   :  { %294 = vst [vmem:[%s458_s3] sm:$0xff] %v293_v36   ;;  %v128_v44 = vsel %vm96_vm4, %v80_v26, %v112_v39  ;;  %v280_v47 = vunpack.c.l.bf16 %v334_v35  ;;  %vm98_vm6 = vcmp.ge.f32.partialorder %v82_v42, 0.0  ;;  %vm99_vm7 = vcmp.ge.f32.partialorder %v83_v43, 0.0 }
   0xe   :  { %337 = vst [vmem:[%s458_s3 + $0x8] sm:$0xff] %v298_v40   ;;  %v129_v49 = vsel %vm97_vm5, %v81_v27, %v113_v41  ;;  %v114_v50 = vmul.f32 0.2, %v82_v42  ;;  %v115_v52 = vmul.f32 0.2, %v83_v43  ;;  %v61_v53 = vmul.f32 %v276_v45, %v370_v1 }
   0xf   :  { %v303_v51 = vpack.c.bf16 %v129_v49, %v128_v44  ;;  %v62_v54 = vmul.f32 %v277_v46, %v370_v1  ;;  %v281_v56 = vunpack.c.h.bf16 %v334_v35  ;;  %v63_v57 = vmul.f32 %v280_v47, %v370_v1 }
  0x10   :  { %v130_v55 = vsel %vm98_vm6, %v82_v42, %v114_v50  ;;  %v284_v58 = vunpack.c.l.bf16 %v335_v48  ;;  %v131_v59 = vsel %vm99_vm7, %v83_v43, %v115_v52  ;;  %v84_v60 = vadd.f32 %v384_v7, %v61_v53 }
  0x11   :  { %338 = vst [vmem:[%s458_s3 + $0x10] sm:$0xff] %v303_v51   ;;  %v85_v61 = vadd.f32 %v384_v7, %v62_v54  ;;  %v285_v62 = vunpack.c.h.bf16 %v335_v48  ;;  %v308_v63 = vpack.c.bf16 %v131_v59, %v130_v55  ;;  %v64_v0 = vmul.f32 %v281_v56, %v370_v1 }
  0x12   :  { %v86_v2 = vadd.f32 %v384_v7, %v63_v57  ;;  %v65_v3 = vmul.f32 %v284_v58, %v370_v1  ;;  %vm100_vm8 = vcmp.ge.f32.partialorder %v84_v60, 0.0  ;;  %v116_v5 = vmul.f32 0.2, %v84_v60 }
  0x13   :  { %vm101_vm9 = vcmp.ge.f32.partialorder %v85_v61, 0.0  ;;  %v117_v6 = vmul.f32 0.2, %v85_v61  ;;  %339 = vst [vmem:[%s458_s3 + $0x18] sm:$0xff] %v308_v63   ;;  %v87_v8 = vadd.f32 %v384_v7, %v64_v0  ;;  %v66_v10 = vmul.f32 %v285_v62, %v370_v1 }
  0x14   :  { %vm102_vm10 = vcmp.ge.f32.partialorder %v86_v2, 0.0  ;;  %v118_v9 = vmul.f32 0.2, %v86_v2  ;;  %v132_v11 = vsel %vm100_vm8, %v84_v60, %v116_v5  ;;  %v88_v13 = vadd.f32 %v384_v7, %v65_v3 }
  0x15   :  { %v133_v12 = vsel %vm101_vm9, %v85_v61, %v117_v6  ;;  %v288_v14 = vunpack.c.l.bf16 %v336_v4  ;;  %vm103_vm11 = vcmp.ge.f32.partialorder %v87_v8, 0.0  ;;  %v119_v16 = vmul.f32 0.2, %v87_v8 }
  0x16   :  { %v313_v15 = vpack.c.bf16 %v133_v12, %v132_v11  ;;  %v134_v17 = vsel %vm102_vm10, %v86_v2, %v118_v9  ;;  %v89_v18 = vadd.f32 %v384_v7, %v66_v10  ;;  %vm104_vm12 = vcmp.ge.f32.partialorder %v88_v13, 0.0 }
  0x17   :  { %v120_v19 = vmul.f32 0.2, %v88_v13  ;;  %v289_v20 = vunpack.c.h.bf16 %v336_v4  ;;  %v135_v21 = vsel %vm103_vm11, %v87_v8, %v119_v16  ;;  %v67_v22 = vmul.f32 %v288_v14, %v370_v1 }
  0x18   :  { %340 = vst [vmem:[%s458_s3 + $0x20] sm:$0xff] %v313_v15   ;;  %v318_v23 = vpack.c.bf16 %v135_v21, %v134_v17  ;;  %vm105_vm13 = vcmp.ge.f32.partialorder %v89_v18, 0.0  ;;  %v121_v24 = vmul.f32 0.2, %v89_v18 }
  0x19   :  { %v136_v25 = vsel %vm104_vm12, %v88_v13, %v120_v19  ;;  %v68_v26 = vmul.f32 %v289_v20, %v370_v1  ;;  %v90_v27 = vadd.f32 %v384_v7, %v67_v22 }
  0x1a   :  { %341 = vst [vmem:[%s458_s3 + $0x28] sm:$0xff] %v318_v23   ;;  %v137_v28 = vsel %vm105_vm13, %v89_v18, %v121_v24 }
  0x1b   :  { %v323_v29 = vpack.c.bf16 %v137_v28, %v136_v25  ;;  %v91_v30 = vadd.f32 %v384_v7, %v68_v26  ;;  %vm106_vm14 = vcmp.ge.f32.partialorder %v90_v27, 0.0  ;;  %v122_v31 = vmul.f32 0.2, %v90_v27 }
  0x1d   :  { %342 = vst [vmem:[%s458_s3 + $0x30] sm:$0xff] %v323_v29   ;;  %vm107_vm15 = vcmp.ge.f32.partialorder %v91_v30, 0.0  ;;  %v123_v32 = vmul.f32 0.2, %v91_v30  ;;  %v138_v33 = vsel %vm106_vm14, %v90_v27, %v122_v31 }
  0x1f   :  { %v139_v1 = vsel %vm107_vm15, %v91_v30, %v123_v32 }
  0x20   :  { %v328_v34 = vpack.c.bf16 %v139_v1, %v138_v33 }
  0x22   :  { %343 = vst [vmem:[%s458_s3 + $0x38] sm:$0xff] %v328_v34  }

// kernel: patchgan_forward.9
= control target key start
LH: loop header
LB: loop body
LE: loop exit
PB: predicated region body
PF: predicated region fallthrough
CT: control target
= control target key end

     0   :  { %s2601_s1 = inlined_call_operand.vmem [shape: bf16[1024,128], index: 1, kind: input, shape index: {}]   ;;  %s2602_s0 = inlined_call_operand.vmem [shape: bf16[128,1024], index: 0, kind: input, shape index: {}]   ;;  %s2603_s2 = inlined_call_operand.vmem [shape: f32[1,128], index: 2, kind: input, shape index: {}]   ;;  %s2604_s3 = inlined_call_operand.vmem [shape: bf16[128,128], index: 3, kind: output, shape index: {0}]   ;;  %s2605_s4 = inlined_call_operand.vmem [shape: f32[1,8,128], index: 4, kind: output, shape index: {1}]   ;;  %s2606_s5 = inlined_call_operand.vmem [shape: f32[1,8,128], index: 5, kind: output, shape index: {2}]  }
   0x1   :  { %v2024_v0 = vld [vmem:[%s2601_s1 + $0x40] sm:$0xff]   ;;  %v2028_v4 = vld [vmem:[%s2601_s1 + $0x48] sm:$0xff]   ;;  %v2032_v8 = vld [vmem:[%s2601_s1 + $0x50] sm:$0xff]  }
   0x2   :  { %v2025_v1 = vld [vmem:[%s2601_s1 + $0xc0] sm:$0xff]   ;;  %1768 = vmatprep.subr.bf16.mxu0 %v2024_v0  ;;  %v2029_v5 = vld [vmem:[%s2601_s1 + $0xc8] sm:$0xff]   ;;  %v2033_v9 = vld [vmem:[%s2601_s1 + $0xd0] sm:$0xff]  }
   0x3   :  { %v2026_v2 = vld [vmem:[%s2601_s1] sm:$0xff]   ;;  %1832 = vmatprep.subr.bf16.mxu1 %v2025_v1  ;;  %v2030_v6 = vld [vmem:[%s2601_s1 + $0x8] sm:$0xff]   ;;  %v2034_v10 = vld [vmem:[%s2601_s1 + $0x10] sm:$0xff]  }
   0x4   :  { %v2027_v3 = vld [vmem:[%s2601_s1 + $0x80] sm:$0xff]   ;;  %1769 = vmatpush3.bf16.msra.mxu0 %v2026_v2  ;;  %v2031_v7 = vld [vmem:[%s2601_s1 + $0x88] sm:$0xff]   ;;  %v2035_v11 = vld [vmem:[%s2601_s1 + $0x90] sm:$0xff]  }
   0x5   :  { %1833 = vmatpush3.bf16.msra.mxu1 %v2027_v3  ;;  %1770 = vmatprep.subr.bf16.mxu0 %v2028_v4  ;;  %v2036_v12 = vld [vmem:[%s2601_s1 + $0x58] sm:$0xff]   ;;  %v2040_v16 = vld [vmem:[%s2601_s1 + $0x60] sm:$0xff]   ;;  %v2044_v20 = vld [vmem:[%s2601_s1 + $0x68] sm:$0xff]  }
   0x6   :  { %1834 = vmatprep.subr.bf16.mxu1 %v2029_v5  ;;  %v2037_v13 = vld [vmem:[%s2601_s1 + $0xd8] sm:$0xff]   ;;  %v2041_v17 = vld [vmem:[%s2601_s1 + $0xe0] sm:$0xff]   ;;  %v2045_v21 = vld [vmem:[%s2601_s1 + $0xe8] sm:$0xff]  }
   0x7   :  { %v2038_v14 = vld [vmem:[%s2601_s1 + $0x18] sm:$0xff]   ;;  %v2042_v18 = vld [vmem:[%s2601_s1 + $0x20] sm:$0xff]   ;;  %v2046_v22 = vld [vmem:[%s2601_s1 + $0x28] sm:$0xff]  }
   0x8   :  { %1771 = vmatpush3.bf16.msra.mxu0 %v2030_v6  ;;  %v2039_v15 = vld [vmem:[%s2601_s1 + $0x98] sm:$0xff]   ;;  %v2043_v19 = vld [vmem:[%s2601_s1 + $0xa0] sm:$0xff]   ;;  %v2047_v23 = vld [vmem:[%s2601_s1 + $0xa8] sm:$0xff]  }
   0x9   :  { %1835 = vmatpush3.bf16.msra.mxu1 %v2031_v7  ;;  %1772 = vmatprep.subr.bf16.mxu0 %v2032_v8  ;;  %v2048_v24 = vld [vmem:[%s2601_s1 + $0x70] sm:$0xff]   ;;  %v2052_v28 = vld [vmem:[%s2601_s1 + $0x78] sm:$0xff]   ;;  %v18_v32 = vld [vmem:[%s2602_s0] sm:$0xff] }
   0xa   :  { %1836 = vmatprep.subr.bf16.mxu1 %v2033_v9  ;;  %v2049_v25 = vld [vmem:[%s2601_s1 + $0xf0] sm:$0xff]   ;;  %v2053_v29 = vld [vmem:[%s2601_s1 + $0xf8] sm:$0xff]   ;;  %v22_v33 = vld [vmem:[%s2602_s0 + $0x20] sm:$0xff] }
   0xb   :  { %v2050_v26 = vld [vmem:[%s2601_s1 + $0x30] sm:$0xff]   ;;  %v2054_v30 = vld [vmem:[%s2601_s1 + $0x38] sm:$0xff]   ;;  %v19_v34 = vld [vmem:[%s2602_s0 + $0x8] sm:$0xff]  ;;  %v1561_v35 = vcombine.low %v18_v32, %v22_v33  ;;  %v1562_v36 = vcombine.high %v18_v32, %v22_v33 }
   0xc   :  { %1773 = vmatpush3.bf16.msra.mxu0 %v2034_v10  ;;  %v2051_v27 = vld [vmem:[%s2601_s1 + $0xb0] sm:$0xff]   ;;  %v2055_v31 = vld [vmem:[%s2601_s1 + $0xb8] sm:$0xff]   ;;  %v23_v37 = vld [vmem:[%s2602_s0 + $0x28] sm:$0xff] }
   0xd   :  { %1837 = vmatpush3.bf16.msra.mxu1 %v2035_v11  ;;  %1774 = vmatprep.subr.bf16.mxu0 %v2036_v12  ;;  %v1563_v38 = vcombine.low %v19_v34, %v23_v37  ;;  %v1564_v39 = vcombine.high %v19_v34, %v23_v37  ;;  %v2056_v40 = vld [vmem:[%s2601_s1 + $0x140] sm:$0xff]   ;;  %v27_v47 = vld [vmem:[%s2602_s0 + $0x48] sm:$0xff]  ;;  %v2064_v62 = vld [vmem:[%s2601_s1 + $0x150] sm:$0xff]  }
   0xe   :  { %1838 = vmatprep.subr.bf16.mxu1 %v2037_v13  ;;  %953 = vmatprep.mubr.bf16.mxu0 %v1562_v36  ;;  %v2057_v41 = vld [vmem:[%s2601_s1 + $0x100] sm:$0xff]   ;;  %v31_v48 = vld [vmem:[%s2602_s0 + $0x68] sm:$0xff]  ;;  %v2065_v63 = vld [vmem:[%s2601_s1 + $0x110] sm:$0xff]  }
   0xf   :  { %1050 = vmatprep.mubr.bf16.mxu1 %v1564_v39  ;;  %v2058_v42 = vld [vmem:[%s2601_s1 + $0x1c0] sm:$0xff]   ;;  %v1572_v49 = vcombine.high %v27_v47, %v31_v48  ;;  %v2060_v50 = vld [vmem:[%s2601_s1 + $0x148] sm:$0xff]   ;;  %v1571_v53 = vcombine.low %v27_v47, %v31_v48  ;;  %v2066_v0 = vld [vmem:[%s2601_s1 + $0x1d0] sm:$0xff]  }
  0x10   :  { %1775 = vmatpush3.bf16.msra.mxu0 %v2038_v14  ;;  %v2059_v43 = vld [vmem:[%s2601_s1 + $0x180] sm:$0xff]   ;;  %v2061_v52 = vld [vmem:[%s2601_s1 + $0x108] sm:$0xff]   ;;  %v2067_v1 = vld [vmem:[%s2601_s1 + $0x190] sm:$0xff]  }
  0x11   :  { %1839 = vmatpush3.bf16.msra.mxu1 %v2039_v15  ;;  %1776 = vmatprep.subr.bf16.mxu0 %v2040_v16  ;;  %v26_v44 = vld [vmem:[%s2602_s0 + $0x40] sm:$0xff]  ;;  %v2062_v54 = vld [vmem:[%s2601_s1 + $0x1c8] sm:$0xff]   ;;  %v2068_v10 = vld [vmem:[%s2601_s1 + $0x158] sm:$0xff]  }
  0x12   :  { %1840 = vmatprep.subr.bf16.mxu1 %v2041_v17  ;;  %v30_v45 = vld [vmem:[%s2602_s0 + $0x60] sm:$0xff]  ;;  %v2063_v55 = vld [vmem:[%s2601_s1 + $0x188] sm:$0xff]   ;;  %v2069_v11 = vld [vmem:[%s2601_s1 + $0x118] sm:$0xff]  }
  0x13   :  { %v1570_v46 = vcombine.high %v26_v44, %v30_v45  ;;  %v1569_v51 = vcombine.low %v26_v44, %v30_v45  ;;  %v34_v56 = vld [vmem:[%s2602_s0 + $0x80] sm:$0xff]  ;;  %v35_v58 = vld [vmem:[%s2602_s0 + $0x88] sm:$0xff]  ;;  %v2070_v12 = vld [vmem:[%s2601_s1 + $0x1d8] sm:$0xff]  }
  0x14   :  { %1777 = vmatpush3.bf16.msra.mxu0 %v2042_v18  ;;  %v38_v57 = vld [vmem:[%s2602_s0 + $0xa0] sm:$0xff]  ;;  %v39_v59 = vld [vmem:[%s2602_s0 + $0xa8] sm:$0xff]  ;;  %v2071_v13 = vld [vmem:[%s2601_s1 + $0x198] sm:$0xff]  }
  0x15   :  { %1841 = vmatpush3.bf16.msra.mxu1 %v2043_v19  ;;  %1778 = vmatprep.subr.bf16.mxu0 %v2044_v20  ;;  %v1578_v60 = vcombine.high %v34_v56, %v38_v57  ;;  %v1580_v61 = vcombine.high %v35_v58, %v39_v59  ;;  %v1577_v2 = vcombine.low %v34_v56, %v38_v57  ;;  %v42_v3 = vld [vmem:[%s2602_s0 + $0xc0] sm:$0xff]  ;;  %v43_v5 = vld [vmem:[%s2602_s0 + $0xc8] sm:$0xff]  ;;  %v2081_v39 = vld [vmem:[%s2601_s1 + $0x130] sm:$0xff]  }
  0x16   :  { %1842 = vmatprep.subr.bf16.mxu1 %v2045_v21  ;;  %v46_v4 = vld [vmem:[%s2602_s0 + $0xe0] sm:$0xff]  ;;  %v1579_v6 = vcombine.low %v35_v58, %v39_v59  ;;  %v47_v8 = vld [vmem:[%s2602_s0 + $0xe8] sm:$0xff]  ;;  %v2085_v48 = vld [vmem:[%s2601_s1 + $0x138] sm:$0xff]  }
  0x17   :  { %v1586_v7 = vcombine.high %v42_v3, %v46_v4  ;;  %v1588_v9 = vcombine.high %v43_v5, %v47_v8  ;;  %v50_v14 = vld [vmem:[%s2602_s0 + $0x100] sm:$0xff]  ;;  %v51_v16 = vld [vmem:[%s2602_s0 + $0x108] sm:$0xff]  ;;  %v1585_v19 = vcombine.low %v42_v3, %v46_v4  ;;  %v1587_v21 = vcombine.low %v43_v5, %v47_v8  ;;  %v29_v8 = vld [vmem:[%s2602_s0 + $0x58] sm:$0xff] }
  0x18   :  { %1779 = vmatpush3.bf16.msra.mxu0 %v2046_v22  ;;  %v54_v15 = vld [vmem:[%s2602_s0 + $0x120] sm:$0xff]  ;;  %v55_v17 = vld [vmem:[%s2602_s0 + $0x128] sm:$0xff] }
  0x19   :  { %1843 = vmatpush3.bf16.msra.mxu1 %v2047_v23  ;;  %1780 = vmatprep.subr.bf16.mxu0 %v2048_v24  ;;  %v2072_v18 = vld [vmem:[%s2601_s1 + $0x160] sm:$0xff]   ;;  %v1594_v22 = vcombine.high %v50_v14, %v54_v15  ;;  %v1596_v24 = vcombine.high %v51_v16, %v55_v17  ;;  %v2078_v32 = vld [vmem:[%s2601_s1 + $0x1e8] sm:$0xff]   ;;  %v1593_v34 = vcombine.low %v50_v14, %v54_v15  ;;  %v36_v14 = vld [vmem:[%s2602_s0 + $0x90] sm:$0xff] }
  0x1a   :  { %1844 = vmatprep.subr.bf16.mxu1 %v2049_v25  ;;  %v2073_v20 = vld [vmem:[%s2601_s1 + $0x120] sm:$0xff]   ;;  %v2079_v33 = vld [vmem:[%s2601_s1 + $0x1a8] sm:$0xff]   ;;  %v40_v15 = vld [vmem:[%s2602_s0 + $0xb0] sm:$0xff] }
  0x1b   :  { %v2074_v23 = vld [vmem:[%s2601_s1 + $0x1e0] sm:$0xff]   ;;  %v67_v44 = vld [vmem:[%s2602_s0 + $0x188] sm:$0xff] }
  0x1c   :  { %1781 = vmatpush3.bf16.msra.mxu0 %v2050_v26  ;;  %v2075_v25 = vld [vmem:[%s2601_s1 + $0x1a0] sm:$0xff]   ;;  %v71_v45 = vld [vmem:[%s2602_s0 + $0x1a8] sm:$0xff] }
  0x1d   :  { %1845 = vmatpush3.bf16.msra.mxu1 %v2051_v27  ;;  %1782 = vmatprep.subr.bf16.mxu0 %v2052_v28  ;;  %v58_v26 = vld [vmem:[%s2602_s0 + $0x140] sm:$0xff]  ;;  %v2076_v28 = vld [vmem:[%s2601_s1 + $0x168] sm:$0xff]   ;;  %v1611_v59 = vcombine.low %v67_v44, %v71_v45 }
  0x1e   :  { %1846 = vmatprep.subr.bf16.mxu1 %v2053_v29  ;;  %v62_v27 = vld [vmem:[%s2602_s0 + $0x160] sm:$0xff]  ;;  %v59_v29 = vld [vmem:[%s2602_s0 + $0x148] sm:$0xff] }
  0x1f   :  { %v1602_v36 = vcombine.high %v58_v26, %v62_v27  ;;  %v1601_v47 = vcombine.low %v58_v26, %v62_v27  ;;  %v75_v56 = vld [vmem:[%s2602_s0 + $0x1c8] sm:$0xff]  ;;  %v1581_v26 = vcombine.low %v36_v14, %v40_v15 }
  0x20   :  { %1783 = vmatpush3.bf16.msra.mxu0 %v2054_v30  ;;  %v63_v30 = vld [vmem:[%s2602_s0 + $0x168] sm:$0xff] }
  0x21   :  { %1847 = vmatpush3.bf16.msra.mxu1 %v2055_v31  ;;  %1896 = vmatprep.subr.bf16.mxu0 %v2056_v40  ;;  %v2077_v31 = vld [vmem:[%s2601_s1 + $0x128] sm:$0xff]   ;;  %v1604_v37 = vcombine.high %v59_v29, %v63_v30  ;;  %v2082_v40 = vld [vmem:[%s2601_s1 + $0x1f0] sm:$0xff]  }
  0x22   :  { %1960 = vmatprep.subr.bf16.mxu1 %v2058_v42  ;;  %v70_v42 = vld [vmem:[%s2602_s0 + $0x1a0] sm:$0xff]  ;;  %v79_v57 = vld [vmem:[%s2602_s0 + $0x1e8] sm:$0xff] }
  0x23   :  { %954 = vmatmul.mubr.bf16.vlgmr.msra.gmra.mrb[0].mxu0 %v1561_v35  ;;  %v1595_v35 = vcombine.low %v51_v16, %v55_v17  ;;  %v1619_v3 = vcombine.low %v75_v56, %v79_v57  ;;  %v37_v16 = vld [vmem:[%s2602_s0 + $0x98] sm:$0xff] }
  0x24   :  { %1051 = vmatmul.mubr.bf16.vlgmr.msra.gmra.mrb[0].mxu1 %v1563_v38  ;;  %1897 = vmatpush3.bf16.msra.mxu0 %v2057_v41  ;;  %v2080_v38 = vld [vmem:[%s2601_s1 + $0x170] sm:$0xff]   ;;  %v66_v41 = vld [vmem:[%s2602_s0 + $0x180] sm:$0xff]  ;;  %v41_v17 = vld [vmem:[%s2602_s0 + $0xb8] sm:$0xff] }
  0x25   :  { %1961 = vmatpush3.bf16.msra.mxu1 %v2059_v43  ;;  %961 = vmatprep.mubr.bf16.mxu0 %v1570_v46  ;;  %v2083_v43 = vld [vmem:[%s2601_s1 + $0x1b0] sm:$0xff]   ;;  %v2084_v46 = vld [vmem:[%s2601_s1 + $0x178] sm:$0xff]   ;;  %v1609_v58 = vcombine.low %v66_v41, %v70_v42  ;;  %v1583_v27 = vcombine.low %v37_v16, %v41_v17 }
  0x26   :  { %1058 = vmatprep.mubr.bf16.mxu1 %v1572_v49  ;;  %1898 = vmatprep.subr.bf16.mxu0 %v2060_v50  ;;  %v1603_v49 = vcombine.low %v59_v29, %v63_v30  ;;  %v1610_v50 = vcombine.high %v66_v41, %v70_v42  ;;  %v52_v30 = vld [vmem:[%s2602_s0 + $0x110] sm:$0xff]  ;;  %v65_v41 = vld [vmem:[%s2602_s0 + $0x178] sm:$0xff] }
  0x27   :  { %1962 = vmatprep.subr.bf16.mxu1 %v2062_v54  ;;  %v74_v54 = vld [vmem:[%s2602_s0 + $0x1c0] sm:$0xff] }
  0x28   :  { %1899 = vmatpush3.bf16.msra.mxu0 %v2061_v52  ;;  %v1612_v52 = vcombine.high %v67_v44, %v71_v45 }
  0x29   :  { %1963 = vmatpush3.bf16.msra.mxu1 %v2063_v55  ;;  %1900 = vmatprep.subr.bf16.mxu0 %v2064_v62  ;;  %v78_v55 = vld [vmem:[%s2602_s0 + $0x1e0] sm:$0xff]  ;;  %v20_v62 = vld [vmem:[%s2602_s0 + $0x10] sm:$0xff] }
  0x2a   :  { %1964 = vmatprep.subr.bf16.mxu1 %v2066_v0  ;;  %v21_v0 = vld [vmem:[%s2602_s0 + $0x18] sm:$0xff] }
  0x2b   :  { %962 = vmatmul.mubr.bf16.gmra.mrb[4].mxu0 %v1569_v51  ;;  %v2086_v51 = vld [vmem:[%s2601_s1 + $0x1f8] sm:$0xff]  }
  0x2c   :  { %1059 = vmatmul.mubr.bf16.gmra.mrb[4].mxu1 %v1571_v53  ;;  %969 = vmatprep.mubr.bf16.mxu0 %v1578_v60  ;;  %v2087_v53 = vld [vmem:[%s2601_s1 + $0x1b8] sm:$0xff]   ;;  %v1618_v60 = vcombine.high %v74_v54, %v78_v55 }
  0x2d   :  { %1066 = vmatprep.mubr.bf16.mxu1 %v1580_v61  ;;  %1901 = vmatpush3.bf16.msra.mxu0 %v2065_v63  ;;  %v1620_v61 = vcombine.high %v75_v56, %v79_v57  ;;  %v24_v63 = vld [vmem:[%s2602_s0 + $0x30] sm:$0xff]  ;;  %v77_v56 = vld [vmem:[%s2602_s0 + $0x1d8] sm:$0xff] }
  0x2e   :  { %1965 = vmatpush3.bf16.msra.mxu1 %v2067_v1  ;;  %1902 = vmatprep.subr.bf16.mxu0 %v2068_v10  ;;  %v25_v1 = vld [vmem:[%s2602_s0 + $0x38] sm:$0xff]  ;;  %v1566_v4 = vcombine.high %v20_v62, %v24_v63  ;;  %v1565_v10 = vcombine.low %v20_v62, %v24_v63 }
  0x2f   :  { %1966 = vmatprep.subr.bf16.mxu1 %v2070_v12  ;;  %v1568_v5 = vcombine.high %v21_v0, %v25_v1  ;;  %v81_v57 = vld [vmem:[%s2602_s0 + $0x1f8] sm:$0xff] }
  0x30   :  { %v1623_v63 = vcombine.low %v77_v56, %v81_v57 }
  0x31   :  { %1903 = vmatpush3.bf16.msra.mxu0 %v2069_v11  ;;  %v1567_v11 = vcombine.low %v21_v0, %v25_v1 }
  0x32   :  { %1967 = vmatpush3.bf16.msra.mxu1 %v2071_v13  ;;  %1904 = vmatprep.subr.bf16.mxu0 %v2072_v18 }
  0x33   :  { %970 = vmatmul.mubr.bf16.gmra.mrb[8].mxu0 %v1577_v2  ;;  %1968 = vmatprep.subr.bf16.mxu1 %v2074_v23  ;;  %v1617_v2 = vcombine.low %v74_v54, %v78_v55  ;;  %v48_v23 = vld [vmem:[%s2602_s0 + $0xf0] sm:$0xff] }
  0x34   :  { %1067 = vmatmul.mubr.bf16.gmra.mrb[8].mxu1 %v1579_v6  ;;  %977 = vmatprep.mubr.bf16.mxu0 %v1586_v7  ;;  %v28_v6 = vld [vmem:[%s2602_s0 + $0x50] sm:$0xff] }
  0x35   :  { %1074 = vmatprep.mubr.bf16.mxu1 %v1588_v9  ;;  %1905 = vmatpush3.bf16.msra.mxu0 %v2073_v20  ;;  %v32_v7 = vld [vmem:[%s2602_s0 + $0x70] sm:$0xff]  ;;  %v33_v9 = vld [vmem:[%s2602_s0 + $0x78] sm:$0xff]  ;;  %v1582_v20 = vcombine.high %v36_v14, %v40_v15 }
  0x36   :  { %1969 = vmatpush3.bf16.msra.mxu1 %v2075_v25  ;;  %1906 = vmatprep.subr.bf16.mxu0 %v2076_v28  ;;  %v1574_v12 = vcombine.high %v28_v6, %v32_v7  ;;  %v1576_v13 = vcombine.high %v29_v8, %v33_v9  ;;  %v1573_v18 = vcombine.low %v28_v6, %v32_v7  ;;  %v49_v25 = vld [vmem:[%s2602_s0 + $0xf8] sm:$0xff]  ;;  %v76_v54 = vld [vmem:[%s2602_s0 + $0x1d0] sm:$0xff] }
  0x37   :  { %1970 = vmatprep.subr.bf16.mxu1 %v2078_v32  ;;  %v53_v32 = vld [vmem:[%s2602_s0 + $0x118] sm:$0xff]  ;;  %v80_v55 = vld [vmem:[%s2602_s0 + $0x1f0] sm:$0xff] }
  0x38   :  { %v1621_v62 = vcombine.low %v76_v54, %v80_v55 }
  0x39   :  { %1907 = vmatpush3.bf16.msra.mxu0 %v2077_v31  ;;  %v56_v31 = vld [vmem:[%s2602_s0 + $0x130] sm:$0xff] }
  0x3a   :  { %1971 = vmatpush3.bf16.msra.mxu1 %v2079_v33  ;;  %1908 = vmatprep.subr.bf16.mxu0 %v2080_v38  ;;  %v57_v33 = vld [vmem:[%s2602_s0 + $0x138] sm:$0xff]  ;;  %v60_v38 = vld [vmem:[%s2602_s0 + $0x150] sm:$0xff]  ;;  %v1597_v42 = vcombine.low %v52_v30, %v56_v31 }
  0x3b   :  { %978 = vmatmul.mubr.bf16.gmra.mrb[12].mxu0 %v1585_v19  ;;  %1972 = vmatprep.subr.bf16.mxu1 %v2082_v40  ;;  %v1575_v19 = vcombine.low %v29_v8, %v33_v9  ;;  %v61_v40 = vld [vmem:[%s2602_s0 + $0x158] sm:$0xff] }
  0x3c   :  { %1075 = vmatmul.mubr.bf16.gmra.mrb[12].mxu1 %v1587_v21  ;;  %985 = vmatprep.mubr.bf16.mxu0 %v1594_v22  ;;  %v1584_v21 = vcombine.high %v37_v16, %v41_v17  ;;  %v44_v22 = vld [vmem:[%s2602_s0 + $0xd0] sm:$0xff]  ;;  %v1608_v45 = vcombine.high %v61_v40, %v65_v41 }
  0x3d   :  { %1082 = vmatprep.mubr.bf16.mxu1 %v1596_v24  ;;  %1909 = vmatpush3.bf16.msra.mxu0 %v2081_v39  ;;  %v45_v24 = vld [vmem:[%s2602_s0 + $0xd8] sm:$0xff]  ;;  %v1590_v28 = vcombine.high %v44_v22, %v48_v23  ;;  %v64_v39 = vld [vmem:[%s2602_s0 + $0x170] sm:$0xff] }
  0x3e   :  { %1973 = vmatpush3.bf16.msra.mxu1 %v2083_v43  ;;  %1910 = vmatprep.subr.bf16.mxu0 %v2084_v46  ;;  %v1592_v29 = vcombine.high %v45_v24, %v49_v25  ;;  %v1599_v43 = vcombine.low %v53_v32, %v57_v33  ;;  %v1606_v44 = vcombine.high %v60_v38, %v64_v39  ;;  %v68_v46 = vld [vmem:[%s2602_s0 + $0x190] sm:$0xff] }
  0x3f   :  { %1974 = vmatprep.subr.bf16.mxu1 %v2086_v51  ;;  %v1607_v51 = vcombine.low %v61_v40, %v65_v41 }
  0x41   :  { %1911 = vmatpush3.bf16.msra.mxu0 %v2085_v48  ;;  %v69_v48 = vld [vmem:[%s2602_s0 + $0x198] sm:$0xff] }
  0x42   :  { %1975 = vmatpush3.bf16.msra.mxu1 %v2087_v53 }
  0x43   :  { %986 = vmatmul.mubr.bf16.gmra.mrb[16].mxu0 %v1593_v34  ;;  %v1589_v34 = vcombine.low %v44_v22, %v48_v23 }
  0x44   :  { %1083 = vmatmul.mubr.bf16.gmra.mrb[16].mxu1 %v1595_v35  ;;  %993 = vmatprep.mubr.bf16.mxu0 %v1602_v36  ;;  %v1591_v35 = vcombine.low %v45_v24, %v49_v25  ;;  %v1598_v36 = vcombine.high %v52_v30, %v56_v31 }
  0x45   :  { %1090 = vmatprep.mubr.bf16.mxu1 %v1604_v37  ;;  %v1600_v37 = vcombine.high %v53_v32, %v57_v33 }
  0x4b   :  { %994 = vmatmul.mubr.bf16.gmra.mrb[20].mxu0 %v1601_v47  ;;  %v72_v47 = vld [vmem:[%s2602_s0 + $0x1b0] sm:$0xff] }
  0x4c   :  { %1091 = vmatmul.mubr.bf16.gmra.mrb[20].mxu1 %v1603_v49  ;;  %1001 = vmatprep.mubr.bf16.mxu0 %v1610_v50  ;;  %v73_v49 = vld [vmem:[%s2602_s0 + $0x1b8] sm:$0xff]  ;;  %v1605_v50 = vcombine.low %v60_v38, %v64_v39 }
  0x4d   :  { %1098 = vmatprep.mubr.bf16.mxu1 %v1612_v52  ;;  %v1614_v52 = vcombine.high %v68_v46, %v72_v47  ;;  %v1616_v53 = vcombine.high %v69_v48, %v73_v49 }
  0x53   :  { %1002 = vmatmul.mubr.bf16.gmra.mrb[24].mxu0 %v1609_v58  ;;  %v1613_v58 = vcombine.low %v68_v46, %v72_v47 }
  0x54   :  { %1099 = vmatmul.mubr.bf16.gmra.mrb[24].mxu1 %v1611_v59  ;;  %1009 = vmatprep.mubr.bf16.mxu0 %v1618_v60  ;;  %v1615_v59 = vcombine.low %v69_v48, %v73_v49  ;;  %v1622_v60 = vcombine.high %v76_v54, %v80_v55 }
  0x55   :  { %1106 = vmatprep.mubr.bf16.mxu1 %v1620_v61  ;;  %v1624_v61 = vcombine.high %v77_v56, %v81_v57 }
  0x5b   :  { %1010 = vmatmul.mubr.bf16.gmra.mrb[28].mxu0 %v1617_v2  ;;  %v2505_v2 = vld [vmem:[%s2603_s2] ss:$0 sm:$0xff] }
  0x5c   :  { %1107 = vmatmul.mubr.bf16.gmra.mrb[28].mxu1 %v1619_v3  ;;  %1147 = vmatprep.mubr.bf16.mxu0 %v1566_v4 }
  0x5d   :  { %1244 = vmatprep.mubr.bf16.mxu1 %v1568_v5 }
  0x63   :  { %1148 = vmatmul.mubr.bf16.vlgmr.msra.gmra.mrb[32].mxu0 %v1565_v10 }
  0x64   :  { %1245 = vmatmul.mubr.bf16.vlgmr.msra.gmra.mrb[32].mxu1 %v1567_v11  ;;  %1155 = vmatprep.mubr.bf16.mxu0 %v1574_v12 }
  0x65   :  { %1252 = vmatprep.mubr.bf16.mxu1 %v1576_v13 }
  0x6b   :  { %1156 = vmatmul.mubr.bf16.gmra.mrb[36].mxu0 %v1573_v18 }
  0x6c   :  { %1253 = vmatmul.mubr.bf16.gmra.mrb[36].mxu1 %v1575_v19  ;;  %1163 = vmatprep.mubr.bf16.mxu0 %v1582_v20 }
  0x6d   :  { %1260 = vmatprep.mubr.bf16.mxu1 %v1584_v21 }
  0x73   :  { %1164 = vmatmul.mubr.bf16.gmra.mrb[40].mxu0 %v1581_v26 }
  0x74   :  { %1261 = vmatmul.mubr.bf16.gmra.mrb[40].mxu1 %v1583_v27  ;;  %1171 = vmatprep.mubr.bf16.mxu0 %v1590_v28 }
  0x75   :  { %1268 = vmatprep.mubr.bf16.mxu1 %v1592_v29 }
  0x7b   :  { %1172 = vmatmul.mubr.bf16.gmra.mrb[44].mxu0 %v1589_v34 }
  0x7c   :  { %1269 = vmatmul.mubr.bf16.gmra.mrb[44].mxu1 %v1591_v35  ;;  %1179 = vmatprep.mubr.bf16.mxu0 %v1598_v36 }
  0x7d   :  { %1276 = vmatprep.mubr.bf16.mxu1 %v1600_v37 }
  0x83   :  { %1180 = vmatmul.mubr.bf16.gmra.mrb[48].mxu0 %v1597_v42 }
  0x84   :  { %1277 = vmatmul.mubr.bf16.gmra.mrb[48].mxu1 %v1599_v43  ;;  %1187 = vmatprep.mubr.bf16.mxu0 %v1606_v44 }
  0x85   :  { %1284 = vmatprep.mubr.bf16.mxu1 %v1608_v45 }
  0x8b   :  { %1188 = vmatmul.mubr.bf16.gmra.mrb[52].mxu0 %v1605_v50 }
  0x8c   :  { %1285 = vmatmul.mubr.bf16.gmra.mrb[52].mxu1 %v1607_v51  ;;  %1195 = vmatprep.mubr.bf16.mxu0 %v1614_v52 }
  0x8d   :  { %1292 = vmatprep.mubr.bf16.mxu1 %v1616_v53 }
  0x93   :  { %1196 = vmatmul.mubr.bf16.gmra.mrb[56].mxu0 %v1613_v58 }
  0x94   :  { %1293 = vmatmul.mubr.bf16.gmra.mrb[56].mxu1 %v1615_v59  ;;  %1203 = vmatprep.mubr.bf16.mxu0 %v1622_v60 }
  0x95   :  { %1300 = vmatprep.mubr.bf16.mxu1 %v1624_v61 }
  0x9b   :  { %1204 = vmatmul.mubr.bf16.gmra.mrb[60].mxu0 %v1621_v62 }
  0x9c   :  { %1301 = vmatmul.mubr.bf16.gmra.mrb[60].mxu1 %v1623_v63 }
  0xf6   :  { %v1784_v0 = vpop.f32.mrb[0].mxu0 }
  0xf7   :  { %v1848_v1 = vpop.f32.mrb[0].mxu1  ;;  %v1785_v3 = vpop.f32.mrb[1].mxu0 }
  0xf8   :  { %v1786_v4 = vadd.f32 %v1785_v3, %v1784_v0  ;;  %v1849_v5 = vpop.f32.mrb[1].mxu1  ;;  %v1787_v6 = vpop.f32.mrb[2].mxu0 }
  0xf9   :  { %v1850_v7 = vadd.f32 %v1849_v5, %v1848_v1  ;;  %v1851_v8 = vpop.f32.mrb[2].mxu1  ;;  %v1788_v9 = vpop.f32.mrb[3].mxu0 }
  0xfa   :  { %v956_v10 = vadd.f32 %v1786_v4, %v2505_v2  ;;  %v1789_v11 = vadd.f32 %v1788_v9, %v1787_v6  ;;  %v1852_v12 = vpop.f32.mrb[3].mxu1 }
  0xfb   :  { %v1853_v13 = vadd.f32 %v1852_v12, %v1851_v8 }
  0xfc   :  { %v2508_v14 = vadd.f32 %v1850_v7, %v956_v10  ;;  %v959_v15 = vadd.f32 %v1789_v11, %v2505_v2 }
  0xfe   :  { %v2511_v16 = vadd.f32 %v1853_v13, %v959_v15  ;;  %v1790_v17 = vpop.f32.mrb[4].mxu0 }
  0xff   :  { %v1854_v18 = vpop.f32.mrb[4].mxu1  ;;  %v1791_v19 = vpop.f32.mrb[5].mxu0 }
 0x100   :  { %v1792_v20 = vadd.f32 %v1791_v19, %v1790_v17  ;;  %v1855_v21 = vpop.f32.mrb[5].mxu1  ;;  %v1793_v22 = vpop.f32.mrb[6].mxu0 }
 0x101   :  { %v1856_v23 = vadd.f32 %v1855_v21, %v1854_v18  ;;  %v1857_v24 = vpop.f32.mrb[6].mxu1  ;;  %v1794_v25 = vpop.f32.mrb[7].mxu0 }
 0x102   :  { %v964_v26 = vadd.f32 %v1792_v20, %v2505_v2  ;;  %v1795_v27 = vadd.f32 %v1794_v25, %v1793_v22  ;;  %v1858_v28 = vpop.f32.mrb[7].mxu1 }
 0x103   :  { %v1859_v29 = vadd.f32 %v1858_v28, %v1857_v24 }
 0x104   :  { %v2514_v30 = vadd.f32 %v1856_v23, %v964_v26  ;;  %v967_v31 = vadd.f32 %v1795_v27, %v2505_v2 }
 0x106   :  { %v2517_v32 = vadd.f32 %v1859_v29, %v967_v31  ;;  %v1796_v33 = vpop.f32.mrb[8].mxu0 }
 0x107   :  { %v1860_v34 = vpop.f32.mrb[8].mxu1  ;;  %v1797_v35 = vpop.f32.mrb[9].mxu0 }
 0x108   :  { %v1798_v36 = vadd.f32 %v1797_v35, %v1796_v33  ;;  %v1861_v37 = vpop.f32.mrb[9].mxu1  ;;  %v1799_v38 = vpop.f32.mrb[10].mxu0 }
 0x109   :  { %v1862_v39 = vadd.f32 %v1861_v37, %v1860_v34  ;;  %v1863_v40 = vpop.f32.mrb[10].mxu1  ;;  %v1800_v41 = vpop.f32.mrb[11].mxu0 }
 0x10a   :  { %v972_v42 = vadd.f32 %v1798_v36, %v2505_v2  ;;  %v1801_v43 = vadd.f32 %v1800_v41, %v1799_v38  ;;  %v1864_v44 = vpop.f32.mrb[11].mxu1 }
 0x10b   :  { %v1865_v45 = vadd.f32 %v1864_v44, %v1863_v40 }
 0x10c   :  { %v2520_v46 = vadd.f32 %v1862_v39, %v972_v42  ;;  %v975_v47 = vadd.f32 %v1801_v43, %v2505_v2 }
 0x10e   :  { %v2523_v48 = vadd.f32 %v1865_v45, %v975_v47  ;;  %v1802_v49 = vpop.f32.mrb[12].mxu0 }
 0x10f   :  { %v1866_v50 = vpop.f32.mrb[12].mxu1  ;;  %v1803_v51 = vpop.f32.mrb[13].mxu0 }
 0x110   :  { %v1804_v52 = vadd.f32 %v1803_v51, %v1802_v49  ;;  %v1867_v53 = vpop.f32.mrb[13].mxu1  ;;  %v1805_v54 = vpop.f32.mrb[14].mxu0 }
 0x111   :  { %v1868_v55 = vadd.f32 %v1867_v53, %v1866_v50  ;;  %v1869_v56 = vpop.f32.mrb[14].mxu1  ;;  %v1806_v57 = vpop.f32.mrb[15].mxu0 }
 0x112   :  { %v980_v58 = vadd.f32 %v1804_v52, %v2505_v2  ;;  %v1807_v59 = vadd.f32 %v1806_v57, %v1805_v54  ;;  %v1870_v60 = vpop.f32.mrb[15].mxu1 }
 0x113   :  { %v1871_v61 = vadd.f32 %v1870_v60, %v1869_v56 }
 0x114   :  { %v2526_v62 = vadd.f32 %v1868_v55, %v980_v58  ;;  %v983_v63 = vadd.f32 %v1807_v59, %v2505_v2 }
 0x116   :  { %v2529_v0 = vadd.f32 %v1871_v61, %v983_v63  ;;  %v1808_v1 = vpop.f32.mrb[16].mxu0 }
 0x117   :  { %v1872_v3 = vpop.f32.mrb[16].mxu1  ;;  %v1809_v4 = vpop.f32.mrb[17].mxu0 }
 0x118   :  { %v1810_v5 = vadd.f32 %v1809_v4, %v1808_v1  ;;  %v1873_v6 = vpop.f32.mrb[17].mxu1  ;;  %v1811_v7 = vpop.f32.mrb[18].mxu0 }
 0x119   :  { %v1874_v8 = vadd.f32 %v1873_v6, %v1872_v3  ;;  %v1875_v9 = vpop.f32.mrb[18].mxu1  ;;  %v1812_v10 = vpop.f32.mrb[19].mxu0 }
 0x11a   :  { %v988_v11 = vadd.f32 %v1810_v5, %v2505_v2  ;;  %v1813_v12 = vadd.f32 %v1812_v10, %v1811_v7  ;;  %v1876_v13 = vpop.f32.mrb[19].mxu1 }
 0x11b   :  { %v1877_v15 = vadd.f32 %v1876_v13, %v1875_v9 }
 0x11c   :  { %v2532_v17 = vadd.f32 %v1874_v8, %v988_v11  ;;  %v991_v18 = vadd.f32 %v1813_v12, %v2505_v2 }
 0x11e   :  { %v2535_v19 = vadd.f32 %v1877_v15, %v991_v18  ;;  %v1814_v20 = vpop.f32.mrb[20].mxu0 }
 0x11f   :  { %v1878_v21 = vpop.f32.mrb[20].mxu1  ;;  %v1815_v22 = vpop.f32.mrb[21].mxu0 }
 0x120   :  { %v1816_v23 = vadd.f32 %v1815_v22, %v1814_v20  ;;  %v1879_v24 = vpop.f32.mrb[21].mxu1  ;;  %v1817_v25 = vpop.f32.mrb[22].mxu0 }
 0x121   :  { %v1880_v26 = vadd.f32 %v1879_v24, %v1878_v21  ;;  %v1881_v27 = vpop.f32.mrb[22].mxu1  ;;  %v1818_v28 = vpop.f32.mrb[23].mxu0 }
 0x122   :  { %v996_v29 = vadd.f32 %v1816_v23, %v2505_v2  ;;  %v1819_v31 = vadd.f32 %v1818_v28, %v1817_v25  ;;  %v1882_v33 = vpop.f32.mrb[23].mxu1 }
 0x123   :  { %v1883_v34 = vadd.f32 %v1882_v33, %v1881_v27 }
 0x124   :  { %v2538_v35 = vadd.f32 %v1880_v26, %v996_v29  ;;  %v999_v36 = vadd.f32 %v1819_v31, %v2505_v2 }
 0x126   :  { %v2541_v37 = vadd.f32 %v1883_v34, %v999_v36  ;;  %v1820_v38 = vpop.f32.mrb[24].mxu0 }
 0x127   :  { %v1884_v39 = vpop.f32.mrb[24].mxu1  ;;  %v1821_v40 = vpop.f32.mrb[25].mxu0 }
 0x128   :  { %v1822_v41 = vadd.f32 %v1821_v40, %v1820_v38  ;;  %v1885_v42 = vpop.f32.mrb[25].mxu1  ;;  %v1823_v43 = vpop.f32.mrb[26].mxu0 }
 0x129   :  { %v1886_v44 = vadd.f32 %v1885_v42, %v1884_v39  ;;  %v1887_v45 = vpop.f32.mrb[26].mxu1  ;;  %v1824_v47 = vpop.f32.mrb[27].mxu0 }
 0x12a   :  { %v1004_v49 = vadd.f32 %v1822_v41, %v2505_v2  ;;  %v1825_v50 = vadd.f32 %v1824_v47, %v1823_v43  ;;  %v1888_v51 = vpop.f32.mrb[27].mxu1 }
 0x12b   :  { %v1889_v52 = vadd.f32 %v1888_v51, %v1887_v45 }
 0x12c   :  { %v2544_v53 = vadd.f32 %v1886_v44, %v1004_v49  ;;  %v1007_v54 = vadd.f32 %v1825_v50, %v2505_v2 }
 0x12e   :  { %v2547_v55 = vadd.f32 %v1889_v52, %v1007_v54  ;;  %v1826_v56 = vpop.f32.mrb[28].mxu0 }
 0x12f   :  { %v1890_v57 = vpop.f32.mrb[28].mxu1  ;;  %v1827_v58 = vpop.f32.mrb[29].mxu0 }
 0x130   :  { %v1828_v59 = vadd.f32 %v1827_v58, %v1826_v56  ;;  %v1891_v60 = vpop.f32.mrb[29].mxu1  ;;  %v1829_v61 = vpop.f32.mrb[30].mxu0 }
 0x131   :  { %v1892_v63 = vadd.f32 %v1891_v60, %v1890_v57  ;;  %v1893_v1 = vpop.f32.mrb[30].mxu1  ;;  %v1830_v3 = vpop.f32.mrb[31].mxu0 }
 0x132   :  { %v1012_v4 = vadd.f32 %v1828_v59, %v2505_v2  ;;  %v1831_v5 = vadd.f32 %v1830_v3, %v1829_v61  ;;  %v1894_v6 = vpop.f32.mrb[31].mxu1 }
 0x133   :  { %v1895_v7 = vadd.f32 %v1894_v6, %v1893_v1 }
 0x134   :  { %v2550_v8 = vadd.f32 %v1892_v63, %v1012_v4  ;;  %v1015_v9 = vadd.f32 %v1831_v5, %v2505_v2 }
 0x136   :  { %v2553_v10 = vadd.f32 %v1895_v7, %v1015_v9  ;;  %v1912_v11 = vpop.f32.mrb[32].mxu0 }
 0x137   :  { %v1976_v12 = vpop.f32.mrb[32].mxu1  ;;  %v1913_v13 = vpop.f32.mrb[33].mxu0 }
 0x138   :  { %v1914_v15 = vadd.f32 %v1913_v13, %v1912_v11  ;;  %v1977_v18 = vpop.f32.mrb[33].mxu1  ;;  %v1915_v20 = vpop.f32.mrb[34].mxu0 }
 0x139   :  { %v1978_v21 = vadd.f32 %v1977_v18, %v1976_v12  ;;  %v1979_v22 = vpop.f32.mrb[34].mxu1  ;;  %v1916_v23 = vpop.f32.mrb[35].mxu0 }
 0x13a   :  { %v1150_v24 = vadd.f32 %v1914_v15, %v2508_v14  ;;  %v1917_v25 = vadd.f32 %v1916_v23, %v1915_v20  ;;  %v1980_v26 = vpop.f32.mrb[35].mxu1 }
 0x13b   :  { %v1981_v27 = vadd.f32 %v1980_v26, %v1979_v22 }
 0x13c   :  { %v1247_v28 = vadd.f32 %v1978_v21, %v1150_v24  ;;  %v1153_v29 = vadd.f32 %v1917_v25, %v2511_v16 }
 0x13e   :  { %v1250_v2 = vadd.f32 %v1981_v27, %v1153_v29  ;;  %v1918_v31 = vpop.f32.mrb[36].mxu0  ;;  %v1429_v33 = vmul.f32 %v1247_v28, %v1247_v28 }
 0x13f   :  { %v1982_v34 = vpop.f32.mrb[36].mxu1  ;;  %v1919_v36 = vpop.f32.mrb[37].mxu0 }
 0x140   :  { %v1408_v38 = vadd.f32 %v1250_v2, %v1247_v28  ;;  %v1430_v39 = vmul.f32 %v1250_v2, %v1250_v2  ;;  %v1724_v40 = vpack.c.bf16 %v1250_v2, %v1247_v28  ;;  %v1920_v41 = vadd.f32 %v1919_v36, %v1918_v31  ;;  %v1983_v42 = vpop.f32.mrb[37].mxu1  ;;  %v1921_v43 = vpop.f32.mrb[38].mxu0 }
 0x141   :  { %v1984_v44 = vadd.f32 %v1983_v42, %v1982_v34  ;;  %v1985_v45 = vpop.f32.mrb[38].mxu1  ;;  %v1922_v14 = vpop.f32.mrb[39].mxu0 }
 0x142   :  { %v1445_v47 = vadd.f32 %v1430_v39, %v1429_v33  ;;  %1725 = vst [vmem:[%s2604_s3] sm:$0xff] %v1724_v40   ;;  %v1158_v16 = vadd.f32 %v1920_v41, %v2514_v30  ;;  %v1923_v49 = vadd.f32 %v1922_v14, %v1921_v43  ;;  %v1986_v50 = vpop.f32.mrb[39].mxu1 }
 0x143   :  { %v1987_v51 = vadd.f32 %v1986_v50, %v1985_v45 }
 0x144   :  { %v1255_v52 = vadd.f32 %v1984_v44, %v1158_v16  ;;  %v1161_v54 = vadd.f32 %v1923_v49, %v2517_v32 }
 0x146   :  { %v1409_v56 = vadd.f32 %v1408_v38, %v1255_v52  ;;  %v1431_v57 = vmul.f32 %v1255_v52, %v1255_v52  ;;  %v1258_v58 = vadd.f32 %v1987_v51, %v1161_v54  ;;  %v1924_v59 = vpop.f32.mrb[40].mxu0 }
 0x147   :  { %v1988_v60 = vpop.f32.mrb[40].mxu1  ;;  %v1925_v61 = vpop.f32.mrb[41].mxu0 }
 0x148   :  { %v1446_v63 = vadd.f32 %v1445_v47, %v1431_v57  ;;  %v1410_v1 = vadd.f32 %v1409_v56, %v1258_v58  ;;  %v1432_v3 = vmul.f32 %v1258_v58, %v1258_v58  ;;  %v1729_v4 = vpack.c.bf16 %v1258_v58, %v1255_v52  ;;  %v1989_v5 = vpop.f32.mrb[41].mxu1  ;;  %v1927_v6 = vpop.f32.mrb[42].mxu0 }
 0x149   :  { %v1926_v7 = vadd.f32 %v1925_v61, %v1924_v59  ;;  %v1990_v30 = vadd.f32 %v1989_v5, %v1988_v60  ;;  %v1991_v9 = vpop.f32.mrb[42].mxu1  ;;  %v1928_v11 = vpop.f32.mrb[43].mxu0 }
 0x14a   :  { %v1447_v12 = vadd.f32 %v1446_v63, %v1432_v3  ;;  %1761 = vst [vmem:[%s2604_s3 + $0x8] sm:$0xff] %v1729_v4   ;;  %v1929_v32 = vadd.f32 %v1928_v11, %v1927_v6  ;;  %v1992_v13 = vpop.f32.mrb[43].mxu1 }
 0x14b   :  { %v1166_v15 = vadd.f32 %v1926_v7, %v2520_v46  ;;  %v1993_v18 = vadd.f32 %v1992_v13, %v1991_v9 }
 0x14c   :  { %v1169_v20 = vadd.f32 %v1929_v32, %v2523_v48 }
 0x14d   :  { %v1263_v21 = vadd.f32 %v1990_v30, %v1166_v15 }
 0x14e   :  { %v1266_v22 = vadd.f32 %v1993_v18, %v1169_v20  ;;  %v1930_v23 = vpop.f32.mrb[44].mxu0 }
 0x14f   :  { %v1411_v24 = vadd.f32 %v1410_v1, %v1263_v21  ;;  %v1433_v25 = vmul.f32 %v1263_v21, %v1263_v21  ;;  %v1994_v26 = vpop.f32.mrb[44].mxu1  ;;  %v1931_v27 = vpop.f32.mrb[45].mxu0 }
 0x150   :  { %v1434_v28 = vmul.f32 %v1266_v22, %v1266_v22  ;;  %v1734_v29 = vpack.c.bf16 %v1266_v22, %v1263_v21  ;;  %v1932_v2 = vadd.f32 %v1931_v27, %v1930_v23  ;;  %v1995_v31 = vpop.f32.mrb[45].mxu1  ;;  %v1933_v33 = vpop.f32.mrb[46].mxu0 }
 0x151   :  { %v1448_v34 = vadd.f32 %v1447_v12, %v1433_v25  ;;  %v1412_v36 = vadd.f32 %v1411_v24, %v1266_v22  ;;  %v1996_v38 = vadd.f32 %v1995_v31, %v1994_v26  ;;  %v1997_v39 = vpop.f32.mrb[46].mxu1  ;;  %v1934_v46 = vpop.f32.mrb[47].mxu0 }
 0x152   :  { %1762 = vst [vmem:[%s2604_s3 + $0x10] sm:$0xff] %v1734_v29   ;;  %v1174_v48 = vadd.f32 %v1932_v2, %v2526_v62  ;;  %v1935_v40 = vadd.f32 %v1934_v46, %v1933_v33  ;;  %v1998_v41 = vpop.f32.mrb[47].mxu1 }
 0x153   :  { %v1449_v42 = vadd.f32 %v1448_v34, %v1434_v28  ;;  %v1999_v43 = vadd.f32 %v1998_v41, %v1997_v39 }
 0x154   :  { %v1271_v44 = vadd.f32 %v1996_v38, %v1174_v48  ;;  %v1177_v45 = vadd.f32 %v1935_v40, %v2529_v0 }
 0x156   :  { %v1413_v14 = vadd.f32 %v1412_v36, %v1271_v44  ;;  %v1435_v47 = vmul.f32 %v1271_v44, %v1271_v44  ;;  %v1274_v16 = vadd.f32 %v1999_v43, %v1177_v45  ;;  %v1936_v49 = vpop.f32.mrb[48].mxu0 }
 0x157   :  { %v2000_v50 = vpop.f32.mrb[48].mxu1  ;;  %v1937_v51 = vpop.f32.mrb[49].mxu0 }
 0x158   :  { %v1450_v52 = vadd.f32 %v1449_v42, %v1435_v47  ;;  %v1414_v54 = vadd.f32 %v1413_v14, %v1274_v16  ;;  %v1436_v56 = vmul.f32 %v1274_v16, %v1274_v16  ;;  %v1739_v57 = vpack.c.bf16 %v1274_v16, %v1271_v44  ;;  %v2001_v58 = vpop.f32.mrb[49].mxu1  ;;  %v1939_v59 = vpop.f32.mrb[50].mxu0 }
 0x159   :  { %v1938_v62 = vadd.f32 %v1937_v51, %v1936_v49  ;;  %v2002_v60 = vadd.f32 %v2001_v58, %v2000_v50  ;;  %v2003_v61 = vpop.f32.mrb[50].mxu1  ;;  %v1940_v63 = vpop.f32.mrb[51].mxu0 }
 0x15a   :  { %v1451_v1 = vadd.f32 %v1450_v52, %v1436_v56  ;;  %1763 = vst [vmem:[%s2604_s3 + $0x18] sm:$0xff] %v1739_v57   ;;  %v1941_v0 = vadd.f32 %v1940_v63, %v1939_v59  ;;  %v2004_v3 = vpop.f32.mrb[51].mxu1 }
 0x15b   :  { %v1182_v4 = vadd.f32 %v1938_v62, %v2532_v17  ;;  %v2005_v5 = vadd.f32 %v2004_v3, %v2003_v61 }
 0x15c   :  { %v1185_v6 = vadd.f32 %v1941_v0, %v2535_v19 }
 0x15d   :  { %v1279_v7 = vadd.f32 %v2002_v60, %v1182_v4 }
 0x15e   :  { %v1282_v30 = vadd.f32 %v2005_v5, %v1185_v6  ;;  %v1942_v9 = vpop.f32.mrb[52].mxu0 }
 0x15f   :  { %v1415_v11 = vadd.f32 %v1414_v54, %v1279_v7  ;;  %v1437_v12 = vmul.f32 %v1279_v7, %v1279_v7  ;;  %v2006_v32 = vpop.f32.mrb[52].mxu1  ;;  %v1943_v13 = vpop.f32.mrb[53].mxu0 }
 0x160   :  { %v1438_v15 = vmul.f32 %v1282_v30, %v1282_v30  ;;  %v1744_v18 = vpack.c.bf16 %v1282_v30, %v1279_v7  ;;  %v1944_v20 = vadd.f32 %v1943_v13, %v1942_v9  ;;  %v2007_v21 = vpop.f32.mrb[53].mxu1  ;;  %v1945_v22 = vpop.f32.mrb[54].mxu0 }
 0x161   :  { %v1452_v23 = vadd.f32 %v1451_v1, %v1437_v12  ;;  %v1416_v24 = vadd.f32 %v1415_v11, %v1282_v30  ;;  %v2008_v25 = vadd.f32 %v2007_v21, %v2006_v32  ;;  %v2009_v26 = vpop.f32.mrb[54].mxu1  ;;  %v1946_v17 = vpop.f32.mrb[55].mxu0 }
 0x162   :  { %1764 = vst [vmem:[%s2604_s3 + $0x20] sm:$0xff] %v1744_v18   ;;  %v1190_v19 = vadd.f32 %v1944_v20, %v2538_v35  ;;  %v1947_v27 = vadd.f32 %v1946_v17, %v1945_v22  ;;  %v2010_v28 = vpop.f32.mrb[55].mxu1 }
 0x163   :  { %v1453_v29 = vadd.f32 %v1452_v23, %v1438_v15  ;;  %v2011_v2 = vadd.f32 %v2010_v28, %v2009_v26 }
 0x164   :  { %v1287_v31 = vadd.f32 %v2008_v25, %v1190_v19  ;;  %v1193_v33 = vadd.f32 %v1947_v27, %v2541_v37 }
 0x166   :  { %v1417_v34 = vadd.f32 %v1416_v24, %v1287_v31  ;;  %v1439_v36 = vmul.f32 %v1287_v31, %v1287_v31  ;;  %v1290_v38 = vadd.f32 %v2011_v2, %v1193_v33  ;;  %v1948_v39 = vpop.f32.mrb[56].mxu0 }
 0x167   :  { %v2012_v46 = vpop.f32.mrb[56].mxu1  ;;  %v1949_v48 = vpop.f32.mrb[57].mxu0 }
 0x168   :  { %v1454_v40 = vadd.f32 %v1453_v29, %v1439_v36  ;;  %v1418_v41 = vadd.f32 %v1417_v34, %v1290_v38  ;;  %v1440_v42 = vmul.f32 %v1290_v38, %v1290_v38  ;;  %v1749_v43 = vpack.c.bf16 %v1290_v38, %v1287_v31  ;;  %v2013_v44 = vpop.f32.mrb[57].mxu1  ;;  %v1951_v45 = vpop.f32.mrb[58].mxu0 }
 0x169   :  { %v1950_v35 = vadd.f32 %v1949_v48, %v1948_v39  ;;  %v2014_v14 = vadd.f32 %v2013_v44, %v2012_v46  ;;  %v2015_v47 = vpop.f32.mrb[58].mxu1  ;;  %v1952_v16 = vpop.f32.mrb[59].mxu0 }
 0x16a   :  { %v1455_v49 = vadd.f32 %v1454_v40, %v1440_v42  ;;  %1765 = vst [vmem:[%s2604_s3 + $0x28] sm:$0xff] %v1749_v43   ;;  %v1953_v37 = vadd.f32 %v1952_v16, %v1951_v45  ;;  %v2016_v50 = vpop.f32.mrb[59].mxu1 }
 0x16b   :  { %v1198_v51 = vadd.f32 %v1950_v35, %v2544_v53  ;;  %v2017_v52 = vadd.f32 %v2016_v50, %v2015_v47 }
 0x16c   :  { %v1201_v54 = vadd.f32 %v1953_v37, %v2547_v55 }
 0x16d   :  { %v1295_v56 = vadd.f32 %v2014_v14, %v1198_v51 }
 0x16e   :  { %v1298_v57 = vadd.f32 %v2017_v52, %v1201_v54  ;;  %v1954_v58 = vpop.f32.mrb[60].mxu0 }
 0x16f   :  { %v1419_v59 = vadd.f32 %v1418_v41, %v1295_v56  ;;  %v1441_v62 = vmul.f32 %v1295_v56, %v1295_v56  ;;  %v2018_v60 = vpop.f32.mrb[60].mxu1  ;;  %v1955_v61 = vpop.f32.mrb[61].mxu0 }
 0x170   :  { %v1442_v63 = vmul.f32 %v1298_v57, %v1298_v57  ;;  %v1754_v1 = vpack.c.bf16 %v1298_v57, %v1295_v56  ;;  %v1956_v0 = vadd.f32 %v1955_v61, %v1954_v58  ;;  %v2019_v3 = vpop.f32.mrb[61].mxu1  ;;  %v1957_v4 = vpop.f32.mrb[62].mxu0 }
 0x171   :  { %v1456_v5 = vadd.f32 %v1455_v49, %v1441_v62  ;;  %v1420_v6 = vadd.f32 %v1419_v59, %v1298_v57  ;;  %v2020_v7 = vadd.f32 %v2019_v3, %v2018_v60  ;;  %v2021_v30 = vpop.f32.mrb[62].mxu1  ;;  %v1958_v53 = vpop.f32.mrb[63].mxu0 }
 0x172   :  { %1766 = vst [vmem:[%s2604_s3 + $0x30] sm:$0xff] %v1754_v1   ;;  %v1206_v55 = vadd.f32 %v1956_v0, %v2550_v8  ;;  %v1959_v9 = vadd.f32 %v1958_v53, %v1957_v4  ;;  %v2022_v11 = vpop.f32.mrb[63].mxu1 }
 0x173   :  { %v1457_v12 = vadd.f32 %v1456_v5, %v1442_v63  ;;  %v2023_v32 = vadd.f32 %v2022_v11, %v2021_v30 }
 0x174   :  { %v1303_v13 = vadd.f32 %v2020_v7, %v1206_v55  ;;  %v1209_v15 = vadd.f32 %v1959_v9, %v2553_v10 }
 0x176   :  { %v1421_v18 = vadd.f32 %v1420_v6, %v1303_v13  ;;  %v1443_v20 = vmul.f32 %v1303_v13, %v1303_v13  ;;  %v1306_v21 = vadd.f32 %v2023_v32, %v1209_v15 }
 0x178   :  { %v1458_v22 = vadd.f32 %v1457_v12, %v1443_v20  ;;  %v1422_v23 = vadd.f32 %v1421_v18, %v1306_v21  ;;  %v1444_v24 = vmul.f32 %v1306_v21, %v1306_v21  ;;  %v1759_v25 = vpack.c.bf16 %v1306_v21, %v1303_v13 }
 0x17a   :  { %v1423_v26 = vrot.slane %v1422_v23, 4  ;;  %v1459_v17 = vadd.f32 %v1458_v22, %v1444_v24  ;;  %1767 = vst [vmem:[%s2604_s3 + $0x38] sm:$0xff] %v1759_v25  }
 0x17c   :  { %v1424_v8 = vadd.f32 %v1423_v26, %v1422_v23  ;;  %v1460_v19 = vrot.slane %v1459_v17, 4 }
 0x17e   :  { %v1425_v27 = vrot.slane %v1424_v8, 2  ;;  %v1461_v28 = vadd.f32 %v1460_v19, %v1459_v17 }
 0x180   :  { %v1426_v29 = vadd.f32 %v1425_v27, %v1424_v8  ;;  %v1462_v2 = vrot.slane %v1461_v28, 2 }
 0x182   :  { %v1427_v10 = vrot.slane %v1426_v29, 1  ;;  %v1463_v31 = vadd.f32 %v1462_v2, %v1461_v28 }
 0x184   :  { %v1428_v33 = vadd.f32 %v1427_v10, %v1426_v29  ;;  %v1464_v34 = vrot.slane %v1463_v31, 1 }
 0x186   :  { %v1465_v36 = vadd.f32 %v1464_v34, %v1463_v31  ;;  %1466 = vst [vmem:[%s2605_s4] sm:$0xff] %v1428_v33 }
 0x188   :  { %1467 = vst [vmem:[%s2606_s5] sm:$0xff] %v1465_v36 }

// kernel: patchgan_forward.12
= control target key start
LH: loop header
LB: loop body
LE: loop exit
PB: predicated region body
PF: predicated region fallthrough
CT: control target
= control target key end

     0   :  { %v28_v0 = vlaneseq  ;;  %s180_s0 = inlined_call_operand.vmem [shape: bf16[32,256], index: 0, kind: input, shape index: {}]   ;;  %s181_s1 = inlined_call_operand.vmem [shape: f32[1,256], index: 1, kind: input, shape index: {}]   ;;  %s182_s2 = inlined_call_operand.vmem [shape: f32[1,256], index: 2, kind: input, shape index: {}]   ;;  %s183_s3 = inlined_call_operand.vmem [shape: bf16[32,256], index: 3, kind: output, shape index: {}]  }
   0x1   :  { %v14_v1 = vld [vmem:[%s180_s0] sm:$0xff]  ;;  %v15_v3 = vld [vmem:[%s180_s0 + $0x8] sm:$0xff]  ;;  %v16_v4 = vld [vmem:[%s180_s0 + $0x10] sm:$0xff] }
   0x2   :  { %v29_v2 = vshrl.u32 %v28_v0, 7  ;;  %v17_v5 = vld [vmem:[%s180_s0 + $0x18] sm:$0xff]  ;;  %v18_v6 = vunpack.c.l.bf16 %v14_v1  ;;  %v19_v7 = vunpack.c.h.bf16 %v14_v1  ;;  %v26_v8 = vld [vmem:[%s181_s1] sm:$0x3]  ;;  %v20_v12 = vunpack.c.l.bf16 %v15_v3 }
   0x3   :  { %v46_v9 = vld [vmem:[%s182_s2] sm:$0x3]  ;;  %v21_v13 = vunpack.c.h.bf16 %v15_v3  ;;  %v22_v14 = vunpack.c.l.bf16 %v16_v4  ;;  %v23_v15 = vunpack.c.h.bf16 %v16_v4  ;;  %v24_v16 = vunpack.c.l.bf16 %v17_v5 }
   0x4   :  { %v30_v10 = vsub.s32 0, %v29_v2  ;;  %v34_v11 = vsub.s32 1, %v29_v2  ;;  %v25_v17 = vunpack.c.h.bf16 %v17_v5 }
   0x6   :  { %v31_v18 = vrot.slane %v26_v8, %v30_v10  ;;  %v35_v19 = vrot.slane %v26_v8, %v34_v11  ;;  %v51_v20 = vrot.slane %v46_v9, %v30_v10  ;;  %v55_v21 = vrot.slane %v46_v9, %v34_v11 }
   0x8   :  { %v38_v22 = vmul.f32 %v31_v18, %v18_v6  ;;  %v39_v23 = vmul.f32 %v35_v19, %v19_v7  ;;  %v40_v24 = vmul.f32 %v31_v18, %v20_v12  ;;  %v41_v25 = vmul.f32 %v35_v19, %v21_v13 }
   0x9   :  { %v42_v26 = vmul.f32 %v31_v18, %v22_v14  ;;  %v43_v27 = vmul.f32 %v35_v19, %v23_v15  ;;  %v44_v28 = vmul.f32 %v31_v18, %v24_v16  ;;  %v45_v29 = vmul.f32 %v35_v19, %v25_v17 }
   0xa   :  { %v58_v30 = vadd.f32 %v51_v20, %v38_v22  ;;  %v59_v31 = vadd.f32 %v55_v21, %v39_v23  ;;  %v60_v32 = vadd.f32 %v51_v20, %v40_v24  ;;  %v61_v33 = vadd.f32 %v55_v21, %v41_v25 }
   0xb   :  { %v62_v34 = vadd.f32 %v51_v20, %v42_v26  ;;  %v63_v35 = vadd.f32 %v55_v21, %v43_v27  ;;  %v64_v36 = vadd.f32 %v51_v20, %v44_v28  ;;  %v65_v37 = vadd.f32 %v55_v21, %v45_v29 }
   0xc   :  { %vm66_vm0 = vcmp.ge.f32.partialorder %v58_v30, 0.0  ;;  %vm67_vm1 = vcmp.ge.f32.partialorder %v59_v31, 0.0  ;;  %v74_v38 = vmul.f32 0.2, %v58_v30  ;;  %v75_v39 = vmul.f32 0.2, %v59_v31 }
   0xd   :  { %vm68_vm2 = vcmp.ge.f32.partialorder %v60_v32, 0.0  ;;  %vm69_vm3 = vcmp.ge.f32.partialorder %v61_v33, 0.0  ;;  %v76_v40 = vmul.f32 0.2, %v60_v32  ;;  %v77_v41 = vmul.f32 0.2, %v61_v33 }
   0xe   :  { %v82_v42 = vsel %vm66_vm0, %v58_v30, %v74_v38  ;;  %v83_v43 = vsel %vm67_vm1, %v59_v31, %v75_v39  ;;  %vm70_vm4 = vcmp.ge.f32.partialorder %v62_v34, 0.0  ;;  %vm71_vm5 = vcmp.ge.f32.partialorder %v63_v35, 0.0 }
   0xf   :  { %v126_v44 = vpack.c.bf16 %v83_v43, %v82_v42  ;;  %v84_v45 = vsel %vm68_vm2, %v60_v32, %v76_v40  ;;  %v85_v46 = vsel %vm69_vm3, %v61_v33, %v77_v41  ;;  %v78_v47 = vmul.f32 0.2, %v62_v34 }
  0x10   :  { %v127_v48 = vpack.c.bf16 %v85_v46, %v84_v45  ;;  %v79_v49 = vmul.f32 0.2, %v63_v35  ;;  %vm72_vm6 = vcmp.ge.f32.partialorder %v64_v36, 0.0  ;;  %vm73_vm7 = vcmp.ge.f32.partialorder %v65_v37, 0.0 }
  0x11   :  { %114 = vst [vmem:[%s183_s3] sm:$0xff] %v126_v44  ;;  %v86_v50 = vsel %vm70_vm4, %v62_v34, %v78_v47  ;;  %v80_v51 = vmul.f32 0.2, %v64_v36  ;;  %v81_v52 = vmul.f32 0.2, %v65_v37 }
  0x12   :  { %115 = vst [vmem:[%s183_s3 + $0x8] sm:$0xff] %v127_v48  ;;  %v87_v53 = vsel %vm71_vm5, %v63_v35, %v79_v49 }
  0x13   :  { %v128_v54 = vpack.c.bf16 %v87_v53, %v86_v50  ;;  %v88_v55 = vsel %vm72_vm6, %v64_v36, %v80_v51  ;;  %v89_v56 = vsel %vm73_vm7, %v65_v37, %v81_v52 }
  0x14   :  { %v129_v57 = vpack.c.bf16 %v89_v56, %v88_v55 }
  0x15   :  { %116 = vst [vmem:[%s183_s3 + $0x10] sm:$0xff] %v128_v54 }
  0x16   :  { %117 = vst [vmem:[%s183_s3 + $0x18] sm:$0xff] %v129_v57 }

// kernel: patchgan_forward.11
= control target key start
LH: loop header
LB: loop body
LE: loop exit
PB: predicated region body
PF: predicated region fallthrough
CT: control target
= control target key end

     0   :  { %s4013_s1 = inlined_call_operand.vmem [shape: bf16[2048,256], index: 1, kind: input, shape index: {}]   ;;  %s4014_s0 = inlined_call_operand.vmem [shape: bf16[32,2048], index: 0, kind: input, shape index: {}]   ;;  %s4015_s2 = inlined_call_operand.vmem [shape: f32[1,256], index: 2, kind: input, shape index: {}]   ;;  %s4016_s3 = inlined_call_operand.vmem [shape: bf16[32,256], index: 3, kind: output, shape index: {0}]   ;;  %s4017_s4 = inlined_call_operand.vmem [shape: f32[1,8,256], index: 4, kind: output, shape index: {1}]   ;;  %s4018_s5 = inlined_call_operand.vmem [shape: f32[1,8,256], index: 5, kind: output, shape index: {2}]  }
   0x1   :  { %v2660_v0 = vld [vmem:[%s4013_s1 + $0x4] ss:$8 sps:$4 sm:$0xff]   ;;  %v2664_v2 = vld [vmem:[%s4013_s1] ss:$8 sps:$4 sm:$0xff]   ;;  %v2666_v4 = vld [vmem:[%s4013_s1 + $0x14] ss:$8 sps:$4 sm:$0xff]  }
   0x2   :  { %v2662_v1 = vld [vmem:[%s4013_s1 + $0x404] ss:$8 sps:$4 sm:$0xff]   ;;  %1757 = vmatprep.subr.bf16.mxu1 %v2660_v0  ;;  %v2665_v3 = vld [vmem:[%s4013_s1 + $0x400] ss:$8 sps:$4 sm:$0xff]   ;;  %v2668_v5 = vld [vmem:[%s4013_s1 + $0x414] ss:$8 sps:$4 sm:$0xff]  }
   0x3   :  { %1969 = vmatprep.subr.bf16.mxu0 %v2662_v1  ;;  %1758 = vmatpush1.bf16.msra.mxu1 %v2664_v2  ;;  %v2670_v6 = vld [vmem:[%s4013_s1 + $0x10] ss:$8 sps:$4 sm:$0xff]   ;;  %v2672_v8 = vld [vmem:[%s4013_s1 + $0x24] ss:$8 sps:$4 sm:$0xff]   ;;  %v2676_v10 = vld [vmem:[%s4013_s1 + $0x20] ss:$8 sps:$4 sm:$0xff]  }
   0x4   :  { %1970 = vmatpush1.bf16.msra.mxu0 %v2665_v3  ;;  %1759 = vmatprep.subr.bf16.mxu1 %v2666_v4  ;;  %v2671_v7 = vld [vmem:[%s4013_s1 + $0x410] ss:$8 sps:$4 sm:$0xff]   ;;  %v2674_v9 = vld [vmem:[%s4013_s1 + $0x424] ss:$8 sps:$4 sm:$0xff]   ;;  %v2677_v11 = vld [vmem:[%s4013_s1 + $0x420] ss:$8 sps:$4 sm:$0xff]  }
   0x5   :  { %1971 = vmatprep.subr.bf16.mxu0 %v2668_v5  ;;  %v2678_v12 = vld [vmem:[%s4013_s1 + $0x34] ss:$8 sps:$4 sm:$0xff]   ;;  %v2682_v14 = vld [vmem:[%s4013_s1 + $0x30] ss:$8 sps:$4 sm:$0xff]   ;;  %v2684_v16 = vld [vmem:[%s4013_s1 + $0x44] ss:$8 sps:$4 sm:$0xff]  }
   0x6   :  { %v2680_v13 = vld [vmem:[%s4013_s1 + $0x434] ss:$8 sps:$4 sm:$0xff]   ;;  %v2683_v15 = vld [vmem:[%s4013_s1 + $0x430] ss:$8 sps:$4 sm:$0xff]   ;;  %v2686_v17 = vld [vmem:[%s4013_s1 + $0x444] ss:$8 sps:$4 sm:$0xff]  }
   0x7   :  { %1760 = vmatpush1.bf16.msra.mxu1 %v2670_v6  ;;  %v2688_v18 = vld [vmem:[%s4013_s1 + $0x40] ss:$8 sps:$4 sm:$0xff]   ;;  %v2690_v20 = vld [vmem:[%s4013_s1 + $0x54] ss:$8 sps:$4 sm:$0xff]   ;;  %v2694_v22 = vld [vmem:[%s4013_s1 + $0x50] ss:$8 sps:$4 sm:$0xff]  }
   0x8   :  { %1972 = vmatpush1.bf16.msra.mxu0 %v2671_v7  ;;  %1761 = vmatprep.subr.bf16.mxu1 %v2672_v8  ;;  %v2689_v19 = vld [vmem:[%s4013_s1 + $0x440] ss:$8 sps:$4 sm:$0xff]   ;;  %v2692_v21 = vld [vmem:[%s4013_s1 + $0x454] ss:$8 sps:$4 sm:$0xff]   ;;  %v2695_v23 = vld [vmem:[%s4013_s1 + $0x450] ss:$8 sps:$4 sm:$0xff]  }
   0x9   :  { %1973 = vmatprep.subr.bf16.mxu0 %v2674_v9  ;;  %v2696_v24 = vld [vmem:[%s4013_s1 + $0x64] ss:$8 sps:$4 sm:$0xff]   ;;  %v2700_v26 = vld [vmem:[%s4013_s1 + $0x60] ss:$8 sps:$4 sm:$0xff]   ;;  %v2702_v28 = vld [vmem:[%s4013_s1 + $0x74] ss:$8 sps:$4 sm:$0xff]  }
   0xa   :  { %v2698_v25 = vld [vmem:[%s4013_s1 + $0x464] ss:$8 sps:$4 sm:$0xff]   ;;  %v2701_v27 = vld [vmem:[%s4013_s1 + $0x460] ss:$8 sps:$4 sm:$0xff]   ;;  %v2704_v29 = vld [vmem:[%s4013_s1 + $0x474] ss:$8 sps:$4 sm:$0xff]  }
   0xb   :  { %1762 = vmatpush1.bf16.msra.mxu1 %v2676_v10  ;;  %v2706_v30 = vld [vmem:[%s4013_s1 + $0x70] ss:$8 sps:$4 sm:$0xff]   ;;  %v2708_v32 = vld [vmem:[%s4013_s1 + $0x84] ss:$8 sps:$4 sm:$0xff]   ;;  %v2712_v34 = vld [vmem:[%s4013_s1 + $0x80] ss:$8 sps:$4 sm:$0xff]  }
   0xc   :  { %1974 = vmatpush1.bf16.msra.mxu0 %v2677_v11  ;;  %1763 = vmatprep.subr.bf16.mxu1 %v2678_v12  ;;  %v2707_v31 = vld [vmem:[%s4013_s1 + $0x470] ss:$8 sps:$4 sm:$0xff]   ;;  %v2710_v33 = vld [vmem:[%s4013_s1 + $0x484] ss:$8 sps:$4 sm:$0xff]   ;;  %v2713_v35 = vld [vmem:[%s4013_s1 + $0x480] ss:$8 sps:$4 sm:$0xff]  }
   0xd   :  { %1975 = vmatprep.subr.bf16.mxu0 %v2680_v13  ;;  %v2714_v36 = vld [vmem:[%s4013_s1 + $0x94] ss:$8 sps:$4 sm:$0xff]   ;;  %v2718_v38 = vld [vmem:[%s4013_s1 + $0x90] ss:$8 sps:$4 sm:$0xff]   ;;  %v2720_v40 = vld [vmem:[%s4013_s1 + $0xa4] ss:$8 sps:$4 sm:$0xff]  }
   0xe   :  { %v2716_v37 = vld [vmem:[%s4013_s1 + $0x494] ss:$8 sps:$4 sm:$0xff]   ;;  %v2719_v39 = vld [vmem:[%s4013_s1 + $0x490] ss:$8 sps:$4 sm:$0xff]   ;;  %v2722_v41 = vld [vmem:[%s4013_s1 + $0x4a4] ss:$8 sps:$4 sm:$0xff]  }
   0xf   :  { %1764 = vmatpush1.bf16.msra.mxu1 %v2682_v14  ;;  %v2724_v42 = vld [vmem:[%s4013_s1 + $0xa0] ss:$8 sps:$4 sm:$0xff]   ;;  %v2726_v44 = vld [vmem:[%s4013_s1 + $0xb4] ss:$8 sps:$4 sm:$0xff]   ;;  %v2730_v46 = vld [vmem:[%s4013_s1 + $0xb0] ss:$8 sps:$4 sm:$0xff]  }
  0x10   :  { %1976 = vmatpush1.bf16.msra.mxu0 %v2683_v15  ;;  %1765 = vmatprep.subr.bf16.mxu1 %v2684_v16  ;;  %v2725_v43 = vld [vmem:[%s4013_s1 + $0x4a0] ss:$8 sps:$4 sm:$0xff]   ;;  %v2728_v45 = vld [vmem:[%s4013_s1 + $0x4b4] ss:$8 sps:$4 sm:$0xff]   ;;  %v2731_v47 = vld [vmem:[%s4013_s1 + $0x4b0] ss:$8 sps:$4 sm:$0xff]  }
  0x11   :  { %1977 = vmatprep.subr.bf16.mxu0 %v2686_v17  ;;  %v17_v48 = vld [vmem:[%s4014_s0] sm:$0xff]  ;;  %v2738_v58 = vld [vmem:[%s4013_s1 + $0xd4] ss:$8 sps:$4 sm:$0xff]   ;;  %v2742_v60 = vld [vmem:[%s4013_s1 + $0xd0] ss:$8 sps:$4 sm:$0xff]  }
  0x12   :  { %v25_v49 = vld [vmem:[%s4014_s0 + $0x40] sm:$0xff]  ;;  %v2740_v59 = vld [vmem:[%s4013_s1 + $0x4d4] ss:$8 sps:$4 sm:$0xff]   ;;  %v2743_v61 = vld [vmem:[%s4013_s1 + $0x4d0] ss:$8 sps:$4 sm:$0xff]  }
  0x13   :  { %1766 = vmatpush1.bf16.msra.mxu1 %v2688_v18  ;;  %v2732_v50 = vld [vmem:[%s4013_s1 + $0xc4] ss:$8 sps:$4 sm:$0xff]   ;;  %v2301_v52 = vcombine.high %v17_v48, %v25_v49  ;;  %v2736_v56 = vld [vmem:[%s4013_s1 + $0xc0] ss:$8 sps:$4 sm:$0xff]   ;;  %v2750_v2 = vld [vmem:[%s4013_s1 + $0xf4] ss:$8 sps:$4 sm:$0xff]   ;;  %v2300_v8 = vcombine.low %v17_v48, %v25_v49 }
  0x14   :  { %1978 = vmatpush1.bf16.msra.mxu0 %v2689_v19  ;;  %1767 = vmatprep.subr.bf16.mxu1 %v2690_v20  ;;  %v2734_v51 = vld [vmem:[%s4013_s1 + $0x4c4] ss:$8 sps:$4 sm:$0xff]   ;;  %v2737_v57 = vld [vmem:[%s4013_s1 + $0x4c0] ss:$8 sps:$4 sm:$0xff]   ;;  %v2752_v3 = vld [vmem:[%s4013_s1 + $0x4f4] ss:$8 sps:$4 sm:$0xff]  }
  0x15   :  { %1979 = vmatprep.subr.bf16.mxu0 %v2692_v21  ;;  %v21_v53 = vld [vmem:[%s4014_s0 + $0x20] sm:$0xff]  ;;  %1789 = vmatprep.mubr.bf16.mxu1 %v2301_v52  ;;  %v2754_v4 = vld [vmem:[%s4013_s1 + $0xf0] ss:$8 sps:$4 sm:$0xff]   ;;  %v2764_v12 = vld [vmem:[%s4013_s1 + $0x114] ss:$8 sps:$4 sm:$0xff]  }
  0x16   :  { %v29_v54 = vld [vmem:[%s4014_s0 + $0x60] sm:$0xff]  ;;  %v2755_v5 = vld [vmem:[%s4013_s1 + $0x4f0] ss:$8 sps:$4 sm:$0xff]   ;;  %v2767_v13 = vld [vmem:[%s4013_s1 + $0x514] ss:$8 sps:$4 sm:$0xff]  }
  0x17   :  { %1768 = vmatpush1.bf16.msra.mxu1 %v2694_v22  ;;  %v2309_v55 = vcombine.high %v21_v53, %v29_v54  ;;  %v2744_v62 = vld [vmem:[%s4013_s1 + $0xe4] ss:$8 sps:$4 sm:$0xff]   ;;  %v2748_v0 = vld [vmem:[%s4013_s1 + $0xe0] ss:$8 sps:$4 sm:$0xff]   ;;  %v2308_v10 = vcombine.low %v21_v53, %v29_v54  ;;  %v2762_v14 = vld [vmem:[%s4013_s1 + $0x110] ss:$8 sps:$4 sm:$0xff]  }
  0x18   :  { %1980 = vmatpush1.bf16.msra.mxu0 %v2695_v23  ;;  %1769 = vmatprep.subr.bf16.mxu1 %v2696_v24  ;;  %v2746_v63 = vld [vmem:[%s4013_s1 + $0x4e4] ss:$8 sps:$4 sm:$0xff]   ;;  %v2749_v1 = vld [vmem:[%s4013_s1 + $0x4e0] ss:$8 sps:$4 sm:$0xff]   ;;  %v2765_v15 = vld [vmem:[%s4013_s1 + $0x510] ss:$8 sps:$4 sm:$0xff]  }
  0x19   :  { %1981 = vmatprep.subr.bf16.mxu0 %v2698_v25  ;;  %2001 = vmatprep.mubr.bf16.mxu0 %v2309_v55  ;;  %v2758_v6 = vld [vmem:[%s4013_s1 + $0x104] ss:$8 sps:$4 sm:$0xff]   ;;  %v2756_v9 = vld [vmem:[%s4013_s1 + $0x100] ss:$8 sps:$4 sm:$0xff]   ;;  %v2776_v20 = vld [vmem:[%s4013_s1 + $0x134] ss:$8 sps:$4 sm:$0xff]  }
  0x1a   :  { %v2761_v7 = vld [vmem:[%s4013_s1 + $0x504] ss:$8 sps:$4 sm:$0xff]   ;;  %v2759_v11 = vld [vmem:[%s4013_s1 + $0x500] ss:$8 sps:$4 sm:$0xff]   ;;  %v2779_v21 = vld [vmem:[%s4013_s1 + $0x534] ss:$8 sps:$4 sm:$0xff]  }
  0x1b   :  { %1770 = vmatpush1.bf16.msra.mxu1 %v2700_v26  ;;  %v2770_v16 = vld [vmem:[%s4013_s1 + $0x124] ss:$8 sps:$4 sm:$0xff]   ;;  %v2768_v18 = vld [vmem:[%s4013_s1 + $0x120] ss:$8 sps:$4 sm:$0xff]   ;;  %v2774_v22 = vld [vmem:[%s4013_s1 + $0x130] ss:$8 sps:$4 sm:$0xff]  }
  0x1c   :  { %1982 = vmatpush1.bf16.msra.mxu0 %v2701_v27  ;;  %1771 = vmatprep.subr.bf16.mxu1 %v2702_v28  ;;  %v2773_v17 = vld [vmem:[%s4013_s1 + $0x524] ss:$8 sps:$4 sm:$0xff]   ;;  %v2771_v19 = vld [vmem:[%s4013_s1 + $0x520] ss:$8 sps:$4 sm:$0xff]   ;;  %v2777_v23 = vld [vmem:[%s4013_s1 + $0x530] ss:$8 sps:$4 sm:$0xff]  }
  0x1d   :  { %1983 = vmatprep.subr.bf16.mxu0 %v2704_v29  ;;  %v2782_v24 = vld [vmem:[%s4013_s1 + $0x144] ss:$8 sps:$4 sm:$0xff]   ;;  %v2780_v26 = vld [vmem:[%s4013_s1 + $0x140] ss:$8 sps:$4 sm:$0xff]   ;;  %v2788_v28 = vld [vmem:[%s4013_s1 + $0x154] ss:$8 sps:$4 sm:$0xff]  }
  0x1e   :  { %v2785_v25 = vld [vmem:[%s4013_s1 + $0x544] ss:$8 sps:$4 sm:$0xff]   ;;  %v2783_v27 = vld [vmem:[%s4013_s1 + $0x540] ss:$8 sps:$4 sm:$0xff]   ;;  %v2791_v29 = vld [vmem:[%s4013_s1 + $0x554] ss:$8 sps:$4 sm:$0xff]  }
  0x1f   :  { %1772 = vmatpush1.bf16.msra.mxu1 %v2706_v30  ;;  %v33_v30 = vld [vmem:[%s4014_s0 + $0x80] sm:$0xff]  ;;  %v3395_v49 = vld [vmem:[%s4014_s0 + $0x28] sm:$0xff]  ;;  %v2801_v52 = vld [vmem:[%s4013_s1 + $0x570] ss:$8 sps:$4 sm:$0xff]  }
  0x20   :  { %1984 = vmatpush1.bf16.msra.mxu0 %v2707_v31  ;;  %1773 = vmatprep.subr.bf16.mxu1 %v2708_v32  ;;  %v41_v31 = vld [vmem:[%s4014_s0 + $0xc0] sm:$0xff]  ;;  %v2786_v32 = vld [vmem:[%s4013_s1 + $0x150] ss:$8 sps:$4 sm:$0xff]  }
  0x21   :  { %1985 = vmatprep.subr.bf16.mxu0 %v2710_v33  ;;  %v2317_v33 = vcombine.high %v33_v30, %v41_v31  ;;  %v2806_v54 = vld [vmem:[%s4013_s1 + $0x184] ss:$8 sps:$4 sm:$0xff]  }
  0x22   :  { %v2809_v55 = vld [vmem:[%s4013_s1 + $0x584] ss:$8 sps:$4 sm:$0xff]  }
  0x23   :  { %1774 = vmatpush1.bf16.msra.mxu1 %v2712_v34  ;;  %v2789_v34 = vld [vmem:[%s4013_s1 + $0x550] ss:$8 sps:$4 sm:$0xff]  }
  0x24   :  { %1986 = vmatpush1.bf16.msra.mxu0 %v2713_v35  ;;  %1775 = vmatprep.subr.bf16.mxu1 %v2714_v36  ;;  %v37_v35 = vld [vmem:[%s4014_s0 + $0xa0] sm:$0xff] }
  0x25   :  { %1987 = vmatprep.subr.bf16.mxu0 %v2716_v37  ;;  %v45_v36 = vld [vmem:[%s4014_s0 + $0xe0] sm:$0xff]  ;;  %v2316_v37 = vcombine.low %v33_v30, %v41_v31  ;;  %v2860_v30 = vld [vmem:[%s4013_s1 + $0x214] ss:$8 sps:$4 sm:$0xff]  }
  0x26   :  { %v2863_v31 = vld [vmem:[%s4013_s1 + $0x614] ss:$8 sps:$4 sm:$0xff]  }
  0x27   :  { %1776 = vmatpush1.bf16.msra.mxu1 %v2718_v38  ;;  %v2794_v38 = vld [vmem:[%s4013_s1 + $0x164] ss:$8 sps:$4 sm:$0xff]  }
  0x28   :  { %1988 = vmatpush1.bf16.msra.mxu0 %v2719_v39  ;;  %1777 = vmatprep.subr.bf16.mxu1 %v2720_v40  ;;  %v2325_v39 = vcombine.high %v37_v35, %v45_v36  ;;  %v2324_v40 = vcombine.low %v37_v35, %v45_v36  ;;  %v2858_v36 = vld [vmem:[%s4013_s1 + $0x210] ss:$8 sps:$4 sm:$0xff]  }
  0x29   :  { %1989 = vmatprep.subr.bf16.mxu0 %v2722_v41  ;;  %v2797_v41 = vld [vmem:[%s4013_s1 + $0x564] ss:$8 sps:$4 sm:$0xff]  }
  0x2b   :  { %1778 = vmatpush1.bf16.msra.mxu1 %v2724_v42  ;;  %v2792_v42 = vld [vmem:[%s4013_s1 + $0x160] ss:$8 sps:$4 sm:$0xff]  }
  0x2c   :  { %1990 = vmatpush1.bf16.msra.mxu0 %v2725_v43  ;;  %1779 = vmatprep.subr.bf16.mxu1 %v2726_v44  ;;  %v2795_v43 = vld [vmem:[%s4013_s1 + $0x560] ss:$8 sps:$4 sm:$0xff]  }
  0x2d   :  { %1991 = vmatprep.subr.bf16.mxu0 %v2728_v45  ;;  %v3377_v44 = vld [vmem:[%s4014_s0 + $0x8] sm:$0xff] }
  0x2e   :  { %v3382_v45 = vld [vmem:[%s4014_s0 + $0x48] sm:$0xff] }
  0x2f   :  { %1780 = vmatpush1.bf16.msra.mxu1 %v2730_v46  ;;  %v2800_v46 = vld [vmem:[%s4013_s1 + $0x174] ss:$8 sps:$4 sm:$0xff]   ;;  %v2303_v48 = vcombine.high %v3377_v44, %v3382_v45 }
  0x30   :  { %1992 = vmatpush1.bf16.msra.mxu0 %v2731_v47  ;;  %1781 = vmatprep.subr.bf16.mxu1 %v2732_v50  ;;  %v2803_v47 = vld [vmem:[%s4013_s1 + $0x574] ss:$8 sps:$4 sm:$0xff]   ;;  %v3400_v50 = vld [vmem:[%s4014_s0 + $0x68] sm:$0xff] }
  0x31   :  { %1993 = vmatprep.subr.bf16.mxu0 %v2734_v51  ;;  %v2798_v51 = vld [vmem:[%s4013_s1 + $0x170] ss:$8 sps:$4 sm:$0xff]   ;;  %v2311_v53 = vcombine.high %v3395_v49, %v3400_v50 }
  0x33   :  { %1782 = vmatpush1.bf16.msra.mxu1 %v2736_v56  ;;  %v2804_v56 = vld [vmem:[%s4013_s1 + $0x180] ss:$8 sps:$4 sm:$0xff]  }
  0x34   :  { %1994 = vmatpush1.bf16.msra.mxu0 %v2737_v57  ;;  %1783 = vmatprep.subr.bf16.mxu1 %v2738_v58  ;;  %v2807_v57 = vld [vmem:[%s4013_s1 + $0x580] ss:$8 sps:$4 sm:$0xff]   ;;  %v2812_v58 = vld [vmem:[%s4013_s1 + $0x194] ss:$8 sps:$4 sm:$0xff]  }
  0x35   :  { %1995 = vmatprep.subr.bf16.mxu0 %v2740_v59  ;;  %v2815_v59 = vld [vmem:[%s4013_s1 + $0x594] ss:$8 sps:$4 sm:$0xff]  }
  0x37   :  { %1784 = vmatpush1.bf16.msra.mxu1 %v2742_v60  ;;  %v2810_v60 = vld [vmem:[%s4013_s1 + $0x190] ss:$8 sps:$4 sm:$0xff]  }
  0x38   :  { %1996 = vmatpush1.bf16.msra.mxu0 %v2743_v61  ;;  %1785 = vmatprep.subr.bf16.mxu1 %v2744_v62  ;;  %v2813_v61 = vld [vmem:[%s4013_s1 + $0x590] ss:$8 sps:$4 sm:$0xff]   ;;  %v2818_v62 = vld [vmem:[%s4013_s1 + $0x1a4] ss:$8 sps:$4 sm:$0xff]  }
  0x39   :  { %1997 = vmatprep.subr.bf16.mxu0 %v2746_v63  ;;  %v2821_v63 = vld [vmem:[%s4013_s1 + $0x5a4] ss:$8 sps:$4 sm:$0xff]  }
  0x3b   :  { %1786 = vmatpush1.bf16.msra.mxu1 %v2748_v0  ;;  %v2816_v0 = vld [vmem:[%s4013_s1 + $0x1a0] ss:$8 sps:$4 sm:$0xff]  }
  0x3c   :  { %1998 = vmatpush1.bf16.msra.mxu0 %v2749_v1  ;;  %1787 = vmatprep.subr.bf16.mxu1 %v2750_v2  ;;  %v2819_v1 = vld [vmem:[%s4013_s1 + $0x5a0] ss:$8 sps:$4 sm:$0xff]   ;;  %v2824_v2 = vld [vmem:[%s4013_s1 + $0x1b4] ss:$8 sps:$4 sm:$0xff]  }
  0x3d   :  { %1999 = vmatprep.subr.bf16.mxu0 %v2752_v3  ;;  %v2827_v3 = vld [vmem:[%s4013_s1 + $0x5b4] ss:$8 sps:$4 sm:$0xff]  }
  0x3f   :  { %1788 = vmatpush1.bf16.msra.mxu1 %v2754_v4  ;;  %v2822_v4 = vld [vmem:[%s4013_s1 + $0x1b0] ss:$8 sps:$4 sm:$0xff]  }
  0x40   :  { %2000 = vmatpush1.bf16.msra.mxu0 %v2755_v5  ;;  %1810 = vmatprep.subr.bf16.mxu1 %v2758_v6  ;;  %v2825_v5 = vld [vmem:[%s4013_s1 + $0x5b0] ss:$8 sps:$4 sm:$0xff]   ;;  %v2830_v6 = vld [vmem:[%s4013_s1 + $0x1c4] ss:$8 sps:$4 sm:$0xff]  }
  0x41   :  { %2022 = vmatprep.subr.bf16.mxu0 %v2761_v7  ;;  %v2833_v7 = vld [vmem:[%s4013_s1 + $0x5c4] ss:$8 sps:$4 sm:$0xff]  }
  0x42   :  { %1790 = vmatmul.mubr.bf16.vlgmr.msra.gmra.mrb[0].mxu1 %v2300_v8  ;;  %v2828_v8 = vld [vmem:[%s4013_s1 + $0x1c0] ss:$8 sps:$4 sm:$0xff]  }
  0x43   :  { %2002 = vmatmul.mubr.bf16.vlgmr.msra.gmra.mrb[0].mxu0 %v2308_v10  ;;  %1811 = vmatpush1.bf16.msra.mxu1 %v2756_v9  ;;  %v2831_v9 = vld [vmem:[%s4013_s1 + $0x5c0] ss:$8 sps:$4 sm:$0xff]   ;;  %v2836_v10 = vld [vmem:[%s4013_s1 + $0x1d4] ss:$8 sps:$4 sm:$0xff]  }
  0x44   :  { %2023 = vmatpush1.bf16.msra.mxu0 %v2759_v11  ;;  %1812 = vmatprep.subr.bf16.mxu1 %v2764_v12  ;;  %v2839_v11 = vld [vmem:[%s4013_s1 + $0x5d4] ss:$8 sps:$4 sm:$0xff]   ;;  %v2834_v12 = vld [vmem:[%s4013_s1 + $0x1d0] ss:$8 sps:$4 sm:$0xff]  }
  0x45   :  { %2024 = vmatprep.subr.bf16.mxu0 %v2767_v13  ;;  %1799 = vmatprep.mubr.bf16.mxu1 %v2317_v33  ;;  %v2837_v13 = vld [vmem:[%s4013_s1 + $0x5d0] ss:$8 sps:$4 sm:$0xff]   ;;  %v46_v33 = vld [vmem:[%s4014_s0 + $0xe8] sm:$0xff] }
  0x46   :  { %2011 = vmatprep.mubr.bf16.mxu0 %v2325_v39  ;;  %v2869_v39 = vld [vmem:[%s4013_s1 + $0x624] ss:$8 sps:$4 sm:$0xff]  }
  0x47   :  { %1813 = vmatpush1.bf16.msra.mxu1 %v2762_v14  ;;  %v2842_v14 = vld [vmem:[%s4013_s1 + $0x1e4] ss:$8 sps:$4 sm:$0xff]  }
  0x48   :  { %2025 = vmatpush1.bf16.msra.mxu0 %v2765_v15  ;;  %1814 = vmatprep.subr.bf16.mxu1 %v2770_v16  ;;  %v2845_v15 = vld [vmem:[%s4013_s1 + $0x5e4] ss:$8 sps:$4 sm:$0xff]   ;;  %v2840_v16 = vld [vmem:[%s4013_s1 + $0x1e0] ss:$8 sps:$4 sm:$0xff]  }
  0x49   :  { %2026 = vmatprep.subr.bf16.mxu0 %v2773_v17  ;;  %v2843_v17 = vld [vmem:[%s4013_s1 + $0x5e0] ss:$8 sps:$4 sm:$0xff]  }
  0x4a   :  { %1800 = vmatmul.mubr.bf16.gmra.mrb[4].mxu1 %v2316_v37  ;;  %v2861_v37 = vld [vmem:[%s4013_s1 + $0x610] ss:$8 sps:$4 sm:$0xff]  }
  0x4b   :  { %1815 = vmatpush1.bf16.msra.mxu1 %v2768_v18  ;;  %2012 = vmatmul.mubr.bf16.gmra.mrb[4].mxu0 %v2324_v40  ;;  %v2848_v18 = vld [vmem:[%s4013_s1 + $0x1f4] ss:$8 sps:$4 sm:$0xff]   ;;  %v2864_v40 = vld [vmem:[%s4013_s1 + $0x220] ss:$8 sps:$4 sm:$0xff]  }
  0x4c   :  { %2027 = vmatpush1.bf16.msra.mxu0 %v2771_v19  ;;  %1816 = vmatprep.subr.bf16.mxu1 %v2776_v20  ;;  %v2851_v19 = vld [vmem:[%s4013_s1 + $0x5f4] ss:$8 sps:$4 sm:$0xff]   ;;  %v2846_v20 = vld [vmem:[%s4013_s1 + $0x1f0] ss:$8 sps:$4 sm:$0xff]  }
  0x4d   :  { %2028 = vmatprep.subr.bf16.mxu0 %v2779_v21  ;;  %1842 = vmatprep.mubr.bf16.mxu1 %v2303_v48  ;;  %v2849_v21 = vld [vmem:[%s4013_s1 + $0x5f0] ss:$8 sps:$4 sm:$0xff]   ;;  %v2872_v48 = vld [vmem:[%s4013_s1 + $0x234] ss:$8 sps:$4 sm:$0xff]  }
  0x4e   :  { %2054 = vmatprep.mubr.bf16.mxu0 %v2311_v53  ;;  %v2873_v53 = vld [vmem:[%s4013_s1 + $0x630] ss:$8 sps:$4 sm:$0xff]  }
  0x4f   :  { %1817 = vmatpush1.bf16.msra.mxu1 %v2774_v22  ;;  %v2854_v22 = vld [vmem:[%s4013_s1 + $0x204] ss:$8 sps:$4 sm:$0xff]  }
  0x50   :  { %2029 = vmatpush1.bf16.msra.mxu0 %v2777_v23  ;;  %1818 = vmatprep.subr.bf16.mxu1 %v2782_v24  ;;  %v2857_v23 = vld [vmem:[%s4013_s1 + $0x604] ss:$8 sps:$4 sm:$0xff]   ;;  %v2852_v24 = vld [vmem:[%s4013_s1 + $0x200] ss:$8 sps:$4 sm:$0xff]  }
  0x51   :  { %2030 = vmatprep.subr.bf16.mxu0 %v2785_v25  ;;  %v2855_v25 = vld [vmem:[%s4013_s1 + $0x600] ss:$8 sps:$4 sm:$0xff]  }
  0x53   :  { %1819 = vmatpush1.bf16.msra.mxu1 %v2780_v26  ;;  %v34_v26 = vld [vmem:[%s4014_s0 + $0x88] sm:$0xff] }
  0x54   :  { %2031 = vmatpush1.bf16.msra.mxu0 %v2783_v27  ;;  %1820 = vmatprep.subr.bf16.mxu1 %v2788_v28  ;;  %v2302_v27 = vcombine.low %v3377_v44, %v3382_v45  ;;  %v2310_v28 = vcombine.low %v3395_v49, %v3400_v50  ;;  %v3566_v45 = vld [vmem:[%s4014_s0 + $0x50] sm:$0xff] }
  0x55   :  { %2032 = vmatprep.subr.bf16.mxu0 %v2791_v29  ;;  %v42_v29 = vld [vmem:[%s4014_s0 + $0xc8] sm:$0xff]  ;;  %v2875_v49 = vld [vmem:[%s4013_s1 + $0x634] ss:$8 sps:$4 sm:$0xff]  }
  0x57   :  { %1821 = vmatpush1.bf16.msra.mxu1 %v2786_v32  ;;  %v38_v32 = vld [vmem:[%s4014_s0 + $0xa8] sm:$0xff] }
  0x58   :  { %2033 = vmatpush1.bf16.msra.mxu0 %v2789_v34  ;;  %1822 = vmatprep.subr.bf16.mxu1 %v2794_v38  ;;  %v2319_v34 = vcombine.high %v34_v26, %v42_v29  ;;  %v2327_v35 = vcombine.high %v38_v32, %v46_v33  ;;  %v2866_v38 = vld [vmem:[%s4013_s1 + $0x224] ss:$8 sps:$4 sm:$0xff]   ;;  %v2326_v44 = vcombine.low %v38_v32, %v46_v33  ;;  %v2936_v32 = vld [vmem:[%s4013_s1 + $0x2e0] ss:$8 sps:$4 sm:$0xff]  }
  0x59   :  { %2034 = vmatprep.subr.bf16.mxu0 %v2797_v41  ;;  %v2867_v41 = vld [vmem:[%s4013_s1 + $0x620] ss:$8 sps:$4 sm:$0xff]  }
  0x5a   :  { %v2939_v33 = vld [vmem:[%s4013_s1 + $0x6e0] ss:$8 sps:$4 sm:$0xff]  }
  0x5b   :  { %1823 = vmatpush1.bf16.msra.mxu1 %v2792_v42  ;;  %v3561_v42 = vld [vmem:[%s4014_s0 + $0x10] sm:$0xff] }
  0x5c   :  { %2035 = vmatpush1.bf16.msra.mxu0 %v2795_v43  ;;  %1824 = vmatprep.subr.bf16.mxu1 %v2800_v46  ;;  %v2318_v43 = vcombine.low %v34_v26, %v42_v29  ;;  %v3571_v46 = vld [vmem:[%s4014_s0 + $0x30] sm:$0xff]  ;;  %v2305_v50 = vcombine.high %v3561_v42, %v3566_v45 }
  0x5d   :  { %2036 = vmatprep.subr.bf16.mxu0 %v2803_v47  ;;  %v3576_v47 = vld [vmem:[%s4014_s0 + $0x70] sm:$0xff] }
  0x5e   :  { %v2932_v26 = vld [vmem:[%s4013_s1 + $0x2d4] ss:$8 sps:$4 sm:$0xff]   ;;  %v2933_v29 = vld [vmem:[%s4013_s1 + $0x6d0] ss:$8 sps:$4 sm:$0xff]  }
  0x5f   :  { %1825 = vmatpush1.bf16.msra.mxu1 %v2798_v51  ;;  %v2313_v51 = vcombine.high %v3571_v46, %v3576_v47 }
  0x60   :  { %2037 = vmatpush1.bf16.msra.mxu0 %v2801_v52  ;;  %1826 = vmatprep.subr.bf16.mxu1 %v2806_v54  ;;  %v2870_v52 = vld [vmem:[%s4013_s1 + $0x230] ss:$8 sps:$4 sm:$0xff]   ;;  %v2878_v54 = vld [vmem:[%s4013_s1 + $0x244] ss:$8 sps:$4 sm:$0xff]  }
  0x61   :  { %2038 = vmatprep.subr.bf16.mxu0 %v2809_v55  ;;  %v2881_v55 = vld [vmem:[%s4013_s1 + $0x644] ss:$8 sps:$4 sm:$0xff]  }
  0x63   :  { %1827 = vmatpush1.bf16.msra.mxu1 %v2804_v56  ;;  %v2876_v56 = vld [vmem:[%s4013_s1 + $0x240] ss:$8 sps:$4 sm:$0xff]  }
  0x64   :  { %2039 = vmatpush1.bf16.msra.mxu0 %v2807_v57  ;;  %1828 = vmatprep.subr.bf16.mxu1 %v2812_v58  ;;  %v2879_v57 = vld [vmem:[%s4013_s1 + $0x640] ss:$8 sps:$4 sm:$0xff]   ;;  %v2884_v58 = vld [vmem:[%s4013_s1 + $0x254] ss:$8 sps:$4 sm:$0xff]  }
  0x65   :  { %2040 = vmatprep.subr.bf16.mxu0 %v2815_v59  ;;  %v2887_v59 = vld [vmem:[%s4013_s1 + $0x654] ss:$8 sps:$4 sm:$0xff]  }
  0x67   :  { %1829 = vmatpush1.bf16.msra.mxu1 %v2810_v60  ;;  %v2882_v60 = vld [vmem:[%s4013_s1 + $0x250] ss:$8 sps:$4 sm:$0xff]  }
  0x68   :  { %2041 = vmatpush1.bf16.msra.mxu0 %v2813_v61  ;;  %1830 = vmatprep.subr.bf16.mxu1 %v2818_v62  ;;  %v2885_v61 = vld [vmem:[%s4013_s1 + $0x650] ss:$8 sps:$4 sm:$0xff]   ;;  %v2890_v62 = vld [vmem:[%s4013_s1 + $0x264] ss:$8 sps:$4 sm:$0xff]  }
  0x69   :  { %2042 = vmatprep.subr.bf16.mxu0 %v2821_v63  ;;  %v2893_v63 = vld [vmem:[%s4013_s1 + $0x664] ss:$8 sps:$4 sm:$0xff]  }
  0x6b   :  { %1831 = vmatpush1.bf16.msra.mxu1 %v2816_v0  ;;  %v2888_v0 = vld [vmem:[%s4013_s1 + $0x260] ss:$8 sps:$4 sm:$0xff]  }
  0x6c   :  { %2043 = vmatpush1.bf16.msra.mxu0 %v2819_v1  ;;  %1832 = vmatprep.subr.bf16.mxu1 %v2824_v2  ;;  %v2891_v1 = vld [vmem:[%s4013_s1 + $0x660] ss:$8 sps:$4 sm:$0xff]   ;;  %v2896_v2 = vld [vmem:[%s4013_s1 + $0x274] ss:$8 sps:$4 sm:$0xff]  }
  0x6d   :  { %2044 = vmatprep.subr.bf16.mxu0 %v2827_v3  ;;  %v2899_v3 = vld [vmem:[%s4013_s1 + $0x674] ss:$8 sps:$4 sm:$0xff]  }
  0x6f   :  { %1833 = vmatpush1.bf16.msra.mxu1 %v2822_v4  ;;  %v2894_v4 = vld [vmem:[%s4013_s1 + $0x270] ss:$8 sps:$4 sm:$0xff]  }
  0x70   :  { %2045 = vmatpush1.bf16.msra.mxu0 %v2825_v5  ;;  %1834 = vmatprep.subr.bf16.mxu1 %v2830_v6  ;;  %v2897_v5 = vld [vmem:[%s4013_s1 + $0x670] ss:$8 sps:$4 sm:$0xff]   ;;  %v2902_v6 = vld [vmem:[%s4013_s1 + $0x284] ss:$8 sps:$4 sm:$0xff]  }
  0x71   :  { %2046 = vmatprep.subr.bf16.mxu0 %v2833_v7  ;;  %v2905_v7 = vld [vmem:[%s4013_s1 + $0x684] ss:$8 sps:$4 sm:$0xff]  }
  0x73   :  { %1835 = vmatpush1.bf16.msra.mxu1 %v2828_v8  ;;  %v2900_v8 = vld [vmem:[%s4013_s1 + $0x280] ss:$8 sps:$4 sm:$0xff]  }
  0x74   :  { %2047 = vmatpush1.bf16.msra.mxu0 %v2831_v9  ;;  %1836 = vmatprep.subr.bf16.mxu1 %v2836_v10  ;;  %v2903_v9 = vld [vmem:[%s4013_s1 + $0x680] ss:$8 sps:$4 sm:$0xff]   ;;  %v2908_v10 = vld [vmem:[%s4013_s1 + $0x294] ss:$8 sps:$4 sm:$0xff]  }
  0x75   :  { %2048 = vmatprep.subr.bf16.mxu0 %v2839_v11  ;;  %v2911_v11 = vld [vmem:[%s4013_s1 + $0x694] ss:$8 sps:$4 sm:$0xff]  }
  0x77   :  { %1837 = vmatpush1.bf16.msra.mxu1 %v2834_v12  ;;  %v2906_v12 = vld [vmem:[%s4013_s1 + $0x290] ss:$8 sps:$4 sm:$0xff]  }
  0x78   :  { %2049 = vmatpush1.bf16.msra.mxu0 %v2837_v13  ;;  %1838 = vmatprep.subr.bf16.mxu1 %v2842_v14  ;;  %v2909_v13 = vld [vmem:[%s4013_s1 + $0x690] ss:$8 sps:$4 sm:$0xff]   ;;  %v2914_v14 = vld [vmem:[%s4013_s1 + $0x2a4] ss:$8 sps:$4 sm:$0xff]  }
  0x79   :  { %2050 = vmatprep.subr.bf16.mxu0 %v2845_v15  ;;  %v2917_v15 = vld [vmem:[%s4013_s1 + $0x6a4] ss:$8 sps:$4 sm:$0xff]  }
  0x7b   :  { %1839 = vmatpush1.bf16.msra.mxu1 %v2840_v16  ;;  %v2912_v16 = vld [vmem:[%s4013_s1 + $0x2a0] ss:$8 sps:$4 sm:$0xff]  }
  0x7c   :  { %2051 = vmatpush1.bf16.msra.mxu0 %v2843_v17  ;;  %1840 = vmatprep.subr.bf16.mxu1 %v2848_v18  ;;  %v2915_v17 = vld [vmem:[%s4013_s1 + $0x6a0] ss:$8 sps:$4 sm:$0xff]   ;;  %v2920_v18 = vld [vmem:[%s4013_s1 + $0x2b4] ss:$8 sps:$4 sm:$0xff]  }
  0x7d   :  { %2052 = vmatprep.subr.bf16.mxu0 %v2851_v19  ;;  %v2923_v19 = vld [vmem:[%s4013_s1 + $0x6b4] ss:$8 sps:$4 sm:$0xff]  }
  0x7f   :  { %1841 = vmatpush1.bf16.msra.mxu1 %v2846_v20  ;;  %v2918_v20 = vld [vmem:[%s4013_s1 + $0x2b0] ss:$8 sps:$4 sm:$0xff]  }
  0x80   :  { %2053 = vmatpush1.bf16.msra.mxu0 %v2849_v21  ;;  %1863 = vmatprep.subr.bf16.mxu1 %v2854_v22  ;;  %v2921_v21 = vld [vmem:[%s4013_s1 + $0x6b0] ss:$8 sps:$4 sm:$0xff]   ;;  %v2926_v22 = vld [vmem:[%s4013_s1 + $0x2c4] ss:$8 sps:$4 sm:$0xff]  }
  0x81   :  { %2075 = vmatprep.subr.bf16.mxu0 %v2857_v23  ;;  %v2929_v23 = vld [vmem:[%s4013_s1 + $0x6c4] ss:$8 sps:$4 sm:$0xff]  }
  0x82   :  { %1843 = vmatmul.mubr.bf16.vlgmr.msra.gmra.mrb[0].mxu1 %v2302_v27  ;;  %v2935_v27 = vld [vmem:[%s4013_s1 + $0x6d4] ss:$8 sps:$4 sm:$0xff]  }
  0x83   :  { %2055 = vmatmul.mubr.bf16.vlgmr.msra.gmra.mrb[0].mxu0 %v2310_v28  ;;  %1864 = vmatpush1.bf16.msra.mxu1 %v2852_v24  ;;  %v2924_v24 = vld [vmem:[%s4013_s1 + $0x2c0] ss:$8 sps:$4 sm:$0xff]   ;;  %v2930_v28 = vld [vmem:[%s4013_s1 + $0x2d0] ss:$8 sps:$4 sm:$0xff]  }
  0x84   :  { %2076 = vmatpush1.bf16.msra.mxu0 %v2855_v25  ;;  %1865 = vmatprep.subr.bf16.mxu1 %v2860_v30  ;;  %v2927_v25 = vld [vmem:[%s4013_s1 + $0x6c0] ss:$8 sps:$4 sm:$0xff]   ;;  %v2938_v30 = vld [vmem:[%s4013_s1 + $0x2e4] ss:$8 sps:$4 sm:$0xff]  }
  0x85   :  { %2077 = vmatprep.subr.bf16.mxu0 %v2863_v31  ;;  %1852 = vmatprep.mubr.bf16.mxu1 %v2319_v34  ;;  %v2941_v31 = vld [vmem:[%s4013_s1 + $0x6e4] ss:$8 sps:$4 sm:$0xff]   ;;  %v2944_v34 = vld [vmem:[%s4013_s1 + $0x2f4] ss:$8 sps:$4 sm:$0xff]  }
  0x86   :  { %2064 = vmatprep.mubr.bf16.mxu0 %v2327_v35  ;;  %v2947_v35 = vld [vmem:[%s4013_s1 + $0x6f4] ss:$8 sps:$4 sm:$0xff]  }
  0x87   :  { %1866 = vmatpush1.bf16.msra.mxu1 %v2858_v36  ;;  %v2942_v36 = vld [vmem:[%s4013_s1 + $0x2f0] ss:$8 sps:$4 sm:$0xff]  }
  0x88   :  { %2078 = vmatpush1.bf16.msra.mxu0 %v2861_v37  ;;  %1867 = vmatprep.subr.bf16.mxu1 %v2866_v38  ;;  %v2945_v37 = vld [vmem:[%s4013_s1 + $0x6f0] ss:$8 sps:$4 sm:$0xff]   ;;  %v2950_v38 = vld [vmem:[%s4013_s1 + $0x304] ss:$8 sps:$4 sm:$0xff]  }
  0x89   :  { %2079 = vmatprep.subr.bf16.mxu0 %v2869_v39  ;;  %v2953_v39 = vld [vmem:[%s4013_s1 + $0x704] ss:$8 sps:$4 sm:$0xff]  }
  0x8a   :  { %1853 = vmatmul.mubr.bf16.gmra.mrb[4].mxu1 %v2318_v43  ;;  %v2312_v43 = vcombine.low %v3571_v46, %v3576_v47  ;;  %v2956_v46 = vld [vmem:[%s4013_s1 + $0x314] ss:$8 sps:$4 sm:$0xff]  }
  0x8b   :  { %2065 = vmatmul.mubr.bf16.gmra.mrb[4].mxu0 %v2326_v44  ;;  %1868 = vmatpush1.bf16.msra.mxu1 %v2864_v40  ;;  %v35_v40 = vld [vmem:[%s4014_s0 + $0x90] sm:$0xff] }
  0x8c   :  { %2080 = vmatpush1.bf16.msra.mxu0 %v2867_v41  ;;  %1869 = vmatprep.subr.bf16.mxu1 %v2872_v48  ;;  %v2304_v41 = vcombine.low %v3561_v42, %v3566_v45  ;;  %v43_v44 = vld [vmem:[%s4014_s0 + $0xd0] sm:$0xff]  ;;  %v2948_v42 = vld [vmem:[%s4013_s1 + $0x300] ss:$8 sps:$4 sm:$0xff]  }
  0x8d   :  { %2081 = vmatprep.subr.bf16.mxu0 %v2875_v49  ;;  %1895 = vmatprep.mubr.bf16.mxu1 %v2305_v50  ;;  %v39_v48 = vld [vmem:[%s4014_s0 + $0xb0] sm:$0xff]  ;;  %v2951_v45 = vld [vmem:[%s4013_s1 + $0x700] ss:$8 sps:$4 sm:$0xff]   ;;  %v2321_v50 = vcombine.high %v35_v40, %v43_v44 }
  0x8e   :  { %2107 = vmatprep.mubr.bf16.mxu0 %v2313_v51  ;;  %v47_v49 = vld [vmem:[%s4014_s0 + $0xf0] sm:$0xff] }
  0x8f   :  { %1870 = vmatpush1.bf16.msra.mxu1 %v2870_v52  ;;  %v2959_v47 = vld [vmem:[%s4013_s1 + $0x714] ss:$8 sps:$4 sm:$0xff]   ;;  %v2329_v51 = vcombine.high %v39_v48, %v47_v49  ;;  %v2954_v52 = vld [vmem:[%s4013_s1 + $0x310] ss:$8 sps:$4 sm:$0xff]  }
  0x90   :  { %2082 = vmatpush1.bf16.msra.mxu0 %v2873_v53  ;;  %1871 = vmatprep.subr.bf16.mxu1 %v2878_v54  ;;  %v2957_v53 = vld [vmem:[%s4013_s1 + $0x710] ss:$8 sps:$4 sm:$0xff]   ;;  %v2962_v54 = vld [vmem:[%s4013_s1 + $0x324] ss:$8 sps:$4 sm:$0xff]  }
  0x91   :  { %2083 = vmatprep.subr.bf16.mxu0 %v2881_v55  ;;  %v2965_v55 = vld [vmem:[%s4013_s1 + $0x724] ss:$8 sps:$4 sm:$0xff]  }
  0x93   :  { %1872 = vmatpush1.bf16.msra.mxu1 %v2876_v56  ;;  %v3787_v56 = vld [vmem:[%s4014_s0 + $0x18] sm:$0xff] }
  0x94   :  { %2084 = vmatpush1.bf16.msra.mxu0 %v2879_v57  ;;  %1873 = vmatprep.subr.bf16.mxu1 %v2884_v58  ;;  %v2320_v57 = vcombine.low %v35_v40, %v43_v44  ;;  %v2328_v58 = vcombine.low %v39_v48, %v47_v49  ;;  %v3020_v40 = vld [vmem:[%s4013_s1 + $0x3c0] ss:$8 sps:$4 sm:$0xff]   ;;  %v3031_v44 = vld [vmem:[%s4013_s1 + $0x7d4] ss:$8 sps:$4 sm:$0xff]   ;;  %v3026_v48 = vld [vmem:[%s4013_s1 + $0x3d0] ss:$8 sps:$4 sm:$0xff]  }
  0x95   :  { %2085 = vmatprep.subr.bf16.mxu0 %v2887_v59  ;;  %v3792_v59 = vld [vmem:[%s4014_s0 + $0x58] sm:$0xff] }
  0x96   :  { %v3029_v49 = vld [vmem:[%s4013_s1 + $0x7d0] ss:$8 sps:$4 sm:$0xff]  }
  0x97   :  { %1874 = vmatpush1.bf16.msra.mxu1 %v2882_v60  ;;  %v3797_v60 = vld [vmem:[%s4014_s0 + $0x38] sm:$0xff] }
  0x98   :  { %2086 = vmatpush1.bf16.msra.mxu0 %v2885_v61  ;;  %1875 = vmatprep.subr.bf16.mxu1 %v2890_v62  ;;  %v3802_v61 = vld [vmem:[%s4014_s0 + $0x78] sm:$0xff]  ;;  %v2960_v62 = vld [vmem:[%s4013_s1 + $0x320] ss:$8 sps:$4 sm:$0xff]  }
  0x99   :  { %2087 = vmatprep.subr.bf16.mxu0 %v2893_v63  ;;  %v2963_v63 = vld [vmem:[%s4013_s1 + $0x720] ss:$8 sps:$4 sm:$0xff]  }
  0x9b   :  { %1876 = vmatpush1.bf16.msra.mxu1 %v2888_v0  ;;  %v2968_v0 = vld [vmem:[%s4013_s1 + $0x334] ss:$8 sps:$4 sm:$0xff]  }
  0x9c   :  { %2088 = vmatpush1.bf16.msra.mxu0 %v2891_v1  ;;  %1877 = vmatprep.subr.bf16.mxu1 %v2896_v2  ;;  %v2971_v1 = vld [vmem:[%s4013_s1 + $0x734] ss:$8 sps:$4 sm:$0xff]   ;;  %v2307_v2 = vcombine.high %v3787_v56, %v3792_v59 }
  0x9d   :  { %2089 = vmatprep.subr.bf16.mxu0 %v2899_v3  ;;  %v2315_v3 = vcombine.high %v3797_v60, %v3802_v61 }
  0x9f   :  { %1878 = vmatpush1.bf16.msra.mxu1 %v2894_v4  ;;  %v2966_v4 = vld [vmem:[%s4013_s1 + $0x330] ss:$8 sps:$4 sm:$0xff]  }
  0xa0   :  { %2090 = vmatpush1.bf16.msra.mxu0 %v2897_v5  ;;  %1879 = vmatprep.subr.bf16.mxu1 %v2902_v6  ;;  %v2969_v5 = vld [vmem:[%s4013_s1 + $0x730] ss:$8 sps:$4 sm:$0xff]   ;;  %v2974_v6 = vld [vmem:[%s4013_s1 + $0x344] ss:$8 sps:$4 sm:$0xff]  }
  0xa1   :  { %2091 = vmatprep.subr.bf16.mxu0 %v2905_v7  ;;  %v2977_v7 = vld [vmem:[%s4013_s1 + $0x744] ss:$8 sps:$4 sm:$0xff]  }
  0xa3   :  { %1880 = vmatpush1.bf16.msra.mxu1 %v2900_v8  ;;  %v2972_v8 = vld [vmem:[%s4013_s1 + $0x340] ss:$8 sps:$4 sm:$0xff]  }
  0xa4   :  { %2092 = vmatpush1.bf16.msra.mxu0 %v2903_v9  ;;  %1881 = vmatprep.subr.bf16.mxu1 %v2908_v10  ;;  %v2975_v9 = vld [vmem:[%s4013_s1 + $0x740] ss:$8 sps:$4 sm:$0xff]   ;;  %v2980_v10 = vld [vmem:[%s4013_s1 + $0x354] ss:$8 sps:$4 sm:$0xff]  }
  0xa5   :  { %2093 = vmatprep.subr.bf16.mxu0 %v2911_v11  ;;  %v2983_v11 = vld [vmem:[%s4013_s1 + $0x754] ss:$8 sps:$4 sm:$0xff]  }
  0xa7   :  { %1882 = vmatpush1.bf16.msra.mxu1 %v2906_v12  ;;  %v2978_v12 = vld [vmem:[%s4013_s1 + $0x350] ss:$8 sps:$4 sm:$0xff]  }
  0xa8   :  { %2094 = vmatpush1.bf16.msra.mxu0 %v2909_v13  ;;  %1883 = vmatprep.subr.bf16.mxu1 %v2914_v14  ;;  %v2981_v13 = vld [vmem:[%s4013_s1 + $0x750] ss:$8 sps:$4 sm:$0xff]   ;;  %v2986_v14 = vld [vmem:[%s4013_s1 + $0x364] ss:$8 sps:$4 sm:$0xff]  }
  0xa9   :  { %2095 = vmatprep.subr.bf16.mxu0 %v2917_v15  ;;  %v2989_v15 = vld [vmem:[%s4013_s1 + $0x764] ss:$8 sps:$4 sm:$0xff]  }
  0xab   :  { %1884 = vmatpush1.bf16.msra.mxu1 %v2912_v16  ;;  %v2984_v16 = vld [vmem:[%s4013_s1 + $0x360] ss:$8 sps:$4 sm:$0xff]  }
  0xac   :  { %2096 = vmatpush1.bf16.msra.mxu0 %v2915_v17  ;;  %1885 = vmatprep.subr.bf16.mxu1 %v2920_v18  ;;  %v2987_v17 = vld [vmem:[%s4013_s1 + $0x760] ss:$8 sps:$4 sm:$0xff]   ;;  %v2992_v18 = vld [vmem:[%s4013_s1 + $0x374] ss:$8 sps:$4 sm:$0xff]  }
  0xad   :  { %2097 = vmatprep.subr.bf16.mxu0 %v2923_v19  ;;  %v2995_v19 = vld [vmem:[%s4013_s1 + $0x774] ss:$8 sps:$4 sm:$0xff]  }
  0xaf   :  { %1886 = vmatpush1.bf16.msra.mxu1 %v2918_v20  ;;  %v2990_v20 = vld [vmem:[%s4013_s1 + $0x370] ss:$8 sps:$4 sm:$0xff]  }
  0xb0   :  { %2098 = vmatpush1.bf16.msra.mxu0 %v2921_v21  ;;  %1887 = vmatprep.subr.bf16.mxu1 %v2926_v22  ;;  %v2993_v21 = vld [vmem:[%s4013_s1 + $0x770] ss:$8 sps:$4 sm:$0xff]   ;;  %v2998_v22 = vld [vmem:[%s4013_s1 + $0x384] ss:$8 sps:$4 sm:$0xff]  }
  0xb1   :  { %2099 = vmatprep.subr.bf16.mxu0 %v2929_v23  ;;  %v3001_v23 = vld [vmem:[%s4013_s1 + $0x784] ss:$8 sps:$4 sm:$0xff]  }
  0xb3   :  { %1888 = vmatpush1.bf16.msra.mxu1 %v2924_v24  ;;  %v2996_v24 = vld [vmem:[%s4013_s1 + $0x380] ss:$8 sps:$4 sm:$0xff]  }
  0xb4   :  { %2100 = vmatpush1.bf16.msra.mxu0 %v2927_v25  ;;  %1889 = vmatprep.subr.bf16.mxu1 %v2932_v26  ;;  %v2999_v25 = vld [vmem:[%s4013_s1 + $0x780] ss:$8 sps:$4 sm:$0xff]   ;;  %v3004_v26 = vld [vmem:[%s4013_s1 + $0x394] ss:$8 sps:$4 sm:$0xff]  }
  0xb5   :  { %2101 = vmatprep.subr.bf16.mxu0 %v2935_v27  ;;  %v3007_v27 = vld [vmem:[%s4013_s1 + $0x794] ss:$8 sps:$4 sm:$0xff]  }
  0xb7   :  { %1890 = vmatpush1.bf16.msra.mxu1 %v2930_v28  ;;  %v3002_v28 = vld [vmem:[%s4013_s1 + $0x390] ss:$8 sps:$4 sm:$0xff]  }
  0xb8   :  { %2102 = vmatpush1.bf16.msra.mxu0 %v2933_v29  ;;  %1891 = vmatprep.subr.bf16.mxu1 %v2938_v30  ;;  %v3005_v29 = vld [vmem:[%s4013_s1 + $0x790] ss:$8 sps:$4 sm:$0xff]   ;;  %v3010_v30 = vld [vmem:[%s4013_s1 + $0x3a4] ss:$8 sps:$4 sm:$0xff]  }
  0xb9   :  { %2103 = vmatprep.subr.bf16.mxu0 %v2941_v31  ;;  %v3013_v31 = vld [vmem:[%s4013_s1 + $0x7a4] ss:$8 sps:$4 sm:$0xff]  }
  0xbb   :  { %1892 = vmatpush1.bf16.msra.mxu1 %v2936_v32  ;;  %v3008_v32 = vld [vmem:[%s4013_s1 + $0x3a0] ss:$8 sps:$4 sm:$0xff]  }
  0xbc   :  { %2104 = vmatpush1.bf16.msra.mxu0 %v2939_v33  ;;  %1893 = vmatprep.subr.bf16.mxu1 %v2944_v34  ;;  %v3011_v33 = vld [vmem:[%s4013_s1 + $0x7a0] ss:$8 sps:$4 sm:$0xff]   ;;  %v3016_v34 = vld [vmem:[%s4013_s1 + $0x3b4] ss:$8 sps:$4 sm:$0xff]  }
  0xbd   :  { %2105 = vmatprep.subr.bf16.mxu0 %v2947_v35  ;;  %v3019_v35 = vld [vmem:[%s4013_s1 + $0x7b4] ss:$8 sps:$4 sm:$0xff]  }
  0xbf   :  { %1894 = vmatpush1.bf16.msra.mxu1 %v2942_v36  ;;  %v3014_v36 = vld [vmem:[%s4013_s1 + $0x3b0] ss:$8 sps:$4 sm:$0xff]  }
  0xc0   :  { %2106 = vmatpush1.bf16.msra.mxu0 %v2945_v37  ;;  %1916 = vmatprep.subr.bf16.mxu1 %v2950_v38  ;;  %v3017_v37 = vld [vmem:[%s4013_s1 + $0x7b0] ss:$8 sps:$4 sm:$0xff]   ;;  %v3022_v38 = vld [vmem:[%s4013_s1 + $0x3c4] ss:$8 sps:$4 sm:$0xff]  }
  0xc1   :  { %2128 = vmatprep.subr.bf16.mxu0 %v2953_v39  ;;  %v3025_v39 = vld [vmem:[%s4013_s1 + $0x7c4] ss:$8 sps:$4 sm:$0xff]  }
  0xc2   :  { %1896 = vmatmul.mubr.bf16.vlgmr.msra.gmra.mrb[0].mxu1 %v2304_v41  ;;  %v3023_v41 = vld [vmem:[%s4013_s1 + $0x7c0] ss:$8 sps:$4 sm:$0xff]  }
  0xc3   :  { %2108 = vmatmul.mubr.bf16.vlgmr.msra.gmra.mrb[0].mxu0 %v2312_v43  ;;  %1917 = vmatpush1.bf16.msra.mxu1 %v2948_v42  ;;  %v3028_v43 = vld [vmem:[%s4013_s1 + $0x3d4] ss:$8 sps:$4 sm:$0xff]   ;;  %v3034_v42 = vld [vmem:[%s4013_s1 + $0x3e4] ss:$8 sps:$4 sm:$0xff]  }
  0xc4   :  { %2129 = vmatpush1.bf16.msra.mxu0 %v2951_v45  ;;  %1918 = vmatprep.subr.bf16.mxu1 %v2956_v46  ;;  %v3037_v45 = vld [vmem:[%s4013_s1 + $0x7e4] ss:$8 sps:$4 sm:$0xff]   ;;  %v3032_v46 = vld [vmem:[%s4013_s1 + $0x3e0] ss:$8 sps:$4 sm:$0xff]  }
  0xc5   :  { %2130 = vmatprep.subr.bf16.mxu0 %v2959_v47  ;;  %1905 = vmatprep.mubr.bf16.mxu1 %v2321_v50  ;;  %v3035_v47 = vld [vmem:[%s4013_s1 + $0x7e0] ss:$8 sps:$4 sm:$0xff]   ;;  %v3040_v50 = vld [vmem:[%s4013_s1 + $0x3f4] ss:$8 sps:$4 sm:$0xff]  }
  0xc6   :  { %2117 = vmatprep.mubr.bf16.mxu0 %v2329_v51  ;;  %v3043_v51 = vld [vmem:[%s4013_s1 + $0x7f4] ss:$8 sps:$4 sm:$0xff]  }
  0xc7   :  { %1919 = vmatpush1.bf16.msra.mxu1 %v2954_v52  ;;  %v3038_v52 = vld [vmem:[%s4013_s1 + $0x3f0] ss:$8 sps:$4 sm:$0xff]  }
  0xc8   :  { %2131 = vmatpush1.bf16.msra.mxu0 %v2957_v53  ;;  %1920 = vmatprep.subr.bf16.mxu1 %v2962_v54  ;;  %v3041_v53 = vld [vmem:[%s4013_s1 + $0x7f0] ss:$8 sps:$4 sm:$0xff]  }
  0xc9   :  { %2132 = vmatprep.subr.bf16.mxu0 %v2965_v55  ;;  %v36_v54 = vld [vmem:[%s4014_s0 + $0x98] sm:$0xff] }
  0xca   :  { %1906 = vmatmul.mubr.bf16.gmra.mrb[4].mxu1 %v2320_v57  ;;  %v44_v55 = vld [vmem:[%s4014_s0 + $0xd8] sm:$0xff] }
  0xcb   :  { %2118 = vmatmul.mubr.bf16.gmra.mrb[4].mxu0 %v2328_v58  ;;  %1921 = vmatpush1.bf16.msra.mxu1 %v2960_v62  ;;  %v40_v57 = vld [vmem:[%s4014_s0 + $0xb8] sm:$0xff]  ;;  %v2306_v62 = vcombine.low %v3787_v56, %v3792_v59  ;;  %v305_v56 = vld [vmem:[%s4015_s2] sm:$0x3] }
  0xcc   :  { %2133 = vmatpush1.bf16.msra.mxu0 %v2963_v63  ;;  %1922 = vmatprep.subr.bf16.mxu1 %v2968_v0  ;;  %v48_v58 = vld [vmem:[%s4014_s0 + $0xf8] sm:$0xff]  ;;  %v2314_v63 = vcombine.low %v3797_v60, %v3802_v61  ;;  %v2323_v0 = vcombine.high %v36_v54, %v44_v55 }
  0xcd   :  { %2134 = vmatprep.subr.bf16.mxu0 %v2971_v1  ;;  %1948 = vmatprep.mubr.bf16.mxu1 %v2307_v2  ;;  %v2331_v1 = vcombine.high %v40_v57, %v48_v58  ;;  %v2322_v2 = vcombine.low %v36_v54, %v44_v55 }
  0xce   :  { %2160 = vmatprep.mubr.bf16.mxu0 %v2315_v3  ;;  %v2330_v3 = vcombine.low %v40_v57, %v48_v58 }
  0xcf   :  { %1923 = vmatpush1.bf16.msra.mxu1 %v2966_v4  ;;  %v307_v4 = vlaneseq }
  0xd0   :  { %2135 = vmatpush1.bf16.msra.mxu0 %v2969_v5  ;;  %1924 = vmatprep.subr.bf16.mxu1 %v2974_v6 }
  0xd1   :  { %2136 = vmatprep.subr.bf16.mxu0 %v2977_v7  ;;  %v308_v5 = vshrl.u32 %v307_v4, 7 }
  0xd3   :  { %1925 = vmatpush1.bf16.msra.mxu1 %v2972_v8  ;;  %v309_v6 = vsub.s32 0, %v308_v5  ;;  %v313_v59 = vsub.s32 1, %v308_v5 }
  0xd4   :  { %2137 = vmatpush1.bf16.msra.mxu0 %v2975_v9  ;;  %1926 = vmatprep.subr.bf16.mxu1 %v2980_v10 }
  0xd5   :  { %2138 = vmatprep.subr.bf16.mxu0 %v2983_v11  ;;  %v310_v60 = vrot.slane %v305_v56, %v309_v6  ;;  %v314_v61 = vrot.slane %v305_v56, %v313_v59 }
  0xd7   :  { %1927 = vmatpush1.bf16.msra.mxu1 %v2978_v12 }
  0xd8   :  { %2139 = vmatpush1.bf16.msra.mxu0 %v2981_v13  ;;  %1928 = vmatprep.subr.bf16.mxu1 %v2986_v14 }
  0xd9   :  { %2140 = vmatprep.subr.bf16.mxu0 %v2989_v15 }
  0xdb   :  { %1929 = vmatpush1.bf16.msra.mxu1 %v2984_v16 }
  0xdc   :  { %2141 = vmatpush1.bf16.msra.mxu0 %v2987_v17  ;;  %1930 = vmatprep.subr.bf16.mxu1 %v2992_v18 }
  0xdd   :  { %2142 = vmatprep.subr.bf16.mxu0 %v2995_v19 }
  0xdf   :  { %1931 = vmatpush1.bf16.msra.mxu1 %v2990_v20 }
  0xe0   :  { %2143 = vmatpush1.bf16.msra.mxu0 %v2993_v21  ;;  %1932 = vmatprep.subr.bf16.mxu1 %v2998_v22 }
  0xe1   :  { %2144 = vmatprep.subr.bf16.mxu0 %v3001_v23 }
  0xe3   :  { %1933 = vmatpush1.bf16.msra.mxu1 %v2996_v24 }
  0xe4   :  { %2145 = vmatpush1.bf16.msra.mxu0 %v2999_v25  ;;  %1934 = vmatprep.subr.bf16.mxu1 %v3004_v26 }
  0xe5   :  { %2146 = vmatprep.subr.bf16.mxu0 %v3007_v27 }
  0xe7   :  { %1935 = vmatpush1.bf16.msra.mxu1 %v3002_v28 }
  0xe8   :  { %2147 = vmatpush1.bf16.msra.mxu0 %v3005_v29  ;;  %1936 = vmatprep.subr.bf16.mxu1 %v3010_v30 }
  0xe9   :  { %2148 = vmatprep.subr.bf16.mxu0 %v3013_v31 }
  0xeb   :  { %1937 = vmatpush1.bf16.msra.mxu1 %v3008_v32 }
  0xec   :  { %2149 = vmatpush1.bf16.msra.mxu0 %v3011_v33  ;;  %1938 = vmatprep.subr.bf16.mxu1 %v3016_v34 }
  0xed   :  { %2150 = vmatprep.subr.bf16.mxu0 %v3019_v35 }
  0xef   :  { %1939 = vmatpush1.bf16.msra.mxu1 %v3014_v36 }
  0xf0   :  { %2151 = vmatpush1.bf16.msra.mxu0 %v3017_v37  ;;  %1940 = vmatprep.subr.bf16.mxu1 %v3022_v38 }
  0xf1   :  { %2152 = vmatprep.subr.bf16.mxu0 %v3025_v39 }
  0xf3   :  { %1941 = vmatpush1.bf16.msra.mxu1 %v3020_v40 }
  0xf4   :  { %2153 = vmatpush1.bf16.msra.mxu0 %v3023_v41  ;;  %1942 = vmatprep.subr.bf16.mxu1 %v3028_v43 }
  0xf5   :  { %2154 = vmatprep.subr.bf16.mxu0 %v3031_v44 }
  0xf7   :  { %1943 = vmatpush1.bf16.msra.mxu1 %v3026_v48 }
  0xf8   :  { %2155 = vmatpush1.bf16.msra.mxu0 %v3029_v49  ;;  %1944 = vmatprep.subr.bf16.mxu1 %v3034_v42 }
  0xf9   :  { %2156 = vmatprep.subr.bf16.mxu0 %v3037_v45 }
  0xfb   :  { %1945 = vmatpush1.bf16.msra.mxu1 %v3032_v46 }
  0xfc   :  { %2157 = vmatpush1.bf16.msra.mxu0 %v3035_v47  ;;  %1946 = vmatprep.subr.bf16.mxu1 %v3040_v50 }
  0xfd   :  { %2158 = vmatprep.subr.bf16.mxu0 %v3043_v51 }
  0xff   :  { %1947 = vmatpush1.bf16.msra.mxu1 %v3038_v52 }
 0x100   :  { %2159 = vmatpush1.bf16.msra.mxu0 %v3041_v53 }
 0x102   :  { %1949 = vmatmul.mubr.bf16.vlgmr.msra.gmra.mrb[0].mxu1 %v2306_v62 }
 0x103   :  { %2161 = vmatmul.mubr.bf16.vlgmr.msra.gmra.mrb[0].mxu0 %v2314_v63  ;;  %1958 = vmatprep.mubr.bf16.mxu1 %v2323_v0 }
 0x104   :  { %2170 = vmatprep.mubr.bf16.mxu0 %v2331_v1 }
 0x10a   :  { %1959 = vmatmul.mubr.bf16.gmra.mrb[4].mxu1 %v2322_v2 }
 0x10b   :  { %2171 = vmatmul.mubr.bf16.gmra.mrb[4].mxu0 %v2330_v3 }
 0x1d5   :  { %v1950_v7 = vpop.f32.mrb[0].mxu1 }
 0x1d6   :  { %v2162_v8 = vpop.f32.mrb[0].mxu0  ;;  %v2596_v9 = vadd.f32 %v1950_v7, %v310_v60  ;;  %v1952_v10 = vpop.f32.mrb[1].mxu1 }
 0x1d7   :  { %v2164_v11 = vpop.f32.mrb[1].mxu0  ;;  %v2598_v12 = vadd.f32 %v1952_v10, %v314_v61  ;;  %v1954_v13 = vpop.f32.mrb[2].mxu1 }
 0x1d8   :  { %v2166_v14 = vpop.f32.mrb[2].mxu0  ;;  %v2597_v15 = vadd.f32 %v2596_v9, %v2162_v8  ;;  %v2600_v16 = vadd.f32 %v1954_v13, %v310_v60  ;;  %v1956_v17 = vpop.f32.mrb[3].mxu1 }
 0x1d9   :  { %v2168_v18 = vpop.f32.mrb[3].mxu0  ;;  %v2599_v19 = vadd.f32 %v2598_v12, %v2164_v11  ;;  %v2602_v20 = vadd.f32 %v1956_v17, %v314_v61 }
 0x1da   :  { %v2601_v21 = vadd.f32 %v2600_v16, %v2166_v14  ;;  %v2230_v24 = vmul.f32 %v2597_v15, %v2597_v15 }
 0x1db   :  { %v2592_v22 = vpack.c.bf16 %v2599_v19, %v2597_v15  ;;  %v2603_v23 = vadd.f32 %v2602_v20, %v2168_v18  ;;  %v2231_v27 = vmul.f32 %v2599_v19, %v2599_v19 }
 0x1dc   :  { %v2212_v25 = vadd.f32 %v2601_v21, %v2597_v15  ;;  %v2232_v26 = vmul.f32 %v2601_v21, %v2601_v21 }
 0x1dd   :  { %2284 = vst [vmem:[%s4016_s3] sm:$0xff] %v2592_v22  ;;  %v2221_v28 = vadd.f32 %v2603_v23, %v2599_v19  ;;  %v2233_v29 = vmul.f32 %v2603_v23, %v2603_v23  ;;  %v2593_v30 = vpack.c.bf16 %v2603_v23, %v2601_v21  ;;  %v1960_v31 = vpop.f32.mrb[4].mxu1 }
 0x1de   :  { %v2172_v32 = vpop.f32.mrb[4].mxu0  ;;  %v2238_v33 = vadd.f32 %v2232_v26, %v2230_v24  ;;  %v2604_v34 = vadd.f32 %v1960_v31, %v310_v60  ;;  %v1962_v35 = vpop.f32.mrb[5].mxu1 }
 0x1df   :  { %v2174_v36 = vpop.f32.mrb[5].mxu0  ;;  %v2247_v37 = vadd.f32 %v2233_v29, %v2231_v27  ;;  %2285 = vst [vmem:[%s4016_s3 + $0x8] sm:$0xff] %v2593_v30  ;;  %v2606_v38 = vadd.f32 %v1962_v35, %v314_v61  ;;  %v1964_v39 = vpop.f32.mrb[6].mxu1 }
 0x1e0   :  { %v2176_v40 = vpop.f32.mrb[6].mxu0  ;;  %v2605_v41 = vadd.f32 %v2604_v34, %v2172_v32  ;;  %v2608_v43 = vadd.f32 %v1964_v39, %v310_v60  ;;  %v1966_v44 = vpop.f32.mrb[7].mxu1 }
 0x1e1   :  { %v2178_v48 = vpop.f32.mrb[7].mxu0  ;;  %v2607_v49 = vadd.f32 %v2606_v38, %v2174_v36  ;;  %v2610_v42 = vadd.f32 %v1966_v44, %v314_v61 }
 0x1e2   :  { %v2213_v45 = vadd.f32 %v2605_v41, %v2212_v25  ;;  %v2234_v46 = vmul.f32 %v2605_v41, %v2605_v41  ;;  %v2609_v47 = vadd.f32 %v2608_v43, %v2176_v40 }
 0x1e3   :  { %v2222_v50 = vadd.f32 %v2607_v49, %v2221_v28  ;;  %v2235_v51 = vmul.f32 %v2607_v49, %v2607_v49  ;;  %v2594_v52 = vpack.c.bf16 %v2607_v49, %v2605_v41  ;;  %v2611_v53 = vadd.f32 %v2610_v42, %v2178_v48 }
 0x1e4   :  { %v2239_v54 = vadd.f32 %v2238_v33, %v2234_v46  ;;  %v2214_v55 = vadd.f32 %v2609_v47, %v2213_v45  ;;  %v2236_v57 = vmul.f32 %v2609_v47, %v2609_v47 }
 0x1e5   :  { %v2248_v58 = vadd.f32 %v2247_v37, %v2235_v51  ;;  %2286 = vst [vmem:[%s4016_s3 + $0x10] sm:$0xff] %v2594_v52  ;;  %v2223_v62 = vadd.f32 %v2611_v53, %v2222_v50  ;;  %v2237_v63 = vmul.f32 %v2611_v53, %v2611_v53  ;;  %v2595_v0 = vpack.c.bf16 %v2611_v53, %v2609_v47 }
 0x1e6   :  { %v2215_v1 = vrot.slane %v2214_v55, 4  ;;  %v2240_v2 = vadd.f32 %v2239_v54, %v2236_v57 }
 0x1e7   :  { %v2224_v3 = vrot.slane %v2223_v62, 4  ;;  %v2249_v4 = vadd.f32 %v2248_v58, %v2237_v63  ;;  %2287 = vst [vmem:[%s4016_s3 + $0x18] sm:$0xff] %v2595_v0 }
 0x1e8   :  { %v2216_v5 = vadd.f32 %v2215_v1, %v2214_v55  ;;  %v2241_v6 = vrot.slane %v2240_v2, 4 }
 0x1e9   :  { %v2225_v56 = vadd.f32 %v2224_v3, %v2223_v62  ;;  %v2250_v59 = vrot.slane %v2249_v4, 4 }
 0x1ea   :  { %v2217_v60 = vrot.slane %v2216_v5, 2  ;;  %v2242_v61 = vadd.f32 %v2241_v6, %v2240_v2 }
 0x1eb   :  { %v2226_v7 = vrot.slane %v2225_v56, 2  ;;  %v2251_v8 = vadd.f32 %v2250_v59, %v2249_v4 }
 0x1ec   :  { %v2218_v9 = vadd.f32 %v2217_v60, %v2216_v5  ;;  %v2243_v10 = vrot.slane %v2242_v61, 2 }
 0x1ed   :  { %v2227_v11 = vadd.f32 %v2226_v7, %v2225_v56  ;;  %v2252_v12 = vrot.slane %v2251_v8, 2 }
 0x1ee   :  { %v2219_v13 = vrot.slane %v2218_v9, 1  ;;  %v2244_v14 = vadd.f32 %v2243_v10, %v2242_v61 }
 0x1ef   :  { %v2228_v15 = vrot.slane %v2227_v11, 1  ;;  %v2253_v16 = vadd.f32 %v2252_v12, %v2251_v8 }
 0x1f0   :  { %v2220_v17 = vadd.f32 %v2219_v13, %v2218_v9  ;;  %v2245_v18 = vrot.slane %v2244_v14, 1 }
 0x1f1   :  { %v2229_v19 = vadd.f32 %v2228_v15, %v2227_v11  ;;  %v2254_v20 = vrot.slane %v2253_v16, 1 }
 0x1f2   :  { %v2246_v21 = vadd.f32 %v2245_v18, %v2244_v14  ;;  %2256 = vst [vmem:[%s4017_s4] sm:$0xff] %v2220_v17 }
 0x1f3   :  { %v2255_v22 = vadd.f32 %v2254_v20, %v2253_v16  ;;  %2257 = vst [vmem:[%s4017_s4 + $0x8] sm:$0xff] %v2229_v19 }
 0x1f4   :  { %2258 = vst [vmem:[%s4018_s5] sm:$0xff] %v2246_v21 }
 0x1f5   :  { %2259 = vst [vmem:[%s4018_s5 + $0x8] sm:$0xff] %v2255_v22 }

// kernel: patchgan_forward.14
= control target key start
LH: loop header
LB: loop body
LE: loop exit
PB: predicated region body
PF: predicated region fallthrough
CT: control target
= control target key end

     0   :  { %v34_v0 = vlaneseq  ;;  %s275_s0 = inlined_call_operand.vmem [shape: bf16[24,512], index: 0, kind: input, shape index: {}]   ;;  %s276_s1 = inlined_call_operand.vmem [shape: f32[1,512], index: 1, kind: input, shape index: {}]   ;;  %s277_s2 = inlined_call_operand.vmem [shape: f32[1,512], index: 2, kind: input, shape index: {}]   ;;  %s278_s3 = inlined_call_operand.vmem [shape: bf16[24,512], index: 3, kind: output, shape index: {}]  }
   0x1   :  { %v14_v1 = vld [vmem:[%s275_s0] sm:$0xff]  ;;  %v15_v5 = vld [vmem:[%s275_s0 + $0x8] sm:$0xff]  ;;  %v16_v6 = vld [vmem:[%s275_s0 + $0x10] sm:$0xff] }
   0x2   :  { %v20_v2 = vunpack.c.l.bf16 %v14_v1  ;;  %v21_v3 = vunpack.c.h.bf16 %v14_v1  ;;  %v35_v4 = vshrl.u32 %v34_v0, 7  ;;  %v17_v7 = vld [vmem:[%s275_s0 + $0x18] sm:$0xff]  ;;  %v32_v8 = vld [vmem:[%s276_s1] sm:$0xf]  ;;  %v22_v10 = vunpack.c.l.bf16 %v15_v5  ;;  %v19_v57 = vld [vmem:[%s275_s0 + $0x28] sm:$0xff] }
   0x3   :  { %v66_v9 = vld [vmem:[%s277_s2] sm:$0xf]  ;;  %v23_v11 = vunpack.c.h.bf16 %v15_v5  ;;  %v24_v12 = vunpack.c.l.bf16 %v16_v6  ;;  %v25_v13 = vunpack.c.h.bf16 %v16_v6  ;;  %v26_v19 = vunpack.c.l.bf16 %v17_v7 }
   0x4   :  { %v239_v14 = vld [vmem:[%s275_s0 + $0x20] sm:$0xff]  ;;  %v36_v15 = vsub.s32 0, %v35_v4  ;;  %v40_v16 = vsub.s32 1, %v35_v4  ;;  %v44_v17 = vsub.s32 2, %v35_v4  ;;  %v48_v18 = vsub.s32 3, %v35_v4 }
   0x5   :  { %v27_v20 = vunpack.c.h.bf16 %v17_v7  ;;  %v28_v21 = vunpack.c.l.bf16 %v239_v14  ;;  %v29_v22 = vunpack.c.h.bf16 %v239_v14 }
   0x6   :  { %v37_v23 = vrot.slane %v32_v8, %v36_v15  ;;  %v41_v24 = vrot.slane %v32_v8, %v40_v16  ;;  %v71_v25 = vrot.slane %v66_v9, %v36_v15  ;;  %v75_v26 = vrot.slane %v66_v9, %v40_v16 }
   0x7   :  { %v45_v27 = vrot.slane %v32_v8, %v44_v17  ;;  %v49_v28 = vrot.slane %v32_v8, %v48_v18  ;;  %v243_v29 = vrot.slane %v66_v9, %v44_v17  ;;  %v245_v30 = vrot.slane %v66_v9, %v48_v18 }
   0x8   :  { %v54_v31 = vmul.f32 %v37_v23, %v20_v2  ;;  %v55_v32 = vmul.f32 %v41_v24, %v21_v3  ;;  %v58_v33 = vmul.f32 %v37_v23, %v24_v12  ;;  %v59_v34 = vmul.f32 %v41_v24, %v25_v13 }
   0x9   :  { %v56_v35 = vmul.f32 %v45_v27, %v22_v10  ;;  %v57_v36 = vmul.f32 %v49_v28, %v23_v11  ;;  %v60_v37 = vmul.f32 %v45_v27, %v26_v19  ;;  %v61_v38 = vmul.f32 %v49_v28, %v27_v20 }
   0xa   :  { %v88_v39 = vadd.f32 %v71_v25, %v54_v31  ;;  %v89_v40 = vadd.f32 %v75_v26, %v55_v32  ;;  %v92_v41 = vadd.f32 %v71_v25, %v58_v33  ;;  %v93_v42 = vadd.f32 %v75_v26, %v59_v34 }
   0xb   :  { %v90_v43 = vadd.f32 %v243_v29, %v56_v35  ;;  %v91_v44 = vadd.f32 %v245_v30, %v57_v36  ;;  %v94_v45 = vadd.f32 %v243_v29, %v60_v37  ;;  %v95_v46 = vadd.f32 %v245_v30, %v61_v38 }
   0xc   :  { %vm100_vm0 = vcmp.ge.f32.partialorder %v88_v39, 0.0  ;;  %vm101_vm1 = vcmp.ge.f32.partialorder %v89_v40, 0.0  ;;  %v112_v47 = vmul.f32 0.2, %v88_v39  ;;  %v113_v48 = vmul.f32 0.2, %v89_v40 }
   0xd   :  { %vm102_vm2 = vcmp.ge.f32.partialorder %v90_v43, 0.0  ;;  %vm103_vm3 = vcmp.ge.f32.partialorder %v91_v44, 0.0  ;;  %v114_v49 = vmul.f32 0.2, %v90_v43  ;;  %v115_v50 = vmul.f32 0.2, %v91_v44 }
   0xe   :  { %v124_v51 = vsel %vm100_vm0, %v88_v39, %v112_v47  ;;  %v125_v52 = vsel %vm101_vm1, %v89_v40, %v113_v48  ;;  %vm104_vm4 = vcmp.ge.f32.partialorder %v92_v41, 0.0  ;;  %vm105_vm5 = vcmp.ge.f32.partialorder %v93_v42, 0.0 }
   0xf   :  { %v192_v53 = vpack.c.bf16 %v125_v52, %v124_v51  ;;  %v126_v54 = vsel %vm102_vm2, %v90_v43, %v114_v49  ;;  %v127_v55 = vsel %vm103_vm3, %v91_v44, %v115_v50  ;;  %v116_v56 = vmul.f32 0.2, %v92_v41 }
  0x10   :  { %v193_v58 = vpack.c.bf16 %v127_v55, %v126_v54  ;;  %v117_v59 = vmul.f32 0.2, %v93_v42  ;;  %vm106_vm6 = vcmp.ge.f32.partialorder %v94_v45, 0.0  ;;  %vm107_vm7 = vcmp.ge.f32.partialorder %v95_v46, 0.0 }
  0x11   :  { %176 = vst [vmem:[%s278_s3] sm:$0xff] %v192_v53  ;;  %v128_v60 = vsel %vm104_vm4, %v92_v41, %v116_v56  ;;  %v118_v61 = vmul.f32 0.2, %v94_v45  ;;  %v119_v62 = vmul.f32 0.2, %v95_v46  ;;  %v62_v63 = vmul.f32 %v37_v23, %v28_v21 }
  0x12   :  { %177 = vst [vmem:[%s278_s3 + $0x8] sm:$0xff] %v193_v58  ;;  %v129_v0 = vsel %vm105_vm5, %v93_v42, %v117_v59  ;;  %v63_v1 = vmul.f32 %v41_v24, %v29_v22  ;;  %v30_v2 = vunpack.c.l.bf16 %v19_v57  ;;  %v31_v3 = vunpack.c.h.bf16 %v19_v57 }
  0x13   :  { %v194_v4 = vpack.c.bf16 %v129_v0, %v128_v60  ;;  %v130_v5 = vsel %vm106_vm6, %v94_v45, %v118_v61  ;;  %v131_v6 = vsel %vm107_vm7, %v95_v46, %v119_v62  ;;  %v96_v7 = vadd.f32 %v71_v25, %v62_v63 }
  0x14   :  { %v195_v8 = vpack.c.bf16 %v131_v6, %v130_v5  ;;  %v97_v9 = vadd.f32 %v75_v26, %v63_v1  ;;  %v64_v10 = vmul.f32 %v45_v27, %v30_v2  ;;  %v65_v11 = vmul.f32 %v49_v28, %v31_v3 }
  0x15   :  { %178 = vst [vmem:[%s278_s3 + $0x10] sm:$0xff] %v194_v4  ;;  %vm108_vm8 = vcmp.ge.f32.partialorder %v96_v7, 0.0  ;;  %v120_v12 = vmul.f32 0.2, %v96_v7 }
  0x16   :  { %179 = vst [vmem:[%s278_s3 + $0x18] sm:$0xff] %v195_v8  ;;  %vm109_vm9 = vcmp.ge.f32.partialorder %v97_v9, 0.0  ;;  %v121_v13 = vmul.f32 0.2, %v97_v9  ;;  %v98_v14 = vadd.f32 %v243_v29, %v64_v10  ;;  %v99_v15 = vadd.f32 %v245_v30, %v65_v11 }
  0x17   :  { %v132_v16 = vsel %vm108_vm8, %v96_v7, %v120_v12 }
  0x18   :  { %v133_v17 = vsel %vm109_vm9, %v97_v9, %v121_v13  ;;  %vm110_vm10 = vcmp.ge.f32.partialorder %v98_v14, 0.0  ;;  %vm111_vm11 = vcmp.ge.f32.partialorder %v99_v15, 0.0  ;;  %v122_v18 = vmul.f32 0.2, %v98_v14 }
  0x19   :  { %v196_v19 = vpack.c.bf16 %v133_v17, %v132_v16  ;;  %v123_v20 = vmul.f32 0.2, %v99_v15 }
  0x1a   :  { %v134_v21 = vsel %vm110_vm10, %v98_v14, %v122_v18 }
  0x1b   :  { %180 = vst [vmem:[%s278_s3 + $0x20] sm:$0xff] %v196_v19  ;;  %v135_v22 = vsel %vm111_vm11, %v99_v15, %v123_v20 }
  0x1c   :  { %v197_v23 = vpack.c.bf16 %v135_v22, %v134_v21 }
  0x1e   :  { %181 = vst [vmem:[%s278_s3 + $0x28] sm:$0xff] %v197_v23 }

// kernel: patchgan_forward.13
= control target key start
LH: loop header
LB: loop body
LE: loop exit
PB: predicated region body
PF: predicated region fallthrough
CT: control target
= control target key end

     0   :  { %s14642_s1 = inlined_call_operand.vmem [shape: bf16[4096,512], index: 1, kind: input, shape index: {}]   ;;  %s14643_s0 = inlined_call_operand.vmem [shape: bf16[24,4096], index: 0, kind: input, shape index: {}]   ;;  %s14644_s2 = inlined_call_operand.vmem [shape: f32[1,512], index: 2, kind: input, shape index: {}]   ;;  %s14645_s3 = inlined_call_operand.vmem [shape: bf16[24,512], index: 3, kind: output, shape index: {0}]   ;;  %s14646_s4 = inlined_call_operand.vmem [shape: f32[1,8,512], index: 4, kind: output, shape index: {1}]   ;;  %s14647_s5 = inlined_call_operand.vmem [shape: f32[1,8,512], index: 5, kind: output, shape index: {2}]  }
   0x1   :  { %v9659_v0 = vld [vmem:[%s14642_s1 + $0x4] ss:$16 sps:$4 sm:$0xff]   ;;  %v9661_v1 = vld [vmem:[%s14642_s1 + $0xc] ss:$16 sps:$4 sm:$0xff]   ;;  %v9663_v2 = vld [vmem:[%s14642_s1] ss:$16 sps:$4 sm:$0xff]  }
   0x2   :  { %6503 = vmatprep.subr.bf16.mxu0 %v9659_v0  ;;  %v9664_v3 = vld [vmem:[%s14642_s1 + $0x8] ss:$16 sps:$4 sm:$0xff]   ;;  %7319 = vmatprep.subr.bf16.mxu1 %v9661_v1  ;;  %v9665_v4 = vld [vmem:[%s14642_s1 + $0x24] ss:$16 sps:$4 sm:$0xff]   ;;  %v9667_v5 = vld [vmem:[%s14642_s1 + $0x2c] ss:$16 sps:$4 sm:$0xff]  }
   0x3   :  { %6504 = vmatpush1.bf16.msra.mxu0 %v9663_v2  ;;  %7320 = vmatpush1.bf16.msra.mxu1 %v9664_v3  ;;  %v9669_v6 = vld [vmem:[%s14642_s1 + $0x20] ss:$16 sps:$4 sm:$0xff]   ;;  %v9670_v7 = vld [vmem:[%s14642_s1 + $0x28] ss:$16 sps:$4 sm:$0xff]   ;;  %v9671_v8 = vld [vmem:[%s14642_s1 + $0x44] ss:$16 sps:$4 sm:$0xff]  }
   0x4   :  { %6505 = vmatprep.subr.bf16.mxu0 %v9665_v4  ;;  %7321 = vmatprep.subr.bf16.mxu1 %v9667_v5  ;;  %v9673_v9 = vld [vmem:[%s14642_s1 + $0x4c] ss:$16 sps:$4 sm:$0xff]   ;;  %v9675_v10 = vld [vmem:[%s14642_s1 + $0x40] ss:$16 sps:$4 sm:$0xff]   ;;  %v9676_v11 = vld [vmem:[%s14642_s1 + $0x48] ss:$16 sps:$4 sm:$0xff]  }
   0x5   :  { %v9677_v12 = vld [vmem:[%s14642_s1 + $0x64] ss:$16 sps:$4 sm:$0xff]   ;;  %v9679_v13 = vld [vmem:[%s14642_s1 + $0x6c] ss:$16 sps:$4 sm:$0xff]   ;;  %v9681_v14 = vld [vmem:[%s14642_s1 + $0x60] ss:$16 sps:$4 sm:$0xff]  }
   0x6   :  { %v9682_v15 = vld [vmem:[%s14642_s1 + $0x68] ss:$16 sps:$4 sm:$0xff]   ;;  %v9683_v16 = vld [vmem:[%s14642_s1 + $0x84] ss:$16 sps:$4 sm:$0xff]   ;;  %v9685_v17 = vld [vmem:[%s14642_s1 + $0x8c] ss:$16 sps:$4 sm:$0xff]  }
   0x7   :  { %6506 = vmatpush1.bf16.msra.mxu0 %v9669_v6  ;;  %7322 = vmatpush1.bf16.msra.mxu1 %v9670_v7  ;;  %v9687_v18 = vld [vmem:[%s14642_s1 + $0x80] ss:$16 sps:$4 sm:$0xff]   ;;  %v9688_v19 = vld [vmem:[%s14642_s1 + $0x88] ss:$16 sps:$4 sm:$0xff]   ;;  %v9689_v20 = vld [vmem:[%s14642_s1 + $0xa4] ss:$16 sps:$4 sm:$0xff]  }
   0x8   :  { %6507 = vmatprep.subr.bf16.mxu0 %v9671_v8  ;;  %7323 = vmatprep.subr.bf16.mxu1 %v9673_v9  ;;  %v9691_v21 = vld [vmem:[%s14642_s1 + $0xac] ss:$16 sps:$4 sm:$0xff]   ;;  %v9693_v22 = vld [vmem:[%s14642_s1 + $0xa0] ss:$16 sps:$4 sm:$0xff]   ;;  %v9694_v23 = vld [vmem:[%s14642_s1 + $0xa8] ss:$16 sps:$4 sm:$0xff]  }
   0x9   :  { %v9695_v24 = vld [vmem:[%s14642_s1 + $0xc4] ss:$16 sps:$4 sm:$0xff]   ;;  %v9697_v25 = vld [vmem:[%s14642_s1 + $0xcc] ss:$16 sps:$4 sm:$0xff]   ;;  %v9699_v26 = vld [vmem:[%s14642_s1 + $0xc0] ss:$16 sps:$4 sm:$0xff]  }
   0xa   :  { %v9700_v27 = vld [vmem:[%s14642_s1 + $0xc8] ss:$16 sps:$4 sm:$0xff]   ;;  %v9701_v28 = vld [vmem:[%s14642_s1 + $0xe4] ss:$16 sps:$4 sm:$0xff]   ;;  %v9703_v29 = vld [vmem:[%s14642_s1 + $0xec] ss:$16 sps:$4 sm:$0xff]  }
   0xb   :  { %6508 = vmatpush1.bf16.msra.mxu0 %v9675_v10  ;;  %7324 = vmatpush1.bf16.msra.mxu1 %v9676_v11  ;;  %v9705_v30 = vld [vmem:[%s14642_s1 + $0xe0] ss:$16 sps:$4 sm:$0xff]   ;;  %v9706_v31 = vld [vmem:[%s14642_s1 + $0xe8] ss:$16 sps:$4 sm:$0xff]   ;;  %v9707_v32 = vld [vmem:[%s14642_s1 + $0x104] ss:$16 sps:$4 sm:$0xff]  }
   0xc   :  { %6509 = vmatprep.subr.bf16.mxu0 %v9677_v12  ;;  %7325 = vmatprep.subr.bf16.mxu1 %v9679_v13  ;;  %v9709_v33 = vld [vmem:[%s14642_s1 + $0x10c] ss:$16 sps:$4 sm:$0xff]   ;;  %v9711_v34 = vld [vmem:[%s14642_s1 + $0x100] ss:$16 sps:$4 sm:$0xff]   ;;  %v9712_v35 = vld [vmem:[%s14642_s1 + $0x108] ss:$16 sps:$4 sm:$0xff]  }
   0xd   :  { %v9713_v36 = vld [vmem:[%s14642_s1 + $0x124] ss:$16 sps:$4 sm:$0xff]   ;;  %v9715_v37 = vld [vmem:[%s14642_s1 + $0x12c] ss:$16 sps:$4 sm:$0xff]   ;;  %v9717_v38 = vld [vmem:[%s14642_s1 + $0x120] ss:$16 sps:$4 sm:$0xff]  }
   0xe   :  { %v9718_v39 = vld [vmem:[%s14642_s1 + $0x128] ss:$16 sps:$4 sm:$0xff]   ;;  %v9719_v40 = vld [vmem:[%s14642_s1 + $0x144] ss:$16 sps:$4 sm:$0xff]   ;;  %v9721_v41 = vld [vmem:[%s14642_s1 + $0x14c] ss:$16 sps:$4 sm:$0xff]  }
   0xf   :  { %6510 = vmatpush1.bf16.msra.mxu0 %v9681_v14  ;;  %7326 = vmatpush1.bf16.msra.mxu1 %v9682_v15  ;;  %v9723_v42 = vld [vmem:[%s14642_s1 + $0x140] ss:$16 sps:$4 sm:$0xff]   ;;  %v9724_v43 = vld [vmem:[%s14642_s1 + $0x148] ss:$16 sps:$4 sm:$0xff]   ;;  %v9725_v44 = vld [vmem:[%s14642_s1 + $0x164] ss:$16 sps:$4 sm:$0xff]  }
  0x10   :  { %6511 = vmatprep.subr.bf16.mxu0 %v9683_v16  ;;  %7327 = vmatprep.subr.bf16.mxu1 %v9685_v17  ;;  %v9727_v45 = vld [vmem:[%s14642_s1 + $0x16c] ss:$16 sps:$4 sm:$0xff]   ;;  %v17_v46 = vld [vmem:[%s14643_s0] sm:$0xff]  ;;  %v9730_v49 = vld [vmem:[%s14642_s1 + $0x168] ss:$16 sps:$4 sm:$0xff]  }
  0x11   :  { %v33_v47 = vld [vmem:[%s14643_s0 + $0x80] sm:$0xff]  ;;  %v9733_v52 = vld [vmem:[%s14642_s1 + $0x18c] ss:$16 sps:$4 sm:$0xff]   ;;  %v9736_v54 = vld [vmem:[%s14642_s1 + $0x188] ss:$16 sps:$4 sm:$0xff]  }
  0x12   :  { %v9729_v48 = vld [vmem:[%s14642_s1 + $0x160] ss:$16 sps:$4 sm:$0xff]   ;;  %v8308_v50 = vcombine.high %v17_v46, %v33_v47  ;;  %v9731_v51 = vld [vmem:[%s14642_s1 + $0x184] ss:$16 sps:$4 sm:$0xff]   ;;  %v9739_v56 = vld [vmem:[%s14642_s1 + $0x1ac] ss:$16 sps:$4 sm:$0xff]   ;;  %v8307_v5 = vcombine.low %v17_v46, %v33_v47 }
  0x13   :  { %6512 = vmatpush1.bf16.msra.mxu0 %v9687_v18  ;;  %7328 = vmatpush1.bf16.msra.mxu1 %v9688_v19  ;;  %v9735_v53 = vld [vmem:[%s14642_s1 + $0x180] ss:$16 sps:$4 sm:$0xff]   ;;  %v9737_v55 = vld [vmem:[%s14642_s1 + $0x1a4] ss:$16 sps:$4 sm:$0xff]   ;;  %v9742_v58 = vld [vmem:[%s14642_s1 + $0x1a8] ss:$16 sps:$4 sm:$0xff]  }
  0x14   :  { %6513 = vmatprep.subr.bf16.mxu0 %v9689_v20  ;;  %7329 = vmatprep.subr.bf16.mxu1 %v9691_v21  ;;  %v9741_v57 = vld [vmem:[%s14642_s1 + $0x1a0] ss:$16 sps:$4 sm:$0xff]   ;;  %v9743_v59 = vld [vmem:[%s14642_s1 + $0x1c4] ss:$16 sps:$4 sm:$0xff]   ;;  %v9745_v60 = vld [vmem:[%s14642_s1 + $0x1cc] ss:$16 sps:$4 sm:$0xff]  }
  0x15   :  { %6535 = vmatprep.mubr.bf16.mxu0 %v8308_v50  ;;  %7351 = vmatprep.mubr.bf16.mxu1 %v8308_v50  ;;  %v9747_v61 = vld [vmem:[%s14642_s1 + $0x1c0] ss:$16 sps:$4 sm:$0xff]   ;;  %v9748_v62 = vld [vmem:[%s14642_s1 + $0x1c8] ss:$16 sps:$4 sm:$0xff]   ;;  %v9749_v63 = vld [vmem:[%s14642_s1 + $0x1e4] ss:$16 sps:$4 sm:$0xff]  }
  0x16   :  { %v9751_v0 = vld [vmem:[%s14642_s1 + $0x1ec] ss:$16 sps:$4 sm:$0xff]   ;;  %v9753_v1 = vld [vmem:[%s14642_s1 + $0x1e0] ss:$16 sps:$4 sm:$0xff]   ;;  %v9754_v2 = vld [vmem:[%s14642_s1 + $0x1e8] ss:$16 sps:$4 sm:$0xff]  }
  0x17   :  { %6514 = vmatpush1.bf16.msra.mxu0 %v9693_v22  ;;  %7330 = vmatpush1.bf16.msra.mxu1 %v9694_v23  ;;  %v9757_v3 = vld [vmem:[%s14642_s1 + $0x204] ss:$16 sps:$4 sm:$0xff]   ;;  %v9760_v4 = vld [vmem:[%s14642_s1 + $0x20c] ss:$16 sps:$4 sm:$0xff]   ;;  %v9755_v6 = vld [vmem:[%s14642_s1 + $0x200] ss:$16 sps:$4 sm:$0xff]  }
  0x18   :  { %6515 = vmatprep.subr.bf16.mxu0 %v9695_v24  ;;  %7331 = vmatprep.subr.bf16.mxu1 %v9697_v25  ;;  %v9758_v7 = vld [vmem:[%s14642_s1 + $0x208] ss:$16 sps:$4 sm:$0xff]   ;;  %v9763_v8 = vld [vmem:[%s14642_s1 + $0x224] ss:$16 sps:$4 sm:$0xff]   ;;  %v9766_v9 = vld [vmem:[%s14642_s1 + $0x22c] ss:$16 sps:$4 sm:$0xff]  }
  0x19   :  { %v9761_v10 = vld [vmem:[%s14642_s1 + $0x220] ss:$16 sps:$4 sm:$0xff]   ;;  %v9764_v11 = vld [vmem:[%s14642_s1 + $0x228] ss:$16 sps:$4 sm:$0xff]   ;;  %v9769_v12 = vld [vmem:[%s14642_s1 + $0x244] ss:$16 sps:$4 sm:$0xff]  }
  0x1a   :  { %v9772_v13 = vld [vmem:[%s14642_s1 + $0x24c] ss:$16 sps:$4 sm:$0xff]   ;;  %v9767_v14 = vld [vmem:[%s14642_s1 + $0x240] ss:$16 sps:$4 sm:$0xff]   ;;  %v9770_v15 = vld [vmem:[%s14642_s1 + $0x248] ss:$16 sps:$4 sm:$0xff]  }
  0x1b   :  { %6516 = vmatpush1.bf16.msra.mxu0 %v9699_v26  ;;  %7332 = vmatpush1.bf16.msra.mxu1 %v9700_v27  ;;  %v9775_v16 = vld [vmem:[%s14642_s1 + $0x264] ss:$16 sps:$4 sm:$0xff]   ;;  %v9778_v17 = vld [vmem:[%s14642_s1 + $0x26c] ss:$16 sps:$4 sm:$0xff]   ;;  %v9773_v18 = vld [vmem:[%s14642_s1 + $0x260] ss:$16 sps:$4 sm:$0xff]  }
  0x1c   :  { %6517 = vmatprep.subr.bf16.mxu0 %v9701_v28  ;;  %7333 = vmatprep.subr.bf16.mxu1 %v9703_v29  ;;  %v9776_v19 = vld [vmem:[%s14642_s1 + $0x268] ss:$16 sps:$4 sm:$0xff]   ;;  %v9781_v20 = vld [vmem:[%s14642_s1 + $0x284] ss:$16 sps:$4 sm:$0xff]   ;;  %v9784_v21 = vld [vmem:[%s14642_s1 + $0x28c] ss:$16 sps:$4 sm:$0xff]  }
  0x1d   :  { %v9779_v22 = vld [vmem:[%s14642_s1 + $0x280] ss:$16 sps:$4 sm:$0xff]   ;;  %v9782_v23 = vld [vmem:[%s14642_s1 + $0x288] ss:$16 sps:$4 sm:$0xff]   ;;  %v9787_v24 = vld [vmem:[%s14642_s1 + $0x2a4] ss:$16 sps:$4 sm:$0xff]  }
  0x1e   :  { %v49_v25 = vld [vmem:[%s14643_s0 + $0x100] sm:$0xff]  ;;  %v9790_v26 = vld [vmem:[%s14642_s1 + $0x2ac] ss:$16 sps:$4 sm:$0xff]  }
  0x1f   :  { %6518 = vmatpush1.bf16.msra.mxu0 %v9705_v30  ;;  %7334 = vmatpush1.bf16.msra.mxu1 %v9706_v31  ;;  %v8340_v27 = vcombine.high %v49_v25, %v49_v25  ;;  %v8339_v28 = vcombine.low %v49_v25, %v49_v25  ;;  %v9785_v29 = vld [vmem:[%s14642_s1 + $0x2a0] ss:$16 sps:$4 sm:$0xff]   ;;  %v9788_v30 = vld [vmem:[%s14642_s1 + $0x2a8] ss:$16 sps:$4 sm:$0xff]   ;;  %v9793_v31 = vld [vmem:[%s14642_s1 + $0x2c4] ss:$16 sps:$4 sm:$0xff]  }
  0x20   :  { %6519 = vmatprep.subr.bf16.mxu0 %v9707_v32  ;;  %7335 = vmatprep.subr.bf16.mxu1 %v9709_v33  ;;  %v9796_v32 = vld [vmem:[%s14642_s1 + $0x2cc] ss:$16 sps:$4 sm:$0xff]   ;;  %v9811_v46 = vld [vmem:[%s14642_s1 + $0x324] ss:$16 sps:$4 sm:$0xff]  }
  0x21   :  { %v11539_v33 = vld [vmem:[%s14643_s0 + $0x8] sm:$0xff]  ;;  %v9817_v50 = vld [vmem:[%s14642_s1 + $0x344] ss:$16 sps:$4 sm:$0xff]  }
  0x22   :  { %v9814_v47 = vld [vmem:[%s14642_s1 + $0x32c] ss:$16 sps:$4 sm:$0xff]  }
  0x23   :  { %6520 = vmatpush1.bf16.msra.mxu0 %v9711_v34  ;;  %7336 = vmatpush1.bf16.msra.mxu1 %v9712_v35  ;;  %v11544_v34 = vld [vmem:[%s14643_s0 + $0x88] sm:$0xff]  ;;  %v9791_v35 = vld [vmem:[%s14642_s1 + $0x2c0] ss:$16 sps:$4 sm:$0xff]  }
  0x24   :  { %6521 = vmatprep.subr.bf16.mxu0 %v9713_v36  ;;  %7337 = vmatprep.subr.bf16.mxu1 %v9715_v37  ;;  %v8310_v36 = vcombine.high %v11539_v33, %v11544_v34  ;;  %v9794_v37 = vld [vmem:[%s14642_s1 + $0x2c8] ss:$16 sps:$4 sm:$0xff]  }
  0x27   :  { %6522 = vmatpush1.bf16.msra.mxu0 %v9717_v38  ;;  %7338 = vmatpush1.bf16.msra.mxu1 %v9718_v39  ;;  %v9799_v38 = vld [vmem:[%s14642_s1 + $0x2e4] ss:$16 sps:$4 sm:$0xff]   ;;  %v9802_v39 = vld [vmem:[%s14642_s1 + $0x2ec] ss:$16 sps:$4 sm:$0xff]  }
  0x28   :  { %6523 = vmatprep.subr.bf16.mxu0 %v9719_v40  ;;  %7339 = vmatprep.subr.bf16.mxu1 %v9721_v41  ;;  %v9797_v40 = vld [vmem:[%s14642_s1 + $0x2e0] ss:$16 sps:$4 sm:$0xff]   ;;  %v9800_v41 = vld [vmem:[%s14642_s1 + $0x2e8] ss:$16 sps:$4 sm:$0xff]  }
  0x2b   :  { %6524 = vmatpush1.bf16.msra.mxu0 %v9723_v42  ;;  %7340 = vmatpush1.bf16.msra.mxu1 %v9724_v43  ;;  %v9805_v42 = vld [vmem:[%s14642_s1 + $0x304] ss:$16 sps:$4 sm:$0xff]   ;;  %v9808_v43 = vld [vmem:[%s14642_s1 + $0x30c] ss:$16 sps:$4 sm:$0xff]  }
  0x2c   :  { %6525 = vmatprep.subr.bf16.mxu0 %v9725_v44  ;;  %7341 = vmatprep.subr.bf16.mxu1 %v9727_v45  ;;  %v9803_v44 = vld [vmem:[%s14642_s1 + $0x300] ss:$16 sps:$4 sm:$0xff]   ;;  %v9806_v45 = vld [vmem:[%s14642_s1 + $0x308] ss:$16 sps:$4 sm:$0xff]  }
  0x2f   :  { %6526 = vmatpush1.bf16.msra.mxu0 %v9729_v48  ;;  %7342 = vmatpush1.bf16.msra.mxu1 %v9730_v49  ;;  %v9809_v48 = vld [vmem:[%s14642_s1 + $0x320] ss:$16 sps:$4 sm:$0xff]   ;;  %v9812_v49 = vld [vmem:[%s14642_s1 + $0x328] ss:$16 sps:$4 sm:$0xff]  }
  0x30   :  { %6527 = vmatprep.subr.bf16.mxu0 %v9731_v51  ;;  %7343 = vmatprep.subr.bf16.mxu1 %v9733_v52  ;;  %v9820_v51 = vld [vmem:[%s14642_s1 + $0x34c] ss:$16 sps:$4 sm:$0xff]   ;;  %v9815_v52 = vld [vmem:[%s14642_s1 + $0x340] ss:$16 sps:$4 sm:$0xff]  }
  0x33   :  { %6528 = vmatpush1.bf16.msra.mxu0 %v9735_v53  ;;  %7344 = vmatpush1.bf16.msra.mxu1 %v9736_v54  ;;  %v9818_v53 = vld [vmem:[%s14642_s1 + $0x348] ss:$16 sps:$4 sm:$0xff]   ;;  %v9823_v54 = vld [vmem:[%s14642_s1 + $0x364] ss:$16 sps:$4 sm:$0xff]  }
  0x34   :  { %6529 = vmatprep.subr.bf16.mxu0 %v9737_v55  ;;  %7345 = vmatprep.subr.bf16.mxu1 %v9739_v56  ;;  %v9826_v55 = vld [vmem:[%s14642_s1 + $0x36c] ss:$16 sps:$4 sm:$0xff]   ;;  %v9821_v56 = vld [vmem:[%s14642_s1 + $0x360] ss:$16 sps:$4 sm:$0xff]  }
  0x37   :  { %6530 = vmatpush1.bf16.msra.mxu0 %v9741_v57  ;;  %7346 = vmatpush1.bf16.msra.mxu1 %v9742_v58  ;;  %v9824_v57 = vld [vmem:[%s14642_s1 + $0x368] ss:$16 sps:$4 sm:$0xff]   ;;  %v9829_v58 = vld [vmem:[%s14642_s1 + $0x384] ss:$16 sps:$4 sm:$0xff]  }
  0x38   :  { %6531 = vmatprep.subr.bf16.mxu0 %v9743_v59  ;;  %7347 = vmatprep.subr.bf16.mxu1 %v9745_v60  ;;  %v9832_v59 = vld [vmem:[%s14642_s1 + $0x38c] ss:$16 sps:$4 sm:$0xff]   ;;  %v9827_v60 = vld [vmem:[%s14642_s1 + $0x380] ss:$16 sps:$4 sm:$0xff]  }
  0x3b   :  { %6532 = vmatpush1.bf16.msra.mxu0 %v9747_v61  ;;  %7348 = vmatpush1.bf16.msra.mxu1 %v9748_v62  ;;  %v9830_v61 = vld [vmem:[%s14642_s1 + $0x388] ss:$16 sps:$4 sm:$0xff]   ;;  %v9835_v62 = vld [vmem:[%s14642_s1 + $0x3a4] ss:$16 sps:$4 sm:$0xff]  }
  0x3c   :  { %6533 = vmatprep.subr.bf16.mxu0 %v9749_v63  ;;  %7349 = vmatprep.subr.bf16.mxu1 %v9751_v0  ;;  %v9838_v63 = vld [vmem:[%s14642_s1 + $0x3ac] ss:$16 sps:$4 sm:$0xff]   ;;  %v9833_v0 = vld [vmem:[%s14642_s1 + $0x3a0] ss:$16 sps:$4 sm:$0xff]  }
  0x3f   :  { %6534 = vmatpush1.bf16.msra.mxu0 %v9753_v1  ;;  %7350 = vmatpush1.bf16.msra.mxu1 %v9754_v2  ;;  %v9836_v1 = vld [vmem:[%s14642_s1 + $0x3a8] ss:$16 sps:$4 sm:$0xff]   ;;  %v9842_v2 = vld [vmem:[%s14642_s1 + $0x3c4] ss:$16 sps:$4 sm:$0xff]  }
  0x40   :  { %6554 = vmatprep.subr.bf16.mxu0 %v9757_v3  ;;  %7370 = vmatprep.subr.bf16.mxu1 %v9760_v4  ;;  %v9845_v3 = vld [vmem:[%s14642_s1 + $0x3cc] ss:$16 sps:$4 sm:$0xff]   ;;  %v9840_v4 = vld [vmem:[%s14642_s1 + $0x3c0] ss:$16 sps:$4 sm:$0xff]  }
  0x42   :  { %6536 = vmatmul.mubr.bf16.vlgmr.msra.gmra.mrb[0].mxu0 %v8307_v5  ;;  %7352 = vmatmul.mubr.bf16.vlgmr.msra.gmra.mrb[0].mxu1 %v8307_v5  ;;  %v9843_v5 = vld [vmem:[%s14642_s1 + $0x3c8] ss:$16 sps:$4 sm:$0xff]  }
  0x43   :  { %6555 = vmatpush1.bf16.msra.mxu0 %v9755_v6  ;;  %7371 = vmatpush1.bf16.msra.mxu1 %v9758_v7  ;;  %v9849_v6 = vld [vmem:[%s14642_s1 + $0x3e4] ss:$16 sps:$4 sm:$0xff]   ;;  %v9852_v7 = vld [vmem:[%s14642_s1 + $0x3ec] ss:$16 sps:$4 sm:$0xff]  }
  0x44   :  { %6556 = vmatprep.subr.bf16.mxu0 %v9763_v8  ;;  %7372 = vmatprep.subr.bf16.mxu1 %v9766_v9  ;;  %v9847_v8 = vld [vmem:[%s14642_s1 + $0x3e0] ss:$16 sps:$4 sm:$0xff]   ;;  %v9850_v9 = vld [vmem:[%s14642_s1 + $0x3e8] ss:$16 sps:$4 sm:$0xff]  }
  0x45   :  { %6545 = vmatprep.mubr.bf16.mxu0 %v8340_v27  ;;  %7361 = vmatprep.mubr.bf16.mxu1 %v8340_v27  ;;  %v11711_v27 = vld [vmem:[%s14643_s0 + $0x90] sm:$0xff] }
  0x47   :  { %6557 = vmatpush1.bf16.msra.mxu0 %v9761_v10  ;;  %7373 = vmatpush1.bf16.msra.mxu1 %v9764_v11  ;;  %v9855_v10 = vld [vmem:[%s14642_s1 + $0x404] ss:$16 sps:$4 sm:$0xff]   ;;  %v9858_v11 = vld [vmem:[%s14642_s1 + $0x40c] ss:$16 sps:$4 sm:$0xff]  }
  0x48   :  { %6558 = vmatprep.subr.bf16.mxu0 %v9769_v12  ;;  %7374 = vmatprep.subr.bf16.mxu1 %v9772_v13  ;;  %v8309_v12 = vcombine.low %v11539_v33, %v11544_v34  ;;  %v50_v13 = vld [vmem:[%s14643_s0 + $0x108] sm:$0xff]  ;;  %v9879_v33 = vld [vmem:[%s14642_s1 + $0x484] ss:$16 sps:$4 sm:$0xff]  }
  0x49   :  { %v8341_v25 = vcombine.low %v50_v13, %v50_v13  ;;  %v9882_v34 = vld [vmem:[%s14642_s1 + $0x48c] ss:$16 sps:$4 sm:$0xff]  }
  0x4a   :  { %6546 = vmatmul.mubr.bf16.gmra.mrb[4].mxu0 %v8339_v28  ;;  %7362 = vmatmul.mubr.bf16.gmra.mrb[4].mxu1 %v8339_v28  ;;  %v9873_v28 = vld [vmem:[%s14642_s1 + $0x464] ss:$16 sps:$4 sm:$0xff]  }
  0x4b   :  { %6559 = vmatpush1.bf16.msra.mxu0 %v9767_v14  ;;  %7375 = vmatpush1.bf16.msra.mxu1 %v9770_v15  ;;  %v9853_v14 = vld [vmem:[%s14642_s1 + $0x400] ss:$16 sps:$4 sm:$0xff]   ;;  %v9856_v15 = vld [vmem:[%s14642_s1 + $0x408] ss:$16 sps:$4 sm:$0xff]  }
  0x4c   :  { %6560 = vmatprep.subr.bf16.mxu0 %v9775_v16  ;;  %7376 = vmatprep.subr.bf16.mxu1 %v9778_v17  ;;  %v9861_v16 = vld [vmem:[%s14642_s1 + $0x424] ss:$16 sps:$4 sm:$0xff]   ;;  %v9864_v17 = vld [vmem:[%s14642_s1 + $0x42c] ss:$16 sps:$4 sm:$0xff]  }
  0x4d   :  { %6586 = vmatprep.mubr.bf16.mxu0 %v8310_v36  ;;  %7402 = vmatprep.mubr.bf16.mxu1 %v8310_v36  ;;  %v9880_v36 = vld [vmem:[%s14642_s1 + $0x488] ss:$16 sps:$4 sm:$0xff]  }
  0x4f   :  { %6561 = vmatpush1.bf16.msra.mxu0 %v9773_v18  ;;  %7377 = vmatpush1.bf16.msra.mxu1 %v9776_v19  ;;  %v8342_v18 = vcombine.high %v50_v13, %v50_v13  ;;  %v9859_v19 = vld [vmem:[%s14642_s1 + $0x420] ss:$16 sps:$4 sm:$0xff]   ;;  %v9947_v13 = vld [vmem:[%s14642_s1 + $0x5e4] ss:$16 sps:$4 sm:$0xff]  }
  0x50   :  { %6562 = vmatprep.subr.bf16.mxu0 %v9781_v20  ;;  %7378 = vmatprep.subr.bf16.mxu1 %v9784_v21  ;;  %v9862_v20 = vld [vmem:[%s14642_s1 + $0x428] ss:$16 sps:$4 sm:$0xff]   ;;  %v9867_v21 = vld [vmem:[%s14642_s1 + $0x444] ss:$16 sps:$4 sm:$0xff]  }
  0x53   :  { %6563 = vmatpush1.bf16.msra.mxu0 %v9779_v22  ;;  %7379 = vmatpush1.bf16.msra.mxu1 %v9782_v23  ;;  %v9870_v22 = vld [vmem:[%s14642_s1 + $0x44c] ss:$16 sps:$4 sm:$0xff]   ;;  %v9865_v23 = vld [vmem:[%s14642_s1 + $0x440] ss:$16 sps:$4 sm:$0xff]  }
  0x54   :  { %6564 = vmatprep.subr.bf16.mxu0 %v9787_v24  ;;  %7380 = vmatprep.subr.bf16.mxu1 %v9790_v26  ;;  %v9868_v24 = vld [vmem:[%s14642_s1 + $0x448] ss:$16 sps:$4 sm:$0xff]   ;;  %v11706_v26 = vld [vmem:[%s14643_s0 + $0x10] sm:$0xff] }
  0x57   :  { %6565 = vmatpush1.bf16.msra.mxu0 %v9785_v29  ;;  %7381 = vmatpush1.bf16.msra.mxu1 %v9788_v30  ;;  %v9876_v29 = vld [vmem:[%s14642_s1 + $0x46c] ss:$16 sps:$4 sm:$0xff]   ;;  %v8312_v30 = vcombine.high %v11706_v26, %v11711_v27 }
  0x58   :  { %6566 = vmatprep.subr.bf16.mxu0 %v9793_v31  ;;  %7382 = vmatprep.subr.bf16.mxu1 %v9796_v32  ;;  %v9871_v31 = vld [vmem:[%s14642_s1 + $0x460] ss:$16 sps:$4 sm:$0xff]   ;;  %v9874_v32 = vld [vmem:[%s14642_s1 + $0x468] ss:$16 sps:$4 sm:$0xff]  }
  0x5b   :  { %6567 = vmatpush1.bf16.msra.mxu0 %v9791_v35  ;;  %7383 = vmatpush1.bf16.msra.mxu1 %v9794_v37  ;;  %v9877_v35 = vld [vmem:[%s14642_s1 + $0x480] ss:$16 sps:$4 sm:$0xff]   ;;  %v9885_v37 = vld [vmem:[%s14642_s1 + $0x4a4] ss:$16 sps:$4 sm:$0xff]  }
  0x5c   :  { %6568 = vmatprep.subr.bf16.mxu0 %v9799_v38  ;;  %7384 = vmatprep.subr.bf16.mxu1 %v9802_v39  ;;  %v9888_v38 = vld [vmem:[%s14642_s1 + $0x4ac] ss:$16 sps:$4 sm:$0xff]   ;;  %v9883_v39 = vld [vmem:[%s14642_s1 + $0x4a0] ss:$16 sps:$4 sm:$0xff]  }
  0x5f   :  { %6569 = vmatpush1.bf16.msra.mxu0 %v9797_v40  ;;  %7385 = vmatpush1.bf16.msra.mxu1 %v9800_v41  ;;  %v9886_v40 = vld [vmem:[%s14642_s1 + $0x4a8] ss:$16 sps:$4 sm:$0xff]   ;;  %v9891_v41 = vld [vmem:[%s14642_s1 + $0x4c4] ss:$16 sps:$4 sm:$0xff]  }
  0x60   :  { %6570 = vmatprep.subr.bf16.mxu0 %v9805_v42  ;;  %7386 = vmatprep.subr.bf16.mxu1 %v9808_v43  ;;  %v9894_v42 = vld [vmem:[%s14642_s1 + $0x4cc] ss:$16 sps:$4 sm:$0xff]   ;;  %v9889_v43 = vld [vmem:[%s14642_s1 + $0x4c0] ss:$16 sps:$4 sm:$0xff]  }
  0x63   :  { %6571 = vmatpush1.bf16.msra.mxu0 %v9803_v44  ;;  %7387 = vmatpush1.bf16.msra.mxu1 %v9806_v45  ;;  %v9892_v44 = vld [vmem:[%s14642_s1 + $0x4c8] ss:$16 sps:$4 sm:$0xff]   ;;  %v9897_v45 = vld [vmem:[%s14642_s1 + $0x4e4] ss:$16 sps:$4 sm:$0xff]  }
  0x64   :  { %6572 = vmatprep.subr.bf16.mxu0 %v9811_v46  ;;  %7388 = vmatprep.subr.bf16.mxu1 %v9814_v47  ;;  %v9900_v46 = vld [vmem:[%s14642_s1 + $0x4ec] ss:$16 sps:$4 sm:$0xff]   ;;  %v9895_v47 = vld [vmem:[%s14642_s1 + $0x4e0] ss:$16 sps:$4 sm:$0xff]  }
  0x67   :  { %6573 = vmatpush1.bf16.msra.mxu0 %v9809_v48  ;;  %7389 = vmatpush1.bf16.msra.mxu1 %v9812_v49  ;;  %v9898_v48 = vld [vmem:[%s14642_s1 + $0x4e8] ss:$16 sps:$4 sm:$0xff]   ;;  %v9903_v49 = vld [vmem:[%s14642_s1 + $0x504] ss:$16 sps:$4 sm:$0xff]  }
  0x68   :  { %6574 = vmatprep.subr.bf16.mxu0 %v9817_v50  ;;  %7390 = vmatprep.subr.bf16.mxu1 %v9820_v51  ;;  %v9906_v50 = vld [vmem:[%s14642_s1 + $0x50c] ss:$16 sps:$4 sm:$0xff]   ;;  %v9901_v51 = vld [vmem:[%s14642_s1 + $0x500] ss:$16 sps:$4 sm:$0xff]  }
  0x6b   :  { %6575 = vmatpush1.bf16.msra.mxu0 %v9815_v52  ;;  %7391 = vmatpush1.bf16.msra.mxu1 %v9818_v53  ;;  %v9904_v52 = vld [vmem:[%s14642_s1 + $0x508] ss:$16 sps:$4 sm:$0xff]   ;;  %v9909_v53 = vld [vmem:[%s14642_s1 + $0x524] ss:$16 sps:$4 sm:$0xff]  }
  0x6c   :  { %6576 = vmatprep.subr.bf16.mxu0 %v9823_v54  ;;  %7392 = vmatprep.subr.bf16.mxu1 %v9826_v55  ;;  %v9912_v54 = vld [vmem:[%s14642_s1 + $0x52c] ss:$16 sps:$4 sm:$0xff]   ;;  %v9907_v55 = vld [vmem:[%s14642_s1 + $0x520] ss:$16 sps:$4 sm:$0xff]  }
  0x6f   :  { %6577 = vmatpush1.bf16.msra.mxu0 %v9821_v56  ;;  %7393 = vmatpush1.bf16.msra.mxu1 %v9824_v57  ;;  %v9910_v56 = vld [vmem:[%s14642_s1 + $0x528] ss:$16 sps:$4 sm:$0xff]   ;;  %v9915_v57 = vld [vmem:[%s14642_s1 + $0x544] ss:$16 sps:$4 sm:$0xff]  }
  0x70   :  { %6578 = vmatprep.subr.bf16.mxu0 %v9829_v58  ;;  %7394 = vmatprep.subr.bf16.mxu1 %v9832_v59  ;;  %v9918_v58 = vld [vmem:[%s14642_s1 + $0x54c] ss:$16 sps:$4 sm:$0xff]   ;;  %v9913_v59 = vld [vmem:[%s14642_s1 + $0x540] ss:$16 sps:$4 sm:$0xff]  }
  0x73   :  { %6579 = vmatpush1.bf16.msra.mxu0 %v9827_v60  ;;  %7395 = vmatpush1.bf16.msra.mxu1 %v9830_v61  ;;  %v9916_v60 = vld [vmem:[%s14642_s1 + $0x548] ss:$16 sps:$4 sm:$0xff]   ;;  %v9921_v61 = vld [vmem:[%s14642_s1 + $0x564] ss:$16 sps:$4 sm:$0xff]  }
  0x74   :  { %6580 = vmatprep.subr.bf16.mxu0 %v9835_v62  ;;  %7396 = vmatprep.subr.bf16.mxu1 %v9838_v63  ;;  %v9924_v62 = vld [vmem:[%s14642_s1 + $0x56c] ss:$16 sps:$4 sm:$0xff]   ;;  %v9919_v63 = vld [vmem:[%s14642_s1 + $0x560] ss:$16 sps:$4 sm:$0xff]  }
  0x77   :  { %6581 = vmatpush1.bf16.msra.mxu0 %v9833_v0  ;;  %7397 = vmatpush1.bf16.msra.mxu1 %v9836_v1  ;;  %v9922_v0 = vld [vmem:[%s14642_s1 + $0x568] ss:$16 sps:$4 sm:$0xff]   ;;  %v9927_v1 = vld [vmem:[%s14642_s1 + $0x584] ss:$16 sps:$4 sm:$0xff]  }
  0x78   :  { %6582 = vmatprep.subr.bf16.mxu0 %v9842_v2  ;;  %7398 = vmatprep.subr.bf16.mxu1 %v9845_v3  ;;  %v9930_v2 = vld [vmem:[%s14642_s1 + $0x58c] ss:$16 sps:$4 sm:$0xff]   ;;  %v9925_v3 = vld [vmem:[%s14642_s1 + $0x580] ss:$16 sps:$4 sm:$0xff]  }
  0x7b   :  { %6583 = vmatpush1.bf16.msra.mxu0 %v9840_v4  ;;  %7399 = vmatpush1.bf16.msra.mxu1 %v9843_v5  ;;  %v9928_v4 = vld [vmem:[%s14642_s1 + $0x588] ss:$16 sps:$4 sm:$0xff]   ;;  %v9933_v5 = vld [vmem:[%s14642_s1 + $0x5a4] ss:$16 sps:$4 sm:$0xff]  }
  0x7c   :  { %6584 = vmatprep.subr.bf16.mxu0 %v9849_v6  ;;  %7400 = vmatprep.subr.bf16.mxu1 %v9852_v7  ;;  %v9936_v6 = vld [vmem:[%s14642_s1 + $0x5ac] ss:$16 sps:$4 sm:$0xff]   ;;  %v9931_v7 = vld [vmem:[%s14642_s1 + $0x5a0] ss:$16 sps:$4 sm:$0xff]  }
  0x7f   :  { %6585 = vmatpush1.bf16.msra.mxu0 %v9847_v8  ;;  %7401 = vmatpush1.bf16.msra.mxu1 %v9850_v9  ;;  %v9934_v8 = vld [vmem:[%s14642_s1 + $0x5a8] ss:$16 sps:$4 sm:$0xff]   ;;  %v9940_v9 = vld [vmem:[%s14642_s1 + $0x5c4] ss:$16 sps:$4 sm:$0xff]  }
  0x80   :  { %6605 = vmatprep.subr.bf16.mxu0 %v9855_v10  ;;  %7421 = vmatprep.subr.bf16.mxu1 %v9858_v11  ;;  %v9943_v10 = vld [vmem:[%s14642_s1 + $0x5cc] ss:$16 sps:$4 sm:$0xff]   ;;  %v9938_v11 = vld [vmem:[%s14642_s1 + $0x5c0] ss:$16 sps:$4 sm:$0xff]  }
  0x82   :  { %6587 = vmatmul.mubr.bf16.vlgmr.msra.gmra.mrb[0].mxu0 %v8309_v12  ;;  %7403 = vmatmul.mubr.bf16.vlgmr.msra.gmra.mrb[0].mxu1 %v8309_v12  ;;  %v9941_v12 = vld [vmem:[%s14642_s1 + $0x5c8] ss:$16 sps:$4 sm:$0xff]  }
  0x83   :  { %6606 = vmatpush1.bf16.msra.mxu0 %v9853_v14  ;;  %7422 = vmatpush1.bf16.msra.mxu1 %v9856_v15  ;;  %v9950_v14 = vld [vmem:[%s14642_s1 + $0x5ec] ss:$16 sps:$4 sm:$0xff]   ;;  %v9945_v15 = vld [vmem:[%s14642_s1 + $0x5e0] ss:$16 sps:$4 sm:$0xff]  }
  0x84   :  { %6607 = vmatprep.subr.bf16.mxu0 %v9861_v16  ;;  %7423 = vmatprep.subr.bf16.mxu1 %v9864_v17  ;;  %v9948_v16 = vld [vmem:[%s14642_s1 + $0x5e8] ss:$16 sps:$4 sm:$0xff]   ;;  %v9953_v17 = vld [vmem:[%s14642_s1 + $0x604] ss:$16 sps:$4 sm:$0xff]  }
  0x85   :  { %6596 = vmatprep.mubr.bf16.mxu0 %v8342_v18  ;;  %7412 = vmatprep.mubr.bf16.mxu1 %v8342_v18  ;;  %v9956_v18 = vld [vmem:[%s14642_s1 + $0x60c] ss:$16 sps:$4 sm:$0xff]  }
  0x87   :  { %6608 = vmatpush1.bf16.msra.mxu0 %v9859_v19  ;;  %7424 = vmatpush1.bf16.msra.mxu1 %v9862_v20  ;;  %v8311_v19 = vcombine.low %v11706_v26, %v11711_v27  ;;  %v9951_v20 = vld [vmem:[%s14642_s1 + $0x600] ss:$16 sps:$4 sm:$0xff]   ;;  %v9960_v27 = vld [vmem:[%s14642_s1 + $0x628] ss:$16 sps:$4 sm:$0xff]  }
  0x88   :  { %6609 = vmatprep.subr.bf16.mxu0 %v9867_v21  ;;  %7425 = vmatprep.subr.bf16.mxu1 %v9870_v22  ;;  %v51_v21 = vld [vmem:[%s14643_s0 + $0x110] sm:$0xff]  ;;  %v9954_v22 = vld [vmem:[%s14642_s1 + $0x608] ss:$16 sps:$4 sm:$0xff]  }
  0x89   :  { %v9957_v26 = vld [vmem:[%s14642_s1 + $0x620] ss:$16 sps:$4 sm:$0xff]  }
  0x8a   :  { %6597 = vmatmul.mubr.bf16.gmra.mrb[4].mxu0 %v8341_v25  ;;  %7413 = vmatmul.mubr.bf16.gmra.mrb[4].mxu1 %v8341_v25  ;;  %v8344_v25 = vcombine.high %v51_v21, %v51_v21 }
  0x8b   :  { %6610 = vmatpush1.bf16.msra.mxu0 %v9865_v23  ;;  %7426 = vmatpush1.bf16.msra.mxu1 %v9868_v24  ;;  %v9959_v23 = vld [vmem:[%s14642_s1 + $0x624] ss:$16 sps:$4 sm:$0xff]   ;;  %v9962_v24 = vld [vmem:[%s14642_s1 + $0x62c] ss:$16 sps:$4 sm:$0xff]  }
  0x8c   :  { %6611 = vmatprep.subr.bf16.mxu0 %v9873_v28  ;;  %7427 = vmatprep.subr.bf16.mxu1 %v9876_v29  ;;  %v9965_v28 = vld [vmem:[%s14642_s1 + $0x644] ss:$16 sps:$4 sm:$0xff]   ;;  %v9968_v29 = vld [vmem:[%s14642_s1 + $0x64c] ss:$16 sps:$4 sm:$0xff]  }
  0x8d   :  { %6637 = vmatprep.mubr.bf16.mxu0 %v8312_v30  ;;  %7453 = vmatprep.mubr.bf16.mxu1 %v8312_v30  ;;  %v9963_v30 = vld [vmem:[%s14642_s1 + $0x640] ss:$16 sps:$4 sm:$0xff]  }
  0x8f   :  { %6612 = vmatpush1.bf16.msra.mxu0 %v9871_v31  ;;  %7428 = vmatpush1.bf16.msra.mxu1 %v9874_v32  ;;  %v8343_v31 = vcombine.low %v51_v21, %v51_v21  ;;  %v11912_v32 = vld [vmem:[%s14643_s0 + $0x18] sm:$0xff] }
  0x90   :  { %6613 = vmatprep.subr.bf16.mxu0 %v9879_v33  ;;  %7429 = vmatprep.subr.bf16.mxu1 %v9882_v34  ;;  %v11917_v33 = vld [vmem:[%s14643_s0 + $0x98] sm:$0xff] }
  0x91   :  { %v9966_v34 = vld [vmem:[%s14642_s1 + $0x648] ss:$16 sps:$4 sm:$0xff]   ;;  %v10048_v21 = vld [vmem:[%s14642_s1 + $0x7ec] ss:$16 sps:$4 sm:$0xff]  }
  0x93   :  { %6614 = vmatpush1.bf16.msra.mxu0 %v9877_v35  ;;  %7430 = vmatpush1.bf16.msra.mxu1 %v9880_v36  ;;  %v9971_v35 = vld [vmem:[%s14642_s1 + $0x664] ss:$16 sps:$4 sm:$0xff]   ;;  %v9974_v36 = vld [vmem:[%s14642_s1 + $0x66c] ss:$16 sps:$4 sm:$0xff]  }
  0x94   :  { %6615 = vmatprep.subr.bf16.mxu0 %v9885_v37  ;;  %7431 = vmatprep.subr.bf16.mxu1 %v9888_v38  ;;  %v8314_v37 = vcombine.high %v11912_v32, %v11917_v33  ;;  %v9969_v38 = vld [vmem:[%s14642_s1 + $0x660] ss:$16 sps:$4 sm:$0xff]  }
  0x97   :  { %6616 = vmatpush1.bf16.msra.mxu0 %v9883_v39  ;;  %7432 = vmatpush1.bf16.msra.mxu1 %v9886_v40  ;;  %v9972_v39 = vld [vmem:[%s14642_s1 + $0x668] ss:$16 sps:$4 sm:$0xff]   ;;  %v9977_v40 = vld [vmem:[%s14642_s1 + $0x684] ss:$16 sps:$4 sm:$0xff]  }
  0x98   :  { %6617 = vmatprep.subr.bf16.mxu0 %v9891_v41  ;;  %7433 = vmatprep.subr.bf16.mxu1 %v9894_v42  ;;  %v9980_v41 = vld [vmem:[%s14642_s1 + $0x68c] ss:$16 sps:$4 sm:$0xff]   ;;  %v9975_v42 = vld [vmem:[%s14642_s1 + $0x680] ss:$16 sps:$4 sm:$0xff]  }
  0x9b   :  { %6618 = vmatpush1.bf16.msra.mxu0 %v9889_v43  ;;  %7434 = vmatpush1.bf16.msra.mxu1 %v9892_v44  ;;  %v9978_v43 = vld [vmem:[%s14642_s1 + $0x688] ss:$16 sps:$4 sm:$0xff]   ;;  %v9983_v44 = vld [vmem:[%s14642_s1 + $0x6a4] ss:$16 sps:$4 sm:$0xff]  }
  0x9c   :  { %6619 = vmatprep.subr.bf16.mxu0 %v9897_v45  ;;  %7435 = vmatprep.subr.bf16.mxu1 %v9900_v46  ;;  %v9986_v45 = vld [vmem:[%s14642_s1 + $0x6ac] ss:$16 sps:$4 sm:$0xff]   ;;  %v9981_v46 = vld [vmem:[%s14642_s1 + $0x6a0] ss:$16 sps:$4 sm:$0xff]  }
  0x9f   :  { %6620 = vmatpush1.bf16.msra.mxu0 %v9895_v47  ;;  %7436 = vmatpush1.bf16.msra.mxu1 %v9898_v48  ;;  %v9984_v47 = vld [vmem:[%s14642_s1 + $0x6a8] ss:$16 sps:$4 sm:$0xff]   ;;  %v9989_v48 = vld [vmem:[%s14642_s1 + $0x6c4] ss:$16 sps:$4 sm:$0xff]  }
  0xa0   :  { %6621 = vmatprep.subr.bf16.mxu0 %v9903_v49  ;;  %7437 = vmatprep.subr.bf16.mxu1 %v9906_v50  ;;  %v9992_v49 = vld [vmem:[%s14642_s1 + $0x6cc] ss:$16 sps:$4 sm:$0xff]   ;;  %v9987_v50 = vld [vmem:[%s14642_s1 + $0x6c0] ss:$16 sps:$4 sm:$0xff]  }
  0xa3   :  { %6622 = vmatpush1.bf16.msra.mxu0 %v9901_v51  ;;  %7438 = vmatpush1.bf16.msra.mxu1 %v9904_v52  ;;  %v9990_v51 = vld [vmem:[%s14642_s1 + $0x6c8] ss:$16 sps:$4 sm:$0xff]   ;;  %v9995_v52 = vld [vmem:[%s14642_s1 + $0x6e4] ss:$16 sps:$4 sm:$0xff]  }
  0xa4   :  { %6623 = vmatprep.subr.bf16.mxu0 %v9909_v53  ;;  %7439 = vmatprep.subr.bf16.mxu1 %v9912_v54  ;;  %v9998_v53 = vld [vmem:[%s14642_s1 + $0x6ec] ss:$16 sps:$4 sm:$0xff]   ;;  %v9993_v54 = vld [vmem:[%s14642_s1 + $0x6e0] ss:$16 sps:$4 sm:$0xff]  }
  0xa7   :  { %6624 = vmatpush1.bf16.msra.mxu0 %v9907_v55  ;;  %7440 = vmatpush1.bf16.msra.mxu1 %v9910_v56  ;;  %v9996_v55 = vld [vmem:[%s14642_s1 + $0x6e8] ss:$16 sps:$4 sm:$0xff]   ;;  %v10001_v56 = vld [vmem:[%s14642_s1 + $0x704] ss:$16 sps:$4 sm:$0xff]  }
  0xa8   :  { %6625 = vmatprep.subr.bf16.mxu0 %v9915_v57  ;;  %7441 = vmatprep.subr.bf16.mxu1 %v9918_v58  ;;  %v10004_v57 = vld [vmem:[%s14642_s1 + $0x70c] ss:$16 sps:$4 sm:$0xff]   ;;  %v9999_v58 = vld [vmem:[%s14642_s1 + $0x700] ss:$16 sps:$4 sm:$0xff]  }
  0xab   :  { %6626 = vmatpush1.bf16.msra.mxu0 %v9913_v59  ;;  %7442 = vmatpush1.bf16.msra.mxu1 %v9916_v60  ;;  %v10002_v59 = vld [vmem:[%s14642_s1 + $0x708] ss:$16 sps:$4 sm:$0xff]   ;;  %v10007_v60 = vld [vmem:[%s14642_s1 + $0x724] ss:$16 sps:$4 sm:$0xff]  }
  0xac   :  { %6627 = vmatprep.subr.bf16.mxu0 %v9921_v61  ;;  %7443 = vmatprep.subr.bf16.mxu1 %v9924_v62  ;;  %v10010_v61 = vld [vmem:[%s14642_s1 + $0x72c] ss:$16 sps:$4 sm:$0xff]   ;;  %v10005_v62 = vld [vmem:[%s14642_s1 + $0x720] ss:$16 sps:$4 sm:$0xff]  }
  0xaf   :  { %6628 = vmatpush1.bf16.msra.mxu0 %v9919_v63  ;;  %7444 = vmatpush1.bf16.msra.mxu1 %v9922_v0  ;;  %v10008_v63 = vld [vmem:[%s14642_s1 + $0x728] ss:$16 sps:$4 sm:$0xff]   ;;  %v10013_v0 = vld [vmem:[%s14642_s1 + $0x744] ss:$16 sps:$4 sm:$0xff]  }
  0xb0   :  { %6629 = vmatprep.subr.bf16.mxu0 %v9927_v1  ;;  %7445 = vmatprep.subr.bf16.mxu1 %v9930_v2  ;;  %v10016_v1 = vld [vmem:[%s14642_s1 + $0x74c] ss:$16 sps:$4 sm:$0xff]   ;;  %v10011_v2 = vld [vmem:[%s14642_s1 + $0x740] ss:$16 sps:$4 sm:$0xff]  }
  0xb3   :  { %6630 = vmatpush1.bf16.msra.mxu0 %v9925_v3  ;;  %7446 = vmatpush1.bf16.msra.mxu1 %v9928_v4  ;;  %v10014_v3 = vld [vmem:[%s14642_s1 + $0x748] ss:$16 sps:$4 sm:$0xff]   ;;  %v10019_v4 = vld [vmem:[%s14642_s1 + $0x764] ss:$16 sps:$4 sm:$0xff]  }
  0xb4   :  { %6631 = vmatprep.subr.bf16.mxu0 %v9933_v5  ;;  %7447 = vmatprep.subr.bf16.mxu1 %v9936_v6  ;;  %v10022_v5 = vld [vmem:[%s14642_s1 + $0x76c] ss:$16 sps:$4 sm:$0xff]   ;;  %v10017_v6 = vld [vmem:[%s14642_s1 + $0x760] ss:$16 sps:$4 sm:$0xff]  }
  0xb7   :  { %6632 = vmatpush1.bf16.msra.mxu0 %v9931_v7  ;;  %7448 = vmatpush1.bf16.msra.mxu1 %v9934_v8  ;;  %v10020_v7 = vld [vmem:[%s14642_s1 + $0x768] ss:$16 sps:$4 sm:$0xff]   ;;  %v10025_v8 = vld [vmem:[%s14642_s1 + $0x784] ss:$16 sps:$4 sm:$0xff]  }
  0xb8   :  { %6633 = vmatprep.subr.bf16.mxu0 %v9940_v9  ;;  %7449 = vmatprep.subr.bf16.mxu1 %v9943_v10  ;;  %v10028_v9 = vld [vmem:[%s14642_s1 + $0x78c] ss:$16 sps:$4 sm:$0xff]   ;;  %v10023_v10 = vld [vmem:[%s14642_s1 + $0x780] ss:$16 sps:$4 sm:$0xff]  }
  0xbb   :  { %6634 = vmatpush1.bf16.msra.mxu0 %v9938_v11  ;;  %7450 = vmatpush1.bf16.msra.mxu1 %v9941_v12  ;;  %v10026_v11 = vld [vmem:[%s14642_s1 + $0x788] ss:$16 sps:$4 sm:$0xff]   ;;  %v10031_v12 = vld [vmem:[%s14642_s1 + $0x7a4] ss:$16 sps:$4 sm:$0xff]  }
  0xbc   :  { %6635 = vmatprep.subr.bf16.mxu0 %v9947_v13  ;;  %7451 = vmatprep.subr.bf16.mxu1 %v9950_v14  ;;  %v10034_v13 = vld [vmem:[%s14642_s1 + $0x7ac] ss:$16 sps:$4 sm:$0xff]   ;;  %v10029_v14 = vld [vmem:[%s14642_s1 + $0x7a0] ss:$16 sps:$4 sm:$0xff]  }
  0xbf   :  { %6636 = vmatpush1.bf16.msra.mxu0 %v9945_v15  ;;  %7452 = vmatpush1.bf16.msra.mxu1 %v9948_v16  ;;  %v10032_v15 = vld [vmem:[%s14642_s1 + $0x7a8] ss:$16 sps:$4 sm:$0xff]   ;;  %v10038_v16 = vld [vmem:[%s14642_s1 + $0x7c4] ss:$16 sps:$4 sm:$0xff]  }
  0xc0   :  { %6656 = vmatprep.subr.bf16.mxu0 %v9953_v17  ;;  %7472 = vmatprep.subr.bf16.mxu1 %v9956_v18  ;;  %v10041_v17 = vld [vmem:[%s14642_s1 + $0x7cc] ss:$16 sps:$4 sm:$0xff]   ;;  %v10036_v18 = vld [vmem:[%s14642_s1 + $0x7c0] ss:$16 sps:$4 sm:$0xff]  }
  0xc2   :  { %6638 = vmatmul.mubr.bf16.vlgmr.msra.gmra.mrb[0].mxu0 %v8311_v19  ;;  %7454 = vmatmul.mubr.bf16.vlgmr.msra.gmra.mrb[0].mxu1 %v8311_v19  ;;  %v10039_v19 = vld [vmem:[%s14642_s1 + $0x7c8] ss:$16 sps:$4 sm:$0xff]  }
  0xc3   :  { %6657 = vmatpush1.bf16.msra.mxu0 %v9951_v20  ;;  %7473 = vmatpush1.bf16.msra.mxu1 %v9954_v22  ;;  %v10045_v20 = vld [vmem:[%s14642_s1 + $0x7e4] ss:$16 sps:$4 sm:$0xff]   ;;  %v10043_v22 = vld [vmem:[%s14642_s1 + $0x7e0] ss:$16 sps:$4 sm:$0xff]  }
  0xc4   :  { %6658 = vmatprep.subr.bf16.mxu0 %v9959_v23  ;;  %7474 = vmatprep.subr.bf16.mxu1 %v9962_v24  ;;  %v10046_v23 = vld [vmem:[%s14642_s1 + $0x7e8] ss:$16 sps:$4 sm:$0xff]   ;;  %v10051_v24 = vld [vmem:[%s14642_s1 + $0x804] ss:$16 sps:$4 sm:$0xff]  }
  0xc5   :  { %6647 = vmatprep.mubr.bf16.mxu0 %v8344_v25  ;;  %7463 = vmatprep.mubr.bf16.mxu1 %v8344_v25  ;;  %v10054_v25 = vld [vmem:[%s14642_s1 + $0x80c] ss:$16 sps:$4 sm:$0xff]  }
  0xc7   :  { %6659 = vmatpush1.bf16.msra.mxu0 %v9957_v26  ;;  %7475 = vmatpush1.bf16.msra.mxu1 %v9960_v27  ;;  %v8313_v26 = vcombine.low %v11912_v32, %v11917_v33  ;;  %v10049_v27 = vld [vmem:[%s14642_s1 + $0x800] ss:$16 sps:$4 sm:$0xff]  }
  0xc8   :  { %6660 = vmatprep.subr.bf16.mxu0 %v9965_v28  ;;  %7476 = vmatprep.subr.bf16.mxu1 %v9968_v29  ;;  %v52_v28 = vld [vmem:[%s14643_s0 + $0x118] sm:$0xff]  ;;  %v10055_v33 = vld [vmem:[%s14642_s1 + $0x820] ss:$16 sps:$4 sm:$0xff]  }
  0xc9   :  { %v10052_v29 = vld [vmem:[%s14642_s1 + $0x808] ss:$16 sps:$4 sm:$0xff]   ;;  %v8346_v32 = vcombine.high %v52_v28, %v52_v28 }
  0xca   :  { %6648 = vmatmul.mubr.bf16.gmra.mrb[4].mxu0 %v8343_v31  ;;  %7464 = vmatmul.mubr.bf16.gmra.mrb[4].mxu1 %v8343_v31  ;;  %v10060_v31 = vld [vmem:[%s14642_s1 + $0x82c] ss:$16 sps:$4 sm:$0xff]  }
  0xcb   :  { %6661 = vmatpush1.bf16.msra.mxu0 %v9963_v30  ;;  %7477 = vmatpush1.bf16.msra.mxu1 %v9966_v34  ;;  %v10057_v30 = vld [vmem:[%s14642_s1 + $0x824] ss:$16 sps:$4 sm:$0xff]   ;;  %v10058_v34 = vld [vmem:[%s14642_s1 + $0x828] ss:$16 sps:$4 sm:$0xff]  }
  0xcc   :  { %6662 = vmatprep.subr.bf16.mxu0 %v9971_v35  ;;  %7478 = vmatprep.subr.bf16.mxu1 %v9974_v36  ;;  %v10063_v35 = vld [vmem:[%s14642_s1 + $0x844] ss:$16 sps:$4 sm:$0xff]   ;;  %v10066_v36 = vld [vmem:[%s14642_s1 + $0x84c] ss:$16 sps:$4 sm:$0xff]  }
  0xcd   :  { %6688 = vmatprep.mubr.bf16.mxu0 %v8314_v37  ;;  %7504 = vmatprep.mubr.bf16.mxu1 %v8314_v37  ;;  %v10061_v37 = vld [vmem:[%s14642_s1 + $0x840] ss:$16 sps:$4 sm:$0xff]  }
  0xcf   :  { %6663 = vmatpush1.bf16.msra.mxu0 %v9969_v38  ;;  %7479 = vmatpush1.bf16.msra.mxu1 %v9972_v39  ;;  %v12121_v38 = vld [vmem:[%s14643_s0 + $0x20] sm:$0xff]  ;;  %v8345_v39 = vcombine.low %v52_v28, %v52_v28  ;;  %v10146_v28 = vld [vmem:[%s14642_s1 + $0x9ec] ss:$16 sps:$4 sm:$0xff]  }
  0xd0   :  { %6664 = vmatprep.subr.bf16.mxu0 %v9977_v40  ;;  %7480 = vmatprep.subr.bf16.mxu1 %v9980_v41  ;;  %v12126_v40 = vld [vmem:[%s14643_s0 + $0xa0] sm:$0xff]  ;;  %v10064_v41 = vld [vmem:[%s14642_s1 + $0x848] ss:$16 sps:$4 sm:$0xff]  }
  0xd3   :  { %6665 = vmatpush1.bf16.msra.mxu0 %v9975_v42  ;;  %7481 = vmatpush1.bf16.msra.mxu1 %v9978_v43  ;;  %v10069_v42 = vld [vmem:[%s14642_s1 + $0x864] ss:$16 sps:$4 sm:$0xff]   ;;  %v10072_v43 = vld [vmem:[%s14642_s1 + $0x86c] ss:$16 sps:$4 sm:$0xff]  }
  0xd4   :  { %6666 = vmatprep.subr.bf16.mxu0 %v9983_v44  ;;  %7482 = vmatprep.subr.bf16.mxu1 %v9986_v45  ;;  %v8316_v44 = vcombine.high %v12121_v38, %v12126_v40  ;;  %v10067_v45 = vld [vmem:[%s14642_s1 + $0x860] ss:$16 sps:$4 sm:$0xff]  }
  0xd7   :  { %6667 = vmatpush1.bf16.msra.mxu0 %v9981_v46  ;;  %7483 = vmatpush1.bf16.msra.mxu1 %v9984_v47  ;;  %v10070_v46 = vld [vmem:[%s14642_s1 + $0x868] ss:$16 sps:$4 sm:$0xff]   ;;  %v10075_v47 = vld [vmem:[%s14642_s1 + $0x884] ss:$16 sps:$4 sm:$0xff]  }
  0xd8   :  { %6668 = vmatprep.subr.bf16.mxu0 %v9989_v48  ;;  %7484 = vmatprep.subr.bf16.mxu1 %v9992_v49  ;;  %v10078_v48 = vld [vmem:[%s14642_s1 + $0x88c] ss:$16 sps:$4 sm:$0xff]   ;;  %v10073_v49 = vld [vmem:[%s14642_s1 + $0x880] ss:$16 sps:$4 sm:$0xff]  }
  0xdb   :  { %6669 = vmatpush1.bf16.msra.mxu0 %v9987_v50  ;;  %7485 = vmatpush1.bf16.msra.mxu1 %v9990_v51  ;;  %v10076_v50 = vld [vmem:[%s14642_s1 + $0x888] ss:$16 sps:$4 sm:$0xff]   ;;  %v10081_v51 = vld [vmem:[%s14642_s1 + $0x8a4] ss:$16 sps:$4 sm:$0xff]  }
  0xdc   :  { %6670 = vmatprep.subr.bf16.mxu0 %v9995_v52  ;;  %7486 = vmatprep.subr.bf16.mxu1 %v9998_v53  ;;  %v10084_v52 = vld [vmem:[%s14642_s1 + $0x8ac] ss:$16 sps:$4 sm:$0xff]   ;;  %v10079_v53 = vld [vmem:[%s14642_s1 + $0x8a0] ss:$16 sps:$4 sm:$0xff]  }
  0xdf   :  { %6671 = vmatpush1.bf16.msra.mxu0 %v9993_v54  ;;  %7487 = vmatpush1.bf16.msra.mxu1 %v9996_v55  ;;  %v10082_v54 = vld [vmem:[%s14642_s1 + $0x8a8] ss:$16 sps:$4 sm:$0xff]   ;;  %v10087_v55 = vld [vmem:[%s14642_s1 + $0x8c4] ss:$16 sps:$4 sm:$0xff]  }
  0xe0   :  { %6672 = vmatprep.subr.bf16.mxu0 %v10001_v56  ;;  %7488 = vmatprep.subr.bf16.mxu1 %v10004_v57  ;;  %v10090_v56 = vld [vmem:[%s14642_s1 + $0x8cc] ss:$16 sps:$4 sm:$0xff]   ;;  %v10085_v57 = vld [vmem:[%s14642_s1 + $0x8c0] ss:$16 sps:$4 sm:$0xff]  }
  0xe3   :  { %6673 = vmatpush1.bf16.msra.mxu0 %v9999_v58  ;;  %7489 = vmatpush1.bf16.msra.mxu1 %v10002_v59  ;;  %v10088_v58 = vld [vmem:[%s14642_s1 + $0x8c8] ss:$16 sps:$4 sm:$0xff]   ;;  %v10093_v59 = vld [vmem:[%s14642_s1 + $0x8e4] ss:$16 sps:$4 sm:$0xff]  }
  0xe4   :  { %6674 = vmatprep.subr.bf16.mxu0 %v10007_v60  ;;  %7490 = vmatprep.subr.bf16.mxu1 %v10010_v61  ;;  %v10096_v60 = vld [vmem:[%s14642_s1 + $0x8ec] ss:$16 sps:$4 sm:$0xff]   ;;  %v10091_v61 = vld [vmem:[%s14642_s1 + $0x8e0] ss:$16 sps:$4 sm:$0xff]  }
  0xe7   :  { %6675 = vmatpush1.bf16.msra.mxu0 %v10005_v62  ;;  %7491 = vmatpush1.bf16.msra.mxu1 %v10008_v63  ;;  %v10094_v62 = vld [vmem:[%s14642_s1 + $0x8e8] ss:$16 sps:$4 sm:$0xff]   ;;  %v10099_v63 = vld [vmem:[%s14642_s1 + $0x904] ss:$16 sps:$4 sm:$0xff]  }
  0xe8   :  { %6676 = vmatprep.subr.bf16.mxu0 %v10013_v0  ;;  %7492 = vmatprep.subr.bf16.mxu1 %v10016_v1  ;;  %v10102_v0 = vld [vmem:[%s14642_s1 + $0x90c] ss:$16 sps:$4 sm:$0xff]   ;;  %v10097_v1 = vld [vmem:[%s14642_s1 + $0x900] ss:$16 sps:$4 sm:$0xff]  }
  0xeb   :  { %6677 = vmatpush1.bf16.msra.mxu0 %v10011_v2  ;;  %7493 = vmatpush1.bf16.msra.mxu1 %v10014_v3  ;;  %v10100_v2 = vld [vmem:[%s14642_s1 + $0x908] ss:$16 sps:$4 sm:$0xff]   ;;  %v10105_v3 = vld [vmem:[%s14642_s1 + $0x924] ss:$16 sps:$4 sm:$0xff]  }
  0xec   :  { %6678 = vmatprep.subr.bf16.mxu0 %v10019_v4  ;;  %7494 = vmatprep.subr.bf16.mxu1 %v10022_v5  ;;  %v10108_v4 = vld [vmem:[%s14642_s1 + $0x92c] ss:$16 sps:$4 sm:$0xff]   ;;  %v10103_v5 = vld [vmem:[%s14642_s1 + $0x920] ss:$16 sps:$4 sm:$0xff]  }
  0xef   :  { %6679 = vmatpush1.bf16.msra.mxu0 %v10017_v6  ;;  %7495 = vmatpush1.bf16.msra.mxu1 %v10020_v7  ;;  %v10106_v6 = vld [vmem:[%s14642_s1 + $0x928] ss:$16 sps:$4 sm:$0xff]   ;;  %v10111_v7 = vld [vmem:[%s14642_s1 + $0x944] ss:$16 sps:$4 sm:$0xff]  }
  0xf0   :  { %6680 = vmatprep.subr.bf16.mxu0 %v10025_v8  ;;  %7496 = vmatprep.subr.bf16.mxu1 %v10028_v9  ;;  %v10114_v8 = vld [vmem:[%s14642_s1 + $0x94c] ss:$16 sps:$4 sm:$0xff]   ;;  %v10109_v9 = vld [vmem:[%s14642_s1 + $0x940] ss:$16 sps:$4 sm:$0xff]  }
  0xf3   :  { %6681 = vmatpush1.bf16.msra.mxu0 %v10023_v10  ;;  %7497 = vmatpush1.bf16.msra.mxu1 %v10026_v11  ;;  %v10112_v10 = vld [vmem:[%s14642_s1 + $0x948] ss:$16 sps:$4 sm:$0xff]   ;;  %v10117_v11 = vld [vmem:[%s14642_s1 + $0x964] ss:$16 sps:$4 sm:$0xff]  }
  0xf4   :  { %6682 = vmatprep.subr.bf16.mxu0 %v10031_v12  ;;  %7498 = vmatprep.subr.bf16.mxu1 %v10034_v13  ;;  %v10120_v12 = vld [vmem:[%s14642_s1 + $0x96c] ss:$16 sps:$4 sm:$0xff]   ;;  %v10115_v13 = vld [vmem:[%s14642_s1 + $0x960] ss:$16 sps:$4 sm:$0xff]  }
  0xf7   :  { %6683 = vmatpush1.bf16.msra.mxu0 %v10029_v14  ;;  %7499 = vmatpush1.bf16.msra.mxu1 %v10032_v15  ;;  %v10118_v14 = vld [vmem:[%s14642_s1 + $0x968] ss:$16 sps:$4 sm:$0xff]   ;;  %v10123_v15 = vld [vmem:[%s14642_s1 + $0x984] ss:$16 sps:$4 sm:$0xff]  }
  0xf8   :  { %6684 = vmatprep.subr.bf16.mxu0 %v10038_v16  ;;  %7500 = vmatprep.subr.bf16.mxu1 %v10041_v17  ;;  %v10126_v16 = vld [vmem:[%s14642_s1 + $0x98c] ss:$16 sps:$4 sm:$0xff]   ;;  %v10121_v17 = vld [vmem:[%s14642_s1 + $0x980] ss:$16 sps:$4 sm:$0xff]  }
  0xfb   :  { %6685 = vmatpush1.bf16.msra.mxu0 %v10036_v18  ;;  %7501 = vmatpush1.bf16.msra.mxu1 %v10039_v19  ;;  %v10124_v18 = vld [vmem:[%s14642_s1 + $0x988] ss:$16 sps:$4 sm:$0xff]   ;;  %v10129_v19 = vld [vmem:[%s14642_s1 + $0x9a4] ss:$16 sps:$4 sm:$0xff]  }
  0xfc   :  { %6686 = vmatprep.subr.bf16.mxu0 %v10045_v20  ;;  %7502 = vmatprep.subr.bf16.mxu1 %v10048_v21  ;;  %v10132_v20 = vld [vmem:[%s14642_s1 + $0x9ac] ss:$16 sps:$4 sm:$0xff]   ;;  %v10127_v21 = vld [vmem:[%s14642_s1 + $0x9a0] ss:$16 sps:$4 sm:$0xff]  }
  0xff   :  { %6687 = vmatpush1.bf16.msra.mxu0 %v10043_v22  ;;  %7503 = vmatpush1.bf16.msra.mxu1 %v10046_v23  ;;  %v10130_v22 = vld [vmem:[%s14642_s1 + $0x9a8] ss:$16 sps:$4 sm:$0xff]   ;;  %v10136_v23 = vld [vmem:[%s14642_s1 + $0x9c4] ss:$16 sps:$4 sm:$0xff]  }
 0x100   :  { %6707 = vmatprep.subr.bf16.mxu0 %v10051_v24  ;;  %7523 = vmatprep.subr.bf16.mxu1 %v10054_v25  ;;  %v10139_v24 = vld [vmem:[%s14642_s1 + $0x9cc] ss:$16 sps:$4 sm:$0xff]   ;;  %v10134_v25 = vld [vmem:[%s14642_s1 + $0x9c0] ss:$16 sps:$4 sm:$0xff]  }
 0x102   :  { %6689 = vmatmul.mubr.bf16.vlgmr.msra.gmra.mrb[0].mxu0 %v8313_v26  ;;  %7505 = vmatmul.mubr.bf16.vlgmr.msra.gmra.mrb[0].mxu1 %v8313_v26  ;;  %v10137_v26 = vld [vmem:[%s14642_s1 + $0x9c8] ss:$16 sps:$4 sm:$0xff]  }
 0x103   :  { %6708 = vmatpush1.bf16.msra.mxu0 %v10049_v27  ;;  %7524 = vmatpush1.bf16.msra.mxu1 %v10052_v29  ;;  %v10143_v27 = vld [vmem:[%s14642_s1 + $0x9e4] ss:$16 sps:$4 sm:$0xff]   ;;  %v10141_v29 = vld [vmem:[%s14642_s1 + $0x9e0] ss:$16 sps:$4 sm:$0xff]  }
 0x104   :  { %6709 = vmatprep.subr.bf16.mxu0 %v10057_v30  ;;  %7525 = vmatprep.subr.bf16.mxu1 %v10060_v31  ;;  %v10144_v30 = vld [vmem:[%s14642_s1 + $0x9e8] ss:$16 sps:$4 sm:$0xff]   ;;  %v10149_v31 = vld [vmem:[%s14642_s1 + $0xa04] ss:$16 sps:$4 sm:$0xff]  }
 0x105   :  { %6698 = vmatprep.mubr.bf16.mxu0 %v8346_v32  ;;  %7514 = vmatprep.mubr.bf16.mxu1 %v8346_v32  ;;  %v10152_v32 = vld [vmem:[%s14642_s1 + $0xa0c] ss:$16 sps:$4 sm:$0xff]  }
 0x107   :  { %6710 = vmatpush1.bf16.msra.mxu0 %v10055_v33  ;;  %7526 = vmatpush1.bf16.msra.mxu1 %v10058_v34  ;;  %v53_v33 = vld [vmem:[%s14643_s0 + $0x120] sm:$0xff]  ;;  %v8315_v34 = vcombine.low %v12121_v38, %v12126_v40  ;;  %v10158_v38 = vld [vmem:[%s14642_s1 + $0xa2c] ss:$16 sps:$4 sm:$0xff]   ;;  %v10156_v40 = vld [vmem:[%s14642_s1 + $0xa28] ss:$16 sps:$4 sm:$0xff]  }
 0x108   :  { %6711 = vmatprep.subr.bf16.mxu0 %v10063_v35  ;;  %7527 = vmatprep.subr.bf16.mxu1 %v10066_v36  ;;  %v10147_v35 = vld [vmem:[%s14642_s1 + $0xa00] ss:$16 sps:$4 sm:$0xff]   ;;  %v10150_v36 = vld [vmem:[%s14642_s1 + $0xa08] ss:$16 sps:$4 sm:$0xff]  }
 0x10a   :  { %6699 = vmatmul.mubr.bf16.gmra.mrb[4].mxu0 %v8345_v39  ;;  %7515 = vmatmul.mubr.bf16.gmra.mrb[4].mxu1 %v8345_v39  ;;  %v10153_v39 = vld [vmem:[%s14642_s1 + $0xa20] ss:$16 sps:$4 sm:$0xff]  }
 0x10b   :  { %6712 = vmatpush1.bf16.msra.mxu0 %v10061_v37  ;;  %7528 = vmatpush1.bf16.msra.mxu1 %v10064_v41  ;;  %v10155_v37 = vld [vmem:[%s14642_s1 + $0xa24] ss:$16 sps:$4 sm:$0xff]   ;;  %v8348_v41 = vcombine.high %v53_v33, %v53_v33 }
 0x10c   :  { %6713 = vmatprep.subr.bf16.mxu0 %v10069_v42  ;;  %7529 = vmatprep.subr.bf16.mxu1 %v10072_v43  ;;  %v10161_v42 = vld [vmem:[%s14642_s1 + $0xa44] ss:$16 sps:$4 sm:$0xff]   ;;  %v10164_v43 = vld [vmem:[%s14642_s1 + $0xa4c] ss:$16 sps:$4 sm:$0xff]  }
 0x10d   :  { %6739 = vmatprep.mubr.bf16.mxu0 %v8316_v44  ;;  %7555 = vmatprep.mubr.bf16.mxu1 %v8316_v44  ;;  %v12327_v44 = vld [vmem:[%s14643_s0 + $0x28] sm:$0xff] }
 0x10f   :  { %6714 = vmatpush1.bf16.msra.mxu0 %v10067_v45  ;;  %7530 = vmatpush1.bf16.msra.mxu1 %v10070_v46  ;;  %v12332_v45 = vld [vmem:[%s14643_s0 + $0xa8] sm:$0xff]  ;;  %v8347_v46 = vcombine.low %v53_v33, %v53_v33 }
 0x110   :  { %6715 = vmatprep.subr.bf16.mxu0 %v10075_v47  ;;  %7531 = vmatprep.subr.bf16.mxu1 %v10078_v48  ;;  %v10159_v47 = vld [vmem:[%s14642_s1 + $0xa40] ss:$16 sps:$4 sm:$0xff]   ;;  %v10162_v48 = vld [vmem:[%s14642_s1 + $0xa48] ss:$16 sps:$4 sm:$0xff]  }
 0x111   :  { %v10235_v33 = vld [vmem:[%s14642_s1 + $0xbc8] ss:$16 sps:$4 sm:$0xff]  }
 0x113   :  { %6716 = vmatpush1.bf16.msra.mxu0 %v10073_v49  ;;  %7532 = vmatpush1.bf16.msra.mxu1 %v10076_v50  ;;  %v10167_v49 = vld [vmem:[%s14642_s1 + $0xa64] ss:$16 sps:$4 sm:$0xff]   ;;  %v10170_v50 = vld [vmem:[%s14642_s1 + $0xa6c] ss:$16 sps:$4 sm:$0xff]  }
 0x114   :  { %6717 = vmatprep.subr.bf16.mxu0 %v10081_v51  ;;  %7533 = vmatprep.subr.bf16.mxu1 %v10084_v52  ;;  %v8318_v51 = vcombine.high %v12327_v44, %v12332_v45  ;;  %v10165_v52 = vld [vmem:[%s14642_s1 + $0xa60] ss:$16 sps:$4 sm:$0xff]  }
 0x117   :  { %6718 = vmatpush1.bf16.msra.mxu0 %v10079_v53  ;;  %7534 = vmatpush1.bf16.msra.mxu1 %v10082_v54  ;;  %v10168_v53 = vld [vmem:[%s14642_s1 + $0xa68] ss:$16 sps:$4 sm:$0xff]   ;;  %v10173_v54 = vld [vmem:[%s14642_s1 + $0xa84] ss:$16 sps:$4 sm:$0xff]  }
 0x118   :  { %6719 = vmatprep.subr.bf16.mxu0 %v10087_v55  ;;  %7535 = vmatprep.subr.bf16.mxu1 %v10090_v56  ;;  %v10176_v55 = vld [vmem:[%s14642_s1 + $0xa8c] ss:$16 sps:$4 sm:$0xff]   ;;  %v10171_v56 = vld [vmem:[%s14642_s1 + $0xa80] ss:$16 sps:$4 sm:$0xff]  }
 0x11b   :  { %6720 = vmatpush1.bf16.msra.mxu0 %v10085_v57  ;;  %7536 = vmatpush1.bf16.msra.mxu1 %v10088_v58  ;;  %v10174_v57 = vld [vmem:[%s14642_s1 + $0xa88] ss:$16 sps:$4 sm:$0xff]   ;;  %v10179_v58 = vld [vmem:[%s14642_s1 + $0xaa4] ss:$16 sps:$4 sm:$0xff]  }
 0x11c   :  { %6721 = vmatprep.subr.bf16.mxu0 %v10093_v59  ;;  %7537 = vmatprep.subr.bf16.mxu1 %v10096_v60  ;;  %v10182_v59 = vld [vmem:[%s14642_s1 + $0xaac] ss:$16 sps:$4 sm:$0xff]   ;;  %v10177_v60 = vld [vmem:[%s14642_s1 + $0xaa0] ss:$16 sps:$4 sm:$0xff]  }
 0x11f   :  { %6722 = vmatpush1.bf16.msra.mxu0 %v10091_v61  ;;  %7538 = vmatpush1.bf16.msra.mxu1 %v10094_v62  ;;  %v10180_v61 = vld [vmem:[%s14642_s1 + $0xaa8] ss:$16 sps:$4 sm:$0xff]   ;;  %v10185_v62 = vld [vmem:[%s14642_s1 + $0xac4] ss:$16 sps:$4 sm:$0xff]  }
 0x120   :  { %6723 = vmatprep.subr.bf16.mxu0 %v10099_v63  ;;  %7539 = vmatprep.subr.bf16.mxu1 %v10102_v0  ;;  %v10188_v63 = vld [vmem:[%s14642_s1 + $0xacc] ss:$16 sps:$4 sm:$0xff]   ;;  %v10183_v0 = vld [vmem:[%s14642_s1 + $0xac0] ss:$16 sps:$4 sm:$0xff]  }
 0x123   :  { %6724 = vmatpush1.bf16.msra.mxu0 %v10097_v1  ;;  %7540 = vmatpush1.bf16.msra.mxu1 %v10100_v2  ;;  %v10186_v1 = vld [vmem:[%s14642_s1 + $0xac8] ss:$16 sps:$4 sm:$0xff]   ;;  %v10191_v2 = vld [vmem:[%s14642_s1 + $0xae4] ss:$16 sps:$4 sm:$0xff]  }
 0x124   :  { %6725 = vmatprep.subr.bf16.mxu0 %v10105_v3  ;;  %7541 = vmatprep.subr.bf16.mxu1 %v10108_v4  ;;  %v10194_v3 = vld [vmem:[%s14642_s1 + $0xaec] ss:$16 sps:$4 sm:$0xff]   ;;  %v10189_v4 = vld [vmem:[%s14642_s1 + $0xae0] ss:$16 sps:$4 sm:$0xff]  }
 0x127   :  { %6726 = vmatpush1.bf16.msra.mxu0 %v10103_v5  ;;  %7542 = vmatpush1.bf16.msra.mxu1 %v10106_v6  ;;  %v10192_v5 = vld [vmem:[%s14642_s1 + $0xae8] ss:$16 sps:$4 sm:$0xff]   ;;  %v10197_v6 = vld [vmem:[%s14642_s1 + $0xb04] ss:$16 sps:$4 sm:$0xff]  }
 0x128   :  { %6727 = vmatprep.subr.bf16.mxu0 %v10111_v7  ;;  %7543 = vmatprep.subr.bf16.mxu1 %v10114_v8  ;;  %v10200_v7 = vld [vmem:[%s14642_s1 + $0xb0c] ss:$16 sps:$4 sm:$0xff]   ;;  %v10195_v8 = vld [vmem:[%s14642_s1 + $0xb00] ss:$16 sps:$4 sm:$0xff]  }
 0x12b   :  { %6728 = vmatpush1.bf16.msra.mxu0 %v10109_v9  ;;  %7544 = vmatpush1.bf16.msra.mxu1 %v10112_v10  ;;  %v10198_v9 = vld [vmem:[%s14642_s1 + $0xb08] ss:$16 sps:$4 sm:$0xff]   ;;  %v10203_v10 = vld [vmem:[%s14642_s1 + $0xb24] ss:$16 sps:$4 sm:$0xff]  }
 0x12c   :  { %6729 = vmatprep.subr.bf16.mxu0 %v10117_v11  ;;  %7545 = vmatprep.subr.bf16.mxu1 %v10120_v12  ;;  %v10206_v11 = vld [vmem:[%s14642_s1 + $0xb2c] ss:$16 sps:$4 sm:$0xff]   ;;  %v10201_v12 = vld [vmem:[%s14642_s1 + $0xb20] ss:$16 sps:$4 sm:$0xff]  }
 0x12f   :  { %6730 = vmatpush1.bf16.msra.mxu0 %v10115_v13  ;;  %7546 = vmatpush1.bf16.msra.mxu1 %v10118_v14  ;;  %v10204_v13 = vld [vmem:[%s14642_s1 + $0xb28] ss:$16 sps:$4 sm:$0xff]   ;;  %v10209_v14 = vld [vmem:[%s14642_s1 + $0xb44] ss:$16 sps:$4 sm:$0xff]  }
 0x130   :  { %6731 = vmatprep.subr.bf16.mxu0 %v10123_v15  ;;  %7547 = vmatprep.subr.bf16.mxu1 %v10126_v16  ;;  %v10212_v15 = vld [vmem:[%s14642_s1 + $0xb4c] ss:$16 sps:$4 sm:$0xff]   ;;  %v10207_v16 = vld [vmem:[%s14642_s1 + $0xb40] ss:$16 sps:$4 sm:$0xff]  }
 0x133   :  { %6732 = vmatpush1.bf16.msra.mxu0 %v10121_v17  ;;  %7548 = vmatpush1.bf16.msra.mxu1 %v10124_v18  ;;  %v10210_v17 = vld [vmem:[%s14642_s1 + $0xb48] ss:$16 sps:$4 sm:$0xff]   ;;  %v10215_v18 = vld [vmem:[%s14642_s1 + $0xb64] ss:$16 sps:$4 sm:$0xff]  }
 0x134   :  { %6733 = vmatprep.subr.bf16.mxu0 %v10129_v19  ;;  %7549 = vmatprep.subr.bf16.mxu1 %v10132_v20  ;;  %v10218_v19 = vld [vmem:[%s14642_s1 + $0xb6c] ss:$16 sps:$4 sm:$0xff]   ;;  %v10213_v20 = vld [vmem:[%s14642_s1 + $0xb60] ss:$16 sps:$4 sm:$0xff]  }
 0x137   :  { %6734 = vmatpush1.bf16.msra.mxu0 %v10127_v21  ;;  %7550 = vmatpush1.bf16.msra.mxu1 %v10130_v22  ;;  %v10216_v21 = vld [vmem:[%s14642_s1 + $0xb68] ss:$16 sps:$4 sm:$0xff]   ;;  %v10221_v22 = vld [vmem:[%s14642_s1 + $0xb84] ss:$16 sps:$4 sm:$0xff]  }
 0x138   :  { %6735 = vmatprep.subr.bf16.mxu0 %v10136_v23  ;;  %7551 = vmatprep.subr.bf16.mxu1 %v10139_v24  ;;  %v10224_v23 = vld [vmem:[%s14642_s1 + $0xb8c] ss:$16 sps:$4 sm:$0xff]   ;;  %v10219_v24 = vld [vmem:[%s14642_s1 + $0xb80] ss:$16 sps:$4 sm:$0xff]  }
 0x13b   :  { %6736 = vmatpush1.bf16.msra.mxu0 %v10134_v25  ;;  %7552 = vmatpush1.bf16.msra.mxu1 %v10137_v26  ;;  %v10222_v25 = vld [vmem:[%s14642_s1 + $0xb88] ss:$16 sps:$4 sm:$0xff]   ;;  %v10227_v26 = vld [vmem:[%s14642_s1 + $0xba4] ss:$16 sps:$4 sm:$0xff]  }
 0x13c   :  { %6737 = vmatprep.subr.bf16.mxu0 %v10143_v27  ;;  %7553 = vmatprep.subr.bf16.mxu1 %v10146_v28  ;;  %v10230_v27 = vld [vmem:[%s14642_s1 + $0xbac] ss:$16 sps:$4 sm:$0xff]   ;;  %v10225_v28 = vld [vmem:[%s14642_s1 + $0xba0] ss:$16 sps:$4 sm:$0xff]  }
 0x13f   :  { %6738 = vmatpush1.bf16.msra.mxu0 %v10141_v29  ;;  %7554 = vmatpush1.bf16.msra.mxu1 %v10144_v30  ;;  %v10228_v29 = vld [vmem:[%s14642_s1 + $0xba8] ss:$16 sps:$4 sm:$0xff]   ;;  %v10234_v30 = vld [vmem:[%s14642_s1 + $0xbc4] ss:$16 sps:$4 sm:$0xff]  }
 0x140   :  { %6758 = vmatprep.subr.bf16.mxu0 %v10149_v31  ;;  %7574 = vmatprep.subr.bf16.mxu1 %v10152_v32  ;;  %v10237_v31 = vld [vmem:[%s14642_s1 + $0xbcc] ss:$16 sps:$4 sm:$0xff]   ;;  %v10232_v32 = vld [vmem:[%s14642_s1 + $0xbc0] ss:$16 sps:$4 sm:$0xff]  }
 0x142   :  { %6740 = vmatmul.mubr.bf16.vlgmr.msra.gmra.mrb[0].mxu0 %v8315_v34  ;;  %7556 = vmatmul.mubr.bf16.vlgmr.msra.gmra.mrb[0].mxu1 %v8315_v34  ;;  %v10241_v34 = vld [vmem:[%s14642_s1 + $0xbe4] ss:$16 sps:$4 sm:$0xff]  }
 0x143   :  { %6759 = vmatpush1.bf16.msra.mxu0 %v10147_v35  ;;  %7575 = vmatpush1.bf16.msra.mxu1 %v10150_v36  ;;  %v10244_v35 = vld [vmem:[%s14642_s1 + $0xbec] ss:$16 sps:$4 sm:$0xff]   ;;  %v10239_v36 = vld [vmem:[%s14642_s1 + $0xbe0] ss:$16 sps:$4 sm:$0xff]  }
 0x144   :  { %6760 = vmatprep.subr.bf16.mxu0 %v10155_v37  ;;  %7576 = vmatprep.subr.bf16.mxu1 %v10158_v38  ;;  %v10242_v37 = vld [vmem:[%s14642_s1 + $0xbe8] ss:$16 sps:$4 sm:$0xff]   ;;  %v10247_v38 = vld [vmem:[%s14642_s1 + $0xc04] ss:$16 sps:$4 sm:$0xff]  }
 0x145   :  { %6749 = vmatprep.mubr.bf16.mxu0 %v8348_v41  ;;  %7565 = vmatprep.mubr.bf16.mxu1 %v8348_v41  ;;  %v8317_v41 = vcombine.low %v12327_v44, %v12332_v45  ;;  %v10256_v44 = vld [vmem:[%s14642_s1 + $0xc2c] ss:$16 sps:$4 sm:$0xff]   ;;  %v10251_v45 = vld [vmem:[%s14642_s1 + $0xc20] ss:$16 sps:$4 sm:$0xff]  }
 0x147   :  { %6761 = vmatpush1.bf16.msra.mxu0 %v10153_v39  ;;  %7577 = vmatpush1.bf16.msra.mxu1 %v10156_v40  ;;  %v10250_v39 = vld [vmem:[%s14642_s1 + $0xc0c] ss:$16 sps:$4 sm:$0xff]  }
 0x148   :  { %6762 = vmatprep.subr.bf16.mxu0 %v10161_v42  ;;  %7578 = vmatprep.subr.bf16.mxu1 %v10164_v43  ;;  %v54_v40 = vld [vmem:[%s14643_s0 + $0x128] sm:$0xff]  ;;  %v10245_v42 = vld [vmem:[%s14642_s1 + $0xc00] ss:$16 sps:$4 sm:$0xff]  }
 0x149   :  { %v10248_v43 = vld [vmem:[%s14642_s1 + $0xc08] ss:$16 sps:$4 sm:$0xff]  }
 0x14a   :  { %6750 = vmatmul.mubr.bf16.gmra.mrb[4].mxu0 %v8347_v46  ;;  %7566 = vmatmul.mubr.bf16.gmra.mrb[4].mxu1 %v8347_v46  ;;  %v10253_v46 = vld [vmem:[%s14642_s1 + $0xc24] ss:$16 sps:$4 sm:$0xff]  }
 0x14b   :  { %6763 = vmatpush1.bf16.msra.mxu0 %v10159_v47  ;;  %7579 = vmatpush1.bf16.msra.mxu1 %v10162_v48  ;;  %v10254_v47 = vld [vmem:[%s14642_s1 + $0xc28] ss:$16 sps:$4 sm:$0xff]   ;;  %v8350_v48 = vcombine.high %v54_v40, %v54_v40 }
 0x14c   :  { %6764 = vmatprep.subr.bf16.mxu0 %v10167_v49  ;;  %7580 = vmatprep.subr.bf16.mxu1 %v10170_v50  ;;  %v10259_v49 = vld [vmem:[%s14642_s1 + $0xc44] ss:$16 sps:$4 sm:$0xff]   ;;  %v10262_v50 = vld [vmem:[%s14642_s1 + $0xc4c] ss:$16 sps:$4 sm:$0xff]  }
 0x14d   :  { %6790 = vmatprep.mubr.bf16.mxu0 %v8318_v51  ;;  %7606 = vmatprep.mubr.bf16.mxu1 %v8318_v51  ;;  %v12536_v51 = vld [vmem:[%s14643_s0 + $0x30] sm:$0xff] }
 0x14f   :  { %6765 = vmatpush1.bf16.msra.mxu0 %v10165_v52  ;;  %7581 = vmatpush1.bf16.msra.mxu1 %v10168_v53  ;;  %v12541_v52 = vld [vmem:[%s14643_s0 + $0xb0] sm:$0xff]  ;;  %v8349_v53 = vcombine.low %v54_v40, %v54_v40  ;;  %v10333_v40 = vld [vmem:[%s14642_s1 + $0xdc8] ss:$16 sps:$4 sm:$0xff]  }
 0x150   :  { %6766 = vmatprep.subr.bf16.mxu0 %v10173_v54  ;;  %7582 = vmatprep.subr.bf16.mxu1 %v10176_v55  ;;  %v10257_v54 = vld [vmem:[%s14642_s1 + $0xc40] ss:$16 sps:$4 sm:$0xff]   ;;  %v10260_v55 = vld [vmem:[%s14642_s1 + $0xc48] ss:$16 sps:$4 sm:$0xff]  }
 0x153   :  { %6767 = vmatpush1.bf16.msra.mxu0 %v10171_v56  ;;  %7583 = vmatpush1.bf16.msra.mxu1 %v10174_v57  ;;  %v10265_v56 = vld [vmem:[%s14642_s1 + $0xc64] ss:$16 sps:$4 sm:$0xff]   ;;  %v10268_v57 = vld [vmem:[%s14642_s1 + $0xc6c] ss:$16 sps:$4 sm:$0xff]  }
 0x154   :  { %6768 = vmatprep.subr.bf16.mxu0 %v10179_v58  ;;  %7584 = vmatprep.subr.bf16.mxu1 %v10182_v59  ;;  %v8320_v58 = vcombine.high %v12536_v51, %v12541_v52  ;;  %v10263_v59 = vld [vmem:[%s14642_s1 + $0xc60] ss:$16 sps:$4 sm:$0xff]  }
 0x157   :  { %6769 = vmatpush1.bf16.msra.mxu0 %v10177_v60  ;;  %7585 = vmatpush1.bf16.msra.mxu1 %v10180_v61  ;;  %v10266_v60 = vld [vmem:[%s14642_s1 + $0xc68] ss:$16 sps:$4 sm:$0xff]   ;;  %v10271_v61 = vld [vmem:[%s14642_s1 + $0xc84] ss:$16 sps:$4 sm:$0xff]  }
 0x158   :  { %6770 = vmatprep.subr.bf16.mxu0 %v10185_v62  ;;  %7586 = vmatprep.subr.bf16.mxu1 %v10188_v63  ;;  %v10274_v62 = vld [vmem:[%s14642_s1 + $0xc8c] ss:$16 sps:$4 sm:$0xff]   ;;  %v10269_v63 = vld [vmem:[%s14642_s1 + $0xc80] ss:$16 sps:$4 sm:$0xff]  }
 0x15b   :  { %6771 = vmatpush1.bf16.msra.mxu0 %v10183_v0  ;;  %7587 = vmatpush1.bf16.msra.mxu1 %v10186_v1  ;;  %v10272_v0 = vld [vmem:[%s14642_s1 + $0xc88] ss:$16 sps:$4 sm:$0xff]   ;;  %v10277_v1 = vld [vmem:[%s14642_s1 + $0xca4] ss:$16 sps:$4 sm:$0xff]  }
 0x15c   :  { %6772 = vmatprep.subr.bf16.mxu0 %v10191_v2  ;;  %7588 = vmatprep.subr.bf16.mxu1 %v10194_v3  ;;  %v10280_v2 = vld [vmem:[%s14642_s1 + $0xcac] ss:$16 sps:$4 sm:$0xff]   ;;  %v10275_v3 = vld [vmem:[%s14642_s1 + $0xca0] ss:$16 sps:$4 sm:$0xff]  }
 0x15f   :  { %6773 = vmatpush1.bf16.msra.mxu0 %v10189_v4  ;;  %7589 = vmatpush1.bf16.msra.mxu1 %v10192_v5  ;;  %v10278_v4 = vld [vmem:[%s14642_s1 + $0xca8] ss:$16 sps:$4 sm:$0xff]   ;;  %v10283_v5 = vld [vmem:[%s14642_s1 + $0xcc4] ss:$16 sps:$4 sm:$0xff]  }
 0x160   :  { %6774 = vmatprep.subr.bf16.mxu0 %v10197_v6  ;;  %7590 = vmatprep.subr.bf16.mxu1 %v10200_v7  ;;  %v10286_v6 = vld [vmem:[%s14642_s1 + $0xccc] ss:$16 sps:$4 sm:$0xff]   ;;  %v10281_v7 = vld [vmem:[%s14642_s1 + $0xcc0] ss:$16 sps:$4 sm:$0xff]  }
 0x163   :  { %6775 = vmatpush1.bf16.msra.mxu0 %v10195_v8  ;;  %7591 = vmatpush1.bf16.msra.mxu1 %v10198_v9  ;;  %v10284_v8 = vld [vmem:[%s14642_s1 + $0xcc8] ss:$16 sps:$4 sm:$0xff]   ;;  %v10289_v9 = vld [vmem:[%s14642_s1 + $0xce4] ss:$16 sps:$4 sm:$0xff]  }
 0x164   :  { %6776 = vmatprep.subr.bf16.mxu0 %v10203_v10  ;;  %7592 = vmatprep.subr.bf16.mxu1 %v10206_v11  ;;  %v10292_v10 = vld [vmem:[%s14642_s1 + $0xcec] ss:$16 sps:$4 sm:$0xff]   ;;  %v10287_v11 = vld [vmem:[%s14642_s1 + $0xce0] ss:$16 sps:$4 sm:$0xff]  }
 0x167   :  { %6777 = vmatpush1.bf16.msra.mxu0 %v10201_v12  ;;  %7593 = vmatpush1.bf16.msra.mxu1 %v10204_v13  ;;  %v10290_v12 = vld [vmem:[%s14642_s1 + $0xce8] ss:$16 sps:$4 sm:$0xff]   ;;  %v10295_v13 = vld [vmem:[%s14642_s1 + $0xd04] ss:$16 sps:$4 sm:$0xff]  }
 0x168   :  { %6778 = vmatprep.subr.bf16.mxu0 %v10209_v14  ;;  %7594 = vmatprep.subr.bf16.mxu1 %v10212_v15  ;;  %v10298_v14 = vld [vmem:[%s14642_s1 + $0xd0c] ss:$16 sps:$4 sm:$0xff]   ;;  %v10293_v15 = vld [vmem:[%s14642_s1 + $0xd00] ss:$16 sps:$4 sm:$0xff]  }
 0x16b   :  { %6779 = vmatpush1.bf16.msra.mxu0 %v10207_v16  ;;  %7595 = vmatpush1.bf16.msra.mxu1 %v10210_v17  ;;  %v10296_v16 = vld [vmem:[%s14642_s1 + $0xd08] ss:$16 sps:$4 sm:$0xff]   ;;  %v10301_v17 = vld [vmem:[%s14642_s1 + $0xd24] ss:$16 sps:$4 sm:$0xff]  }
 0x16c   :  { %6780 = vmatprep.subr.bf16.mxu0 %v10215_v18  ;;  %7596 = vmatprep.subr.bf16.mxu1 %v10218_v19  ;;  %v10304_v18 = vld [vmem:[%s14642_s1 + $0xd2c] ss:$16 sps:$4 sm:$0xff]   ;;  %v10299_v19 = vld [vmem:[%s14642_s1 + $0xd20] ss:$16 sps:$4 sm:$0xff]  }
 0x16f   :  { %6781 = vmatpush1.bf16.msra.mxu0 %v10213_v20  ;;  %7597 = vmatpush1.bf16.msra.mxu1 %v10216_v21  ;;  %v10302_v20 = vld [vmem:[%s14642_s1 + $0xd28] ss:$16 sps:$4 sm:$0xff]   ;;  %v10307_v21 = vld [vmem:[%s14642_s1 + $0xd44] ss:$16 sps:$4 sm:$0xff]  }
 0x170   :  { %6782 = vmatprep.subr.bf16.mxu0 %v10221_v22  ;;  %7598 = vmatprep.subr.bf16.mxu1 %v10224_v23  ;;  %v10310_v22 = vld [vmem:[%s14642_s1 + $0xd4c] ss:$16 sps:$4 sm:$0xff]   ;;  %v10305_v23 = vld [vmem:[%s14642_s1 + $0xd40] ss:$16 sps:$4 sm:$0xff]  }
 0x173   :  { %6783 = vmatpush1.bf16.msra.mxu0 %v10219_v24  ;;  %7599 = vmatpush1.bf16.msra.mxu1 %v10222_v25  ;;  %v10308_v24 = vld [vmem:[%s14642_s1 + $0xd48] ss:$16 sps:$4 sm:$0xff]   ;;  %v10313_v25 = vld [vmem:[%s14642_s1 + $0xd64] ss:$16 sps:$4 sm:$0xff]  }
 0x174   :  { %6784 = vmatprep.subr.bf16.mxu0 %v10227_v26  ;;  %7600 = vmatprep.subr.bf16.mxu1 %v10230_v27  ;;  %v10316_v26 = vld [vmem:[%s14642_s1 + $0xd6c] ss:$16 sps:$4 sm:$0xff]   ;;  %v10311_v27 = vld [vmem:[%s14642_s1 + $0xd60] ss:$16 sps:$4 sm:$0xff]  }
 0x177   :  { %6785 = vmatpush1.bf16.msra.mxu0 %v10225_v28  ;;  %7601 = vmatpush1.bf16.msra.mxu1 %v10228_v29  ;;  %v10314_v28 = vld [vmem:[%s14642_s1 + $0xd68] ss:$16 sps:$4 sm:$0xff]   ;;  %v10319_v29 = vld [vmem:[%s14642_s1 + $0xd84] ss:$16 sps:$4 sm:$0xff]  }
 0x178   :  { %6786 = vmatprep.subr.bf16.mxu0 %v10234_v30  ;;  %7602 = vmatprep.subr.bf16.mxu1 %v10237_v31  ;;  %v10322_v30 = vld [vmem:[%s14642_s1 + $0xd8c] ss:$16 sps:$4 sm:$0xff]   ;;  %v10317_v31 = vld [vmem:[%s14642_s1 + $0xd80] ss:$16 sps:$4 sm:$0xff]  }
 0x17b   :  { %6787 = vmatpush1.bf16.msra.mxu0 %v10232_v32  ;;  %7603 = vmatpush1.bf16.msra.mxu1 %v10235_v33  ;;  %v10320_v32 = vld [vmem:[%s14642_s1 + $0xd88] ss:$16 sps:$4 sm:$0xff]   ;;  %v10325_v33 = vld [vmem:[%s14642_s1 + $0xda4] ss:$16 sps:$4 sm:$0xff]  }
 0x17c   :  { %6788 = vmatprep.subr.bf16.mxu0 %v10241_v34  ;;  %7604 = vmatprep.subr.bf16.mxu1 %v10244_v35  ;;  %v10328_v34 = vld [vmem:[%s14642_s1 + $0xdac] ss:$16 sps:$4 sm:$0xff]   ;;  %v10323_v35 = vld [vmem:[%s14642_s1 + $0xda0] ss:$16 sps:$4 sm:$0xff]  }
 0x17f   :  { %6789 = vmatpush1.bf16.msra.mxu0 %v10239_v36  ;;  %7605 = vmatpush1.bf16.msra.mxu1 %v10242_v37  ;;  %v10326_v36 = vld [vmem:[%s14642_s1 + $0xda8] ss:$16 sps:$4 sm:$0xff]   ;;  %v10332_v37 = vld [vmem:[%s14642_s1 + $0xdc4] ss:$16 sps:$4 sm:$0xff]  }
 0x180   :  { %6809 = vmatprep.subr.bf16.mxu0 %v10247_v38  ;;  %7625 = vmatprep.subr.bf16.mxu1 %v10250_v39  ;;  %v10335_v38 = vld [vmem:[%s14642_s1 + $0xdcc] ss:$16 sps:$4 sm:$0xff]   ;;  %v10330_v39 = vld [vmem:[%s14642_s1 + $0xdc0] ss:$16 sps:$4 sm:$0xff]  }
 0x182   :  { %6791 = vmatmul.mubr.bf16.vlgmr.msra.gmra.mrb[0].mxu0 %v8317_v41  ;;  %7607 = vmatmul.mubr.bf16.vlgmr.msra.gmra.mrb[0].mxu1 %v8317_v41  ;;  %v10339_v41 = vld [vmem:[%s14642_s1 + $0xde4] ss:$16 sps:$4 sm:$0xff]  }
 0x183   :  { %6810 = vmatpush1.bf16.msra.mxu0 %v10245_v42  ;;  %7626 = vmatpush1.bf16.msra.mxu1 %v10248_v43  ;;  %v10342_v42 = vld [vmem:[%s14642_s1 + $0xdec] ss:$16 sps:$4 sm:$0xff]   ;;  %v10337_v43 = vld [vmem:[%s14642_s1 + $0xde0] ss:$16 sps:$4 sm:$0xff]  }
 0x184   :  { %6811 = vmatprep.subr.bf16.mxu0 %v10253_v46  ;;  %7627 = vmatprep.subr.bf16.mxu1 %v10256_v44  ;;  %v10340_v46 = vld [vmem:[%s14642_s1 + $0xde8] ss:$16 sps:$4 sm:$0xff]   ;;  %v10345_v44 = vld [vmem:[%s14642_s1 + $0xe04] ss:$16 sps:$4 sm:$0xff]  }
 0x185   :  { %6800 = vmatprep.mubr.bf16.mxu0 %v8350_v48  ;;  %7616 = vmatprep.mubr.bf16.mxu1 %v8350_v48  ;;  %v8319_v48 = vcombine.low %v12536_v51, %v12541_v52  ;;  %v10354_v51 = vld [vmem:[%s14642_s1 + $0xe2c] ss:$16 sps:$4 sm:$0xff]   ;;  %v10349_v52 = vld [vmem:[%s14642_s1 + $0xe20] ss:$16 sps:$4 sm:$0xff]  }
 0x187   :  { %6812 = vmatpush1.bf16.msra.mxu0 %v10251_v45  ;;  %7628 = vmatpush1.bf16.msra.mxu1 %v10254_v47  ;;  %v10348_v45 = vld [vmem:[%s14642_s1 + $0xe0c] ss:$16 sps:$4 sm:$0xff]   ;;  %v55_v47 = vld [vmem:[%s14643_s0 + $0x130] sm:$0xff] }
 0x188   :  { %6813 = vmatprep.subr.bf16.mxu0 %v10259_v49  ;;  %7629 = vmatprep.subr.bf16.mxu1 %v10262_v50  ;;  %v10343_v49 = vld [vmem:[%s14642_s1 + $0xe00] ss:$16 sps:$4 sm:$0xff]   ;;  %v10346_v50 = vld [vmem:[%s14642_s1 + $0xe08] ss:$16 sps:$4 sm:$0xff]  }
 0x18a   :  { %6801 = vmatmul.mubr.bf16.gmra.mrb[4].mxu0 %v8349_v53  ;;  %7617 = vmatmul.mubr.bf16.gmra.mrb[4].mxu1 %v8349_v53  ;;  %v10351_v53 = vld [vmem:[%s14642_s1 + $0xe24] ss:$16 sps:$4 sm:$0xff]  }
 0x18b   :  { %6814 = vmatpush1.bf16.msra.mxu0 %v10257_v54  ;;  %7630 = vmatpush1.bf16.msra.mxu1 %v10260_v55  ;;  %v10352_v54 = vld [vmem:[%s14642_s1 + $0xe28] ss:$16 sps:$4 sm:$0xff]   ;;  %v8352_v55 = vcombine.high %v55_v47, %v55_v47 }
 0x18c   :  { %6815 = vmatprep.subr.bf16.mxu0 %v10265_v56  ;;  %7631 = vmatprep.subr.bf16.mxu1 %v10268_v57  ;;  %v10357_v56 = vld [vmem:[%s14642_s1 + $0xe44] ss:$16 sps:$4 sm:$0xff]   ;;  %v10360_v57 = vld [vmem:[%s14642_s1 + $0xe4c] ss:$16 sps:$4 sm:$0xff]  }
 0x18d   :  { %6841 = vmatprep.mubr.bf16.mxu0 %v8320_v58  ;;  %7657 = vmatprep.mubr.bf16.mxu1 %v8320_v58  ;;  %v12745_v58 = vld [vmem:[%s14643_s0 + $0x38] sm:$0xff] }
 0x18f   :  { %6816 = vmatpush1.bf16.msra.mxu0 %v10263_v59  ;;  %7632 = vmatpush1.bf16.msra.mxu1 %v10266_v60  ;;  %v12750_v59 = vld [vmem:[%s14643_s0 + $0xb8] sm:$0xff]  ;;  %v8351_v60 = vcombine.low %v55_v47, %v55_v47 }
 0x190   :  { %6817 = vmatprep.subr.bf16.mxu0 %v10271_v61  ;;  %7633 = vmatprep.subr.bf16.mxu1 %v10274_v62  ;;  %v10355_v61 = vld [vmem:[%s14642_s1 + $0xe40] ss:$16 sps:$4 sm:$0xff]   ;;  %v10358_v62 = vld [vmem:[%s14642_s1 + $0xe48] ss:$16 sps:$4 sm:$0xff]  }
 0x191   :  { %v10431_v47 = vld [vmem:[%s14642_s1 + $0xfc8] ss:$16 sps:$4 sm:$0xff]  }
 0x193   :  { %6818 = vmatpush1.bf16.msra.mxu0 %v10269_v63  ;;  %7634 = vmatpush1.bf16.msra.mxu1 %v10272_v0  ;;  %v10363_v63 = vld [vmem:[%s14642_s1 + $0xe64] ss:$16 sps:$4 sm:$0xff]   ;;  %v10366_v0 = vld [vmem:[%s14642_s1 + $0xe6c] ss:$16 sps:$4 sm:$0xff]  }
 0x194   :  { %6819 = vmatprep.subr.bf16.mxu0 %v10277_v1  ;;  %7635 = vmatprep.subr.bf16.mxu1 %v10280_v2  ;;  %v8322_v1 = vcombine.high %v12745_v58, %v12750_v59  ;;  %v10361_v2 = vld [vmem:[%s14642_s1 + $0xe60] ss:$16 sps:$4 sm:$0xff]  }
 0x197   :  { %6820 = vmatpush1.bf16.msra.mxu0 %v10275_v3  ;;  %7636 = vmatpush1.bf16.msra.mxu1 %v10278_v4  ;;  %v10364_v3 = vld [vmem:[%s14642_s1 + $0xe68] ss:$16 sps:$4 sm:$0xff]   ;;  %v10369_v4 = vld [vmem:[%s14642_s1 + $0xe84] ss:$16 sps:$4 sm:$0xff]  }
 0x198   :  { %6821 = vmatprep.subr.bf16.mxu0 %v10283_v5  ;;  %7637 = vmatprep.subr.bf16.mxu1 %v10286_v6  ;;  %v10372_v5 = vld [vmem:[%s14642_s1 + $0xe8c] ss:$16 sps:$4 sm:$0xff]   ;;  %v10367_v6 = vld [vmem:[%s14642_s1 + $0xe80] ss:$16 sps:$4 sm:$0xff]  }
 0x19b   :  { %6822 = vmatpush1.bf16.msra.mxu0 %v10281_v7  ;;  %7638 = vmatpush1.bf16.msra.mxu1 %v10284_v8  ;;  %v10370_v7 = vld [vmem:[%s14642_s1 + $0xe88] ss:$16 sps:$4 sm:$0xff]   ;;  %v10375_v8 = vld [vmem:[%s14642_s1 + $0xea4] ss:$16 sps:$4 sm:$0xff]  }
 0x19c   :  { %6823 = vmatprep.subr.bf16.mxu0 %v10289_v9  ;;  %7639 = vmatprep.subr.bf16.mxu1 %v10292_v10  ;;  %v10378_v9 = vld [vmem:[%s14642_s1 + $0xeac] ss:$16 sps:$4 sm:$0xff]   ;;  %v10373_v10 = vld [vmem:[%s14642_s1 + $0xea0] ss:$16 sps:$4 sm:$0xff]  }
 0x19f   :  { %6824 = vmatpush1.bf16.msra.mxu0 %v10287_v11  ;;  %7640 = vmatpush1.bf16.msra.mxu1 %v10290_v12  ;;  %v10376_v11 = vld [vmem:[%s14642_s1 + $0xea8] ss:$16 sps:$4 sm:$0xff]   ;;  %v10381_v12 = vld [vmem:[%s14642_s1 + $0xec4] ss:$16 sps:$4 sm:$0xff]  }
 0x1a0   :  { %6825 = vmatprep.subr.bf16.mxu0 %v10295_v13  ;;  %7641 = vmatprep.subr.bf16.mxu1 %v10298_v14  ;;  %v10384_v13 = vld [vmem:[%s14642_s1 + $0xecc] ss:$16 sps:$4 sm:$0xff]   ;;  %v10379_v14 = vld [vmem:[%s14642_s1 + $0xec0] ss:$16 sps:$4 sm:$0xff]  }
 0x1a3   :  { %6826 = vmatpush1.bf16.msra.mxu0 %v10293_v15  ;;  %7642 = vmatpush1.bf16.msra.mxu1 %v10296_v16  ;;  %v10382_v15 = vld [vmem:[%s14642_s1 + $0xec8] ss:$16 sps:$4 sm:$0xff]   ;;  %v10387_v16 = vld [vmem:[%s14642_s1 + $0xee4] ss:$16 sps:$4 sm:$0xff]  }
 0x1a4   :  { %6827 = vmatprep.subr.bf16.mxu0 %v10301_v17  ;;  %7643 = vmatprep.subr.bf16.mxu1 %v10304_v18  ;;  %v10390_v17 = vld [vmem:[%s14642_s1 + $0xeec] ss:$16 sps:$4 sm:$0xff]   ;;  %v10385_v18 = vld [vmem:[%s14642_s1 + $0xee0] ss:$16 sps:$4 sm:$0xff]  }
 0x1a7   :  { %6828 = vmatpush1.bf16.msra.mxu0 %v10299_v19  ;;  %7644 = vmatpush1.bf16.msra.mxu1 %v10302_v20  ;;  %v10388_v19 = vld [vmem:[%s14642_s1 + $0xee8] ss:$16 sps:$4 sm:$0xff]   ;;  %v10393_v20 = vld [vmem:[%s14642_s1 + $0xf04] ss:$16 sps:$4 sm:$0xff]  }
 0x1a8   :  { %6829 = vmatprep.subr.bf16.mxu0 %v10307_v21  ;;  %7645 = vmatprep.subr.bf16.mxu1 %v10310_v22  ;;  %v10396_v21 = vld [vmem:[%s14642_s1 + $0xf0c] ss:$16 sps:$4 sm:$0xff]   ;;  %v10391_v22 = vld [vmem:[%s14642_s1 + $0xf00] ss:$16 sps:$4 sm:$0xff]  }
 0x1ab   :  { %6830 = vmatpush1.bf16.msra.mxu0 %v10305_v23  ;;  %7646 = vmatpush1.bf16.msra.mxu1 %v10308_v24  ;;  %v10394_v23 = vld [vmem:[%s14642_s1 + $0xf08] ss:$16 sps:$4 sm:$0xff]   ;;  %v10399_v24 = vld [vmem:[%s14642_s1 + $0xf24] ss:$16 sps:$4 sm:$0xff]  }
 0x1ac   :  { %6831 = vmatprep.subr.bf16.mxu0 %v10313_v25  ;;  %7647 = vmatprep.subr.bf16.mxu1 %v10316_v26  ;;  %v10402_v25 = vld [vmem:[%s14642_s1 + $0xf2c] ss:$16 sps:$4 sm:$0xff]   ;;  %v10397_v26 = vld [vmem:[%s14642_s1 + $0xf20] ss:$16 sps:$4 sm:$0xff]  }
 0x1af   :  { %6832 = vmatpush1.bf16.msra.mxu0 %v10311_v27  ;;  %7648 = vmatpush1.bf16.msra.mxu1 %v10314_v28  ;;  %v10400_v27 = vld [vmem:[%s14642_s1 + $0xf28] ss:$16 sps:$4 sm:$0xff]   ;;  %v10405_v28 = vld [vmem:[%s14642_s1 + $0xf44] ss:$16 sps:$4 sm:$0xff]  }
 0x1b0   :  { %6833 = vmatprep.subr.bf16.mxu0 %v10319_v29  ;;  %7649 = vmatprep.subr.bf16.mxu1 %v10322_v30  ;;  %v10408_v29 = vld [vmem:[%s14642_s1 + $0xf4c] ss:$16 sps:$4 sm:$0xff]   ;;  %v10403_v30 = vld [vmem:[%s14642_s1 + $0xf40] ss:$16 sps:$4 sm:$0xff]  }
 0x1b3   :  { %6834 = vmatpush1.bf16.msra.mxu0 %v10317_v31  ;;  %7650 = vmatpush1.bf16.msra.mxu1 %v10320_v32  ;;  %v10406_v31 = vld [vmem:[%s14642_s1 + $0xf48] ss:$16 sps:$4 sm:$0xff]   ;;  %v10411_v32 = vld [vmem:[%s14642_s1 + $0xf64] ss:$16 sps:$4 sm:$0xff]  }
 0x1b4   :  { %6835 = vmatprep.subr.bf16.mxu0 %v10325_v33  ;;  %7651 = vmatprep.subr.bf16.mxu1 %v10328_v34  ;;  %v10414_v33 = vld [vmem:[%s14642_s1 + $0xf6c] ss:$16 sps:$4 sm:$0xff]   ;;  %v10409_v34 = vld [vmem:[%s14642_s1 + $0xf60] ss:$16 sps:$4 sm:$0xff]  }
 0x1b7   :  { %6836 = vmatpush1.bf16.msra.mxu0 %v10323_v35  ;;  %7652 = vmatpush1.bf16.msra.mxu1 %v10326_v36  ;;  %v10412_v35 = vld [vmem:[%s14642_s1 + $0xf68] ss:$16 sps:$4 sm:$0xff]   ;;  %v10417_v36 = vld [vmem:[%s14642_s1 + $0xf84] ss:$16 sps:$4 sm:$0xff]  }
 0x1b8   :  { %6837 = vmatprep.subr.bf16.mxu0 %v10332_v37  ;;  %7653 = vmatprep.subr.bf16.mxu1 %v10335_v38  ;;  %v10420_v37 = vld [vmem:[%s14642_s1 + $0xf8c] ss:$16 sps:$4 sm:$0xff]   ;;  %v10415_v38 = vld [vmem:[%s14642_s1 + $0xf80] ss:$16 sps:$4 sm:$0xff]  }
 0x1bb   :  { %6838 = vmatpush1.bf16.msra.mxu0 %v10330_v39  ;;  %7654 = vmatpush1.bf16.msra.mxu1 %v10333_v40  ;;  %v10418_v39 = vld [vmem:[%s14642_s1 + $0xf88] ss:$16 sps:$4 sm:$0xff]   ;;  %v10423_v40 = vld [vmem:[%s14642_s1 + $0xfa4] ss:$16 sps:$4 sm:$0xff]  }
 0x1bc   :  { %6839 = vmatprep.subr.bf16.mxu0 %v10339_v41  ;;  %7655 = vmatprep.subr.bf16.mxu1 %v10342_v42  ;;  %v10426_v41 = vld [vmem:[%s14642_s1 + $0xfac] ss:$16 sps:$4 sm:$0xff]   ;;  %v10421_v42 = vld [vmem:[%s14642_s1 + $0xfa0] ss:$16 sps:$4 sm:$0xff]  }
 0x1bf   :  { %6840 = vmatpush1.bf16.msra.mxu0 %v10337_v43  ;;  %7656 = vmatpush1.bf16.msra.mxu1 %v10340_v46  ;;  %v10424_v43 = vld [vmem:[%s14642_s1 + $0xfa8] ss:$16 sps:$4 sm:$0xff]   ;;  %v10430_v46 = vld [vmem:[%s14642_s1 + $0xfc4] ss:$16 sps:$4 sm:$0xff]  }
 0x1c0   :  { %6860 = vmatprep.subr.bf16.mxu0 %v10345_v44  ;;  %7676 = vmatprep.subr.bf16.mxu1 %v10348_v45  ;;  %v10433_v44 = vld [vmem:[%s14642_s1 + $0xfcc] ss:$16 sps:$4 sm:$0xff]   ;;  %v10428_v45 = vld [vmem:[%s14642_s1 + $0xfc0] ss:$16 sps:$4 sm:$0xff]  }
 0x1c2   :  { %6842 = vmatmul.mubr.bf16.vlgmr.msra.gmra.mrb[0].mxu0 %v8319_v48  ;;  %7658 = vmatmul.mubr.bf16.vlgmr.msra.gmra.mrb[0].mxu1 %v8319_v48  ;;  %v10437_v48 = vld [vmem:[%s14642_s1 + $0xfe4] ss:$16 sps:$4 sm:$0xff]  }
 0x1c3   :  { %6861 = vmatpush1.bf16.msra.mxu0 %v10343_v49  ;;  %7677 = vmatpush1.bf16.msra.mxu1 %v10346_v50  ;;  %v10440_v49 = vld [vmem:[%s14642_s1 + $0xfec] ss:$16 sps:$4 sm:$0xff]   ;;  %v10435_v50 = vld [vmem:[%s14642_s1 + $0xfe0] ss:$16 sps:$4 sm:$0xff]  }
 0x1c4   :  { %6862 = vmatprep.subr.bf16.mxu0 %v10351_v53  ;;  %7678 = vmatprep.subr.bf16.mxu1 %v10354_v51  ;;  %v10438_v53 = vld [vmem:[%s14642_s1 + $0xfe8] ss:$16 sps:$4 sm:$0xff]   ;;  %v10443_v51 = vld [vmem:[%s14642_s1 + $0x1004] ss:$16 sps:$4 sm:$0xff]  }
 0x1c5   :  { %6851 = vmatprep.mubr.bf16.mxu0 %v8352_v55  ;;  %7667 = vmatprep.mubr.bf16.mxu1 %v8352_v55  ;;  %v8321_v55 = vcombine.low %v12745_v58, %v12750_v59  ;;  %v10452_v58 = vld [vmem:[%s14642_s1 + $0x102c] ss:$16 sps:$4 sm:$0xff]   ;;  %v10447_v59 = vld [vmem:[%s14642_s1 + $0x1020] ss:$16 sps:$4 sm:$0xff]  }
 0x1c7   :  { %6863 = vmatpush1.bf16.msra.mxu0 %v10349_v52  ;;  %7679 = vmatpush1.bf16.msra.mxu1 %v10352_v54  ;;  %v10446_v52 = vld [vmem:[%s14642_s1 + $0x100c] ss:$16 sps:$4 sm:$0xff]  }
 0x1c8   :  { %6864 = vmatprep.subr.bf16.mxu0 %v10357_v56  ;;  %7680 = vmatprep.subr.bf16.mxu1 %v10360_v57  ;;  %v56_v54 = vld [vmem:[%s14643_s0 + $0x138] sm:$0xff]  ;;  %v10441_v56 = vld [vmem:[%s14642_s1 + $0x1000] ss:$16 sps:$4 sm:$0xff]  }
 0x1c9   :  { %v10444_v57 = vld [vmem:[%s14642_s1 + $0x1008] ss:$16 sps:$4 sm:$0xff]  }
 0x1ca   :  { %6852 = vmatmul.mubr.bf16.gmra.mrb[4].mxu0 %v8351_v60  ;;  %7668 = vmatmul.mubr.bf16.gmra.mrb[4].mxu1 %v8351_v60  ;;  %v10449_v60 = vld [vmem:[%s14642_s1 + $0x1024] ss:$16 sps:$4 sm:$0xff]  }
 0x1cb   :  { %6865 = vmatpush1.bf16.msra.mxu0 %v10355_v61  ;;  %7681 = vmatpush1.bf16.msra.mxu1 %v10358_v62  ;;  %v10450_v61 = vld [vmem:[%s14642_s1 + $0x1028] ss:$16 sps:$4 sm:$0xff]   ;;  %v8354_v62 = vcombine.high %v56_v54, %v56_v54 }
 0x1cc   :  { %6866 = vmatprep.subr.bf16.mxu0 %v10363_v63  ;;  %7682 = vmatprep.subr.bf16.mxu1 %v10366_v0  ;;  %v10455_v63 = vld [vmem:[%s14642_s1 + $0x1044] ss:$16 sps:$4 sm:$0xff]   ;;  %v10458_v0 = vld [vmem:[%s14642_s1 + $0x104c] ss:$16 sps:$4 sm:$0xff]  }
 0x1cd   :  { %6892 = vmatprep.mubr.bf16.mxu0 %v8322_v1  ;;  %7708 = vmatprep.mubr.bf16.mxu1 %v8322_v1  ;;  %v12954_v1 = vld [vmem:[%s14643_s0 + $0x40] sm:$0xff] }
 0x1cf   :  { %6867 = vmatpush1.bf16.msra.mxu0 %v10361_v2  ;;  %7683 = vmatpush1.bf16.msra.mxu1 %v10364_v3  ;;  %v12959_v2 = vld [vmem:[%s14643_s0 + $0xc0] sm:$0xff]  ;;  %v8353_v3 = vcombine.low %v56_v54, %v56_v54  ;;  %v10529_v54 = vld [vmem:[%s14642_s1 + $0x11c8] ss:$16 sps:$4 sm:$0xff]  }
 0x1d0   :  { %6868 = vmatprep.subr.bf16.mxu0 %v10369_v4  ;;  %7684 = vmatprep.subr.bf16.mxu1 %v10372_v5  ;;  %v10453_v4 = vld [vmem:[%s14642_s1 + $0x1040] ss:$16 sps:$4 sm:$0xff]   ;;  %v10456_v5 = vld [vmem:[%s14642_s1 + $0x1048] ss:$16 sps:$4 sm:$0xff]  }
 0x1d3   :  { %6869 = vmatpush1.bf16.msra.mxu0 %v10367_v6  ;;  %7685 = vmatpush1.bf16.msra.mxu1 %v10370_v7  ;;  %v10461_v6 = vld [vmem:[%s14642_s1 + $0x1064] ss:$16 sps:$4 sm:$0xff]   ;;  %v10464_v7 = vld [vmem:[%s14642_s1 + $0x106c] ss:$16 sps:$4 sm:$0xff]  }
 0x1d4   :  { %6870 = vmatprep.subr.bf16.mxu0 %v10375_v8  ;;  %7686 = vmatprep.subr.bf16.mxu1 %v10378_v9  ;;  %v8324_v8 = vcombine.high %v12954_v1, %v12959_v2  ;;  %v10459_v9 = vld [vmem:[%s14642_s1 + $0x1060] ss:$16 sps:$4 sm:$0xff]  }
 0x1d7   :  { %6871 = vmatpush1.bf16.msra.mxu0 %v10373_v10  ;;  %7687 = vmatpush1.bf16.msra.mxu1 %v10376_v11  ;;  %v10462_v10 = vld [vmem:[%s14642_s1 + $0x1068] ss:$16 sps:$4 sm:$0xff]   ;;  %v10467_v11 = vld [vmem:[%s14642_s1 + $0x1084] ss:$16 sps:$4 sm:$0xff]  }
 0x1d8   :  { %6872 = vmatprep.subr.bf16.mxu0 %v10381_v12  ;;  %7688 = vmatprep.subr.bf16.mxu1 %v10384_v13  ;;  %v10470_v12 = vld [vmem:[%s14642_s1 + $0x108c] ss:$16 sps:$4 sm:$0xff]   ;;  %v10465_v13 = vld [vmem:[%s14642_s1 + $0x1080] ss:$16 sps:$4 sm:$0xff]  }
 0x1db   :  { %6873 = vmatpush1.bf16.msra.mxu0 %v10379_v14  ;;  %7689 = vmatpush1.bf16.msra.mxu1 %v10382_v15  ;;  %v10468_v14 = vld [vmem:[%s14642_s1 + $0x1088] ss:$16 sps:$4 sm:$0xff]   ;;  %v10473_v15 = vld [vmem:[%s14642_s1 + $0x10a4] ss:$16 sps:$4 sm:$0xff]  }
 0x1dc   :  { %6874 = vmatprep.subr.bf16.mxu0 %v10387_v16  ;;  %7690 = vmatprep.subr.bf16.mxu1 %v10390_v17  ;;  %v10476_v16 = vld [vmem:[%s14642_s1 + $0x10ac] ss:$16 sps:$4 sm:$0xff]   ;;  %v10471_v17 = vld [vmem:[%s14642_s1 + $0x10a0] ss:$16 sps:$4 sm:$0xff]  }
 0x1df   :  { %6875 = vmatpush1.bf16.msra.mxu0 %v10385_v18  ;;  %7691 = vmatpush1.bf16.msra.mxu1 %v10388_v19  ;;  %v10474_v18 = vld [vmem:[%s14642_s1 + $0x10a8] ss:$16 sps:$4 sm:$0xff]   ;;  %v10479_v19 = vld [vmem:[%s14642_s1 + $0x10c4] ss:$16 sps:$4 sm:$0xff]  }
 0x1e0   :  { %6876 = vmatprep.subr.bf16.mxu0 %v10393_v20  ;;  %7692 = vmatprep.subr.bf16.mxu1 %v10396_v21  ;;  %v10482_v20 = vld [vmem:[%s14642_s1 + $0x10cc] ss:$16 sps:$4 sm:$0xff]   ;;  %v10477_v21 = vld [vmem:[%s14642_s1 + $0x10c0] ss:$16 sps:$4 sm:$0xff]  }
 0x1e3   :  { %6877 = vmatpush1.bf16.msra.mxu0 %v10391_v22  ;;  %7693 = vmatpush1.bf16.msra.mxu1 %v10394_v23  ;;  %v10480_v22 = vld [vmem:[%s14642_s1 + $0x10c8] ss:$16 sps:$4 sm:$0xff]   ;;  %v10485_v23 = vld [vmem:[%s14642_s1 + $0x10e4] ss:$16 sps:$4 sm:$0xff]  }
 0x1e4   :  { %6878 = vmatprep.subr.bf16.mxu0 %v10399_v24  ;;  %7694 = vmatprep.subr.bf16.mxu1 %v10402_v25  ;;  %v10488_v24 = vld [vmem:[%s14642_s1 + $0x10ec] ss:$16 sps:$4 sm:$0xff]   ;;  %v10483_v25 = vld [vmem:[%s14642_s1 + $0x10e0] ss:$16 sps:$4 sm:$0xff]  }
 0x1e7   :  { %6879 = vmatpush1.bf16.msra.mxu0 %v10397_v26  ;;  %7695 = vmatpush1.bf16.msra.mxu1 %v10400_v27  ;;  %v10486_v26 = vld [vmem:[%s14642_s1 + $0x10e8] ss:$16 sps:$4 sm:$0xff]   ;;  %v10491_v27 = vld [vmem:[%s14642_s1 + $0x1104] ss:$16 sps:$4 sm:$0xff]  }
 0x1e8   :  { %6880 = vmatprep.subr.bf16.mxu0 %v10405_v28  ;;  %7696 = vmatprep.subr.bf16.mxu1 %v10408_v29  ;;  %v10494_v28 = vld [vmem:[%s14642_s1 + $0x110c] ss:$16 sps:$4 sm:$0xff]   ;;  %v10489_v29 = vld [vmem:[%s14642_s1 + $0x1100] ss:$16 sps:$4 sm:$0xff]  }
 0x1eb   :  { %6881 = vmatpush1.bf16.msra.mxu0 %v10403_v30  ;;  %7697 = vmatpush1.bf16.msra.mxu1 %v10406_v31  ;;  %v10492_v30 = vld [vmem:[%s14642_s1 + $0x1108] ss:$16 sps:$4 sm:$0xff]   ;;  %v10497_v31 = vld [vmem:[%s14642_s1 + $0x1124] ss:$16 sps:$4 sm:$0xff]  }
 0x1ec   :  { %6882 = vmatprep.subr.bf16.mxu0 %v10411_v32  ;;  %7698 = vmatprep.subr.bf16.mxu1 %v10414_v33  ;;  %v10500_v32 = vld [vmem:[%s14642_s1 + $0x112c] ss:$16 sps:$4 sm:$0xff]   ;;  %v10495_v33 = vld [vmem:[%s14642_s1 + $0x1120] ss:$16 sps:$4 sm:$0xff]  }
 0x1ef   :  { %6883 = vmatpush1.bf16.msra.mxu0 %v10409_v34  ;;  %7699 = vmatpush1.bf16.msra.mxu1 %v10412_v35  ;;  %v10498_v34 = vld [vmem:[%s14642_s1 + $0x1128] ss:$16 sps:$4 sm:$0xff]   ;;  %v10503_v35 = vld [vmem:[%s14642_s1 + $0x1144] ss:$16 sps:$4 sm:$0xff]  }
 0x1f0   :  { %6884 = vmatprep.subr.bf16.mxu0 %v10417_v36  ;;  %7700 = vmatprep.subr.bf16.mxu1 %v10420_v37  ;;  %v10506_v36 = vld [vmem:[%s14642_s1 + $0x114c] ss:$16 sps:$4 sm:$0xff]   ;;  %v10501_v37 = vld [vmem:[%s14642_s1 + $0x1140] ss:$16 sps:$4 sm:$0xff]  }
 0x1f3   :  { %6885 = vmatpush1.bf16.msra.mxu0 %v10415_v38  ;;  %7701 = vmatpush1.bf16.msra.mxu1 %v10418_v39  ;;  %v10504_v38 = vld [vmem:[%s14642_s1 + $0x1148] ss:$16 sps:$4 sm:$0xff]   ;;  %v10509_v39 = vld [vmem:[%s14642_s1 + $0x1164] ss:$16 sps:$4 sm:$0xff]  }
 0x1f4   :  { %6886 = vmatprep.subr.bf16.mxu0 %v10423_v40  ;;  %7702 = vmatprep.subr.bf16.mxu1 %v10426_v41  ;;  %v10512_v40 = vld [vmem:[%s14642_s1 + $0x116c] ss:$16 sps:$4 sm:$0xff]   ;;  %v10507_v41 = vld [vmem:[%s14642_s1 + $0x1160] ss:$16 sps:$4 sm:$0xff]  }
 0x1f7   :  { %6887 = vmatpush1.bf16.msra.mxu0 %v10421_v42  ;;  %7703 = vmatpush1.bf16.msra.mxu1 %v10424_v43  ;;  %v10510_v42 = vld [vmem:[%s14642_s1 + $0x1168] ss:$16 sps:$4 sm:$0xff]   ;;  %v10515_v43 = vld [vmem:[%s14642_s1 + $0x1184] ss:$16 sps:$4 sm:$0xff]  }
 0x1f8   :  { %6888 = vmatprep.subr.bf16.mxu0 %v10430_v46  ;;  %7704 = vmatprep.subr.bf16.mxu1 %v10433_v44  ;;  %v10518_v46 = vld [vmem:[%s14642_s1 + $0x118c] ss:$16 sps:$4 sm:$0xff]   ;;  %v10513_v44 = vld [vmem:[%s14642_s1 + $0x1180] ss:$16 sps:$4 sm:$0xff]  }
 0x1fb   :  { %6889 = vmatpush1.bf16.msra.mxu0 %v10428_v45  ;;  %7705 = vmatpush1.bf16.msra.mxu1 %v10431_v47  ;;  %v10516_v45 = vld [vmem:[%s14642_s1 + $0x1188] ss:$16 sps:$4 sm:$0xff]   ;;  %v10521_v47 = vld [vmem:[%s14642_s1 + $0x11a4] ss:$16 sps:$4 sm:$0xff]  }
 0x1fc   :  { %6890 = vmatprep.subr.bf16.mxu0 %v10437_v48  ;;  %7706 = vmatprep.subr.bf16.mxu1 %v10440_v49  ;;  %v10524_v48 = vld [vmem:[%s14642_s1 + $0x11ac] ss:$16 sps:$4 sm:$0xff]   ;;  %v10519_v49 = vld [vmem:[%s14642_s1 + $0x11a0] ss:$16 sps:$4 sm:$0xff]  }
 0x1ff   :  { %6891 = vmatpush1.bf16.msra.mxu0 %v10435_v50  ;;  %7707 = vmatpush1.bf16.msra.mxu1 %v10438_v53  ;;  %v10522_v50 = vld [vmem:[%s14642_s1 + $0x11a8] ss:$16 sps:$4 sm:$0xff]   ;;  %v10528_v53 = vld [vmem:[%s14642_s1 + $0x11c4] ss:$16 sps:$4 sm:$0xff]  }
 0x200   :  { %6911 = vmatprep.subr.bf16.mxu0 %v10443_v51  ;;  %7727 = vmatprep.subr.bf16.mxu1 %v10446_v52  ;;  %v10531_v51 = vld [vmem:[%s14642_s1 + $0x11cc] ss:$16 sps:$4 sm:$0xff]   ;;  %v10526_v52 = vld [vmem:[%s14642_s1 + $0x11c0] ss:$16 sps:$4 sm:$0xff]  }
 0x202   :  { %6893 = vmatmul.mubr.bf16.vlgmr.msra.gmra.mrb[0].mxu0 %v8321_v55  ;;  %7709 = vmatmul.mubr.bf16.vlgmr.msra.gmra.mrb[0].mxu1 %v8321_v55  ;;  %v10535_v55 = vld [vmem:[%s14642_s1 + $0x11e4] ss:$16 sps:$4 sm:$0xff]  }
 0x203   :  { %6912 = vmatpush1.bf16.msra.mxu0 %v10441_v56  ;;  %7728 = vmatpush1.bf16.msra.mxu1 %v10444_v57  ;;  %v10538_v56 = vld [vmem:[%s14642_s1 + $0x11ec] ss:$16 sps:$4 sm:$0xff]   ;;  %v10533_v57 = vld [vmem:[%s14642_s1 + $0x11e0] ss:$16 sps:$4 sm:$0xff]  }
 0x204   :  { %6913 = vmatprep.subr.bf16.mxu0 %v10449_v60  ;;  %7729 = vmatprep.subr.bf16.mxu1 %v10452_v58  ;;  %v10536_v60 = vld [vmem:[%s14642_s1 + $0x11e8] ss:$16 sps:$4 sm:$0xff]   ;;  %v10541_v58 = vld [vmem:[%s14642_s1 + $0x1204] ss:$16 sps:$4 sm:$0xff]  }
 0x205   :  { %6902 = vmatprep.mubr.bf16.mxu0 %v8354_v62  ;;  %7718 = vmatprep.mubr.bf16.mxu1 %v8354_v62  ;;  %v8323_v62 = vcombine.low %v12954_v1, %v12959_v2  ;;  %v10550_v1 = vld [vmem:[%s14642_s1 + $0x122c] ss:$16 sps:$4 sm:$0xff]   ;;  %v10545_v2 = vld [vmem:[%s14642_s1 + $0x1220] ss:$16 sps:$4 sm:$0xff]  }
 0x207   :  { %6914 = vmatpush1.bf16.msra.mxu0 %v10447_v59  ;;  %7730 = vmatpush1.bf16.msra.mxu1 %v10450_v61  ;;  %v10544_v59 = vld [vmem:[%s14642_s1 + $0x120c] ss:$16 sps:$4 sm:$0xff]   ;;  %v57_v61 = vld [vmem:[%s14643_s0 + $0x140] sm:$0xff] }
 0x208   :  { %6915 = vmatprep.subr.bf16.mxu0 %v10455_v63  ;;  %7731 = vmatprep.subr.bf16.mxu1 %v10458_v0  ;;  %v10539_v63 = vld [vmem:[%s14642_s1 + $0x1200] ss:$16 sps:$4 sm:$0xff]   ;;  %v10542_v0 = vld [vmem:[%s14642_s1 + $0x1208] ss:$16 sps:$4 sm:$0xff]  }
 0x20a   :  { %6903 = vmatmul.mubr.bf16.gmra.mrb[4].mxu0 %v8353_v3  ;;  %7719 = vmatmul.mubr.bf16.gmra.mrb[4].mxu1 %v8353_v3  ;;  %v10547_v3 = vld [vmem:[%s14642_s1 + $0x1224] ss:$16 sps:$4 sm:$0xff]  }
 0x20b   :  { %6916 = vmatpush1.bf16.msra.mxu0 %v10453_v4  ;;  %7732 = vmatpush1.bf16.msra.mxu1 %v10456_v5  ;;  %v10548_v4 = vld [vmem:[%s14642_s1 + $0x1228] ss:$16 sps:$4 sm:$0xff]   ;;  %v8356_v5 = vcombine.high %v57_v61, %v57_v61 }
 0x20c   :  { %6917 = vmatprep.subr.bf16.mxu0 %v10461_v6  ;;  %7733 = vmatprep.subr.bf16.mxu1 %v10464_v7  ;;  %v10553_v6 = vld [vmem:[%s14642_s1 + $0x1244] ss:$16 sps:$4 sm:$0xff]   ;;  %v10556_v7 = vld [vmem:[%s14642_s1 + $0x124c] ss:$16 sps:$4 sm:$0xff]  }
 0x20d   :  { %6943 = vmatprep.mubr.bf16.mxu0 %v8324_v8  ;;  %7759 = vmatprep.mubr.bf16.mxu1 %v8324_v8  ;;  %v13163_v8 = vld [vmem:[%s14643_s0 + $0x48] sm:$0xff] }
 0x20f   :  { %6918 = vmatpush1.bf16.msra.mxu0 %v10459_v9  ;;  %7734 = vmatpush1.bf16.msra.mxu1 %v10462_v10  ;;  %v13168_v9 = vld [vmem:[%s14643_s0 + $0xc8] sm:$0xff]  ;;  %v8355_v10 = vcombine.low %v57_v61, %v57_v61 }
 0x210   :  { %6919 = vmatprep.subr.bf16.mxu0 %v10467_v11  ;;  %7735 = vmatprep.subr.bf16.mxu1 %v10470_v12  ;;  %v10551_v11 = vld [vmem:[%s14642_s1 + $0x1240] ss:$16 sps:$4 sm:$0xff]   ;;  %v10554_v12 = vld [vmem:[%s14642_s1 + $0x1248] ss:$16 sps:$4 sm:$0xff]  }
 0x211   :  { %v10627_v61 = vld [vmem:[%s14642_s1 + $0x13c8] ss:$16 sps:$4 sm:$0xff]  }
 0x213   :  { %6920 = vmatpush1.bf16.msra.mxu0 %v10465_v13  ;;  %7736 = vmatpush1.bf16.msra.mxu1 %v10468_v14  ;;  %v10559_v13 = vld [vmem:[%s14642_s1 + $0x1264] ss:$16 sps:$4 sm:$0xff]   ;;  %v10562_v14 = vld [vmem:[%s14642_s1 + $0x126c] ss:$16 sps:$4 sm:$0xff]  }
 0x214   :  { %6921 = vmatprep.subr.bf16.mxu0 %v10473_v15  ;;  %7737 = vmatprep.subr.bf16.mxu1 %v10476_v16  ;;  %v8326_v15 = vcombine.high %v13163_v8, %v13168_v9  ;;  %v10557_v16 = vld [vmem:[%s14642_s1 + $0x1260] ss:$16 sps:$4 sm:$0xff]  }
 0x217   :  { %6922 = vmatpush1.bf16.msra.mxu0 %v10471_v17  ;;  %7738 = vmatpush1.bf16.msra.mxu1 %v10474_v18  ;;  %v10560_v17 = vld [vmem:[%s14642_s1 + $0x1268] ss:$16 sps:$4 sm:$0xff]   ;;  %v10565_v18 = vld [vmem:[%s14642_s1 + $0x1284] ss:$16 sps:$4 sm:$0xff]  }
 0x218   :  { %6923 = vmatprep.subr.bf16.mxu0 %v10479_v19  ;;  %7739 = vmatprep.subr.bf16.mxu1 %v10482_v20  ;;  %v10568_v19 = vld [vmem:[%s14642_s1 + $0x128c] ss:$16 sps:$4 sm:$0xff]   ;;  %v10563_v20 = vld [vmem:[%s14642_s1 + $0x1280] ss:$16 sps:$4 sm:$0xff]  }
 0x21b   :  { %6924 = vmatpush1.bf16.msra.mxu0 %v10477_v21  ;;  %7740 = vmatpush1.bf16.msra.mxu1 %v10480_v22  ;;  %v10566_v21 = vld [vmem:[%s14642_s1 + $0x1288] ss:$16 sps:$4 sm:$0xff]   ;;  %v10571_v22 = vld [vmem:[%s14642_s1 + $0x12a4] ss:$16 sps:$4 sm:$0xff]  }
 0x21c   :  { %6925 = vmatprep.subr.bf16.mxu0 %v10485_v23  ;;  %7741 = vmatprep.subr.bf16.mxu1 %v10488_v24  ;;  %v10574_v23 = vld [vmem:[%s14642_s1 + $0x12ac] ss:$16 sps:$4 sm:$0xff]   ;;  %v10569_v24 = vld [vmem:[%s14642_s1 + $0x12a0] ss:$16 sps:$4 sm:$0xff]  }
 0x21f   :  { %6926 = vmatpush1.bf16.msra.mxu0 %v10483_v25  ;;  %7742 = vmatpush1.bf16.msra.mxu1 %v10486_v26  ;;  %v10572_v25 = vld [vmem:[%s14642_s1 + $0x12a8] ss:$16 sps:$4 sm:$0xff]   ;;  %v10577_v26 = vld [vmem:[%s14642_s1 + $0x12c4] ss:$16 sps:$4 sm:$0xff]  }
 0x220   :  { %6927 = vmatprep.subr.bf16.mxu0 %v10491_v27  ;;  %7743 = vmatprep.subr.bf16.mxu1 %v10494_v28  ;;  %v10580_v27 = vld [vmem:[%s14642_s1 + $0x12cc] ss:$16 sps:$4 sm:$0xff]   ;;  %v10575_v28 = vld [vmem:[%s14642_s1 + $0x12c0] ss:$16 sps:$4 sm:$0xff]  }
 0x223   :  { %6928 = vmatpush1.bf16.msra.mxu0 %v10489_v29  ;;  %7744 = vmatpush1.bf16.msra.mxu1 %v10492_v30  ;;  %v10578_v29 = vld [vmem:[%s14642_s1 + $0x12c8] ss:$16 sps:$4 sm:$0xff]   ;;  %v10583_v30 = vld [vmem:[%s14642_s1 + $0x12e4] ss:$16 sps:$4 sm:$0xff]  }
 0x224   :  { %6929 = vmatprep.subr.bf16.mxu0 %v10497_v31  ;;  %7745 = vmatprep.subr.bf16.mxu1 %v10500_v32  ;;  %v10586_v31 = vld [vmem:[%s14642_s1 + $0x12ec] ss:$16 sps:$4 sm:$0xff]   ;;  %v10581_v32 = vld [vmem:[%s14642_s1 + $0x12e0] ss:$16 sps:$4 sm:$0xff]  }
 0x227   :  { %6930 = vmatpush1.bf16.msra.mxu0 %v10495_v33  ;;  %7746 = vmatpush1.bf16.msra.mxu1 %v10498_v34  ;;  %v10584_v33 = vld [vmem:[%s14642_s1 + $0x12e8] ss:$16 sps:$4 sm:$0xff]   ;;  %v10589_v34 = vld [vmem:[%s14642_s1 + $0x1304] ss:$16 sps:$4 sm:$0xff]  }
 0x228   :  { %6931 = vmatprep.subr.bf16.mxu0 %v10503_v35  ;;  %7747 = vmatprep.subr.bf16.mxu1 %v10506_v36  ;;  %v10592_v35 = vld [vmem:[%s14642_s1 + $0x130c] ss:$16 sps:$4 sm:$0xff]   ;;  %v10587_v36 = vld [vmem:[%s14642_s1 + $0x1300] ss:$16 sps:$4 sm:$0xff]  }
 0x22b   :  { %6932 = vmatpush1.bf16.msra.mxu0 %v10501_v37  ;;  %7748 = vmatpush1.bf16.msra.mxu1 %v10504_v38  ;;  %v10590_v37 = vld [vmem:[%s14642_s1 + $0x1308] ss:$16 sps:$4 sm:$0xff]   ;;  %v10595_v38 = vld [vmem:[%s14642_s1 + $0x1324] ss:$16 sps:$4 sm:$0xff]  }
 0x22c   :  { %6933 = vmatprep.subr.bf16.mxu0 %v10509_v39  ;;  %7749 = vmatprep.subr.bf16.mxu1 %v10512_v40  ;;  %v10598_v39 = vld [vmem:[%s14642_s1 + $0x132c] ss:$16 sps:$4 sm:$0xff]   ;;  %v10593_v40 = vld [vmem:[%s14642_s1 + $0x1320] ss:$16 sps:$4 sm:$0xff]  }
 0x22f   :  { %6934 = vmatpush1.bf16.msra.mxu0 %v10507_v41  ;;  %7750 = vmatpush1.bf16.msra.mxu1 %v10510_v42  ;;  %v10596_v41 = vld [vmem:[%s14642_s1 + $0x1328] ss:$16 sps:$4 sm:$0xff]   ;;  %v10601_v42 = vld [vmem:[%s14642_s1 + $0x1344] ss:$16 sps:$4 sm:$0xff]  }
 0x230   :  { %6935 = vmatprep.subr.bf16.mxu0 %v10515_v43  ;;  %7751 = vmatprep.subr.bf16.mxu1 %v10518_v46  ;;  %v10604_v43 = vld [vmem:[%s14642_s1 + $0x134c] ss:$16 sps:$4 sm:$0xff]   ;;  %v10599_v46 = vld [vmem:[%s14642_s1 + $0x1340] ss:$16 sps:$4 sm:$0xff]  }
 0x233   :  { %6936 = vmatpush1.bf16.msra.mxu0 %v10513_v44  ;;  %7752 = vmatpush1.bf16.msra.mxu1 %v10516_v45  ;;  %v10602_v44 = vld [vmem:[%s14642_s1 + $0x1348] ss:$16 sps:$4 sm:$0xff]   ;;  %v10607_v45 = vld [vmem:[%s14642_s1 + $0x1364] ss:$16 sps:$4 sm:$0xff]  }
 0x234   :  { %6937 = vmatprep.subr.bf16.mxu0 %v10521_v47  ;;  %7753 = vmatprep.subr.bf16.mxu1 %v10524_v48  ;;  %v10610_v47 = vld [vmem:[%s14642_s1 + $0x136c] ss:$16 sps:$4 sm:$0xff]   ;;  %v10605_v48 = vld [vmem:[%s14642_s1 + $0x1360] ss:$16 sps:$4 sm:$0xff]  }
 0x237   :  { %6938 = vmatpush1.bf16.msra.mxu0 %v10519_v49  ;;  %7754 = vmatpush1.bf16.msra.mxu1 %v10522_v50  ;;  %v10608_v49 = vld [vmem:[%s14642_s1 + $0x1368] ss:$16 sps:$4 sm:$0xff]   ;;  %v10613_v50 = vld [vmem:[%s14642_s1 + $0x1384] ss:$16 sps:$4 sm:$0xff]  }
 0x238   :  { %6939 = vmatprep.subr.bf16.mxu0 %v10528_v53  ;;  %7755 = vmatprep.subr.bf16.mxu1 %v10531_v51  ;;  %v10616_v53 = vld [vmem:[%s14642_s1 + $0x138c] ss:$16 sps:$4 sm:$0xff]   ;;  %v10611_v51 = vld [vmem:[%s14642_s1 + $0x1380] ss:$16 sps:$4 sm:$0xff]  }
 0x23b   :  { %6940 = vmatpush1.bf16.msra.mxu0 %v10526_v52  ;;  %7756 = vmatpush1.bf16.msra.mxu1 %v10529_v54  ;;  %v10614_v52 = vld [vmem:[%s14642_s1 + $0x1388] ss:$16 sps:$4 sm:$0xff]   ;;  %v10619_v54 = vld [vmem:[%s14642_s1 + $0x13a4] ss:$16 sps:$4 sm:$0xff]  }
 0x23c   :  { %6941 = vmatprep.subr.bf16.mxu0 %v10535_v55  ;;  %7757 = vmatprep.subr.bf16.mxu1 %v10538_v56  ;;  %v10622_v55 = vld [vmem:[%s14642_s1 + $0x13ac] ss:$16 sps:$4 sm:$0xff]   ;;  %v10617_v56 = vld [vmem:[%s14642_s1 + $0x13a0] ss:$16 sps:$4 sm:$0xff]  }
 0x23f   :  { %6942 = vmatpush1.bf16.msra.mxu0 %v10533_v57  ;;  %7758 = vmatpush1.bf16.msra.mxu1 %v10536_v60  ;;  %v10620_v57 = vld [vmem:[%s14642_s1 + $0x13a8] ss:$16 sps:$4 sm:$0xff]   ;;  %v10626_v60 = vld [vmem:[%s14642_s1 + $0x13c4] ss:$16 sps:$4 sm:$0xff]  }
 0x240   :  { %6962 = vmatprep.subr.bf16.mxu0 %v10541_v58  ;;  %7778 = vmatprep.subr.bf16.mxu1 %v10544_v59  ;;  %v10629_v58 = vld [vmem:[%s14642_s1 + $0x13cc] ss:$16 sps:$4 sm:$0xff]   ;;  %v10624_v59 = vld [vmem:[%s14642_s1 + $0x13c0] ss:$16 sps:$4 sm:$0xff]  }
 0x242   :  { %6944 = vmatmul.mubr.bf16.vlgmr.msra.gmra.mrb[0].mxu0 %v8323_v62  ;;  %7760 = vmatmul.mubr.bf16.vlgmr.msra.gmra.mrb[0].mxu1 %v8323_v62  ;;  %v10633_v62 = vld [vmem:[%s14642_s1 + $0x13e4] ss:$16 sps:$4 sm:$0xff]  }
 0x243   :  { %6963 = vmatpush1.bf16.msra.mxu0 %v10539_v63  ;;  %7779 = vmatpush1.bf16.msra.mxu1 %v10542_v0  ;;  %v10636_v63 = vld [vmem:[%s14642_s1 + $0x13ec] ss:$16 sps:$4 sm:$0xff]   ;;  %v10631_v0 = vld [vmem:[%s14642_s1 + $0x13e0] ss:$16 sps:$4 sm:$0xff]  }
 0x244   :  { %6964 = vmatprep.subr.bf16.mxu0 %v10547_v3  ;;  %7780 = vmatprep.subr.bf16.mxu1 %v10550_v1  ;;  %v10634_v3 = vld [vmem:[%s14642_s1 + $0x13e8] ss:$16 sps:$4 sm:$0xff]   ;;  %v10639_v1 = vld [vmem:[%s14642_s1 + $0x1404] ss:$16 sps:$4 sm:$0xff]  }
 0x245   :  { %6953 = vmatprep.mubr.bf16.mxu0 %v8356_v5  ;;  %7769 = vmatprep.mubr.bf16.mxu1 %v8356_v5  ;;  %v58_v5 = vld [vmem:[%s14643_s0 + $0x148] sm:$0xff] }
 0x247   :  { %6965 = vmatpush1.bf16.msra.mxu0 %v10545_v2  ;;  %7781 = vmatpush1.bf16.msra.mxu1 %v10548_v4  ;;  %v10642_v2 = vld [vmem:[%s14642_s1 + $0x140c] ss:$16 sps:$4 sm:$0xff]   ;;  %v8325_v4 = vcombine.low %v13163_v8, %v13168_v9  ;;  %v10645_v8 = vld [vmem:[%s14642_s1 + $0x1424] ss:$16 sps:$4 sm:$0xff]  }
 0x248   :  { %6966 = vmatprep.subr.bf16.mxu0 %v10553_v6  ;;  %7782 = vmatprep.subr.bf16.mxu1 %v10556_v7  ;;  %v10637_v6 = vld [vmem:[%s14642_s1 + $0x1400] ss:$16 sps:$4 sm:$0xff]   ;;  %v10640_v7 = vld [vmem:[%s14642_s1 + $0x1408] ss:$16 sps:$4 sm:$0xff]   ;;  %v10648_v9 = vld [vmem:[%s14642_s1 + $0x142c] ss:$16 sps:$4 sm:$0xff]  }
 0x24a   :  { %6954 = vmatmul.mubr.bf16.gmra.mrb[4].mxu0 %v8355_v10  ;;  %7770 = vmatmul.mubr.bf16.gmra.mrb[4].mxu1 %v8355_v10  ;;  %v8358_v10 = vcombine.high %v58_v5, %v58_v5 }
 0x24b   :  { %6967 = vmatpush1.bf16.msra.mxu0 %v10551_v11  ;;  %7783 = vmatpush1.bf16.msra.mxu1 %v10554_v12  ;;  %v10643_v11 = vld [vmem:[%s14642_s1 + $0x1420] ss:$16 sps:$4 sm:$0xff]   ;;  %v10646_v12 = vld [vmem:[%s14642_s1 + $0x1428] ss:$16 sps:$4 sm:$0xff]  }
 0x24c   :  { %6968 = vmatprep.subr.bf16.mxu0 %v10559_v13  ;;  %7784 = vmatprep.subr.bf16.mxu1 %v10562_v14  ;;  %v10651_v13 = vld [vmem:[%s14642_s1 + $0x1444] ss:$16 sps:$4 sm:$0xff]   ;;  %v10654_v14 = vld [vmem:[%s14642_s1 + $0x144c] ss:$16 sps:$4 sm:$0xff]  }
 0x24d   :  { %6994 = vmatprep.mubr.bf16.mxu0 %v8326_v15  ;;  %7810 = vmatprep.mubr.bf16.mxu1 %v8326_v15  ;;  %v8357_v15 = vcombine.low %v58_v5, %v58_v5  ;;  %v10731_v5 = vld [vmem:[%s14642_s1 + $0x15e4] ss:$16 sps:$4 sm:$0xff]  }
 0x24f   :  { %6969 = vmatpush1.bf16.msra.mxu0 %v10557_v16  ;;  %7785 = vmatpush1.bf16.msra.mxu1 %v10560_v17  ;;  %v13372_v16 = vld [vmem:[%s14643_s0 + $0x50] sm:$0xff] }
 0x250   :  { %6970 = vmatprep.subr.bf16.mxu0 %v10565_v18  ;;  %7786 = vmatprep.subr.bf16.mxu1 %v10568_v19  ;;  %v13377_v17 = vld [vmem:[%s14643_s0 + $0xd0] sm:$0xff]  ;;  %v10652_v19 = vld [vmem:[%s14642_s1 + $0x1448] ss:$16 sps:$4 sm:$0xff]  }
 0x251   :  { %v10649_v18 = vld [vmem:[%s14642_s1 + $0x1440] ss:$16 sps:$4 sm:$0xff]  }
 0x253   :  { %6971 = vmatpush1.bf16.msra.mxu0 %v10563_v20  ;;  %7787 = vmatpush1.bf16.msra.mxu1 %v10566_v21  ;;  %v10657_v20 = vld [vmem:[%s14642_s1 + $0x1464] ss:$16 sps:$4 sm:$0xff]   ;;  %v10660_v21 = vld [vmem:[%s14642_s1 + $0x146c] ss:$16 sps:$4 sm:$0xff]  }
 0x254   :  { %6972 = vmatprep.subr.bf16.mxu0 %v10571_v22  ;;  %7788 = vmatprep.subr.bf16.mxu1 %v10574_v23  ;;  %v8328_v22 = vcombine.high %v13372_v16, %v13377_v17  ;;  %v10655_v23 = vld [vmem:[%s14642_s1 + $0x1460] ss:$16 sps:$4 sm:$0xff]  }
 0x257   :  { %6973 = vmatpush1.bf16.msra.mxu0 %v10569_v24  ;;  %7789 = vmatpush1.bf16.msra.mxu1 %v10572_v25  ;;  %v10658_v24 = vld [vmem:[%s14642_s1 + $0x1468] ss:$16 sps:$4 sm:$0xff]   ;;  %v10663_v25 = vld [vmem:[%s14642_s1 + $0x1484] ss:$16 sps:$4 sm:$0xff]  }
 0x258   :  { %6974 = vmatprep.subr.bf16.mxu0 %v10577_v26  ;;  %7790 = vmatprep.subr.bf16.mxu1 %v10580_v27  ;;  %v10666_v26 = vld [vmem:[%s14642_s1 + $0x148c] ss:$16 sps:$4 sm:$0xff]   ;;  %v10661_v27 = vld [vmem:[%s14642_s1 + $0x1480] ss:$16 sps:$4 sm:$0xff]  }
 0x25b   :  { %6975 = vmatpush1.bf16.msra.mxu0 %v10575_v28  ;;  %7791 = vmatpush1.bf16.msra.mxu1 %v10578_v29  ;;  %v10664_v28 = vld [vmem:[%s14642_s1 + $0x1488] ss:$16 sps:$4 sm:$0xff]   ;;  %v10669_v29 = vld [vmem:[%s14642_s1 + $0x14a4] ss:$16 sps:$4 sm:$0xff]  }
 0x25c   :  { %6976 = vmatprep.subr.bf16.mxu0 %v10583_v30  ;;  %7792 = vmatprep.subr.bf16.mxu1 %v10586_v31  ;;  %v10672_v30 = vld [vmem:[%s14642_s1 + $0x14ac] ss:$16 sps:$4 sm:$0xff]   ;;  %v10667_v31 = vld [vmem:[%s14642_s1 + $0x14a0] ss:$16 sps:$4 sm:$0xff]  }
 0x25f   :  { %6977 = vmatpush1.bf16.msra.mxu0 %v10581_v32  ;;  %7793 = vmatpush1.bf16.msra.mxu1 %v10584_v33  ;;  %v10670_v32 = vld [vmem:[%s14642_s1 + $0x14a8] ss:$16 sps:$4 sm:$0xff]   ;;  %v10675_v33 = vld [vmem:[%s14642_s1 + $0x14c4] ss:$16 sps:$4 sm:$0xff]  }
 0x260   :  { %6978 = vmatprep.subr.bf16.mxu0 %v10589_v34  ;;  %7794 = vmatprep.subr.bf16.mxu1 %v10592_v35  ;;  %v10678_v34 = vld [vmem:[%s14642_s1 + $0x14cc] ss:$16 sps:$4 sm:$0xff]   ;;  %v10673_v35 = vld [vmem:[%s14642_s1 + $0x14c0] ss:$16 sps:$4 sm:$0xff]  }
 0x263   :  { %6979 = vmatpush1.bf16.msra.mxu0 %v10587_v36  ;;  %7795 = vmatpush1.bf16.msra.mxu1 %v10590_v37  ;;  %v10676_v36 = vld [vmem:[%s14642_s1 + $0x14c8] ss:$16 sps:$4 sm:$0xff]   ;;  %v10681_v37 = vld [vmem:[%s14642_s1 + $0x14e4] ss:$16 sps:$4 sm:$0xff]  }
 0x264   :  { %6980 = vmatprep.subr.bf16.mxu0 %v10595_v38  ;;  %7796 = vmatprep.subr.bf16.mxu1 %v10598_v39  ;;  %v10684_v38 = vld [vmem:[%s14642_s1 + $0x14ec] ss:$16 sps:$4 sm:$0xff]   ;;  %v10679_v39 = vld [vmem:[%s14642_s1 + $0x14e0] ss:$16 sps:$4 sm:$0xff]  }
 0x267   :  { %6981 = vmatpush1.bf16.msra.mxu0 %v10593_v40  ;;  %7797 = vmatpush1.bf16.msra.mxu1 %v10596_v41  ;;  %v10682_v40 = vld [vmem:[%s14642_s1 + $0x14e8] ss:$16 sps:$4 sm:$0xff]   ;;  %v10687_v41 = vld [vmem:[%s14642_s1 + $0x1504] ss:$16 sps:$4 sm:$0xff]  }
 0x268   :  { %6982 = vmatprep.subr.bf16.mxu0 %v10601_v42  ;;  %7798 = vmatprep.subr.bf16.mxu1 %v10604_v43  ;;  %v10690_v42 = vld [vmem:[%s14642_s1 + $0x150c] ss:$16 sps:$4 sm:$0xff]   ;;  %v10685_v43 = vld [vmem:[%s14642_s1 + $0x1500] ss:$16 sps:$4 sm:$0xff]  }
 0x26b   :  { %6983 = vmatpush1.bf16.msra.mxu0 %v10599_v46  ;;  %7799 = vmatpush1.bf16.msra.mxu1 %v10602_v44  ;;  %v10688_v46 = vld [vmem:[%s14642_s1 + $0x1508] ss:$16 sps:$4 sm:$0xff]   ;;  %v10693_v44 = vld [vmem:[%s14642_s1 + $0x1524] ss:$16 sps:$4 sm:$0xff]  }
 0x26c   :  { %6984 = vmatprep.subr.bf16.mxu0 %v10607_v45  ;;  %7800 = vmatprep.subr.bf16.mxu1 %v10610_v47  ;;  %v10696_v45 = vld [vmem:[%s14642_s1 + $0x152c] ss:$16 sps:$4 sm:$0xff]   ;;  %v10691_v47 = vld [vmem:[%s14642_s1 + $0x1520] ss:$16 sps:$4 sm:$0xff]  }
 0x26f   :  { %6985 = vmatpush1.bf16.msra.mxu0 %v10605_v48  ;;  %7801 = vmatpush1.bf16.msra.mxu1 %v10608_v49  ;;  %v10694_v48 = vld [vmem:[%s14642_s1 + $0x1528] ss:$16 sps:$4 sm:$0xff]   ;;  %v10699_v49 = vld [vmem:[%s14642_s1 + $0x1544] ss:$16 sps:$4 sm:$0xff]  }
 0x270   :  { %6986 = vmatprep.subr.bf16.mxu0 %v10613_v50  ;;  %7802 = vmatprep.subr.bf16.mxu1 %v10616_v53  ;;  %v10702_v50 = vld [vmem:[%s14642_s1 + $0x154c] ss:$16 sps:$4 sm:$0xff]   ;;  %v10697_v53 = vld [vmem:[%s14642_s1 + $0x1540] ss:$16 sps:$4 sm:$0xff]  }
 0x273   :  { %6987 = vmatpush1.bf16.msra.mxu0 %v10611_v51  ;;  %7803 = vmatpush1.bf16.msra.mxu1 %v10614_v52  ;;  %v10700_v51 = vld [vmem:[%s14642_s1 + $0x1548] ss:$16 sps:$4 sm:$0xff]   ;;  %v10705_v52 = vld [vmem:[%s14642_s1 + $0x1564] ss:$16 sps:$4 sm:$0xff]  }
 0x274   :  { %6988 = vmatprep.subr.bf16.mxu0 %v10619_v54  ;;  %7804 = vmatprep.subr.bf16.mxu1 %v10622_v55  ;;  %v10708_v54 = vld [vmem:[%s14642_s1 + $0x156c] ss:$16 sps:$4 sm:$0xff]   ;;  %v10703_v55 = vld [vmem:[%s14642_s1 + $0x1560] ss:$16 sps:$4 sm:$0xff]  }
 0x277   :  { %6989 = vmatpush1.bf16.msra.mxu0 %v10617_v56  ;;  %7805 = vmatpush1.bf16.msra.mxu1 %v10620_v57  ;;  %v10706_v56 = vld [vmem:[%s14642_s1 + $0x1568] ss:$16 sps:$4 sm:$0xff]   ;;  %v10711_v57 = vld [vmem:[%s14642_s1 + $0x1584] ss:$16 sps:$4 sm:$0xff]  }
 0x278   :  { %6990 = vmatprep.subr.bf16.mxu0 %v10626_v60  ;;  %7806 = vmatprep.subr.bf16.mxu1 %v10629_v58  ;;  %v10714_v60 = vld [vmem:[%s14642_s1 + $0x158c] ss:$16 sps:$4 sm:$0xff]   ;;  %v10709_v58 = vld [vmem:[%s14642_s1 + $0x1580] ss:$16 sps:$4 sm:$0xff]  }
 0x27b   :  { %6991 = vmatpush1.bf16.msra.mxu0 %v10624_v59  ;;  %7807 = vmatpush1.bf16.msra.mxu1 %v10627_v61  ;;  %v10712_v59 = vld [vmem:[%s14642_s1 + $0x1588] ss:$16 sps:$4 sm:$0xff]   ;;  %v10717_v61 = vld [vmem:[%s14642_s1 + $0x15a4] ss:$16 sps:$4 sm:$0xff]  }
 0x27c   :  { %6992 = vmatprep.subr.bf16.mxu0 %v10633_v62  ;;  %7808 = vmatprep.subr.bf16.mxu1 %v10636_v63  ;;  %v10720_v62 = vld [vmem:[%s14642_s1 + $0x15ac] ss:$16 sps:$4 sm:$0xff]   ;;  %v10715_v63 = vld [vmem:[%s14642_s1 + $0x15a0] ss:$16 sps:$4 sm:$0xff]  }
 0x27f   :  { %6993 = vmatpush1.bf16.msra.mxu0 %v10631_v0  ;;  %7809 = vmatpush1.bf16.msra.mxu1 %v10634_v3  ;;  %v10718_v0 = vld [vmem:[%s14642_s1 + $0x15a8] ss:$16 sps:$4 sm:$0xff]   ;;  %v10724_v3 = vld [vmem:[%s14642_s1 + $0x15c4] ss:$16 sps:$4 sm:$0xff]  }
 0x280   :  { %7013 = vmatprep.subr.bf16.mxu0 %v10639_v1  ;;  %7829 = vmatprep.subr.bf16.mxu1 %v10642_v2  ;;  %v10727_v1 = vld [vmem:[%s14642_s1 + $0x15cc] ss:$16 sps:$4 sm:$0xff]   ;;  %v10722_v2 = vld [vmem:[%s14642_s1 + $0x15c0] ss:$16 sps:$4 sm:$0xff]  }
 0x282   :  { %6995 = vmatmul.mubr.bf16.vlgmr.msra.gmra.mrb[0].mxu0 %v8325_v4  ;;  %7811 = vmatmul.mubr.bf16.vlgmr.msra.gmra.mrb[0].mxu1 %v8325_v4  ;;  %v10725_v4 = vld [vmem:[%s14642_s1 + $0x15c8] ss:$16 sps:$4 sm:$0xff]  }
 0x283   :  { %7014 = vmatpush1.bf16.msra.mxu0 %v10637_v6  ;;  %7830 = vmatpush1.bf16.msra.mxu1 %v10640_v7  ;;  %v10734_v6 = vld [vmem:[%s14642_s1 + $0x15ec] ss:$16 sps:$4 sm:$0xff]   ;;  %v10729_v7 = vld [vmem:[%s14642_s1 + $0x15e0] ss:$16 sps:$4 sm:$0xff]  }
 0x284   :  { %7015 = vmatprep.subr.bf16.mxu0 %v10645_v8  ;;  %7831 = vmatprep.subr.bf16.mxu1 %v10648_v9  ;;  %v10732_v8 = vld [vmem:[%s14642_s1 + $0x15e8] ss:$16 sps:$4 sm:$0xff]   ;;  %v10737_v9 = vld [vmem:[%s14642_s1 + $0x1604] ss:$16 sps:$4 sm:$0xff]  }
 0x285   :  { %7004 = vmatprep.mubr.bf16.mxu0 %v8358_v10  ;;  %7820 = vmatprep.mubr.bf16.mxu1 %v8358_v10  ;;  %v10740_v10 = vld [vmem:[%s14642_s1 + $0x160c] ss:$16 sps:$4 sm:$0xff]  }
 0x287   :  { %7016 = vmatpush1.bf16.msra.mxu0 %v10643_v11  ;;  %7832 = vmatpush1.bf16.msra.mxu1 %v10646_v12  ;;  %v8327_v11 = vcombine.low %v13372_v16, %v13377_v17  ;;  %v59_v12 = vld [vmem:[%s14643_s0 + $0x150] sm:$0xff]  ;;  %v10746_v16 = vld [vmem:[%s14642_s1 + $0x162c] ss:$16 sps:$4 sm:$0xff]  }
 0x288   :  { %7017 = vmatprep.subr.bf16.mxu0 %v10651_v13  ;;  %7833 = vmatprep.subr.bf16.mxu1 %v10654_v14  ;;  %v10735_v13 = vld [vmem:[%s14642_s1 + $0x1600] ss:$16 sps:$4 sm:$0xff]   ;;  %v10738_v14 = vld [vmem:[%s14642_s1 + $0x1608] ss:$16 sps:$4 sm:$0xff]   ;;  %v8360_v17 = vcombine.high %v59_v12, %v59_v12 }
 0x28a   :  { %7005 = vmatmul.mubr.bf16.gmra.mrb[4].mxu0 %v8357_v15  ;;  %7821 = vmatmul.mubr.bf16.gmra.mrb[4].mxu1 %v8357_v15  ;;  %v10743_v15 = vld [vmem:[%s14642_s1 + $0x1624] ss:$16 sps:$4 sm:$0xff]  }
 0x28b   :  { %7018 = vmatpush1.bf16.msra.mxu0 %v10649_v18  ;;  %7834 = vmatpush1.bf16.msra.mxu1 %v10652_v19  ;;  %v10741_v18 = vld [vmem:[%s14642_s1 + $0x1620] ss:$16 sps:$4 sm:$0xff]   ;;  %v10744_v19 = vld [vmem:[%s14642_s1 + $0x1628] ss:$16 sps:$4 sm:$0xff]  }
 0x28c   :  { %7019 = vmatprep.subr.bf16.mxu0 %v10657_v20  ;;  %7835 = vmatprep.subr.bf16.mxu1 %v10660_v21  ;;  %v10749_v20 = vld [vmem:[%s14642_s1 + $0x1644] ss:$16 sps:$4 sm:$0xff]   ;;  %v10752_v21 = vld [vmem:[%s14642_s1 + $0x164c] ss:$16 sps:$4 sm:$0xff]  }
 0x28d   :  { %7045 = vmatprep.mubr.bf16.mxu0 %v8328_v22  ;;  %7861 = vmatprep.mubr.bf16.mxu1 %v8328_v22  ;;  %v8359_v22 = vcombine.low %v59_v12, %v59_v12  ;;  %v10829_v12 = vld [vmem:[%s14642_s1 + $0x17e4] ss:$16 sps:$4 sm:$0xff]  }
 0x28f   :  { %7020 = vmatpush1.bf16.msra.mxu0 %v10655_v23  ;;  %7836 = vmatpush1.bf16.msra.mxu1 %v10658_v24  ;;  %v13581_v23 = vld [vmem:[%s14643_s0 + $0x58] sm:$0xff] }
 0x290   :  { %7021 = vmatprep.subr.bf16.mxu0 %v10663_v25  ;;  %7837 = vmatprep.subr.bf16.mxu1 %v10666_v26  ;;  %v13586_v24 = vld [vmem:[%s14643_s0 + $0xd8] sm:$0xff]  ;;  %v10747_v25 = vld [vmem:[%s14642_s1 + $0x1640] ss:$16 sps:$4 sm:$0xff]  }
 0x291   :  { %v10750_v26 = vld [vmem:[%s14642_s1 + $0x1648] ss:$16 sps:$4 sm:$0xff]  }
 0x293   :  { %7022 = vmatpush1.bf16.msra.mxu0 %v10661_v27  ;;  %7838 = vmatpush1.bf16.msra.mxu1 %v10664_v28  ;;  %v10755_v27 = vld [vmem:[%s14642_s1 + $0x1664] ss:$16 sps:$4 sm:$0xff]   ;;  %v10758_v28 = vld [vmem:[%s14642_s1 + $0x166c] ss:$16 sps:$4 sm:$0xff]  }
 0x294   :  { %7023 = vmatprep.subr.bf16.mxu0 %v10669_v29  ;;  %7839 = vmatprep.subr.bf16.mxu1 %v10672_v30  ;;  %v8330_v29 = vcombine.high %v13581_v23, %v13586_v24  ;;  %v10753_v30 = vld [vmem:[%s14642_s1 + $0x1660] ss:$16 sps:$4 sm:$0xff]  }
 0x297   :  { %7024 = vmatpush1.bf16.msra.mxu0 %v10667_v31  ;;  %7840 = vmatpush1.bf16.msra.mxu1 %v10670_v32  ;;  %v10756_v31 = vld [vmem:[%s14642_s1 + $0x1668] ss:$16 sps:$4 sm:$0xff]   ;;  %v10761_v32 = vld [vmem:[%s14642_s1 + $0x1684] ss:$16 sps:$4 sm:$0xff]  }
 0x298   :  { %7025 = vmatprep.subr.bf16.mxu0 %v10675_v33  ;;  %7841 = vmatprep.subr.bf16.mxu1 %v10678_v34  ;;  %v10764_v33 = vld [vmem:[%s14642_s1 + $0x168c] ss:$16 sps:$4 sm:$0xff]   ;;  %v10759_v34 = vld [vmem:[%s14642_s1 + $0x1680] ss:$16 sps:$4 sm:$0xff]  }
 0x29b   :  { %7026 = vmatpush1.bf16.msra.mxu0 %v10673_v35  ;;  %7842 = vmatpush1.bf16.msra.mxu1 %v10676_v36  ;;  %v10762_v35 = vld [vmem:[%s14642_s1 + $0x1688] ss:$16 sps:$4 sm:$0xff]   ;;  %v10767_v36 = vld [vmem:[%s14642_s1 + $0x16a4] ss:$16 sps:$4 sm:$0xff]  }
 0x29c   :  { %7027 = vmatprep.subr.bf16.mxu0 %v10681_v37  ;;  %7843 = vmatprep.subr.bf16.mxu1 %v10684_v38  ;;  %v10770_v37 = vld [vmem:[%s14642_s1 + $0x16ac] ss:$16 sps:$4 sm:$0xff]   ;;  %v10765_v38 = vld [vmem:[%s14642_s1 + $0x16a0] ss:$16 sps:$4 sm:$0xff]  }
 0x29f   :  { %7028 = vmatpush1.bf16.msra.mxu0 %v10679_v39  ;;  %7844 = vmatpush1.bf16.msra.mxu1 %v10682_v40  ;;  %v10768_v39 = vld [vmem:[%s14642_s1 + $0x16a8] ss:$16 sps:$4 sm:$0xff]   ;;  %v10773_v40 = vld [vmem:[%s14642_s1 + $0x16c4] ss:$16 sps:$4 sm:$0xff]  }
 0x2a0   :  { %7029 = vmatprep.subr.bf16.mxu0 %v10687_v41  ;;  %7845 = vmatprep.subr.bf16.mxu1 %v10690_v42  ;;  %v10776_v41 = vld [vmem:[%s14642_s1 + $0x16cc] ss:$16 sps:$4 sm:$0xff]   ;;  %v10771_v42 = vld [vmem:[%s14642_s1 + $0x16c0] ss:$16 sps:$4 sm:$0xff]  }
 0x2a3   :  { %7030 = vmatpush1.bf16.msra.mxu0 %v10685_v43  ;;  %7846 = vmatpush1.bf16.msra.mxu1 %v10688_v46  ;;  %v10774_v43 = vld [vmem:[%s14642_s1 + $0x16c8] ss:$16 sps:$4 sm:$0xff]   ;;  %v10779_v46 = vld [vmem:[%s14642_s1 + $0x16e4] ss:$16 sps:$4 sm:$0xff]  }
 0x2a4   :  { %7031 = vmatprep.subr.bf16.mxu0 %v10693_v44  ;;  %7847 = vmatprep.subr.bf16.mxu1 %v10696_v45  ;;  %v10782_v44 = vld [vmem:[%s14642_s1 + $0x16ec] ss:$16 sps:$4 sm:$0xff]   ;;  %v10777_v45 = vld [vmem:[%s14642_s1 + $0x16e0] ss:$16 sps:$4 sm:$0xff]  }
 0x2a7   :  { %7032 = vmatpush1.bf16.msra.mxu0 %v10691_v47  ;;  %7848 = vmatpush1.bf16.msra.mxu1 %v10694_v48  ;;  %v10780_v47 = vld [vmem:[%s14642_s1 + $0x16e8] ss:$16 sps:$4 sm:$0xff]   ;;  %v10785_v48 = vld [vmem:[%s14642_s1 + $0x1704] ss:$16 sps:$4 sm:$0xff]  }
 0x2a8   :  { %7033 = vmatprep.subr.bf16.mxu0 %v10699_v49  ;;  %7849 = vmatprep.subr.bf16.mxu1 %v10702_v50  ;;  %v10788_v49 = vld [vmem:[%s14642_s1 + $0x170c] ss:$16 sps:$4 sm:$0xff]   ;;  %v10783_v50 = vld [vmem:[%s14642_s1 + $0x1700] ss:$16 sps:$4 sm:$0xff]  }
 0x2ab   :  { %7034 = vmatpush1.bf16.msra.mxu0 %v10697_v53  ;;  %7850 = vmatpush1.bf16.msra.mxu1 %v10700_v51  ;;  %v10786_v53 = vld [vmem:[%s14642_s1 + $0x1708] ss:$16 sps:$4 sm:$0xff]   ;;  %v10791_v51 = vld [vmem:[%s14642_s1 + $0x1724] ss:$16 sps:$4 sm:$0xff]  }
 0x2ac   :  { %7035 = vmatprep.subr.bf16.mxu0 %v10705_v52  ;;  %7851 = vmatprep.subr.bf16.mxu1 %v10708_v54  ;;  %v10794_v52 = vld [vmem:[%s14642_s1 + $0x172c] ss:$16 sps:$4 sm:$0xff]   ;;  %v10789_v54 = vld [vmem:[%s14642_s1 + $0x1720] ss:$16 sps:$4 sm:$0xff]  }
 0x2af   :  { %7036 = vmatpush1.bf16.msra.mxu0 %v10703_v55  ;;  %7852 = vmatpush1.bf16.msra.mxu1 %v10706_v56  ;;  %v10792_v55 = vld [vmem:[%s14642_s1 + $0x1728] ss:$16 sps:$4 sm:$0xff]   ;;  %v10797_v56 = vld [vmem:[%s14642_s1 + $0x1744] ss:$16 sps:$4 sm:$0xff]  }
 0x2b0   :  { %7037 = vmatprep.subr.bf16.mxu0 %v10711_v57  ;;  %7853 = vmatprep.subr.bf16.mxu1 %v10714_v60  ;;  %v10800_v57 = vld [vmem:[%s14642_s1 + $0x174c] ss:$16 sps:$4 sm:$0xff]   ;;  %v10795_v60 = vld [vmem:[%s14642_s1 + $0x1740] ss:$16 sps:$4 sm:$0xff]  }
 0x2b3   :  { %7038 = vmatpush1.bf16.msra.mxu0 %v10709_v58  ;;  %7854 = vmatpush1.bf16.msra.mxu1 %v10712_v59  ;;  %v10798_v58 = vld [vmem:[%s14642_s1 + $0x1748] ss:$16 sps:$4 sm:$0xff]   ;;  %v10803_v59 = vld [vmem:[%s14642_s1 + $0x1764] ss:$16 sps:$4 sm:$0xff]  }
 0x2b4   :  { %7039 = vmatprep.subr.bf16.mxu0 %v10717_v61  ;;  %7855 = vmatprep.subr.bf16.mxu1 %v10720_v62  ;;  %v10806_v61 = vld [vmem:[%s14642_s1 + $0x176c] ss:$16 sps:$4 sm:$0xff]   ;;  %v10801_v62 = vld [vmem:[%s14642_s1 + $0x1760] ss:$16 sps:$4 sm:$0xff]  }
 0x2b7   :  { %7040 = vmatpush1.bf16.msra.mxu0 %v10715_v63  ;;  %7856 = vmatpush1.bf16.msra.mxu1 %v10718_v0  ;;  %v10804_v63 = vld [vmem:[%s14642_s1 + $0x1768] ss:$16 sps:$4 sm:$0xff]   ;;  %v10809_v0 = vld [vmem:[%s14642_s1 + $0x1784] ss:$16 sps:$4 sm:$0xff]  }
 0x2b8   :  { %7041 = vmatprep.subr.bf16.mxu0 %v10724_v3  ;;  %7857 = vmatprep.subr.bf16.mxu1 %v10727_v1  ;;  %v10812_v3 = vld [vmem:[%s14642_s1 + $0x178c] ss:$16 sps:$4 sm:$0xff]   ;;  %v10807_v1 = vld [vmem:[%s14642_s1 + $0x1780] ss:$16 sps:$4 sm:$0xff]  }
 0x2bb   :  { %7042 = vmatpush1.bf16.msra.mxu0 %v10722_v2  ;;  %7858 = vmatpush1.bf16.msra.mxu1 %v10725_v4  ;;  %v10810_v2 = vld [vmem:[%s14642_s1 + $0x1788] ss:$16 sps:$4 sm:$0xff]   ;;  %v10815_v4 = vld [vmem:[%s14642_s1 + $0x17a4] ss:$16 sps:$4 sm:$0xff]  }
 0x2bc   :  { %7043 = vmatprep.subr.bf16.mxu0 %v10731_v5  ;;  %7859 = vmatprep.subr.bf16.mxu1 %v10734_v6  ;;  %v10818_v5 = vld [vmem:[%s14642_s1 + $0x17ac] ss:$16 sps:$4 sm:$0xff]   ;;  %v10813_v6 = vld [vmem:[%s14642_s1 + $0x17a0] ss:$16 sps:$4 sm:$0xff]  }
 0x2bf   :  { %7044 = vmatpush1.bf16.msra.mxu0 %v10729_v7  ;;  %7860 = vmatpush1.bf16.msra.mxu1 %v10732_v8  ;;  %v10816_v7 = vld [vmem:[%s14642_s1 + $0x17a8] ss:$16 sps:$4 sm:$0xff]   ;;  %v10822_v8 = vld [vmem:[%s14642_s1 + $0x17c4] ss:$16 sps:$4 sm:$0xff]  }
 0x2c0   :  { %7064 = vmatprep.subr.bf16.mxu0 %v10737_v9  ;;  %7880 = vmatprep.subr.bf16.mxu1 %v10740_v10  ;;  %v10825_v9 = vld [vmem:[%s14642_s1 + $0x17cc] ss:$16 sps:$4 sm:$0xff]   ;;  %v10820_v10 = vld [vmem:[%s14642_s1 + $0x17c0] ss:$16 sps:$4 sm:$0xff]  }
 0x2c2   :  { %7046 = vmatmul.mubr.bf16.vlgmr.msra.gmra.mrb[0].mxu0 %v8327_v11  ;;  %7862 = vmatmul.mubr.bf16.vlgmr.msra.gmra.mrb[0].mxu1 %v8327_v11  ;;  %v10823_v11 = vld [vmem:[%s14642_s1 + $0x17c8] ss:$16 sps:$4 sm:$0xff]  }
 0x2c3   :  { %7065 = vmatpush1.bf16.msra.mxu0 %v10735_v13  ;;  %7881 = vmatpush1.bf16.msra.mxu1 %v10738_v14  ;;  %v10832_v13 = vld [vmem:[%s14642_s1 + $0x17ec] ss:$16 sps:$4 sm:$0xff]   ;;  %v10827_v14 = vld [vmem:[%s14642_s1 + $0x17e0] ss:$16 sps:$4 sm:$0xff]  }
 0x2c4   :  { %7066 = vmatprep.subr.bf16.mxu0 %v10743_v15  ;;  %7882 = vmatprep.subr.bf16.mxu1 %v10746_v16  ;;  %v10830_v15 = vld [vmem:[%s14642_s1 + $0x17e8] ss:$16 sps:$4 sm:$0xff]   ;;  %v10835_v16 = vld [vmem:[%s14642_s1 + $0x1804] ss:$16 sps:$4 sm:$0xff]  }
 0x2c5   :  { %7055 = vmatprep.mubr.bf16.mxu0 %v8360_v17  ;;  %7871 = vmatprep.mubr.bf16.mxu1 %v8360_v17  ;;  %v10838_v17 = vld [vmem:[%s14642_s1 + $0x180c] ss:$16 sps:$4 sm:$0xff]  }
 0x2c7   :  { %7067 = vmatpush1.bf16.msra.mxu0 %v10741_v18  ;;  %7883 = vmatpush1.bf16.msra.mxu1 %v10744_v19  ;;  %v8329_v18 = vcombine.low %v13581_v23, %v13586_v24  ;;  %v60_v19 = vld [vmem:[%s14643_s0 + $0x158] sm:$0xff] }
 0x2c8   :  { %7068 = vmatprep.subr.bf16.mxu0 %v10749_v20  ;;  %7884 = vmatprep.subr.bf16.mxu1 %v10752_v21  ;;  %v10833_v20 = vld [vmem:[%s14642_s1 + $0x1800] ss:$16 sps:$4 sm:$0xff]   ;;  %v10836_v21 = vld [vmem:[%s14642_s1 + $0x1808] ss:$16 sps:$4 sm:$0xff]   ;;  %v10844_v23 = vld [vmem:[%s14642_s1 + $0x182c] ss:$16 sps:$4 sm:$0xff]   ;;  %v8362_v24 = vcombine.high %v60_v19, %v60_v19 }
 0x2ca   :  { %7056 = vmatmul.mubr.bf16.gmra.mrb[4].mxu0 %v8359_v22  ;;  %7872 = vmatmul.mubr.bf16.gmra.mrb[4].mxu1 %v8359_v22  ;;  %v10841_v22 = vld [vmem:[%s14642_s1 + $0x1824] ss:$16 sps:$4 sm:$0xff]  }
 0x2cb   :  { %7069 = vmatpush1.bf16.msra.mxu0 %v10747_v25  ;;  %7885 = vmatpush1.bf16.msra.mxu1 %v10750_v26  ;;  %v10839_v25 = vld [vmem:[%s14642_s1 + $0x1820] ss:$16 sps:$4 sm:$0xff]   ;;  %v10842_v26 = vld [vmem:[%s14642_s1 + $0x1828] ss:$16 sps:$4 sm:$0xff]  }
 0x2cc   :  { %7070 = vmatprep.subr.bf16.mxu0 %v10755_v27  ;;  %7886 = vmatprep.subr.bf16.mxu1 %v10758_v28  ;;  %v10847_v27 = vld [vmem:[%s14642_s1 + $0x1844] ss:$16 sps:$4 sm:$0xff]   ;;  %v10850_v28 = vld [vmem:[%s14642_s1 + $0x184c] ss:$16 sps:$4 sm:$0xff]  }
 0x2cd   :  { %7096 = vmatprep.mubr.bf16.mxu0 %v8330_v29  ;;  %7912 = vmatprep.mubr.bf16.mxu1 %v8330_v29  ;;  %v8361_v29 = vcombine.low %v60_v19, %v60_v19  ;;  %v10927_v19 = vld [vmem:[%s14642_s1 + $0x19e4] ss:$16 sps:$4 sm:$0xff]  }
 0x2cf   :  { %7071 = vmatpush1.bf16.msra.mxu0 %v10753_v30  ;;  %7887 = vmatpush1.bf16.msra.mxu1 %v10756_v31  ;;  %v13790_v30 = vld [vmem:[%s14643_s0 + $0x60] sm:$0xff] }
 0x2d0   :  { %7072 = vmatprep.subr.bf16.mxu0 %v10761_v32  ;;  %7888 = vmatprep.subr.bf16.mxu1 %v10764_v33  ;;  %v13795_v31 = vld [vmem:[%s14643_s0 + $0xe0] sm:$0xff]  ;;  %v10848_v33 = vld [vmem:[%s14642_s1 + $0x1848] ss:$16 sps:$4 sm:$0xff]  }
 0x2d1   :  { %v10845_v32 = vld [vmem:[%s14642_s1 + $0x1840] ss:$16 sps:$4 sm:$0xff]  }
 0x2d3   :  { %7073 = vmatpush1.bf16.msra.mxu0 %v10759_v34  ;;  %7889 = vmatpush1.bf16.msra.mxu1 %v10762_v35  ;;  %v10853_v34 = vld [vmem:[%s14642_s1 + $0x1864] ss:$16 sps:$4 sm:$0xff]   ;;  %v10856_v35 = vld [vmem:[%s14642_s1 + $0x186c] ss:$16 sps:$4 sm:$0xff]  }
 0x2d4   :  { %7074 = vmatprep.subr.bf16.mxu0 %v10767_v36  ;;  %7890 = vmatprep.subr.bf16.mxu1 %v10770_v37  ;;  %v8332_v36 = vcombine.high %v13790_v30, %v13795_v31  ;;  %v10851_v37 = vld [vmem:[%s14642_s1 + $0x1860] ss:$16 sps:$4 sm:$0xff]  }
 0x2d7   :  { %7075 = vmatpush1.bf16.msra.mxu0 %v10765_v38  ;;  %7891 = vmatpush1.bf16.msra.mxu1 %v10768_v39  ;;  %v10854_v38 = vld [vmem:[%s14642_s1 + $0x1868] ss:$16 sps:$4 sm:$0xff]   ;;  %v10859_v39 = vld [vmem:[%s14642_s1 + $0x1884] ss:$16 sps:$4 sm:$0xff]  }
 0x2d8   :  { %7076 = vmatprep.subr.bf16.mxu0 %v10773_v40  ;;  %7892 = vmatprep.subr.bf16.mxu1 %v10776_v41  ;;  %v10862_v40 = vld [vmem:[%s14642_s1 + $0x188c] ss:$16 sps:$4 sm:$0xff]   ;;  %v10857_v41 = vld [vmem:[%s14642_s1 + $0x1880] ss:$16 sps:$4 sm:$0xff]  }
 0x2db   :  { %7077 = vmatpush1.bf16.msra.mxu0 %v10771_v42  ;;  %7893 = vmatpush1.bf16.msra.mxu1 %v10774_v43  ;;  %v10860_v42 = vld [vmem:[%s14642_s1 + $0x1888] ss:$16 sps:$4 sm:$0xff]   ;;  %v10865_v43 = vld [vmem:[%s14642_s1 + $0x18a4] ss:$16 sps:$4 sm:$0xff]  }
 0x2dc   :  { %7078 = vmatprep.subr.bf16.mxu0 %v10779_v46  ;;  %7894 = vmatprep.subr.bf16.mxu1 %v10782_v44  ;;  %v10868_v46 = vld [vmem:[%s14642_s1 + $0x18ac] ss:$16 sps:$4 sm:$0xff]   ;;  %v10863_v44 = vld [vmem:[%s14642_s1 + $0x18a0] ss:$16 sps:$4 sm:$0xff]  }
 0x2df   :  { %7079 = vmatpush1.bf16.msra.mxu0 %v10777_v45  ;;  %7895 = vmatpush1.bf16.msra.mxu1 %v10780_v47  ;;  %v10866_v45 = vld [vmem:[%s14642_s1 + $0x18a8] ss:$16 sps:$4 sm:$0xff]   ;;  %v10871_v47 = vld [vmem:[%s14642_s1 + $0x18c4] ss:$16 sps:$4 sm:$0xff]  }
 0x2e0   :  { %7080 = vmatprep.subr.bf16.mxu0 %v10785_v48  ;;  %7896 = vmatprep.subr.bf16.mxu1 %v10788_v49  ;;  %v10874_v48 = vld [vmem:[%s14642_s1 + $0x18cc] ss:$16 sps:$4 sm:$0xff]   ;;  %v10869_v49 = vld [vmem:[%s14642_s1 + $0x18c0] ss:$16 sps:$4 sm:$0xff]  }
 0x2e3   :  { %7081 = vmatpush1.bf16.msra.mxu0 %v10783_v50  ;;  %7897 = vmatpush1.bf16.msra.mxu1 %v10786_v53  ;;  %v10872_v50 = vld [vmem:[%s14642_s1 + $0x18c8] ss:$16 sps:$4 sm:$0xff]   ;;  %v10877_v53 = vld [vmem:[%s14642_s1 + $0x18e4] ss:$16 sps:$4 sm:$0xff]  }
 0x2e4   :  { %7082 = vmatprep.subr.bf16.mxu0 %v10791_v51  ;;  %7898 = vmatprep.subr.bf16.mxu1 %v10794_v52  ;;  %v10880_v51 = vld [vmem:[%s14642_s1 + $0x18ec] ss:$16 sps:$4 sm:$0xff]   ;;  %v10875_v52 = vld [vmem:[%s14642_s1 + $0x18e0] ss:$16 sps:$4 sm:$0xff]  }
 0x2e7   :  { %7083 = vmatpush1.bf16.msra.mxu0 %v10789_v54  ;;  %7899 = vmatpush1.bf16.msra.mxu1 %v10792_v55  ;;  %v10878_v54 = vld [vmem:[%s14642_s1 + $0x18e8] ss:$16 sps:$4 sm:$0xff]   ;;  %v10883_v55 = vld [vmem:[%s14642_s1 + $0x1904] ss:$16 sps:$4 sm:$0xff]  }
 0x2e8   :  { %7084 = vmatprep.subr.bf16.mxu0 %v10797_v56  ;;  %7900 = vmatprep.subr.bf16.mxu1 %v10800_v57  ;;  %v10886_v56 = vld [vmem:[%s14642_s1 + $0x190c] ss:$16 sps:$4 sm:$0xff]   ;;  %v10881_v57 = vld [vmem:[%s14642_s1 + $0x1900] ss:$16 sps:$4 sm:$0xff]  }
 0x2eb   :  { %7085 = vmatpush1.bf16.msra.mxu0 %v10795_v60  ;;  %7901 = vmatpush1.bf16.msra.mxu1 %v10798_v58  ;;  %v10884_v60 = vld [vmem:[%s14642_s1 + $0x1908] ss:$16 sps:$4 sm:$0xff]   ;;  %v10889_v58 = vld [vmem:[%s14642_s1 + $0x1924] ss:$16 sps:$4 sm:$0xff]  }
 0x2ec   :  { %7086 = vmatprep.subr.bf16.mxu0 %v10803_v59  ;;  %7902 = vmatprep.subr.bf16.mxu1 %v10806_v61  ;;  %v10892_v59 = vld [vmem:[%s14642_s1 + $0x192c] ss:$16 sps:$4 sm:$0xff]   ;;  %v10887_v61 = vld [vmem:[%s14642_s1 + $0x1920] ss:$16 sps:$4 sm:$0xff]  }
 0x2ef   :  { %7087 = vmatpush1.bf16.msra.mxu0 %v10801_v62  ;;  %7903 = vmatpush1.bf16.msra.mxu1 %v10804_v63  ;;  %v10890_v62 = vld [vmem:[%s14642_s1 + $0x1928] ss:$16 sps:$4 sm:$0xff]   ;;  %v10895_v63 = vld [vmem:[%s14642_s1 + $0x1944] ss:$16 sps:$4 sm:$0xff]  }
 0x2f0   :  { %7088 = vmatprep.subr.bf16.mxu0 %v10809_v0  ;;  %7904 = vmatprep.subr.bf16.mxu1 %v10812_v3  ;;  %v10898_v0 = vld [vmem:[%s14642_s1 + $0x194c] ss:$16 sps:$4 sm:$0xff]   ;;  %v10893_v3 = vld [vmem:[%s14642_s1 + $0x1940] ss:$16 sps:$4 sm:$0xff]  }
 0x2f3   :  { %7089 = vmatpush1.bf16.msra.mxu0 %v10807_v1  ;;  %7905 = vmatpush1.bf16.msra.mxu1 %v10810_v2  ;;  %v10896_v1 = vld [vmem:[%s14642_s1 + $0x1948] ss:$16 sps:$4 sm:$0xff]   ;;  %v10901_v2 = vld [vmem:[%s14642_s1 + $0x1964] ss:$16 sps:$4 sm:$0xff]  }
 0x2f4   :  { %7090 = vmatprep.subr.bf16.mxu0 %v10815_v4  ;;  %7906 = vmatprep.subr.bf16.mxu1 %v10818_v5  ;;  %v10904_v4 = vld [vmem:[%s14642_s1 + $0x196c] ss:$16 sps:$4 sm:$0xff]   ;;  %v10899_v5 = vld [vmem:[%s14642_s1 + $0x1960] ss:$16 sps:$4 sm:$0xff]  }
 0x2f7   :  { %7091 = vmatpush1.bf16.msra.mxu0 %v10813_v6  ;;  %7907 = vmatpush1.bf16.msra.mxu1 %v10816_v7  ;;  %v10902_v6 = vld [vmem:[%s14642_s1 + $0x1968] ss:$16 sps:$4 sm:$0xff]   ;;  %v10907_v7 = vld [vmem:[%s14642_s1 + $0x1984] ss:$16 sps:$4 sm:$0xff]  }
 0x2f8   :  { %7092 = vmatprep.subr.bf16.mxu0 %v10822_v8  ;;  %7908 = vmatprep.subr.bf16.mxu1 %v10825_v9  ;;  %v10910_v8 = vld [vmem:[%s14642_s1 + $0x198c] ss:$16 sps:$4 sm:$0xff]   ;;  %v10905_v9 = vld [vmem:[%s14642_s1 + $0x1980] ss:$16 sps:$4 sm:$0xff]  }
 0x2fb   :  { %7093 = vmatpush1.bf16.msra.mxu0 %v10820_v10  ;;  %7909 = vmatpush1.bf16.msra.mxu1 %v10823_v11  ;;  %v10908_v10 = vld [vmem:[%s14642_s1 + $0x1988] ss:$16 sps:$4 sm:$0xff]   ;;  %v10913_v11 = vld [vmem:[%s14642_s1 + $0x19a4] ss:$16 sps:$4 sm:$0xff]  }
 0x2fc   :  { %7094 = vmatprep.subr.bf16.mxu0 %v10829_v12  ;;  %7910 = vmatprep.subr.bf16.mxu1 %v10832_v13  ;;  %v10916_v12 = vld [vmem:[%s14642_s1 + $0x19ac] ss:$16 sps:$4 sm:$0xff]   ;;  %v10911_v13 = vld [vmem:[%s14642_s1 + $0x19a0] ss:$16 sps:$4 sm:$0xff]  }
 0x2ff   :  { %7095 = vmatpush1.bf16.msra.mxu0 %v10827_v14  ;;  %7911 = vmatpush1.bf16.msra.mxu1 %v10830_v15  ;;  %v10914_v14 = vld [vmem:[%s14642_s1 + $0x19a8] ss:$16 sps:$4 sm:$0xff]   ;;  %v10920_v15 = vld [vmem:[%s14642_s1 + $0x19c4] ss:$16 sps:$4 sm:$0xff]  }
 0x300   :  { %7115 = vmatprep.subr.bf16.mxu0 %v10835_v16  ;;  %7931 = vmatprep.subr.bf16.mxu1 %v10838_v17  ;;  %v10923_v16 = vld [vmem:[%s14642_s1 + $0x19cc] ss:$16 sps:$4 sm:$0xff]   ;;  %v10918_v17 = vld [vmem:[%s14642_s1 + $0x19c0] ss:$16 sps:$4 sm:$0xff]  }
 0x302   :  { %7097 = vmatmul.mubr.bf16.vlgmr.msra.gmra.mrb[0].mxu0 %v8329_v18  ;;  %7913 = vmatmul.mubr.bf16.vlgmr.msra.gmra.mrb[0].mxu1 %v8329_v18  ;;  %v10921_v18 = vld [vmem:[%s14642_s1 + $0x19c8] ss:$16 sps:$4 sm:$0xff]  }
 0x303   :  { %7116 = vmatpush1.bf16.msra.mxu0 %v10833_v20  ;;  %7932 = vmatpush1.bf16.msra.mxu1 %v10836_v21  ;;  %v10930_v20 = vld [vmem:[%s14642_s1 + $0x19ec] ss:$16 sps:$4 sm:$0xff]   ;;  %v10925_v21 = vld [vmem:[%s14642_s1 + $0x19e0] ss:$16 sps:$4 sm:$0xff]  }
 0x304   :  { %7117 = vmatprep.subr.bf16.mxu0 %v10841_v22  ;;  %7933 = vmatprep.subr.bf16.mxu1 %v10844_v23  ;;  %v10928_v22 = vld [vmem:[%s14642_s1 + $0x19e8] ss:$16 sps:$4 sm:$0xff]   ;;  %v10933_v23 = vld [vmem:[%s14642_s1 + $0x1a04] ss:$16 sps:$4 sm:$0xff]  }
 0x305   :  { %7106 = vmatprep.mubr.bf16.mxu0 %v8362_v24  ;;  %7922 = vmatprep.mubr.bf16.mxu1 %v8362_v24  ;;  %v10936_v24 = vld [vmem:[%s14642_s1 + $0x1a0c] ss:$16 sps:$4 sm:$0xff]  }
 0x307   :  { %7118 = vmatpush1.bf16.msra.mxu0 %v10839_v25  ;;  %7934 = vmatpush1.bf16.msra.mxu1 %v10842_v26  ;;  %v8331_v25 = vcombine.low %v13790_v30, %v13795_v31  ;;  %v61_v26 = vld [vmem:[%s14643_s0 + $0x160] sm:$0xff]  ;;  %v10942_v30 = vld [vmem:[%s14642_s1 + $0x1a2c] ss:$16 sps:$4 sm:$0xff]  }
 0x308   :  { %7119 = vmatprep.subr.bf16.mxu0 %v10847_v27  ;;  %7935 = vmatprep.subr.bf16.mxu1 %v10850_v28  ;;  %v10931_v27 = vld [vmem:[%s14642_s1 + $0x1a00] ss:$16 sps:$4 sm:$0xff]   ;;  %v10934_v28 = vld [vmem:[%s14642_s1 + $0x1a08] ss:$16 sps:$4 sm:$0xff]   ;;  %v8364_v31 = vcombine.high %v61_v26, %v61_v26 }
 0x30a   :  { %7107 = vmatmul.mubr.bf16.gmra.mrb[4].mxu0 %v8361_v29  ;;  %7923 = vmatmul.mubr.bf16.gmra.mrb[4].mxu1 %v8361_v29  ;;  %v10939_v29 = vld [vmem:[%s14642_s1 + $0x1a24] ss:$16 sps:$4 sm:$0xff]  }
 0x30b   :  { %7120 = vmatpush1.bf16.msra.mxu0 %v10845_v32  ;;  %7936 = vmatpush1.bf16.msra.mxu1 %v10848_v33  ;;  %v10937_v32 = vld [vmem:[%s14642_s1 + $0x1a20] ss:$16 sps:$4 sm:$0xff]   ;;  %v10940_v33 = vld [vmem:[%s14642_s1 + $0x1a28] ss:$16 sps:$4 sm:$0xff]  }
 0x30c   :  { %7121 = vmatprep.subr.bf16.mxu0 %v10853_v34  ;;  %7937 = vmatprep.subr.bf16.mxu1 %v10856_v35  ;;  %v10945_v34 = vld [vmem:[%s14642_s1 + $0x1a44] ss:$16 sps:$4 sm:$0xff]   ;;  %v10948_v35 = vld [vmem:[%s14642_s1 + $0x1a4c] ss:$16 sps:$4 sm:$0xff]  }
 0x30d   :  { %7147 = vmatprep.mubr.bf16.mxu0 %v8332_v36  ;;  %7963 = vmatprep.mubr.bf16.mxu1 %v8332_v36  ;;  %v8363_v36 = vcombine.low %v61_v26, %v61_v26  ;;  %v11025_v26 = vld [vmem:[%s14642_s1 + $0x1be4] ss:$16 sps:$4 sm:$0xff]  }
 0x30f   :  { %7122 = vmatpush1.bf16.msra.mxu0 %v10851_v37  ;;  %7938 = vmatpush1.bf16.msra.mxu1 %v10854_v38  ;;  %v13999_v37 = vld [vmem:[%s14643_s0 + $0x68] sm:$0xff] }
 0x310   :  { %7123 = vmatprep.subr.bf16.mxu0 %v10859_v39  ;;  %7939 = vmatprep.subr.bf16.mxu1 %v10862_v40  ;;  %v14004_v38 = vld [vmem:[%s14643_s0 + $0xe8] sm:$0xff]  ;;  %v10943_v39 = vld [vmem:[%s14642_s1 + $0x1a40] ss:$16 sps:$4 sm:$0xff]  }
 0x311   :  { %v10946_v40 = vld [vmem:[%s14642_s1 + $0x1a48] ss:$16 sps:$4 sm:$0xff]  }
 0x313   :  { %7124 = vmatpush1.bf16.msra.mxu0 %v10857_v41  ;;  %7940 = vmatpush1.bf16.msra.mxu1 %v10860_v42  ;;  %v10951_v41 = vld [vmem:[%s14642_s1 + $0x1a64] ss:$16 sps:$4 sm:$0xff]   ;;  %v10954_v42 = vld [vmem:[%s14642_s1 + $0x1a6c] ss:$16 sps:$4 sm:$0xff]  }
 0x314   :  { %7125 = vmatprep.subr.bf16.mxu0 %v10865_v43  ;;  %7941 = vmatprep.subr.bf16.mxu1 %v10868_v46  ;;  %v8334_v43 = vcombine.high %v13999_v37, %v14004_v38  ;;  %v10949_v46 = vld [vmem:[%s14642_s1 + $0x1a60] ss:$16 sps:$4 sm:$0xff]  }
 0x317   :  { %7126 = vmatpush1.bf16.msra.mxu0 %v10863_v44  ;;  %7942 = vmatpush1.bf16.msra.mxu1 %v10866_v45  ;;  %v10952_v44 = vld [vmem:[%s14642_s1 + $0x1a68] ss:$16 sps:$4 sm:$0xff]   ;;  %v10957_v45 = vld [vmem:[%s14642_s1 + $0x1a84] ss:$16 sps:$4 sm:$0xff]  }
 0x318   :  { %7127 = vmatprep.subr.bf16.mxu0 %v10871_v47  ;;  %7943 = vmatprep.subr.bf16.mxu1 %v10874_v48  ;;  %v10960_v47 = vld [vmem:[%s14642_s1 + $0x1a8c] ss:$16 sps:$4 sm:$0xff]   ;;  %v10955_v48 = vld [vmem:[%s14642_s1 + $0x1a80] ss:$16 sps:$4 sm:$0xff]  }
 0x31b   :  { %7128 = vmatpush1.bf16.msra.mxu0 %v10869_v49  ;;  %7944 = vmatpush1.bf16.msra.mxu1 %v10872_v50  ;;  %v10958_v49 = vld [vmem:[%s14642_s1 + $0x1a88] ss:$16 sps:$4 sm:$0xff]   ;;  %v10963_v50 = vld [vmem:[%s14642_s1 + $0x1aa4] ss:$16 sps:$4 sm:$0xff]  }
 0x31c   :  { %7129 = vmatprep.subr.bf16.mxu0 %v10877_v53  ;;  %7945 = vmatprep.subr.bf16.mxu1 %v10880_v51  ;;  %v10966_v53 = vld [vmem:[%s14642_s1 + $0x1aac] ss:$16 sps:$4 sm:$0xff]   ;;  %v10961_v51 = vld [vmem:[%s14642_s1 + $0x1aa0] ss:$16 sps:$4 sm:$0xff]  }
 0x31f   :  { %7130 = vmatpush1.bf16.msra.mxu0 %v10875_v52  ;;  %7946 = vmatpush1.bf16.msra.mxu1 %v10878_v54  ;;  %v10964_v52 = vld [vmem:[%s14642_s1 + $0x1aa8] ss:$16 sps:$4 sm:$0xff]   ;;  %v10969_v54 = vld [vmem:[%s14642_s1 + $0x1ac4] ss:$16 sps:$4 sm:$0xff]  }
 0x320   :  { %7131 = vmatprep.subr.bf16.mxu0 %v10883_v55  ;;  %7947 = vmatprep.subr.bf16.mxu1 %v10886_v56  ;;  %v10972_v55 = vld [vmem:[%s14642_s1 + $0x1acc] ss:$16 sps:$4 sm:$0xff]   ;;  %v10967_v56 = vld [vmem:[%s14642_s1 + $0x1ac0] ss:$16 sps:$4 sm:$0xff]  }
 0x323   :  { %7132 = vmatpush1.bf16.msra.mxu0 %v10881_v57  ;;  %7948 = vmatpush1.bf16.msra.mxu1 %v10884_v60  ;;  %v10970_v57 = vld [vmem:[%s14642_s1 + $0x1ac8] ss:$16 sps:$4 sm:$0xff]   ;;  %v10975_v60 = vld [vmem:[%s14642_s1 + $0x1ae4] ss:$16 sps:$4 sm:$0xff]  }
 0x324   :  { %7133 = vmatprep.subr.bf16.mxu0 %v10889_v58  ;;  %7949 = vmatprep.subr.bf16.mxu1 %v10892_v59  ;;  %v10978_v58 = vld [vmem:[%s14642_s1 + $0x1aec] ss:$16 sps:$4 sm:$0xff]   ;;  %v10973_v59 = vld [vmem:[%s14642_s1 + $0x1ae0] ss:$16 sps:$4 sm:$0xff]  }
 0x327   :  { %7134 = vmatpush1.bf16.msra.mxu0 %v10887_v61  ;;  %7950 = vmatpush1.bf16.msra.mxu1 %v10890_v62  ;;  %v10976_v61 = vld [vmem:[%s14642_s1 + $0x1ae8] ss:$16 sps:$4 sm:$0xff]   ;;  %v10981_v62 = vld [vmem:[%s14642_s1 + $0x1b04] ss:$16 sps:$4 sm:$0xff]  }
 0x328   :  { %7135 = vmatprep.subr.bf16.mxu0 %v10895_v63  ;;  %7951 = vmatprep.subr.bf16.mxu1 %v10898_v0  ;;  %v10984_v63 = vld [vmem:[%s14642_s1 + $0x1b0c] ss:$16 sps:$4 sm:$0xff]   ;;  %v10979_v0 = vld [vmem:[%s14642_s1 + $0x1b00] ss:$16 sps:$4 sm:$0xff]  }
 0x32b   :  { %7136 = vmatpush1.bf16.msra.mxu0 %v10893_v3  ;;  %7952 = vmatpush1.bf16.msra.mxu1 %v10896_v1  ;;  %v10982_v3 = vld [vmem:[%s14642_s1 + $0x1b08] ss:$16 sps:$4 sm:$0xff]   ;;  %v10987_v1 = vld [vmem:[%s14642_s1 + $0x1b24] ss:$16 sps:$4 sm:$0xff]  }
 0x32c   :  { %7137 = vmatprep.subr.bf16.mxu0 %v10901_v2  ;;  %7953 = vmatprep.subr.bf16.mxu1 %v10904_v4  ;;  %v10990_v2 = vld [vmem:[%s14642_s1 + $0x1b2c] ss:$16 sps:$4 sm:$0xff]   ;;  %v10985_v4 = vld [vmem:[%s14642_s1 + $0x1b20] ss:$16 sps:$4 sm:$0xff]  }
 0x32f   :  { %7138 = vmatpush1.bf16.msra.mxu0 %v10899_v5  ;;  %7954 = vmatpush1.bf16.msra.mxu1 %v10902_v6  ;;  %v10988_v5 = vld [vmem:[%s14642_s1 + $0x1b28] ss:$16 sps:$4 sm:$0xff]   ;;  %v10993_v6 = vld [vmem:[%s14642_s1 + $0x1b44] ss:$16 sps:$4 sm:$0xff]  }
 0x330   :  { %7139 = vmatprep.subr.bf16.mxu0 %v10907_v7  ;;  %7955 = vmatprep.subr.bf16.mxu1 %v10910_v8  ;;  %v10996_v7 = vld [vmem:[%s14642_s1 + $0x1b4c] ss:$16 sps:$4 sm:$0xff]   ;;  %v10991_v8 = vld [vmem:[%s14642_s1 + $0x1b40] ss:$16 sps:$4 sm:$0xff]  }
 0x333   :  { %7140 = vmatpush1.bf16.msra.mxu0 %v10905_v9  ;;  %7956 = vmatpush1.bf16.msra.mxu1 %v10908_v10  ;;  %v10994_v9 = vld [vmem:[%s14642_s1 + $0x1b48] ss:$16 sps:$4 sm:$0xff]   ;;  %v10999_v10 = vld [vmem:[%s14642_s1 + $0x1b64] ss:$16 sps:$4 sm:$0xff]  }
 0x334   :  { %7141 = vmatprep.subr.bf16.mxu0 %v10913_v11  ;;  %7957 = vmatprep.subr.bf16.mxu1 %v10916_v12  ;;  %v11002_v11 = vld [vmem:[%s14642_s1 + $0x1b6c] ss:$16 sps:$4 sm:$0xff]   ;;  %v10997_v12 = vld [vmem:[%s14642_s1 + $0x1b60] ss:$16 sps:$4 sm:$0xff]  }
 0x337   :  { %7142 = vmatpush1.bf16.msra.mxu0 %v10911_v13  ;;  %7958 = vmatpush1.bf16.msra.mxu1 %v10914_v14  ;;  %v11000_v13 = vld [vmem:[%s14642_s1 + $0x1b68] ss:$16 sps:$4 sm:$0xff]   ;;  %v11005_v14 = vld [vmem:[%s14642_s1 + $0x1b84] ss:$16 sps:$4 sm:$0xff]  }
 0x338   :  { %7143 = vmatprep.subr.bf16.mxu0 %v10920_v15  ;;  %7959 = vmatprep.subr.bf16.mxu1 %v10923_v16  ;;  %v11008_v15 = vld [vmem:[%s14642_s1 + $0x1b8c] ss:$16 sps:$4 sm:$0xff]   ;;  %v11003_v16 = vld [vmem:[%s14642_s1 + $0x1b80] ss:$16 sps:$4 sm:$0xff]  }
 0x33b   :  { %7144 = vmatpush1.bf16.msra.mxu0 %v10918_v17  ;;  %7960 = vmatpush1.bf16.msra.mxu1 %v10921_v18  ;;  %v11006_v17 = vld [vmem:[%s14642_s1 + $0x1b88] ss:$16 sps:$4 sm:$0xff]   ;;  %v11011_v18 = vld [vmem:[%s14642_s1 + $0x1ba4] ss:$16 sps:$4 sm:$0xff]  }
 0x33c   :  { %7145 = vmatprep.subr.bf16.mxu0 %v10927_v19  ;;  %7961 = vmatprep.subr.bf16.mxu1 %v10930_v20  ;;  %v11014_v19 = vld [vmem:[%s14642_s1 + $0x1bac] ss:$16 sps:$4 sm:$0xff]   ;;  %v11009_v20 = vld [vmem:[%s14642_s1 + $0x1ba0] ss:$16 sps:$4 sm:$0xff]  }
 0x33f   :  { %7146 = vmatpush1.bf16.msra.mxu0 %v10925_v21  ;;  %7962 = vmatpush1.bf16.msra.mxu1 %v10928_v22  ;;  %v11012_v21 = vld [vmem:[%s14642_s1 + $0x1ba8] ss:$16 sps:$4 sm:$0xff]   ;;  %v11018_v22 = vld [vmem:[%s14642_s1 + $0x1bc4] ss:$16 sps:$4 sm:$0xff]  }
 0x340   :  { %7166 = vmatprep.subr.bf16.mxu0 %v10933_v23  ;;  %7982 = vmatprep.subr.bf16.mxu1 %v10936_v24  ;;  %v11021_v23 = vld [vmem:[%s14642_s1 + $0x1bcc] ss:$16 sps:$4 sm:$0xff]   ;;  %v11016_v24 = vld [vmem:[%s14642_s1 + $0x1bc0] ss:$16 sps:$4 sm:$0xff]  }
 0x342   :  { %7148 = vmatmul.mubr.bf16.vlgmr.msra.gmra.mrb[0].mxu0 %v8331_v25  ;;  %7964 = vmatmul.mubr.bf16.vlgmr.msra.gmra.mrb[0].mxu1 %v8331_v25  ;;  %v11019_v25 = vld [vmem:[%s14642_s1 + $0x1bc8] ss:$16 sps:$4 sm:$0xff]  }
 0x343   :  { %7167 = vmatpush1.bf16.msra.mxu0 %v10931_v27  ;;  %7983 = vmatpush1.bf16.msra.mxu1 %v10934_v28  ;;  %v11028_v27 = vld [vmem:[%s14642_s1 + $0x1bec] ss:$16 sps:$4 sm:$0xff]   ;;  %v11023_v28 = vld [vmem:[%s14642_s1 + $0x1be0] ss:$16 sps:$4 sm:$0xff]  }
 0x344   :  { %7168 = vmatprep.subr.bf16.mxu0 %v10939_v29  ;;  %7984 = vmatprep.subr.bf16.mxu1 %v10942_v30  ;;  %v11026_v29 = vld [vmem:[%s14642_s1 + $0x1be8] ss:$16 sps:$4 sm:$0xff]   ;;  %v11031_v30 = vld [vmem:[%s14642_s1 + $0x1c04] ss:$16 sps:$4 sm:$0xff]  }
 0x345   :  { %7157 = vmatprep.mubr.bf16.mxu0 %v8364_v31  ;;  %7973 = vmatprep.mubr.bf16.mxu1 %v8364_v31  ;;  %v11034_v31 = vld [vmem:[%s14642_s1 + $0x1c0c] ss:$16 sps:$4 sm:$0xff]  }
 0x347   :  { %7169 = vmatpush1.bf16.msra.mxu0 %v10937_v32  ;;  %7985 = vmatpush1.bf16.msra.mxu1 %v10940_v33  ;;  %v8333_v32 = vcombine.low %v13999_v37, %v14004_v38  ;;  %v62_v33 = vld [vmem:[%s14643_s0 + $0x168] sm:$0xff] }
 0x348   :  { %7170 = vmatprep.subr.bf16.mxu0 %v10945_v34  ;;  %7986 = vmatprep.subr.bf16.mxu1 %v10948_v35  ;;  %v11029_v34 = vld [vmem:[%s14642_s1 + $0x1c00] ss:$16 sps:$4 sm:$0xff]   ;;  %v11032_v35 = vld [vmem:[%s14642_s1 + $0x1c08] ss:$16 sps:$4 sm:$0xff]   ;;  %v11040_v37 = vld [vmem:[%s14642_s1 + $0x1c2c] ss:$16 sps:$4 sm:$0xff]   ;;  %v8366_v38 = vcombine.high %v62_v33, %v62_v33 }
 0x34a   :  { %7158 = vmatmul.mubr.bf16.gmra.mrb[4].mxu0 %v8363_v36  ;;  %7974 = vmatmul.mubr.bf16.gmra.mrb[4].mxu1 %v8363_v36  ;;  %v11037_v36 = vld [vmem:[%s14642_s1 + $0x1c24] ss:$16 sps:$4 sm:$0xff]  }
 0x34b   :  { %7171 = vmatpush1.bf16.msra.mxu0 %v10943_v39  ;;  %7987 = vmatpush1.bf16.msra.mxu1 %v10946_v40  ;;  %v11035_v39 = vld [vmem:[%s14642_s1 + $0x1c20] ss:$16 sps:$4 sm:$0xff]   ;;  %v11038_v40 = vld [vmem:[%s14642_s1 + $0x1c28] ss:$16 sps:$4 sm:$0xff]  }
 0x34c   :  { %7172 = vmatprep.subr.bf16.mxu0 %v10951_v41  ;;  %7988 = vmatprep.subr.bf16.mxu1 %v10954_v42  ;;  %v11043_v41 = vld [vmem:[%s14642_s1 + $0x1c44] ss:$16 sps:$4 sm:$0xff]   ;;  %v11046_v42 = vld [vmem:[%s14642_s1 + $0x1c4c] ss:$16 sps:$4 sm:$0xff]  }
 0x34d   :  { %7198 = vmatprep.mubr.bf16.mxu0 %v8334_v43  ;;  %8014 = vmatprep.mubr.bf16.mxu1 %v8334_v43  ;;  %v8365_v43 = vcombine.low %v62_v33, %v62_v33  ;;  %v11123_v33 = vld [vmem:[%s14642_s1 + $0x1de4] ss:$16 sps:$4 sm:$0xff]  }
 0x34f   :  { %7173 = vmatpush1.bf16.msra.mxu0 %v10949_v46  ;;  %7989 = vmatpush1.bf16.msra.mxu1 %v10952_v44  ;;  %v14208_v46 = vld [vmem:[%s14643_s0 + $0x70] sm:$0xff] }
 0x350   :  { %7174 = vmatprep.subr.bf16.mxu0 %v10957_v45  ;;  %7990 = vmatprep.subr.bf16.mxu1 %v10960_v47  ;;  %v14213_v44 = vld [vmem:[%s14643_s0 + $0xf0] sm:$0xff]  ;;  %v11044_v47 = vld [vmem:[%s14642_s1 + $0x1c48] ss:$16 sps:$4 sm:$0xff]  }
 0x351   :  { %v11041_v45 = vld [vmem:[%s14642_s1 + $0x1c40] ss:$16 sps:$4 sm:$0xff]  }
 0x353   :  { %7175 = vmatpush1.bf16.msra.mxu0 %v10955_v48  ;;  %7991 = vmatpush1.bf16.msra.mxu1 %v10958_v49  ;;  %v11049_v48 = vld [vmem:[%s14642_s1 + $0x1c64] ss:$16 sps:$4 sm:$0xff]   ;;  %v11052_v49 = vld [vmem:[%s14642_s1 + $0x1c6c] ss:$16 sps:$4 sm:$0xff]  }
 0x354   :  { %7176 = vmatprep.subr.bf16.mxu0 %v10963_v50  ;;  %7992 = vmatprep.subr.bf16.mxu1 %v10966_v53  ;;  %v8336_v50 = vcombine.high %v14208_v46, %v14213_v44  ;;  %v11047_v53 = vld [vmem:[%s14642_s1 + $0x1c60] ss:$16 sps:$4 sm:$0xff]  }
 0x357   :  { %7177 = vmatpush1.bf16.msra.mxu0 %v10961_v51  ;;  %7993 = vmatpush1.bf16.msra.mxu1 %v10964_v52  ;;  %v11050_v51 = vld [vmem:[%s14642_s1 + $0x1c68] ss:$16 sps:$4 sm:$0xff]   ;;  %v11055_v52 = vld [vmem:[%s14642_s1 + $0x1c84] ss:$16 sps:$4 sm:$0xff]  }
 0x358   :  { %7178 = vmatprep.subr.bf16.mxu0 %v10969_v54  ;;  %7994 = vmatprep.subr.bf16.mxu1 %v10972_v55  ;;  %v11058_v54 = vld [vmem:[%s14642_s1 + $0x1c8c] ss:$16 sps:$4 sm:$0xff]   ;;  %v11053_v55 = vld [vmem:[%s14642_s1 + $0x1c80] ss:$16 sps:$4 sm:$0xff]  }
 0x35b   :  { %7179 = vmatpush1.bf16.msra.mxu0 %v10967_v56  ;;  %7995 = vmatpush1.bf16.msra.mxu1 %v10970_v57  ;;  %v11056_v56 = vld [vmem:[%s14642_s1 + $0x1c88] ss:$16 sps:$4 sm:$0xff]   ;;  %v11061_v57 = vld [vmem:[%s14642_s1 + $0x1ca4] ss:$16 sps:$4 sm:$0xff]  }
 0x35c   :  { %7180 = vmatprep.subr.bf16.mxu0 %v10975_v60  ;;  %7996 = vmatprep.subr.bf16.mxu1 %v10978_v58  ;;  %v11064_v60 = vld [vmem:[%s14642_s1 + $0x1cac] ss:$16 sps:$4 sm:$0xff]   ;;  %v11059_v58 = vld [vmem:[%s14642_s1 + $0x1ca0] ss:$16 sps:$4 sm:$0xff]  }
 0x35f   :  { %7181 = vmatpush1.bf16.msra.mxu0 %v10973_v59  ;;  %7997 = vmatpush1.bf16.msra.mxu1 %v10976_v61  ;;  %v11062_v59 = vld [vmem:[%s14642_s1 + $0x1ca8] ss:$16 sps:$4 sm:$0xff]   ;;  %v11067_v61 = vld [vmem:[%s14642_s1 + $0x1cc4] ss:$16 sps:$4 sm:$0xff]  }
 0x360   :  { %7182 = vmatprep.subr.bf16.mxu0 %v10981_v62  ;;  %7998 = vmatprep.subr.bf16.mxu1 %v10984_v63  ;;  %v11070_v62 = vld [vmem:[%s14642_s1 + $0x1ccc] ss:$16 sps:$4 sm:$0xff]   ;;  %v11065_v63 = vld [vmem:[%s14642_s1 + $0x1cc0] ss:$16 sps:$4 sm:$0xff]  }
 0x363   :  { %7183 = vmatpush1.bf16.msra.mxu0 %v10979_v0  ;;  %7999 = vmatpush1.bf16.msra.mxu1 %v10982_v3  ;;  %v11068_v0 = vld [vmem:[%s14642_s1 + $0x1cc8] ss:$16 sps:$4 sm:$0xff]   ;;  %v11073_v3 = vld [vmem:[%s14642_s1 + $0x1ce4] ss:$16 sps:$4 sm:$0xff]  }
 0x364   :  { %7184 = vmatprep.subr.bf16.mxu0 %v10987_v1  ;;  %8000 = vmatprep.subr.bf16.mxu1 %v10990_v2  ;;  %v11076_v1 = vld [vmem:[%s14642_s1 + $0x1cec] ss:$16 sps:$4 sm:$0xff]   ;;  %v11071_v2 = vld [vmem:[%s14642_s1 + $0x1ce0] ss:$16 sps:$4 sm:$0xff]  }
 0x367   :  { %7185 = vmatpush1.bf16.msra.mxu0 %v10985_v4  ;;  %8001 = vmatpush1.bf16.msra.mxu1 %v10988_v5  ;;  %v11074_v4 = vld [vmem:[%s14642_s1 + $0x1ce8] ss:$16 sps:$4 sm:$0xff]   ;;  %v11079_v5 = vld [vmem:[%s14642_s1 + $0x1d04] ss:$16 sps:$4 sm:$0xff]  }
 0x368   :  { %7186 = vmatprep.subr.bf16.mxu0 %v10993_v6  ;;  %8002 = vmatprep.subr.bf16.mxu1 %v10996_v7  ;;  %v11082_v6 = vld [vmem:[%s14642_s1 + $0x1d0c] ss:$16 sps:$4 sm:$0xff]   ;;  %v11077_v7 = vld [vmem:[%s14642_s1 + $0x1d00] ss:$16 sps:$4 sm:$0xff]  }
 0x36b   :  { %7187 = vmatpush1.bf16.msra.mxu0 %v10991_v8  ;;  %8003 = vmatpush1.bf16.msra.mxu1 %v10994_v9  ;;  %v11080_v8 = vld [vmem:[%s14642_s1 + $0x1d08] ss:$16 sps:$4 sm:$0xff]   ;;  %v11085_v9 = vld [vmem:[%s14642_s1 + $0x1d24] ss:$16 sps:$4 sm:$0xff]  }
 0x36c   :  { %7188 = vmatprep.subr.bf16.mxu0 %v10999_v10  ;;  %8004 = vmatprep.subr.bf16.mxu1 %v11002_v11  ;;  %v11088_v10 = vld [vmem:[%s14642_s1 + $0x1d2c] ss:$16 sps:$4 sm:$0xff]   ;;  %v11083_v11 = vld [vmem:[%s14642_s1 + $0x1d20] ss:$16 sps:$4 sm:$0xff]  }
 0x36f   :  { %7189 = vmatpush1.bf16.msra.mxu0 %v10997_v12  ;;  %8005 = vmatpush1.bf16.msra.mxu1 %v11000_v13  ;;  %v11086_v12 = vld [vmem:[%s14642_s1 + $0x1d28] ss:$16 sps:$4 sm:$0xff]   ;;  %v11091_v13 = vld [vmem:[%s14642_s1 + $0x1d44] ss:$16 sps:$4 sm:$0xff]  }
 0x370   :  { %7190 = vmatprep.subr.bf16.mxu0 %v11005_v14  ;;  %8006 = vmatprep.subr.bf16.mxu1 %v11008_v15  ;;  %v11094_v14 = vld [vmem:[%s14642_s1 + $0x1d4c] ss:$16 sps:$4 sm:$0xff]   ;;  %v11089_v15 = vld [vmem:[%s14642_s1 + $0x1d40] ss:$16 sps:$4 sm:$0xff]  }
 0x373   :  { %7191 = vmatpush1.bf16.msra.mxu0 %v11003_v16  ;;  %8007 = vmatpush1.bf16.msra.mxu1 %v11006_v17  ;;  %v11092_v16 = vld [vmem:[%s14642_s1 + $0x1d48] ss:$16 sps:$4 sm:$0xff]   ;;  %v11097_v17 = vld [vmem:[%s14642_s1 + $0x1d64] ss:$16 sps:$4 sm:$0xff]  }
 0x374   :  { %7192 = vmatprep.subr.bf16.mxu0 %v11011_v18  ;;  %8008 = vmatprep.subr.bf16.mxu1 %v11014_v19  ;;  %v11100_v18 = vld [vmem:[%s14642_s1 + $0x1d6c] ss:$16 sps:$4 sm:$0xff]   ;;  %v11095_v19 = vld [vmem:[%s14642_s1 + $0x1d60] ss:$16 sps:$4 sm:$0xff]  }
 0x377   :  { %7193 = vmatpush1.bf16.msra.mxu0 %v11009_v20  ;;  %8009 = vmatpush1.bf16.msra.mxu1 %v11012_v21  ;;  %v11098_v20 = vld [vmem:[%s14642_s1 + $0x1d68] ss:$16 sps:$4 sm:$0xff]   ;;  %v11103_v21 = vld [vmem:[%s14642_s1 + $0x1d84] ss:$16 sps:$4 sm:$0xff]  }
 0x378   :  { %7194 = vmatprep.subr.bf16.mxu0 %v11018_v22  ;;  %8010 = vmatprep.subr.bf16.mxu1 %v11021_v23  ;;  %v11106_v22 = vld [vmem:[%s14642_s1 + $0x1d8c] ss:$16 sps:$4 sm:$0xff]   ;;  %v11101_v23 = vld [vmem:[%s14642_s1 + $0x1d80] ss:$16 sps:$4 sm:$0xff]  }
 0x37b   :  { %7195 = vmatpush1.bf16.msra.mxu0 %v11016_v24  ;;  %8011 = vmatpush1.bf16.msra.mxu1 %v11019_v25  ;;  %v11104_v24 = vld [vmem:[%s14642_s1 + $0x1d88] ss:$16 sps:$4 sm:$0xff]   ;;  %v11109_v25 = vld [vmem:[%s14642_s1 + $0x1da4] ss:$16 sps:$4 sm:$0xff]  }
 0x37c   :  { %7196 = vmatprep.subr.bf16.mxu0 %v11025_v26  ;;  %8012 = vmatprep.subr.bf16.mxu1 %v11028_v27  ;;  %v11112_v26 = vld [vmem:[%s14642_s1 + $0x1dac] ss:$16 sps:$4 sm:$0xff]   ;;  %v11107_v27 = vld [vmem:[%s14642_s1 + $0x1da0] ss:$16 sps:$4 sm:$0xff]  }
 0x37f   :  { %7197 = vmatpush1.bf16.msra.mxu0 %v11023_v28  ;;  %8013 = vmatpush1.bf16.msra.mxu1 %v11026_v29  ;;  %v11110_v28 = vld [vmem:[%s14642_s1 + $0x1da8] ss:$16 sps:$4 sm:$0xff]   ;;  %v11116_v29 = vld [vmem:[%s14642_s1 + $0x1dc4] ss:$16 sps:$4 sm:$0xff]  }
 0x380   :  { %7217 = vmatprep.subr.bf16.mxu0 %v11031_v30  ;;  %8033 = vmatprep.subr.bf16.mxu1 %v11034_v31  ;;  %v11119_v30 = vld [vmem:[%s14642_s1 + $0x1dcc] ss:$16 sps:$4 sm:$0xff]   ;;  %v11114_v31 = vld [vmem:[%s14642_s1 + $0x1dc0] ss:$16 sps:$4 sm:$0xff]  }
 0x382   :  { %7199 = vmatmul.mubr.bf16.vlgmr.msra.gmra.mrb[0].mxu0 %v8333_v32  ;;  %8015 = vmatmul.mubr.bf16.vlgmr.msra.gmra.mrb[0].mxu1 %v8333_v32  ;;  %v11117_v32 = vld [vmem:[%s14642_s1 + $0x1dc8] ss:$16 sps:$4 sm:$0xff]  }
 0x383   :  { %7218 = vmatpush1.bf16.msra.mxu0 %v11029_v34  ;;  %8034 = vmatpush1.bf16.msra.mxu1 %v11032_v35  ;;  %v11126_v34 = vld [vmem:[%s14642_s1 + $0x1dec] ss:$16 sps:$4 sm:$0xff]   ;;  %v11121_v35 = vld [vmem:[%s14642_s1 + $0x1de0] ss:$16 sps:$4 sm:$0xff]  }
 0x384   :  { %7219 = vmatprep.subr.bf16.mxu0 %v11037_v36  ;;  %8035 = vmatprep.subr.bf16.mxu1 %v11040_v37  ;;  %v11124_v36 = vld [vmem:[%s14642_s1 + $0x1de8] ss:$16 sps:$4 sm:$0xff]   ;;  %v11129_v37 = vld [vmem:[%s14642_s1 + $0x1e04] ss:$16 sps:$4 sm:$0xff]  }
 0x385   :  { %7208 = vmatprep.mubr.bf16.mxu0 %v8366_v38  ;;  %8024 = vmatprep.mubr.bf16.mxu1 %v8366_v38  ;;  %v11132_v38 = vld [vmem:[%s14642_s1 + $0x1e0c] ss:$16 sps:$4 sm:$0xff]  }
 0x387   :  { %7220 = vmatpush1.bf16.msra.mxu0 %v11035_v39  ;;  %8036 = vmatpush1.bf16.msra.mxu1 %v11038_v40  ;;  %v8335_v39 = vcombine.low %v14208_v46, %v14213_v44  ;;  %v63_v40 = vld [vmem:[%s14643_s0 + $0x170] sm:$0xff]  ;;  %v11138_v46 = vld [vmem:[%s14642_s1 + $0x1e2c] ss:$16 sps:$4 sm:$0xff]  }
 0x388   :  { %7221 = vmatprep.subr.bf16.mxu0 %v11043_v41  ;;  %8037 = vmatprep.subr.bf16.mxu1 %v11046_v42  ;;  %v11127_v41 = vld [vmem:[%s14642_s1 + $0x1e00] ss:$16 sps:$4 sm:$0xff]   ;;  %v11130_v42 = vld [vmem:[%s14642_s1 + $0x1e08] ss:$16 sps:$4 sm:$0xff]   ;;  %v8368_v44 = vcombine.high %v63_v40, %v63_v40 }
 0x38a   :  { %7209 = vmatmul.mubr.bf16.gmra.mrb[4].mxu0 %v8365_v43  ;;  %8025 = vmatmul.mubr.bf16.gmra.mrb[4].mxu1 %v8365_v43  ;;  %v11135_v43 = vld [vmem:[%s14642_s1 + $0x1e24] ss:$16 sps:$4 sm:$0xff]  }
 0x38b   :  { %7222 = vmatpush1.bf16.msra.mxu0 %v11041_v45  ;;  %8038 = vmatpush1.bf16.msra.mxu1 %v11044_v47  ;;  %v11133_v45 = vld [vmem:[%s14642_s1 + $0x1e20] ss:$16 sps:$4 sm:$0xff]   ;;  %v11136_v47 = vld [vmem:[%s14642_s1 + $0x1e28] ss:$16 sps:$4 sm:$0xff]  }
 0x38c   :  { %7223 = vmatprep.subr.bf16.mxu0 %v11049_v48  ;;  %8039 = vmatprep.subr.bf16.mxu1 %v11052_v49  ;;  %v11141_v48 = vld [vmem:[%s14642_s1 + $0x1e44] ss:$16 sps:$4 sm:$0xff]   ;;  %v11144_v49 = vld [vmem:[%s14642_s1 + $0x1e4c] ss:$16 sps:$4 sm:$0xff]  }
 0x38d   :  { %7249 = vmatprep.mubr.bf16.mxu0 %v8336_v50  ;;  %8065 = vmatprep.mubr.bf16.mxu1 %v8336_v50  ;;  %v8367_v50 = vcombine.low %v63_v40, %v63_v40  ;;  %v11221_v40 = vld [vmem:[%s14642_s1 + $0x1fe4] ss:$16 sps:$4 sm:$0xff]  }
 0x38f   :  { %7224 = vmatpush1.bf16.msra.mxu0 %v11047_v53  ;;  %8040 = vmatpush1.bf16.msra.mxu1 %v11050_v51  ;;  %v14417_v53 = vld [vmem:[%s14643_s0 + $0x78] sm:$0xff] }
 0x390   :  { %7225 = vmatprep.subr.bf16.mxu0 %v11055_v52  ;;  %8041 = vmatprep.subr.bf16.mxu1 %v11058_v54  ;;  %v14422_v51 = vld [vmem:[%s14643_s0 + $0xf8] sm:$0xff]  ;;  %v11139_v52 = vld [vmem:[%s14642_s1 + $0x1e40] ss:$16 sps:$4 sm:$0xff]  }
 0x391   :  { %v11142_v54 = vld [vmem:[%s14642_s1 + $0x1e48] ss:$16 sps:$4 sm:$0xff]  }
 0x393   :  { %7226 = vmatpush1.bf16.msra.mxu0 %v11053_v55  ;;  %8042 = vmatpush1.bf16.msra.mxu1 %v11056_v56  ;;  %v11147_v55 = vld [vmem:[%s14642_s1 + $0x1e64] ss:$16 sps:$4 sm:$0xff]   ;;  %v11150_v56 = vld [vmem:[%s14642_s1 + $0x1e6c] ss:$16 sps:$4 sm:$0xff]  }
 0x394   :  { %7227 = vmatprep.subr.bf16.mxu0 %v11061_v57  ;;  %8043 = vmatprep.subr.bf16.mxu1 %v11064_v60  ;;  %v8338_v57 = vcombine.high %v14417_v53, %v14422_v51  ;;  %v11145_v60 = vld [vmem:[%s14642_s1 + $0x1e60] ss:$16 sps:$4 sm:$0xff]  }
 0x397   :  { %7228 = vmatpush1.bf16.msra.mxu0 %v11059_v58  ;;  %8044 = vmatpush1.bf16.msra.mxu1 %v11062_v59  ;;  %v11148_v58 = vld [vmem:[%s14642_s1 + $0x1e68] ss:$16 sps:$4 sm:$0xff]   ;;  %v11153_v59 = vld [vmem:[%s14642_s1 + $0x1e84] ss:$16 sps:$4 sm:$0xff]  }
 0x398   :  { %7229 = vmatprep.subr.bf16.mxu0 %v11067_v61  ;;  %8045 = vmatprep.subr.bf16.mxu1 %v11070_v62  ;;  %v11156_v61 = vld [vmem:[%s14642_s1 + $0x1e8c] ss:$16 sps:$4 sm:$0xff]   ;;  %v11151_v62 = vld [vmem:[%s14642_s1 + $0x1e80] ss:$16 sps:$4 sm:$0xff]  }
 0x39b   :  { %7230 = vmatpush1.bf16.msra.mxu0 %v11065_v63  ;;  %8046 = vmatpush1.bf16.msra.mxu1 %v11068_v0  ;;  %v11154_v63 = vld [vmem:[%s14642_s1 + $0x1e88] ss:$16 sps:$4 sm:$0xff]   ;;  %v11159_v0 = vld [vmem:[%s14642_s1 + $0x1ea4] ss:$16 sps:$4 sm:$0xff]  }
 0x39c   :  { %7231 = vmatprep.subr.bf16.mxu0 %v11073_v3  ;;  %8047 = vmatprep.subr.bf16.mxu1 %v11076_v1  ;;  %v11162_v3 = vld [vmem:[%s14642_s1 + $0x1eac] ss:$16 sps:$4 sm:$0xff]   ;;  %v11157_v1 = vld [vmem:[%s14642_s1 + $0x1ea0] ss:$16 sps:$4 sm:$0xff]  }
 0x39f   :  { %7232 = vmatpush1.bf16.msra.mxu0 %v11071_v2  ;;  %8048 = vmatpush1.bf16.msra.mxu1 %v11074_v4  ;;  %v11160_v2 = vld [vmem:[%s14642_s1 + $0x1ea8] ss:$16 sps:$4 sm:$0xff]   ;;  %v11165_v4 = vld [vmem:[%s14642_s1 + $0x1ec4] ss:$16 sps:$4 sm:$0xff]  }
 0x3a0   :  { %7233 = vmatprep.subr.bf16.mxu0 %v11079_v5  ;;  %8049 = vmatprep.subr.bf16.mxu1 %v11082_v6  ;;  %v11168_v5 = vld [vmem:[%s14642_s1 + $0x1ecc] ss:$16 sps:$4 sm:$0xff]   ;;  %v11163_v6 = vld [vmem:[%s14642_s1 + $0x1ec0] ss:$16 sps:$4 sm:$0xff]  }
 0x3a3   :  { %7234 = vmatpush1.bf16.msra.mxu0 %v11077_v7  ;;  %8050 = vmatpush1.bf16.msra.mxu1 %v11080_v8  ;;  %v11166_v7 = vld [vmem:[%s14642_s1 + $0x1ec8] ss:$16 sps:$4 sm:$0xff]   ;;  %v11171_v8 = vld [vmem:[%s14642_s1 + $0x1ee4] ss:$16 sps:$4 sm:$0xff]  }
 0x3a4   :  { %7235 = vmatprep.subr.bf16.mxu0 %v11085_v9  ;;  %8051 = vmatprep.subr.bf16.mxu1 %v11088_v10  ;;  %v11174_v9 = vld [vmem:[%s14642_s1 + $0x1eec] ss:$16 sps:$4 sm:$0xff]   ;;  %v11169_v10 = vld [vmem:[%s14642_s1 + $0x1ee0] ss:$16 sps:$4 sm:$0xff]  }
 0x3a7   :  { %7236 = vmatpush1.bf16.msra.mxu0 %v11083_v11  ;;  %8052 = vmatpush1.bf16.msra.mxu1 %v11086_v12  ;;  %v11172_v11 = vld [vmem:[%s14642_s1 + $0x1ee8] ss:$16 sps:$4 sm:$0xff]   ;;  %v11177_v12 = vld [vmem:[%s14642_s1 + $0x1f04] ss:$16 sps:$4 sm:$0xff]  }
 0x3a8   :  { %7237 = vmatprep.subr.bf16.mxu0 %v11091_v13  ;;  %8053 = vmatprep.subr.bf16.mxu1 %v11094_v14  ;;  %v11180_v13 = vld [vmem:[%s14642_s1 + $0x1f0c] ss:$16 sps:$4 sm:$0xff]   ;;  %v11175_v14 = vld [vmem:[%s14642_s1 + $0x1f00] ss:$16 sps:$4 sm:$0xff]  }
 0x3ab   :  { %7238 = vmatpush1.bf16.msra.mxu0 %v11089_v15  ;;  %8054 = vmatpush1.bf16.msra.mxu1 %v11092_v16  ;;  %v11178_v15 = vld [vmem:[%s14642_s1 + $0x1f08] ss:$16 sps:$4 sm:$0xff]   ;;  %v11183_v16 = vld [vmem:[%s14642_s1 + $0x1f24] ss:$16 sps:$4 sm:$0xff]  }
 0x3ac   :  { %7239 = vmatprep.subr.bf16.mxu0 %v11097_v17  ;;  %8055 = vmatprep.subr.bf16.mxu1 %v11100_v18  ;;  %v11186_v17 = vld [vmem:[%s14642_s1 + $0x1f2c] ss:$16 sps:$4 sm:$0xff]   ;;  %v11181_v18 = vld [vmem:[%s14642_s1 + $0x1f20] ss:$16 sps:$4 sm:$0xff]  }
 0x3af   :  { %7240 = vmatpush1.bf16.msra.mxu0 %v11095_v19  ;;  %8056 = vmatpush1.bf16.msra.mxu1 %v11098_v20  ;;  %v11184_v19 = vld [vmem:[%s14642_s1 + $0x1f28] ss:$16 sps:$4 sm:$0xff]   ;;  %v11189_v20 = vld [vmem:[%s14642_s1 + $0x1f44] ss:$16 sps:$4 sm:$0xff]  }
 0x3b0   :  { %7241 = vmatprep.subr.bf16.mxu0 %v11103_v21  ;;  %8057 = vmatprep.subr.bf16.mxu1 %v11106_v22  ;;  %v11192_v21 = vld [vmem:[%s14642_s1 + $0x1f4c] ss:$16 sps:$4 sm:$0xff]   ;;  %v11187_v22 = vld [vmem:[%s14642_s1 + $0x1f40] ss:$16 sps:$4 sm:$0xff]  }
 0x3b3   :  { %7242 = vmatpush1.bf16.msra.mxu0 %v11101_v23  ;;  %8058 = vmatpush1.bf16.msra.mxu1 %v11104_v24  ;;  %v11190_v23 = vld [vmem:[%s14642_s1 + $0x1f48] ss:$16 sps:$4 sm:$0xff]   ;;  %v11195_v24 = vld [vmem:[%s14642_s1 + $0x1f64] ss:$16 sps:$4 sm:$0xff]  }
 0x3b4   :  { %7243 = vmatprep.subr.bf16.mxu0 %v11109_v25  ;;  %8059 = vmatprep.subr.bf16.mxu1 %v11112_v26  ;;  %v11198_v25 = vld [vmem:[%s14642_s1 + $0x1f6c] ss:$16 sps:$4 sm:$0xff]   ;;  %v11193_v26 = vld [vmem:[%s14642_s1 + $0x1f60] ss:$16 sps:$4 sm:$0xff]  }
 0x3b7   :  { %7244 = vmatpush1.bf16.msra.mxu0 %v11107_v27  ;;  %8060 = vmatpush1.bf16.msra.mxu1 %v11110_v28  ;;  %v11196_v27 = vld [vmem:[%s14642_s1 + $0x1f68] ss:$16 sps:$4 sm:$0xff]   ;;  %v11201_v28 = vld [vmem:[%s14642_s1 + $0x1f84] ss:$16 sps:$4 sm:$0xff]  }
 0x3b8   :  { %7245 = vmatprep.subr.bf16.mxu0 %v11116_v29  ;;  %8061 = vmatprep.subr.bf16.mxu1 %v11119_v30  ;;  %v11204_v29 = vld [vmem:[%s14642_s1 + $0x1f8c] ss:$16 sps:$4 sm:$0xff]   ;;  %v11199_v30 = vld [vmem:[%s14642_s1 + $0x1f80] ss:$16 sps:$4 sm:$0xff]  }
 0x3bb   :  { %7246 = vmatpush1.bf16.msra.mxu0 %v11114_v31  ;;  %8062 = vmatpush1.bf16.msra.mxu1 %v11117_v32  ;;  %v11202_v31 = vld [vmem:[%s14642_s1 + $0x1f88] ss:$16 sps:$4 sm:$0xff]   ;;  %v11207_v32 = vld [vmem:[%s14642_s1 + $0x1fa4] ss:$16 sps:$4 sm:$0xff]  }
 0x3bc   :  { %7247 = vmatprep.subr.bf16.mxu0 %v11123_v33  ;;  %8063 = vmatprep.subr.bf16.mxu1 %v11126_v34  ;;  %v11210_v33 = vld [vmem:[%s14642_s1 + $0x1fac] ss:$16 sps:$4 sm:$0xff]   ;;  %v11205_v34 = vld [vmem:[%s14642_s1 + $0x1fa0] ss:$16 sps:$4 sm:$0xff]  }
 0x3bf   :  { %7248 = vmatpush1.bf16.msra.mxu0 %v11121_v35  ;;  %8064 = vmatpush1.bf16.msra.mxu1 %v11124_v36  ;;  %v11208_v35 = vld [vmem:[%s14642_s1 + $0x1fa8] ss:$16 sps:$4 sm:$0xff]   ;;  %v11215_v36 = vld [vmem:[%s14642_s1 + $0x1fc4] ss:$16 sps:$4 sm:$0xff]  }
 0x3c0   :  { %7268 = vmatprep.subr.bf16.mxu0 %v11129_v37  ;;  %8084 = vmatprep.subr.bf16.mxu1 %v11132_v38  ;;  %v11218_v37 = vld [vmem:[%s14642_s1 + $0x1fcc] ss:$16 sps:$4 sm:$0xff]   ;;  %v11213_v38 = vld [vmem:[%s14642_s1 + $0x1fc0] ss:$16 sps:$4 sm:$0xff]  }
 0x3c2   :  { %7250 = vmatmul.mubr.bf16.vlgmr.msra.gmra.mrb[0].mxu0 %v8335_v39  ;;  %8066 = vmatmul.mubr.bf16.vlgmr.msra.gmra.mrb[0].mxu1 %v8335_v39  ;;  %v11216_v39 = vld [vmem:[%s14642_s1 + $0x1fc8] ss:$16 sps:$4 sm:$0xff]  }
 0x3c3   :  { %7269 = vmatpush1.bf16.msra.mxu0 %v11127_v41  ;;  %8085 = vmatpush1.bf16.msra.mxu1 %v11130_v42  ;;  %v11224_v41 = vld [vmem:[%s14642_s1 + $0x1fec] ss:$16 sps:$4 sm:$0xff]   ;;  %v11219_v42 = vld [vmem:[%s14642_s1 + $0x1fe0] ss:$16 sps:$4 sm:$0xff]  }
 0x3c4   :  { %7270 = vmatprep.subr.bf16.mxu0 %v11135_v43  ;;  %8086 = vmatprep.subr.bf16.mxu1 %v11138_v46  ;;  %v11222_v43 = vld [vmem:[%s14642_s1 + $0x1fe8] ss:$16 sps:$4 sm:$0xff]  }
 0x3c5   :  { %7259 = vmatprep.mubr.bf16.mxu0 %v8368_v44  ;;  %8075 = vmatprep.mubr.bf16.mxu1 %v8368_v44  ;;  %v64_v46 = vld [vmem:[%s14643_s0 + $0x178] sm:$0xff]  ;;  %v8337_v44 = vcombine.low %v14417_v53, %v14422_v51 }
 0x3c7   :  { %7271 = vmatpush1.bf16.msra.mxu0 %v11133_v45  ;;  %8087 = vmatpush1.bf16.msra.mxu1 %v11136_v47  ;;  %v8370_v45 = vcombine.high %v64_v46, %v64_v46  ;;  %v8369_v47 = vcombine.low %v64_v46, %v64_v46 }
 0x3c8   :  { %7272 = vmatprep.subr.bf16.mxu0 %v11141_v48  ;;  %8088 = vmatprep.subr.bf16.mxu1 %v11144_v49  ;;  %v1091_v48 = vlaneseq }
 0x3ca   :  { %7260 = vmatmul.mubr.bf16.gmra.mrb[4].mxu0 %v8367_v50  ;;  %8076 = vmatmul.mubr.bf16.gmra.mrb[4].mxu1 %v8367_v50  ;;  %v1092_v49 = vshrl.u32 %v1091_v48, 7 }
 0x3cb   :  { %7273 = vmatpush1.bf16.msra.mxu0 %v11139_v52  ;;  %8089 = vmatpush1.bf16.msra.mxu1 %v11142_v54  ;;  %v1089_v54 = vld [vmem:[%s14644_s2] sm:$0xf] }
 0x3cc   :  { %7274 = vmatprep.subr.bf16.mxu0 %v11147_v55  ;;  %8090 = vmatprep.subr.bf16.mxu1 %v11150_v56  ;;  %v1093_v50 = vsub.s32 0, %v1092_v49  ;;  %v1101_v52 = vsub.s32 2, %v1092_v49  ;;  %v1097_v55 = vsub.s32 1, %v1092_v49  ;;  %v1105_v53 = vsub.s32 3, %v1092_v49 }
 0x3cd   :  { %7300 = vmatprep.mubr.bf16.mxu0 %v8338_v57  ;;  %8116 = vmatprep.mubr.bf16.mxu1 %v8338_v57 }
 0x3ce   :  { %v1094_v51 = vrot.slane %v1089_v54, %v1093_v50  ;;  %v1102_v56 = vrot.slane %v1089_v54, %v1101_v52  ;;  %v1098_v57 = vrot.slane %v1089_v54, %v1097_v55 }
 0x3cf   :  { %7275 = vmatpush1.bf16.msra.mxu0 %v11145_v60  ;;  %8091 = vmatpush1.bf16.msra.mxu1 %v11148_v58  ;;  %v1106_v60 = vrot.slane %v1089_v54, %v1105_v53 }
 0x3d0   :  { %7276 = vmatprep.subr.bf16.mxu0 %v11153_v59  ;;  %8092 = vmatprep.subr.bf16.mxu1 %v11156_v61 }
 0x3d3   :  { %7277 = vmatpush1.bf16.msra.mxu0 %v11151_v62  ;;  %8093 = vmatpush1.bf16.msra.mxu1 %v11154_v63 }
 0x3d4   :  { %7278 = vmatprep.subr.bf16.mxu0 %v11159_v0  ;;  %8094 = vmatprep.subr.bf16.mxu1 %v11162_v3 }
 0x3d7   :  { %7279 = vmatpush1.bf16.msra.mxu0 %v11157_v1  ;;  %8095 = vmatpush1.bf16.msra.mxu1 %v11160_v2 }
 0x3d8   :  { %7280 = vmatprep.subr.bf16.mxu0 %v11165_v4  ;;  %8096 = vmatprep.subr.bf16.mxu1 %v11168_v5  ;;  %v8139_v5 = vadd.s32 16, %v1092_v49 }
 0x3da   :  { %vm8146_vm0 = vcmp.lt.s32.totalorder %v8139_v5, 18 }
 0x3db   :  { %7281 = vmatpush1.bf16.msra.mxu0 %v11163_v6  ;;  %8097 = vmatpush1.bf16.msra.mxu1 %v11166_v7 }
 0x3dc   :  { %7282 = vmatprep.subr.bf16.mxu0 %v11171_v8  ;;  %8098 = vmatprep.subr.bf16.mxu1 %v11174_v9 }
 0x3df   :  { %7283 = vmatpush1.bf16.msra.mxu0 %v11169_v10  ;;  %8099 = vmatpush1.bf16.msra.mxu1 %v11172_v11 }
 0x3e0   :  { %7284 = vmatprep.subr.bf16.mxu0 %v11177_v12  ;;  %8100 = vmatprep.subr.bf16.mxu1 %v11180_v13 }
 0x3e3   :  { %7285 = vmatpush1.bf16.msra.mxu0 %v11175_v14  ;;  %8101 = vmatpush1.bf16.msra.mxu1 %v11178_v15 }
 0x3e4   :  { %7286 = vmatprep.subr.bf16.mxu0 %v11183_v16  ;;  %8102 = vmatprep.subr.bf16.mxu1 %v11186_v17 }
 0x3e7   :  { %7287 = vmatpush1.bf16.msra.mxu0 %v11181_v18  ;;  %8103 = vmatpush1.bf16.msra.mxu1 %v11184_v19 }
 0x3e8   :  { %7288 = vmatprep.subr.bf16.mxu0 %v11189_v20  ;;  %8104 = vmatprep.subr.bf16.mxu1 %v11192_v21 }
 0x3eb   :  { %7289 = vmatpush1.bf16.msra.mxu0 %v11187_v22  ;;  %8105 = vmatpush1.bf16.msra.mxu1 %v11190_v23 }
 0x3ec   :  { %7290 = vmatprep.subr.bf16.mxu0 %v11195_v24  ;;  %8106 = vmatprep.subr.bf16.mxu1 %v11198_v25 }
 0x3ef   :  { %7291 = vmatpush1.bf16.msra.mxu0 %v11193_v26  ;;  %8107 = vmatpush1.bf16.msra.mxu1 %v11196_v27 }
 0x3f0   :  { %7292 = vmatprep.subr.bf16.mxu0 %v11201_v28  ;;  %8108 = vmatprep.subr.bf16.mxu1 %v11204_v29 }
 0x3f3   :  { %7293 = vmatpush1.bf16.msra.mxu0 %v11199_v30  ;;  %8109 = vmatpush1.bf16.msra.mxu1 %v11202_v31 }
 0x3f4   :  { %7294 = vmatprep.subr.bf16.mxu0 %v11207_v32  ;;  %8110 = vmatprep.subr.bf16.mxu1 %v11210_v33 }
 0x3f7   :  { %7295 = vmatpush1.bf16.msra.mxu0 %v11205_v34  ;;  %8111 = vmatpush1.bf16.msra.mxu1 %v11208_v35 }
 0x3f8   :  { %7296 = vmatprep.subr.bf16.mxu0 %v11215_v36  ;;  %8112 = vmatprep.subr.bf16.mxu1 %v11218_v37 }
 0x3fb   :  { %7297 = vmatpush1.bf16.msra.mxu0 %v11213_v38  ;;  %8113 = vmatpush1.bf16.msra.mxu1 %v11216_v39 }
 0x3fc   :  { %7298 = vmatprep.subr.bf16.mxu0 %v11221_v40  ;;  %8114 = vmatprep.subr.bf16.mxu1 %v11224_v41 }
 0x3ff   :  { %7299 = vmatpush1.bf16.msra.mxu0 %v11219_v42  ;;  %8115 = vmatpush1.bf16.msra.mxu1 %v11222_v43 }
 0x402   :  { %7301 = vmatmul.mubr.bf16.vlgmr.msra.gmra.mrb[0].mxu0 %v8337_v44  ;;  %8117 = vmatmul.mubr.bf16.vlgmr.msra.gmra.mrb[0].mxu1 %v8337_v44 }
 0x403   :  { %7310 = vmatprep.mubr.bf16.mxu0 %v8370_v45  ;;  %8126 = vmatprep.mubr.bf16.mxu1 %v8370_v45 }
 0x40a   :  { %7311 = vmatmul.mubr.bf16.gmra.mrb[4].mxu0 %v8369_v47  ;;  %8127 = vmatmul.mubr.bf16.gmra.mrb[4].mxu1 %v8369_v47 }
 0x4d5   :  { %v7302_v58 = vpop.f32.mrb[0].mxu0  ;;  %v8118_v59 = vpop.f32.mrb[0].mxu1 }
 0x4d6   :  { %v9407_v61 = vadd.f32 %v7302_v58, %v1094_v51  ;;  %v9413_v62 = vadd.f32 %v8118_v59, %v1102_v56  ;;  %v7304_v63 = vpop.f32.mrb[1].mxu0  ;;  %v8120_v0 = vpop.f32.mrb[1].mxu1 }
 0x4d7   :  { %v9408_v3 = vadd.f32 %v7304_v63, %v1098_v57  ;;  %v9414_v1 = vadd.f32 %v8120_v0, %v1106_v60  ;;  %v7306_v2 = vpop.f32.mrb[2].mxu0  ;;  %v8122_v4 = vpop.f32.mrb[2].mxu1 }
 0x4d8   :  { %v9409_v6 = vadd.f32 %v7306_v2, %v1094_v51  ;;  %v9415_v7 = vadd.f32 %v8122_v4, %v1102_v56  ;;  %v7308_v8 = vpop.f32.mrb[3].mxu0  ;;  %v8124_v9 = vpop.f32.mrb[3].mxu1  ;;  %v8197_v10 = vmul.f32 %v9407_v61, %v9407_v61  ;;  %v8199_v11 = vmul.f32 %v9413_v62, %v9413_v62 }
 0x4d9   :  { %v9401_v12 = vpack.c.bf16 %v9408_v3, %v9407_v61  ;;  %v9402_v13 = vpack.c.bf16 %v9414_v1, %v9413_v62  ;;  %v9410_v18 = vadd.f32 %v7308_v8, %v1098_v57  ;;  %v9416_v19 = vadd.f32 %v8124_v9, %v1106_v60 }
 0x4da   :  { %v8165_v14 = vadd.f32 %v9409_v6, %v9407_v61  ;;  %v8201_v15 = vmul.f32 %v9409_v6, %v9409_v6  ;;  %v8181_v16 = vadd.f32 %v9415_v7, %v9413_v62  ;;  %v8203_v17 = vmul.f32 %v9415_v7, %v9415_v7 }
 0x4db   :  { %8289 = vst [vmem:[%s14645_s3] sm:$0xff] %v9401_v12  ;;  %8290 = vst [vmem:[%s14645_s3 + $0x8] sm:$0xff] %v9402_v13  ;;  %v8198_v20 = vmul.f32 %v9408_v3, %v9408_v3  ;;  %v8200_v21 = vmul.f32 %v9414_v1, %v9414_v1  ;;  %v8173_v24 = vadd.f32 %v9410_v18, %v9408_v3 }
 0x4dc   :  { %v8209_v22 = vadd.f32 %v8201_v15, %v8197_v10  ;;  %v8225_v23 = vadd.f32 %v8203_v17, %v8199_v11  ;;  %v8202_v25 = vmul.f32 %v9410_v18, %v9410_v18  ;;  %v9403_v26 = vpack.c.bf16 %v9410_v18, %v9409_v6 }
 0x4dd   :  { %v8189_v27 = vadd.f32 %v9416_v19, %v9414_v1  ;;  %v7312_v28 = vpop.f32.mrb[4].mxu0  ;;  %v8128_v29 = vpop.f32.mrb[4].mxu1  ;;  %v8204_v30 = vmul.f32 %v9416_v19, %v9416_v19  ;;  %v9404_v31 = vpack.c.bf16 %v9416_v19, %v9415_v7 }
 0x4de   :  { %v9411_v32 = vadd.f32 %v7312_v28, %v1094_v51  ;;  %v9417_v33 = vadd.f32 %v8128_v29, %v1102_v56  ;;  %v7314_v34 = vpop.f32.mrb[5].mxu0  ;;  %v8130_v35 = vpop.f32.mrb[5].mxu1  ;;  %v8217_v36 = vadd.f32 %v8202_v25, %v8198_v20  ;;  %8291 = vst [vmem:[%s14645_s3 + $0x10] sm:$0xff] %v9403_v26 }
 0x4df   :  { %v9412_v37 = vadd.f32 %v7314_v34, %v1098_v57  ;;  %v9418_v38 = vadd.f32 %v8130_v35, %v1106_v60  ;;  %v7316_v39 = vpop.f32.mrb[6].mxu0  ;;  %v8132_v40 = vpop.f32.mrb[6].mxu1  ;;  %v8233_v41 = vadd.f32 %v8204_v30, %v8200_v21  ;;  %8292 = vst [vmem:[%s14645_s3 + $0x18] sm:$0xff] %v9404_v31 }
 0x4e0   :  { %v8161_v42 = vsel %vm8146_vm0, %v9411_v32, 0.0  ;;  %v8163_v43 = vsel %vm8146_vm0, %v9417_v33, 0.0  ;;  %v7317_v46 = vpop.f32.mrb[7].mxu0  ;;  %v8133_v44 = vpop.f32.mrb[7].mxu1 }
 0x4e1   :  { %v8166_v45 = vadd.f32 %v8165_v14, %v8161_v42  ;;  %v8205_v47 = vmul.f32 %v8161_v42, %v8161_v42  ;;  %v8182_v48 = vadd.f32 %v8181_v16, %v8163_v43  ;;  %v8207_v49 = vmul.f32 %v8163_v43, %v8163_v43 }
 0x4e2   :  { %v8162_v50 = vsel %vm8146_vm0, %v9412_v37, 0.0  ;;  %v9405_v52 = vpack.c.bf16 %v9412_v37, %v9411_v32  ;;  %v8164_v54 = vsel %vm8146_vm0, %v9418_v38, 0.0  ;;  %v9406_v55 = vpack.c.bf16 %v9418_v38, %v9417_v33 }
 0x4e3   :  { %v8167_v53 = vrot.slane %v8166_v45, 4  ;;  %v8210_v51 = vadd.f32 %v8209_v22, %v8205_v47  ;;  %v8183_v56 = vrot.slane %v8182_v48, 4  ;;  %v8226_v57 = vadd.f32 %v8225_v23, %v8207_v49 }
 0x4e4   :  { %v8174_v60 = vadd.f32 %v8173_v24, %v8162_v50  ;;  %v8206_v58 = vmul.f32 %v8162_v50, %v8162_v50  ;;  %8293 = vst [vmem:[%s14645_s3 + $0x20] sm:$0xff] %v9405_v52  ;;  %v8190_v59 = vadd.f32 %v8189_v27, %v8164_v54  ;;  %v8208_v61 = vmul.f32 %v8164_v54, %v8164_v54 }
 0x4e5   :  { %8294 = vst [vmem:[%s14645_s3 + $0x28] sm:$0xff] %v9406_v55  ;;  %v8168_v62 = vadd.f32 %v8167_v53, %v8166_v45  ;;  %v8211_v63 = vrot.slane %v8210_v51, 4  ;;  %v8184_v0 = vadd.f32 %v8183_v56, %v8182_v48  ;;  %v8227_v3 = vrot.slane %v8226_v57, 4 }
 0x4e6   :  { %v8175_v1 = vrot.slane %v8174_v60, 4  ;;  %v8218_v2 = vadd.f32 %v8217_v36, %v8206_v58  ;;  %v8191_v4 = vrot.slane %v8190_v59, 4  ;;  %v8234_v5 = vadd.f32 %v8233_v41, %v8208_v61 }
 0x4e7   :  { %v8169_v6 = vrot.slane %v8168_v62, 2  ;;  %v8212_v7 = vadd.f32 %v8211_v63, %v8210_v51  ;;  %v8185_v8 = vrot.slane %v8184_v0, 2  ;;  %v8228_v9 = vadd.f32 %v8227_v3, %v8226_v57 }
 0x4e8   :  { %v8176_v10 = vadd.f32 %v8175_v1, %v8174_v60  ;;  %v8219_v11 = vrot.slane %v8218_v2, 4  ;;  %v8192_v12 = vadd.f32 %v8191_v4, %v8190_v59  ;;  %v8235_v13 = vrot.slane %v8234_v5, 4 }
 0x4e9   :  { %v8170_v14 = vadd.f32 %v8169_v6, %v8168_v62  ;;  %v8213_v15 = vrot.slane %v8212_v7, 2  ;;  %v8186_v16 = vadd.f32 %v8185_v8, %v8184_v0  ;;  %v8229_v17 = vrot.slane %v8228_v9, 2 }
 0x4ea   :  { %v8177_v18 = vrot.slane %v8176_v10, 2  ;;  %v8220_v19 = vadd.f32 %v8219_v11, %v8218_v2  ;;  %v8193_v20 = vrot.slane %v8192_v12, 2  ;;  %v8236_v21 = vadd.f32 %v8235_v13, %v8234_v5 }
 0x4eb   :  { %v8171_v22 = vrot.slane %v8170_v14, 1  ;;  %v8214_v23 = vadd.f32 %v8213_v15, %v8212_v7  ;;  %v8187_v24 = vrot.slane %v8186_v16, 1  ;;  %v8230_v25 = vadd.f32 %v8229_v17, %v8228_v9 }
 0x4ec   :  { %v8178_v26 = vadd.f32 %v8177_v18, %v8176_v10  ;;  %v8221_v27 = vrot.slane %v8220_v19, 2  ;;  %v8194_v28 = vadd.f32 %v8193_v20, %v8192_v12  ;;  %v8237_v29 = vrot.slane %v8236_v21, 2 }
 0x4ed   :  { %v8172_v30 = vadd.f32 %v8171_v22, %v8170_v14  ;;  %v8215_v31 = vrot.slane %v8214_v23, 1  ;;  %v8188_v32 = vadd.f32 %v8187_v24, %v8186_v16  ;;  %v8231_v33 = vrot.slane %v8230_v25, 1 }
 0x4ee   :  { %v8179_v34 = vrot.slane %v8178_v26, 1  ;;  %v8222_v35 = vadd.f32 %v8221_v27, %v8220_v19  ;;  %v8195_v36 = vrot.slane %v8194_v28, 1  ;;  %v8238_v37 = vadd.f32 %v8237_v29, %v8236_v21 }
 0x4ef   :  { %v8216_v38 = vadd.f32 %v8215_v31, %v8214_v23  ;;  %8241 = vst [vmem:[%s14646_s4] sm:$0xff] %v8172_v30  ;;  %v8232_v39 = vadd.f32 %v8231_v33, %v8230_v25  ;;  %8243 = vst [vmem:[%s14646_s4 + $0x10] sm:$0xff] %v8188_v32 }
 0x4f0   :  { %v8180_v40 = vadd.f32 %v8179_v34, %v8178_v26  ;;  %v8223_v41 = vrot.slane %v8222_v35, 1  ;;  %v8196_v42 = vadd.f32 %v8195_v36, %v8194_v28  ;;  %v8239_v43 = vrot.slane %v8238_v37, 1 }
 0x4f1   :  { %8245 = vst [vmem:[%s14647_s5] sm:$0xff] %v8216_v38  ;;  %8247 = vst [vmem:[%s14647_s5 + $0x10] sm:$0xff] %v8232_v39 }
 0x4f2   :  { %v8224_v46 = vadd.f32 %v8223_v41, %v8222_v35  ;;  %8242 = vst [vmem:[%s14646_s4 + $0x8] sm:$0xff] %v8180_v40  ;;  %v8240_v44 = vadd.f32 %v8239_v43, %v8238_v37  ;;  %8244 = vst [vmem:[%s14646_s4 + $0x18] sm:$0xff] %v8196_v42 }
 0x4f4   :  { %8246 = vst [vmem:[%s14647_s5 + $0x8] sm:$0xff] %v8224_v46  ;;  %8248 = vst [vmem:[%s14647_s5 + $0x18] sm:$0xff] %v8240_v44 }

// kernel: patchgan_forward.15
= control target key start
LH: loop header
LB: loop body
LE: loop exit
PB: predicated region body
PF: predicated region fallthrough
CT: control target
= control target key end

     0   :  { %vm5656_vm0 = vcmask 7168   ;;  %s9201_s1 = inlined_call_operand.vmem [shape: bf16[8192,1], index: 1, kind: input, shape index: {}]   ;;  %s9202_s0 = inlined_call_operand.vmem [shape: bf16[8,8192], index: 0, kind: input, shape index: {}]   ;;  %s9203_s2 = inlined_call_operand.<no memory space> [shape: f32[1,1], index: 2, kind: input, shape index: {}]   ;;  %s9204_s3 = inlined_call_operand.vmem [shape: f32[8,1], index: 3, kind: output, shape index: {}]  }
   0x1   :  { %v6943_v0 = vld [vmem:[%s9201_s1 + $0x40] sm:$0xff]   ;;  %v6947_v4 = vld [vmem:[%s9201_s1 + $0x48] sm:$0xff]   ;;  %v6951_v8 = vld [vmem:[%s9201_s1 + $0x50] sm:$0xff]  }
   0x2   :  { %v6944_v1 = vld [vmem:[%s9201_s1 + $0xc0] sm:$0xff]   ;;  %6239 = vmatprep.subr.bf16.mxu0 %v6943_v0  ;;  %v6948_v5 = vld [vmem:[%s9201_s1 + $0xc8] sm:$0xff]   ;;  %v6952_v9 = vld [vmem:[%s9201_s1 + $0xd0] sm:$0xff]  }
   0x3   :  { %v6945_v2 = vld [vmem:[%s9201_s1] sm:$0xff]   ;;  %6261 = vmatprep.subr.bf16.mxu1 %v6944_v1  ;;  %v6949_v6 = vld [vmem:[%s9201_s1 + $0x8] sm:$0xff]   ;;  %v6953_v10 = vld [vmem:[%s9201_s1 + $0x10] sm:$0xff]  }
   0x4   :  { %v6946_v3 = vld [vmem:[%s9201_s1 + $0x80] sm:$0xff]   ;;  %6240 = vmatpush3.bf16.msra.mxu0 %v6945_v2  ;;  %v6950_v7 = vld [vmem:[%s9201_s1 + $0x88] sm:$0xff]   ;;  %v6954_v11 = vld [vmem:[%s9201_s1 + $0x90] sm:$0xff]  }
   0x5   :  { %6262 = vmatpush3.bf16.msra.mxu1 %v6946_v3  ;;  %6241 = vmatprep.subr.bf16.mxu0 %v6947_v4  ;;  %v6955_v12 = vld [vmem:[%s9201_s1 + $0x58] sm:$0xff]   ;;  %v6959_v16 = vld [vmem:[%s9201_s1 + $0x60] sm:$0xff]   ;;  %v6963_v20 = vld [vmem:[%s9201_s1 + $0x68] sm:$0xff]  }
   0x6   :  { %6263 = vmatprep.subr.bf16.mxu1 %v6948_v5  ;;  %v6956_v13 = vld [vmem:[%s9201_s1 + $0xd8] sm:$0xff]   ;;  %v6960_v17 = vld [vmem:[%s9201_s1 + $0xe0] sm:$0xff]   ;;  %v6964_v21 = vld [vmem:[%s9201_s1 + $0xe8] sm:$0xff]  }
   0x7   :  { %v6957_v14 = vld [vmem:[%s9201_s1 + $0x18] sm:$0xff]   ;;  %v6961_v18 = vld [vmem:[%s9201_s1 + $0x20] sm:$0xff]   ;;  %v6965_v22 = vld [vmem:[%s9201_s1 + $0x28] sm:$0xff]  }
   0x8   :  { %6242 = vmatpush3.bf16.msra.mxu0 %v6949_v6  ;;  %v6958_v15 = vld [vmem:[%s9201_s1 + $0x98] sm:$0xff]   ;;  %v6962_v19 = vld [vmem:[%s9201_s1 + $0xa0] sm:$0xff]   ;;  %v6966_v23 = vld [vmem:[%s9201_s1 + $0xa8] sm:$0xff]  }
   0x9   :  { %6264 = vmatpush3.bf16.msra.mxu1 %v6950_v7  ;;  %6243 = vmatprep.subr.bf16.mxu0 %v6951_v8  ;;  %v6967_v24 = vld [vmem:[%s9201_s1 + $0x70] sm:$0xff]   ;;  %v6971_v28 = vld [vmem:[%s9201_s1 + $0x78] sm:$0xff]   ;;  %v17_v32 = vld [vmem:[%s9202_s0] sm:$0xff] }
   0xa   :  { %6265 = vmatprep.subr.bf16.mxu1 %v6952_v9  ;;  %v6968_v25 = vld [vmem:[%s9201_s1 + $0xf0] sm:$0xff]   ;;  %v6972_v29 = vld [vmem:[%s9201_s1 + $0xf8] sm:$0xff]   ;;  %v18_v33 = vld [vmem:[%s9202_s0 + $0x8] sm:$0xff]  ;;  %v5663_v34 = vcombine.low %v17_v32, %v17_v32  ;;  %v5664_v35 = vcombine.high %v17_v32, %v17_v32 }
   0xb   :  { %v6969_v26 = vld [vmem:[%s9201_s1 + $0x30] sm:$0xff]   ;;  %v6973_v30 = vld [vmem:[%s9201_s1 + $0x38] sm:$0xff]   ;;  %v5665_v36 = vcombine.low %v18_v33, %v18_v33  ;;  %v5666_v37 = vcombine.high %v18_v33, %v18_v33  ;;  %v6979_v38 = vld [vmem:[%s9201_s1 + $0x140] sm:$0xff]  }
   0xc   :  { %6244 = vmatpush3.bf16.msra.mxu0 %v6953_v10  ;;  %v6970_v27 = vld [vmem:[%s9201_s1 + $0xb0] sm:$0xff]   ;;  %v6974_v31 = vld [vmem:[%s9201_s1 + $0xb8] sm:$0xff]   ;;  %v6980_v39 = vld [vmem:[%s9201_s1 + $0x1c0] sm:$0xff]   ;;  %4408 = vmatprep.mubr.bf16.mxu0 %v5664_v35 }
   0xd   :  { %6266 = vmatpush3.bf16.msra.mxu1 %v6954_v11  ;;  %6245 = vmatprep.subr.bf16.mxu0 %v6955_v12  ;;  %v6981_v40 = vld [vmem:[%s9201_s1 + $0x100] sm:$0xff]   ;;  %v6983_v42 = vld [vmem:[%s9201_s1 + $0x148] sm:$0xff]   ;;  %v6987_v46 = vld [vmem:[%s9201_s1 + $0x150] sm:$0xff]  }
   0xe   :  { %6267 = vmatprep.subr.bf16.mxu1 %v6956_v13  ;;  %4448 = vmatprep.mubr.bf16.mxu1 %v5666_v37  ;;  %v6982_v41 = vld [vmem:[%s9201_s1 + $0x180] sm:$0xff]   ;;  %v6984_v43 = vld [vmem:[%s9201_s1 + $0x1c8] sm:$0xff]   ;;  %v6988_v47 = vld [vmem:[%s9201_s1 + $0x1d0] sm:$0xff]  }
   0xf   :  { %v6985_v44 = vld [vmem:[%s9201_s1 + $0x108] sm:$0xff]   ;;  %v6989_v48 = vld [vmem:[%s9201_s1 + $0x110] sm:$0xff]   ;;  %v6991_v50 = vld [vmem:[%s9201_s1 + $0x158] sm:$0xff]  }
  0x10   :  { %6246 = vmatpush3.bf16.msra.mxu0 %v6957_v14  ;;  %v6986_v45 = vld [vmem:[%s9201_s1 + $0x188] sm:$0xff]   ;;  %v6990_v49 = vld [vmem:[%s9201_s1 + $0x190] sm:$0xff]   ;;  %v6992_v51 = vld [vmem:[%s9201_s1 + $0x1d8] sm:$0xff]  }
  0x11   :  { %6268 = vmatpush3.bf16.msra.mxu1 %v6958_v15  ;;  %6247 = vmatprep.subr.bf16.mxu0 %v6959_v16  ;;  %v6993_v52 = vld [vmem:[%s9201_s1 + $0x118] sm:$0xff]   ;;  %v6995_v54 = vld [vmem:[%s9201_s1 + $0x160] sm:$0xff]   ;;  %v6999_v58 = vld [vmem:[%s9201_s1 + $0x168] sm:$0xff]  }
  0x12   :  { %6269 = vmatprep.subr.bf16.mxu1 %v6960_v17  ;;  %v6994_v53 = vld [vmem:[%s9201_s1 + $0x198] sm:$0xff]   ;;  %v6996_v55 = vld [vmem:[%s9201_s1 + $0x1e0] sm:$0xff]   ;;  %v7000_v59 = vld [vmem:[%s9201_s1 + $0x1e8] sm:$0xff]  }
  0x13   :  { %v6997_v56 = vld [vmem:[%s9201_s1 + $0x120] sm:$0xff]   ;;  %v7001_v60 = vld [vmem:[%s9201_s1 + $0x128] sm:$0xff]   ;;  %v7003_v62 = vld [vmem:[%s9201_s1 + $0x170] sm:$0xff]  }
  0x14   :  { %6248 = vmatpush3.bf16.msra.mxu0 %v6961_v18  ;;  %v6998_v57 = vld [vmem:[%s9201_s1 + $0x1a0] sm:$0xff]   ;;  %v7002_v61 = vld [vmem:[%s9201_s1 + $0x1a8] sm:$0xff]   ;;  %v7004_v63 = vld [vmem:[%s9201_s1 + $0x1f0] sm:$0xff]  }
  0x15   :  { %6270 = vmatpush3.bf16.msra.mxu1 %v6962_v19  ;;  %6249 = vmatprep.subr.bf16.mxu0 %v6963_v20  ;;  %v7005_v0 = vld [vmem:[%s9201_s1 + $0x130] sm:$0xff]   ;;  %v7007_v2 = vld [vmem:[%s9201_s1 + $0x178] sm:$0xff]   ;;  %v7015_v12 = vld [vmem:[%s9201_s1 + $0x240] sm:$0xff]  }
  0x16   :  { %6271 = vmatprep.subr.bf16.mxu1 %v6964_v21  ;;  %v7006_v1 = vld [vmem:[%s9201_s1 + $0x1b0] sm:$0xff]   ;;  %v7008_v3 = vld [vmem:[%s9201_s1 + $0x1f8] sm:$0xff]   ;;  %v7016_v13 = vld [vmem:[%s9201_s1 + $0x2c0] sm:$0xff]  }
  0x17   :  { %v7009_v4 = vld [vmem:[%s9201_s1 + $0x138] sm:$0xff]   ;;  %v19_v6 = vld [vmem:[%s9202_s0 + $0x10] sm:$0xff]  ;;  %v7017_v14 = vld [vmem:[%s9201_s1 + $0x200] sm:$0xff]  }
  0x18   :  { %6250 = vmatpush3.bf16.msra.mxu0 %v6965_v22  ;;  %v7010_v5 = vld [vmem:[%s9201_s1 + $0x1b8] sm:$0xff]   ;;  %v5667_v7 = vcombine.low %v19_v6, %v19_v6  ;;  %v5668_v8 = vcombine.high %v19_v6, %v19_v6  ;;  %v7018_v15 = vld [vmem:[%s9201_s1 + $0x280] sm:$0xff]   ;;  %v7019_v16 = vld [vmem:[%s9201_s1 + $0x248] sm:$0xff]  }
  0x19   :  { %6272 = vmatpush3.bf16.msra.mxu1 %v6966_v23  ;;  %6251 = vmatprep.subr.bf16.mxu0 %v6967_v24  ;;  %v20_v9 = vld [vmem:[%s9202_s0 + $0x18] sm:$0xff]  ;;  %v7020_v17 = vld [vmem:[%s9201_s1 + $0x2c8] sm:$0xff]   ;;  %v7023_v20 = vld [vmem:[%s9201_s1 + $0x250] sm:$0xff]  }
  0x1a   :  { %6273 = vmatprep.subr.bf16.mxu1 %v6968_v25  ;;  %v5669_v10 = vcombine.low %v20_v9, %v20_v9  ;;  %v5670_v11 = vcombine.high %v20_v9, %v20_v9  ;;  %v7021_v18 = vld [vmem:[%s9201_s1 + $0x208] sm:$0xff]   ;;  %v7024_v21 = vld [vmem:[%s9201_s1 + $0x2d0] sm:$0xff]   ;;  %v7027_v24 = vld [vmem:[%s9201_s1 + $0x258] sm:$0xff]  }
  0x1b   :  { %v7022_v19 = vld [vmem:[%s9201_s1 + $0x288] sm:$0xff]   ;;  %v7025_v22 = vld [vmem:[%s9201_s1 + $0x210] sm:$0xff]   ;;  %v7028_v25 = vld [vmem:[%s9201_s1 + $0x2d8] sm:$0xff]  }
  0x1c   :  { %6252 = vmatpush3.bf16.msra.mxu0 %v6969_v26  ;;  %v7026_v23 = vld [vmem:[%s9201_s1 + $0x290] sm:$0xff]   ;;  %v7029_v26 = vld [vmem:[%s9201_s1 + $0x218] sm:$0xff]   ;;  %v7035_v32 = vld [vmem:[%s9201_s1 + $0x268] sm:$0xff]  }
  0x1d   :  { %6274 = vmatpush3.bf16.msra.mxu1 %v6970_v27  ;;  %6253 = vmatprep.subr.bf16.mxu0 %v6971_v28  ;;  %v7030_v27 = vld [vmem:[%s9201_s1 + $0x298] sm:$0xff]   ;;  %v7031_v28 = vld [vmem:[%s9201_s1 + $0x260] sm:$0xff]   ;;  %v7036_v33 = vld [vmem:[%s9201_s1 + $0x2e8] sm:$0xff]  }
  0x1e   :  { %6275 = vmatprep.subr.bf16.mxu1 %v6972_v29  ;;  %v7032_v29 = vld [vmem:[%s9201_s1 + $0x2e0] sm:$0xff]   ;;  %v7038_v35 = vld [vmem:[%s9201_s1 + $0x2a8] sm:$0xff]   ;;  %v7040_v37 = vld [vmem:[%s9201_s1 + $0x2f0] sm:$0xff]  }
  0x1f   :  { %v7071_v6 = vld [vmem:[%s9201_s1 + $0x368] sm:$0xff]  }
  0x20   :  { %6254 = vmatpush3.bf16.msra.mxu0 %v6973_v30  ;;  %v7033_v30 = vld [vmem:[%s9201_s1 + $0x220] sm:$0xff]   ;;  %v7073_v9 = vld [vmem:[%s9201_s1 + $0x328] sm:$0xff]  }
  0x21   :  { %6276 = vmatpush3.bf16.msra.mxu1 %v6974_v31  ;;  %6283 = vmatprep.subr.bf16.mxu0 %v6979_v38  ;;  %v7034_v31 = vld [vmem:[%s9201_s1 + $0x2a0] sm:$0xff]   ;;  %v7041_v38 = vld [vmem:[%s9201_s1 + $0x230] sm:$0xff]  }
  0x22   :  { %6305 = vmatprep.subr.bf16.mxu1 %v6980_v39  ;;  %v7042_v39 = vld [vmem:[%s9201_s1 + $0x2b0] sm:$0xff]  }
  0x23   :  { %4409 = vmatmul.mubr.bf16.vlgmr.msra.gmra.mrb[0].mxu0 %v5663_v34  ;;  %v7037_v34 = vld [vmem:[%s9201_s1 + $0x228] sm:$0xff]  }
  0x24   :  { %4449 = vmatmul.mubr.bf16.vlgmr.msra.gmra.mrb[0].mxu1 %v5665_v36  ;;  %6284 = vmatpush3.bf16.msra.mxu0 %v6981_v40  ;;  %v7039_v36 = vld [vmem:[%s9201_s1 + $0x270] sm:$0xff]   ;;  %v7043_v40 = vld [vmem:[%s9201_s1 + $0x278] sm:$0xff]  }
  0x25   :  { %6306 = vmatpush3.bf16.msra.mxu1 %v6982_v41  ;;  %6285 = vmatprep.subr.bf16.mxu0 %v6983_v42  ;;  %v7044_v41 = vld [vmem:[%s9201_s1 + $0x2f8] sm:$0xff]  }
  0x26   :  { %6307 = vmatprep.subr.bf16.mxu1 %v6984_v43  ;;  %4488 = vmatprep.mubr.bf16.mxu0 %v5668_v8  ;;  %v7045_v42 = vld [vmem:[%s9201_s1 + $0x238] sm:$0xff]   ;;  %v8_v8 = vstv %s9203_s2 }
  0x27   :  { %4528 = vmatprep.mubr.bf16.mxu1 %v5670_v11  ;;  %v7046_v43 = vld [vmem:[%s9201_s1 + $0x2b8] sm:$0xff]   ;;  %9 = vst [vmem:[#allocation2] sm:$0x1] %v8_v8  ;;  %v7075_v11 = vld [vmem:[%s9201_s1 + $0x370] sm:$0xff]  }
  0x28   :  { %6286 = vmatpush3.bf16.msra.mxu0 %v6985_v44  ;;  %v21_v44 = vld [vmem:[%s9202_s0 + $0x20] sm:$0xff]  ;;  %v7132_v8 = vld [vmem:[%s9201_s1 + $0x5d0] sm:$0xff]  }
  0x29   :  { %6308 = vmatpush3.bf16.msra.mxu1 %v6986_v45  ;;  %6287 = vmatprep.subr.bf16.mxu0 %v6987_v46  ;;  %v22_v45 = vld [vmem:[%s9202_s0 + $0x28] sm:$0xff]  ;;  %v5671_v46 = vcombine.low %v21_v44, %v21_v44 }
  0x2a   :  { %6309 = vmatprep.subr.bf16.mxu1 %v6988_v47  ;;  %v5672_v47 = vcombine.high %v21_v44, %v21_v44  ;;  %v7106_v44 = vld [vmem:[%s9201_s1 + $0x4a0] sm:$0xff]  }
  0x2c   :  { %6288 = vmatpush3.bf16.msra.mxu0 %v6989_v48  ;;  %v5673_v48 = vcombine.low %v22_v45, %v22_v45 }
  0x2d   :  { %6310 = vmatpush3.bf16.msra.mxu1 %v6990_v49  ;;  %6289 = vmatprep.subr.bf16.mxu0 %v6991_v50  ;;  %v5674_v49 = vcombine.high %v22_v45, %v22_v45  ;;  %v7051_v50 = vld [vmem:[%s9201_s1 + $0x340] sm:$0xff]   ;;  %v7107_v45 = vld [vmem:[%s9201_s1 + $0x468] sm:$0xff]  }
  0x2e   :  { %6311 = vmatprep.subr.bf16.mxu1 %v6992_v51  ;;  %v7052_v51 = vld [vmem:[%s9201_s1 + $0x3c0] sm:$0xff]  }
  0x30   :  { %6290 = vmatpush3.bf16.msra.mxu0 %v6993_v52  ;;  %v7053_v52 = vld [vmem:[%s9201_s1 + $0x300] sm:$0xff]  }
  0x31   :  { %6312 = vmatpush3.bf16.msra.mxu1 %v6994_v53  ;;  %6291 = vmatprep.subr.bf16.mxu0 %v6995_v54  ;;  %v7054_v53 = vld [vmem:[%s9201_s1 + $0x380] sm:$0xff]   ;;  %v7055_v54 = vld [vmem:[%s9201_s1 + $0x348] sm:$0xff]  }
  0x32   :  { %6313 = vmatprep.subr.bf16.mxu1 %v6996_v55  ;;  %v7056_v55 = vld [vmem:[%s9201_s1 + $0x3c8] sm:$0xff]  }
  0x34   :  { %6292 = vmatpush3.bf16.msra.mxu0 %v6997_v56  ;;  %v7057_v56 = vld [vmem:[%s9201_s1 + $0x308] sm:$0xff]  }
  0x35   :  { %6314 = vmatpush3.bf16.msra.mxu1 %v6998_v57  ;;  %6293 = vmatprep.subr.bf16.mxu0 %v6999_v58  ;;  %v7058_v57 = vld [vmem:[%s9201_s1 + $0x388] sm:$0xff]   ;;  %v7059_v58 = vld [vmem:[%s9201_s1 + $0x350] sm:$0xff]  }
  0x36   :  { %6315 = vmatprep.subr.bf16.mxu1 %v7000_v59  ;;  %v7060_v59 = vld [vmem:[%s9201_s1 + $0x3d0] sm:$0xff]  }
  0x38   :  { %6294 = vmatpush3.bf16.msra.mxu0 %v7001_v60  ;;  %v7061_v60 = vld [vmem:[%s9201_s1 + $0x310] sm:$0xff]  }
  0x39   :  { %6316 = vmatpush3.bf16.msra.mxu1 %v7002_v61  ;;  %6295 = vmatprep.subr.bf16.mxu0 %v7003_v62  ;;  %v7062_v61 = vld [vmem:[%s9201_s1 + $0x390] sm:$0xff]   ;;  %v7063_v62 = vld [vmem:[%s9201_s1 + $0x358] sm:$0xff]  }
  0x3a   :  { %6317 = vmatprep.subr.bf16.mxu1 %v7004_v63  ;;  %v7064_v63 = vld [vmem:[%s9201_s1 + $0x3d8] sm:$0xff]  }
  0x3c   :  { %6296 = vmatpush3.bf16.msra.mxu0 %v7005_v0  ;;  %v7065_v0 = vld [vmem:[%s9201_s1 + $0x318] sm:$0xff]  }
  0x3d   :  { %6318 = vmatpush3.bf16.msra.mxu1 %v7006_v1  ;;  %6297 = vmatprep.subr.bf16.mxu0 %v7007_v2  ;;  %v7066_v1 = vld [vmem:[%s9201_s1 + $0x398] sm:$0xff]   ;;  %v7067_v2 = vld [vmem:[%s9201_s1 + $0x360] sm:$0xff]  }
  0x3e   :  { %6319 = vmatprep.subr.bf16.mxu1 %v7008_v3  ;;  %v7068_v3 = vld [vmem:[%s9201_s1 + $0x3e0] sm:$0xff]  }
  0x40   :  { %6298 = vmatpush3.bf16.msra.mxu0 %v7009_v4  ;;  %v7069_v4 = vld [vmem:[%s9201_s1 + $0x320] sm:$0xff]  }
  0x41   :  { %6320 = vmatpush3.bf16.msra.mxu1 %v7010_v5  ;;  %6327 = vmatprep.subr.bf16.mxu0 %v7015_v12  ;;  %v7070_v5 = vld [vmem:[%s9201_s1 + $0x3a0] sm:$0xff]   ;;  %v7076_v12 = vld [vmem:[%s9201_s1 + $0x3f0] sm:$0xff]  }
  0x42   :  { %6349 = vmatprep.subr.bf16.mxu1 %v7016_v13  ;;  %v7077_v13 = vld [vmem:[%s9201_s1 + $0x330] sm:$0xff]  }
  0x43   :  { %4489 = vmatmul.mubr.bf16.vlgmr.msra.gmra.mrb[4].mxu0 %v5667_v7  ;;  %v7072_v7 = vld [vmem:[%s9201_s1 + $0x3e8] sm:$0xff]  }
  0x44   :  { %4529 = vmatmul.mubr.bf16.vlgmr.msra.gmra.mrb[4].mxu1 %v5669_v10  ;;  %6328 = vmatpush3.bf16.msra.mxu0 %v7017_v14  ;;  %v7074_v10 = vld [vmem:[%s9201_s1 + $0x3a8] sm:$0xff]   ;;  %v7078_v14 = vld [vmem:[%s9201_s1 + $0x3b0] sm:$0xff]  }
  0x45   :  { %6350 = vmatpush3.bf16.msra.mxu1 %v7018_v15  ;;  %6329 = vmatprep.subr.bf16.mxu0 %v7019_v16  ;;  %v7079_v15 = vld [vmem:[%s9201_s1 + $0x378] sm:$0xff]  }
  0x46   :  { %6351 = vmatprep.subr.bf16.mxu1 %v7020_v17  ;;  %4568 = vmatprep.mubr.bf16.mxu0 %v5672_v47  ;;  %v7080_v16 = vld [vmem:[%s9201_s1 + $0x3f8] sm:$0xff]   ;;  %v7109_v47 = vld [vmem:[%s9201_s1 + $0x428] sm:$0xff]  }
  0x47   :  { %4608 = vmatprep.mubr.bf16.mxu1 %v5674_v49  ;;  %v7081_v17 = vld [vmem:[%s9201_s1 + $0x338] sm:$0xff]   ;;  %v7111_v49 = vld [vmem:[%s9201_s1 + $0x470] sm:$0xff]  }
  0x48   :  { %6330 = vmatpush3.bf16.msra.mxu0 %v7021_v18  ;;  %v7082_v18 = vld [vmem:[%s9201_s1 + $0x3b8] sm:$0xff]  }
  0x49   :  { %6352 = vmatpush3.bf16.msra.mxu1 %v7022_v19  ;;  %6331 = vmatprep.subr.bf16.mxu0 %v7023_v20  ;;  %v23_v19 = vld [vmem:[%s9202_s0 + $0x30] sm:$0xff]  ;;  %v24_v20 = vld [vmem:[%s9202_s0 + $0x38] sm:$0xff] }
  0x4a   :  { %6353 = vmatprep.subr.bf16.mxu1 %v7024_v21  ;;  %v5675_v21 = vcombine.low %v23_v19, %v23_v19 }
  0x4c   :  { %6332 = vmatpush3.bf16.msra.mxu0 %v7025_v22  ;;  %v5676_v22 = vcombine.high %v23_v19, %v23_v19  ;;  %v7143_v19 = vld [vmem:[%s9201_s1 + $0x568] sm:$0xff]  }
  0x4d   :  { %6354 = vmatpush3.bf16.msra.mxu1 %v7026_v23  ;;  %6333 = vmatprep.subr.bf16.mxu0 %v7027_v24  ;;  %v5677_v23 = vcombine.low %v24_v20, %v24_v20  ;;  %v7087_v24 = vld [vmem:[%s9201_s1 + $0x440] sm:$0xff]  }
  0x4e   :  { %6355 = vmatprep.subr.bf16.mxu1 %v7028_v25  ;;  %v5678_v25 = vcombine.high %v24_v20, %v24_v20  ;;  %v7144_v20 = vld [vmem:[%s9201_s1 + $0x5e8] sm:$0xff]  }
  0x50   :  { %6334 = vmatpush3.bf16.msra.mxu0 %v7029_v26  ;;  %v7088_v26 = vld [vmem:[%s9201_s1 + $0x4c0] sm:$0xff]  }
  0x51   :  { %6356 = vmatpush3.bf16.msra.mxu1 %v7030_v27  ;;  %6335 = vmatprep.subr.bf16.mxu0 %v7031_v28  ;;  %v7089_v27 = vld [vmem:[%s9201_s1 + $0x400] sm:$0xff]  }
  0x52   :  { %6357 = vmatprep.subr.bf16.mxu1 %v7032_v29  ;;  %v7090_v28 = vld [vmem:[%s9201_s1 + $0x480] sm:$0xff]   ;;  %v7091_v29 = vld [vmem:[%s9201_s1 + $0x448] sm:$0xff]  }
  0x54   :  { %6336 = vmatpush3.bf16.msra.mxu0 %v7033_v30  ;;  %v7092_v30 = vld [vmem:[%s9201_s1 + $0x4c8] sm:$0xff]  }
  0x55   :  { %6358 = vmatpush3.bf16.msra.mxu1 %v7034_v31  ;;  %6337 = vmatprep.subr.bf16.mxu0 %v7035_v32  ;;  %v7093_v31 = vld [vmem:[%s9201_s1 + $0x408] sm:$0xff]  }
  0x56   :  { %6359 = vmatprep.subr.bf16.mxu1 %v7036_v33  ;;  %v7094_v32 = vld [vmem:[%s9201_s1 + $0x488] sm:$0xff]   ;;  %v7095_v33 = vld [vmem:[%s9201_s1 + $0x450] sm:$0xff]  }
  0x58   :  { %6338 = vmatpush3.bf16.msra.mxu0 %v7037_v34  ;;  %v7096_v34 = vld [vmem:[%s9201_s1 + $0x4d0] sm:$0xff]  }
  0x59   :  { %6360 = vmatpush3.bf16.msra.mxu1 %v7038_v35  ;;  %6339 = vmatprep.subr.bf16.mxu0 %v7039_v36  ;;  %v7097_v35 = vld [vmem:[%s9201_s1 + $0x410] sm:$0xff]  }
  0x5a   :  { %6361 = vmatprep.subr.bf16.mxu1 %v7040_v37  ;;  %v7098_v36 = vld [vmem:[%s9201_s1 + $0x490] sm:$0xff]   ;;  %v7099_v37 = vld [vmem:[%s9201_s1 + $0x458] sm:$0xff]  }
  0x5c   :  { %6340 = vmatpush3.bf16.msra.mxu0 %v7041_v38  ;;  %v7100_v38 = vld [vmem:[%s9201_s1 + $0x4d8] sm:$0xff]  }
  0x5d   :  { %6362 = vmatpush3.bf16.msra.mxu1 %v7042_v39  ;;  %6341 = vmatprep.subr.bf16.mxu0 %v7043_v40  ;;  %v7101_v39 = vld [vmem:[%s9201_s1 + $0x418] sm:$0xff]  }
  0x5e   :  { %6363 = vmatprep.subr.bf16.mxu1 %v7044_v41  ;;  %v7102_v40 = vld [vmem:[%s9201_s1 + $0x498] sm:$0xff]   ;;  %v7103_v41 = vld [vmem:[%s9201_s1 + $0x460] sm:$0xff]  }
  0x60   :  { %6342 = vmatpush3.bf16.msra.mxu0 %v7045_v42  ;;  %v7104_v42 = vld [vmem:[%s9201_s1 + $0x4e0] sm:$0xff]  }
  0x61   :  { %6364 = vmatpush3.bf16.msra.mxu1 %v7046_v43  ;;  %6371 = vmatprep.subr.bf16.mxu0 %v7051_v50  ;;  %v7105_v43 = vld [vmem:[%s9201_s1 + $0x420] sm:$0xff]   ;;  %v7112_v50 = vld [vmem:[%s9201_s1 + $0x4f0] sm:$0xff]  }
  0x62   :  { %6393 = vmatprep.subr.bf16.mxu1 %v7052_v51  ;;  %v7113_v51 = vld [vmem:[%s9201_s1 + $0x430] sm:$0xff]  }
  0x63   :  { %4569 = vmatmul.mubr.bf16.vlgmr.msra.gmra.mrb[8].mxu0 %v5671_v46  ;;  %v7108_v46 = vld [vmem:[%s9201_s1 + $0x4e8] sm:$0xff]  }
  0x64   :  { %4609 = vmatmul.mubr.bf16.vlgmr.msra.gmra.mrb[8].mxu1 %v5673_v48  ;;  %6372 = vmatpush3.bf16.msra.mxu0 %v7053_v52  ;;  %v7110_v48 = vld [vmem:[%s9201_s1 + $0x4a8] sm:$0xff]   ;;  %v7114_v52 = vld [vmem:[%s9201_s1 + $0x4b0] sm:$0xff]  }
  0x65   :  { %6394 = vmatpush3.bf16.msra.mxu1 %v7054_v53  ;;  %6373 = vmatprep.subr.bf16.mxu0 %v7055_v54  ;;  %v7115_v53 = vld [vmem:[%s9201_s1 + $0x478] sm:$0xff]  }
  0x66   :  { %6395 = vmatprep.subr.bf16.mxu1 %v7056_v55  ;;  %4648 = vmatprep.mubr.bf16.mxu0 %v5676_v22  ;;  %v7116_v54 = vld [vmem:[%s9201_s1 + $0x4f8] sm:$0xff]   ;;  %v7146_v22 = vld [vmem:[%s9201_s1 + $0x5a8] sm:$0xff]  }
  0x67   :  { %4688 = vmatprep.mubr.bf16.mxu1 %v5678_v25  ;;  %v7117_v55 = vld [vmem:[%s9201_s1 + $0x438] sm:$0xff]   ;;  %v7149_v25 = vld [vmem:[%s9201_s1 + $0x530] sm:$0xff]  }
  0x68   :  { %6374 = vmatpush3.bf16.msra.mxu0 %v7057_v56  ;;  %v7118_v56 = vld [vmem:[%s9201_s1 + $0x4b8] sm:$0xff]  }
  0x69   :  { %6396 = vmatpush3.bf16.msra.mxu1 %v7058_v57  ;;  %6375 = vmatprep.subr.bf16.mxu0 %v7059_v58  ;;  %v25_v57 = vld [vmem:[%s9202_s0 + $0x40] sm:$0xff] }
  0x6a   :  { %6397 = vmatprep.subr.bf16.mxu1 %v7060_v59  ;;  %v5679_v58 = vcombine.low %v25_v57, %v25_v57  ;;  %v5680_v59 = vcombine.high %v25_v57, %v25_v57  ;;  %v7179_v57 = vld [vmem:[%s9201_s1 + $0x668] sm:$0xff]  }
  0x6c   :  { %6376 = vmatpush3.bf16.msra.mxu0 %v7061_v60  ;;  %v26_v60 = vld [vmem:[%s9202_s0 + $0x48] sm:$0xff] }
  0x6d   :  { %6398 = vmatpush3.bf16.msra.mxu1 %v7062_v61  ;;  %6377 = vmatprep.subr.bf16.mxu0 %v7063_v62  ;;  %v5681_v61 = vcombine.low %v26_v60, %v26_v60  ;;  %v5682_v62 = vcombine.high %v26_v60, %v26_v60  ;;  %v7182_v60 = vld [vmem:[%s9201_s1 + $0x6a8] sm:$0xff]  }
  0x6e   :  { %6399 = vmatprep.subr.bf16.mxu1 %v7064_v63  ;;  %v7123_v63 = vld [vmem:[%s9201_s1 + $0x540] sm:$0xff]  }
  0x70   :  { %6378 = vmatpush3.bf16.msra.mxu0 %v7065_v0  ;;  %v7124_v0 = vld [vmem:[%s9201_s1 + $0x5c0] sm:$0xff]  }
  0x71   :  { %6400 = vmatpush3.bf16.msra.mxu1 %v7066_v1  ;;  %6379 = vmatprep.subr.bf16.mxu0 %v7067_v2  ;;  %v7125_v1 = vld [vmem:[%s9201_s1 + $0x500] sm:$0xff]  }
  0x72   :  { %6401 = vmatprep.subr.bf16.mxu1 %v7068_v3  ;;  %v7126_v2 = vld [vmem:[%s9201_s1 + $0x580] sm:$0xff]   ;;  %v7127_v3 = vld [vmem:[%s9201_s1 + $0x548] sm:$0xff]  }
  0x74   :  { %6380 = vmatpush3.bf16.msra.mxu0 %v7069_v4  ;;  %v7128_v4 = vld [vmem:[%s9201_s1 + $0x5c8] sm:$0xff]  }
  0x75   :  { %6402 = vmatpush3.bf16.msra.mxu1 %v7070_v5  ;;  %6381 = vmatprep.subr.bf16.mxu0 %v7071_v6  ;;  %v7129_v5 = vld [vmem:[%s9201_s1 + $0x508] sm:$0xff]  }
  0x76   :  { %6403 = vmatprep.subr.bf16.mxu1 %v7072_v7  ;;  %v7130_v6 = vld [vmem:[%s9201_s1 + $0x588] sm:$0xff]   ;;  %v7131_v7 = vld [vmem:[%s9201_s1 + $0x550] sm:$0xff]  }
  0x78   :  { %6382 = vmatpush3.bf16.msra.mxu0 %v7073_v9  ;;  %v7133_v9 = vld [vmem:[%s9201_s1 + $0x510] sm:$0xff]  }
  0x79   :  { %6404 = vmatpush3.bf16.msra.mxu1 %v7074_v10  ;;  %6383 = vmatprep.subr.bf16.mxu0 %v7075_v11  ;;  %v7134_v10 = vld [vmem:[%s9201_s1 + $0x590] sm:$0xff]   ;;  %v7135_v11 = vld [vmem:[%s9201_s1 + $0x558] sm:$0xff]  }
  0x7a   :  { %6405 = vmatprep.subr.bf16.mxu1 %v7076_v12  ;;  %v7136_v12 = vld [vmem:[%s9201_s1 + $0x5d8] sm:$0xff]  }
  0x7c   :  { %6384 = vmatpush3.bf16.msra.mxu0 %v7077_v13  ;;  %v7137_v13 = vld [vmem:[%s9201_s1 + $0x518] sm:$0xff]  }
  0x7d   :  { %6406 = vmatpush3.bf16.msra.mxu1 %v7078_v14  ;;  %6385 = vmatprep.subr.bf16.mxu0 %v7079_v15  ;;  %v7138_v14 = vld [vmem:[%s9201_s1 + $0x598] sm:$0xff]   ;;  %v7139_v15 = vld [vmem:[%s9201_s1 + $0x560] sm:$0xff]  }
  0x7e   :  { %6407 = vmatprep.subr.bf16.mxu1 %v7080_v16  ;;  %v7140_v16 = vld [vmem:[%s9201_s1 + $0x5e0] sm:$0xff]  }
  0x80   :  { %6386 = vmatpush3.bf16.msra.mxu0 %v7081_v17  ;;  %v7141_v17 = vld [vmem:[%s9201_s1 + $0x520] sm:$0xff]  }
  0x81   :  { %6408 = vmatpush3.bf16.msra.mxu1 %v7082_v18  ;;  %6415 = vmatprep.subr.bf16.mxu0 %v7087_v24  ;;  %v7142_v18 = vld [vmem:[%s9201_s1 + $0x5a0] sm:$0xff]   ;;  %v7148_v24 = vld [vmem:[%s9201_s1 + $0x5f0] sm:$0xff]  }
  0x82   :  { %6437 = vmatprep.subr.bf16.mxu1 %v7088_v26  ;;  %v7150_v26 = vld [vmem:[%s9201_s1 + $0x5b0] sm:$0xff]  }
  0x83   :  { %4649 = vmatmul.mubr.bf16.vlgmr.msra.gmra.mrb[12].mxu0 %v5675_v21  ;;  %v7145_v21 = vld [vmem:[%s9201_s1 + $0x528] sm:$0xff]  }
  0x84   :  { %4689 = vmatmul.mubr.bf16.vlgmr.msra.gmra.mrb[12].mxu1 %v5677_v23  ;;  %6416 = vmatpush3.bf16.msra.mxu0 %v7089_v27  ;;  %v7147_v23 = vld [vmem:[%s9201_s1 + $0x570] sm:$0xff]   ;;  %v7151_v27 = vld [vmem:[%s9201_s1 + $0x578] sm:$0xff]  }
  0x85   :  { %6438 = vmatpush3.bf16.msra.mxu1 %v7090_v28  ;;  %6417 = vmatprep.subr.bf16.mxu0 %v7091_v29  ;;  %v7152_v28 = vld [vmem:[%s9201_s1 + $0x5f8] sm:$0xff]  }
  0x86   :  { %6439 = vmatprep.subr.bf16.mxu1 %v7092_v30  ;;  %4728 = vmatprep.mubr.bf16.mxu0 %v5680_v59  ;;  %v7153_v29 = vld [vmem:[%s9201_s1 + $0x538] sm:$0xff]   ;;  %v7181_v59 = vld [vmem:[%s9201_s1 + $0x628] sm:$0xff]  }
  0x87   :  { %4768 = vmatprep.mubr.bf16.mxu1 %v5682_v62  ;;  %v7154_v30 = vld [vmem:[%s9201_s1 + $0x5b8] sm:$0xff]   ;;  %v7184_v62 = vld [vmem:[%s9201_s1 + $0x6f0] sm:$0xff]  }
  0x88   :  { %6418 = vmatpush3.bf16.msra.mxu0 %v7093_v31  ;;  %v27_v31 = vld [vmem:[%s9202_s0 + $0x50] sm:$0xff] }
  0x89   :  { %6440 = vmatpush3.bf16.msra.mxu1 %v7094_v32  ;;  %6419 = vmatprep.subr.bf16.mxu0 %v7095_v33  ;;  %v28_v32 = vld [vmem:[%s9202_s0 + $0x58] sm:$0xff]  ;;  %v5683_v33 = vcombine.low %v27_v31, %v27_v31 }
  0x8a   :  { %6441 = vmatprep.subr.bf16.mxu1 %v7096_v34  ;;  %v5684_v34 = vcombine.high %v27_v31, %v27_v31  ;;  %v7214_v31 = vld [vmem:[%s9201_s1 + $0x7a0] sm:$0xff]  }
  0x8c   :  { %6420 = vmatpush3.bf16.msra.mxu0 %v7097_v35  ;;  %v5685_v35 = vcombine.low %v28_v32, %v28_v32 }
  0x8d   :  { %6442 = vmatpush3.bf16.msra.mxu1 %v7098_v36  ;;  %6421 = vmatprep.subr.bf16.mxu0 %v7099_v37  ;;  %v5686_v36 = vcombine.high %v28_v32, %v28_v32  ;;  %v7159_v37 = vld [vmem:[%s9201_s1 + $0x640] sm:$0xff]  }
  0x8e   :  { %6443 = vmatprep.subr.bf16.mxu1 %v7100_v38  ;;  %v7160_v38 = vld [vmem:[%s9201_s1 + $0x6c0] sm:$0xff]  }
  0x90   :  { %6422 = vmatpush3.bf16.msra.mxu0 %v7101_v39  ;;  %v7161_v39 = vld [vmem:[%s9201_s1 + $0x600] sm:$0xff]  }
  0x91   :  { %6444 = vmatpush3.bf16.msra.mxu1 %v7102_v40  ;;  %6423 = vmatprep.subr.bf16.mxu0 %v7103_v41  ;;  %v7162_v40 = vld [vmem:[%s9201_s1 + $0x680] sm:$0xff]   ;;  %v7163_v41 = vld [vmem:[%s9201_s1 + $0x648] sm:$0xff]  }
  0x92   :  { %6445 = vmatprep.subr.bf16.mxu1 %v7104_v42  ;;  %v7164_v42 = vld [vmem:[%s9201_s1 + $0x6c8] sm:$0xff]  }
  0x94   :  { %6424 = vmatpush3.bf16.msra.mxu0 %v7105_v43  ;;  %v7165_v43 = vld [vmem:[%s9201_s1 + $0x608] sm:$0xff]  }
  0x95   :  { %6446 = vmatpush3.bf16.msra.mxu1 %v7106_v44  ;;  %6425 = vmatprep.subr.bf16.mxu0 %v7107_v45  ;;  %v7166_v44 = vld [vmem:[%s9201_s1 + $0x688] sm:$0xff]   ;;  %v7167_v45 = vld [vmem:[%s9201_s1 + $0x650] sm:$0xff]  }
  0x96   :  { %6447 = vmatprep.subr.bf16.mxu1 %v7108_v46  ;;  %v7168_v46 = vld [vmem:[%s9201_s1 + $0x6d0] sm:$0xff]  }
  0x98   :  { %6426 = vmatpush3.bf16.msra.mxu0 %v7109_v47  ;;  %v7169_v47 = vld [vmem:[%s9201_s1 + $0x610] sm:$0xff]  }
  0x99   :  { %6448 = vmatpush3.bf16.msra.mxu1 %v7110_v48  ;;  %6427 = vmatprep.subr.bf16.mxu0 %v7111_v49  ;;  %v7170_v48 = vld [vmem:[%s9201_s1 + $0x690] sm:$0xff]   ;;  %v7171_v49 = vld [vmem:[%s9201_s1 + $0x658] sm:$0xff]  }
  0x9a   :  { %6449 = vmatprep.subr.bf16.mxu1 %v7112_v50  ;;  %v7172_v50 = vld [vmem:[%s9201_s1 + $0x6d8] sm:$0xff]  }
  0x9c   :  { %6428 = vmatpush3.bf16.msra.mxu0 %v7113_v51  ;;  %v7173_v51 = vld [vmem:[%s9201_s1 + $0x618] sm:$0xff]  }
  0x9d   :  { %6450 = vmatpush3.bf16.msra.mxu1 %v7114_v52  ;;  %6429 = vmatprep.subr.bf16.mxu0 %v7115_v53  ;;  %v7174_v52 = vld [vmem:[%s9201_s1 + $0x698] sm:$0xff]   ;;  %v7175_v53 = vld [vmem:[%s9201_s1 + $0x660] sm:$0xff]  }
  0x9e   :  { %6451 = vmatprep.subr.bf16.mxu1 %v7116_v54  ;;  %v7176_v54 = vld [vmem:[%s9201_s1 + $0x6e0] sm:$0xff]  }
  0xa0   :  { %6430 = vmatpush3.bf16.msra.mxu0 %v7117_v55  ;;  %v7177_v55 = vld [vmem:[%s9201_s1 + $0x620] sm:$0xff]  }
  0xa1   :  { %6452 = vmatpush3.bf16.msra.mxu1 %v7118_v56  ;;  %6459 = vmatprep.subr.bf16.mxu0 %v7123_v63  ;;  %v7178_v56 = vld [vmem:[%s9201_s1 + $0x6a0] sm:$0xff]   ;;  %v7185_v63 = vld [vmem:[%s9201_s1 + $0x630] sm:$0xff]  }
  0xa2   :  { %6481 = vmatprep.subr.bf16.mxu1 %v7124_v0  ;;  %v7186_v0 = vld [vmem:[%s9201_s1 + $0x6b0] sm:$0xff]  }
  0xa3   :  { %4729 = vmatmul.mubr.bf16.vlgmr.msra.gmra.mrb[16].mxu0 %v5679_v58  ;;  %v7180_v58 = vld [vmem:[%s9201_s1 + $0x6e8] sm:$0xff]  }
  0xa4   :  { %4769 = vmatmul.mubr.bf16.vlgmr.msra.gmra.mrb[16].mxu1 %v5681_v61  ;;  %6460 = vmatpush3.bf16.msra.mxu0 %v7125_v1  ;;  %v7183_v61 = vld [vmem:[%s9201_s1 + $0x670] sm:$0xff]   ;;  %v7187_v1 = vld [vmem:[%s9201_s1 + $0x678] sm:$0xff]  }
  0xa5   :  { %6482 = vmatpush3.bf16.msra.mxu1 %v7126_v2  ;;  %6461 = vmatprep.subr.bf16.mxu0 %v7127_v3  ;;  %v7188_v2 = vld [vmem:[%s9201_s1 + $0x6f8] sm:$0xff]  }
  0xa6   :  { %6483 = vmatprep.subr.bf16.mxu1 %v7128_v4  ;;  %4808 = vmatprep.mubr.bf16.mxu0 %v5684_v34  ;;  %v7189_v3 = vld [vmem:[%s9201_s1 + $0x638] sm:$0xff]  }
  0xa7   :  { %4848 = vmatprep.mubr.bf16.mxu1 %v5686_v36  ;;  %v7190_v4 = vld [vmem:[%s9201_s1 + $0x6b8] sm:$0xff]  }
  0xa8   :  { %6462 = vmatpush3.bf16.msra.mxu0 %v7129_v5  ;;  %v29_v5 = vld [vmem:[%s9202_s0 + $0x60] sm:$0xff] }
  0xa9   :  { %6484 = vmatpush3.bf16.msra.mxu1 %v7130_v6  ;;  %6463 = vmatprep.subr.bf16.mxu0 %v7131_v7  ;;  %v30_v6 = vld [vmem:[%s9202_s0 + $0x68] sm:$0xff]  ;;  %v5687_v7 = vcombine.low %v29_v5, %v29_v5 }
  0xaa   :  { %6485 = vmatprep.subr.bf16.mxu1 %v7132_v8  ;;  %v5688_v8 = vcombine.high %v29_v5, %v29_v5  ;;  %v7238_v5 = vld [vmem:[%s9201_s1 + $0x888] sm:$0xff]  }
  0xac   :  { %6464 = vmatpush3.bf16.msra.mxu0 %v7133_v9  ;;  %v5689_v9 = vcombine.low %v30_v6, %v30_v6 }
  0xad   :  { %6486 = vmatpush3.bf16.msra.mxu1 %v7134_v10  ;;  %6465 = vmatprep.subr.bf16.mxu0 %v7135_v11  ;;  %v7195_v10 = vld [vmem:[%s9201_s1 + $0x740] sm:$0xff]   ;;  %v5690_v11 = vcombine.high %v30_v6, %v30_v6  ;;  %v7239_v6 = vld [vmem:[%s9201_s1 + $0x850] sm:$0xff]  }
  0xae   :  { %6487 = vmatprep.subr.bf16.mxu1 %v7136_v12  ;;  %v7196_v12 = vld [vmem:[%s9201_s1 + $0x7c0] sm:$0xff]  }
  0xb0   :  { %6466 = vmatpush3.bf16.msra.mxu0 %v7137_v13  ;;  %v7197_v13 = vld [vmem:[%s9201_s1 + $0x700] sm:$0xff]  }
  0xb1   :  { %6488 = vmatpush3.bf16.msra.mxu1 %v7138_v14  ;;  %6467 = vmatprep.subr.bf16.mxu0 %v7139_v15  ;;  %v7198_v14 = vld [vmem:[%s9201_s1 + $0x780] sm:$0xff]   ;;  %v7199_v15 = vld [vmem:[%s9201_s1 + $0x748] sm:$0xff]  }
  0xb2   :  { %6489 = vmatprep.subr.bf16.mxu1 %v7140_v16  ;;  %v7200_v16 = vld [vmem:[%s9201_s1 + $0x7c8] sm:$0xff]  }
  0xb4   :  { %6468 = vmatpush3.bf16.msra.mxu0 %v7141_v17  ;;  %v7201_v17 = vld [vmem:[%s9201_s1 + $0x708] sm:$0xff]  }
  0xb5   :  { %6490 = vmatpush3.bf16.msra.mxu1 %v7142_v18  ;;  %6469 = vmatprep.subr.bf16.mxu0 %v7143_v19  ;;  %v7202_v18 = vld [vmem:[%s9201_s1 + $0x788] sm:$0xff]   ;;  %v7203_v19 = vld [vmem:[%s9201_s1 + $0x750] sm:$0xff]  }
  0xb6   :  { %6491 = vmatprep.subr.bf16.mxu1 %v7144_v20  ;;  %v7204_v20 = vld [vmem:[%s9201_s1 + $0x7d0] sm:$0xff]  }
  0xb8   :  { %6470 = vmatpush3.bf16.msra.mxu0 %v7145_v21  ;;  %v7205_v21 = vld [vmem:[%s9201_s1 + $0x710] sm:$0xff]  }
  0xb9   :  { %6492 = vmatpush3.bf16.msra.mxu1 %v7146_v22  ;;  %6471 = vmatprep.subr.bf16.mxu0 %v7147_v23  ;;  %v7206_v22 = vld [vmem:[%s9201_s1 + $0x790] sm:$0xff]   ;;  %v7207_v23 = vld [vmem:[%s9201_s1 + $0x758] sm:$0xff]  }
  0xba   :  { %6493 = vmatprep.subr.bf16.mxu1 %v7148_v24  ;;  %v7208_v24 = vld [vmem:[%s9201_s1 + $0x7d8] sm:$0xff]  }
  0xbc   :  { %6472 = vmatpush3.bf16.msra.mxu0 %v7149_v25  ;;  %v7209_v25 = vld [vmem:[%s9201_s1 + $0x718] sm:$0xff]  }
  0xbd   :  { %6494 = vmatpush3.bf16.msra.mxu1 %v7150_v26  ;;  %6473 = vmatprep.subr.bf16.mxu0 %v7151_v27  ;;  %v7210_v26 = vld [vmem:[%s9201_s1 + $0x798] sm:$0xff]   ;;  %v7211_v27 = vld [vmem:[%s9201_s1 + $0x760] sm:$0xff]  }
  0xbe   :  { %6495 = vmatprep.subr.bf16.mxu1 %v7152_v28  ;;  %v7212_v28 = vld [vmem:[%s9201_s1 + $0x7e0] sm:$0xff]  }
  0xc0   :  { %6474 = vmatpush3.bf16.msra.mxu0 %v7153_v29  ;;  %v7213_v29 = vld [vmem:[%s9201_s1 + $0x720] sm:$0xff]  }
  0xc1   :  { %6496 = vmatpush3.bf16.msra.mxu1 %v7154_v30  ;;  %6503 = vmatprep.subr.bf16.mxu0 %v7159_v37 }
  0xc2   :  { %6525 = vmatprep.subr.bf16.mxu1 %v7160_v38  ;;  %v7215_v38 = vld [vmem:[%s9201_s1 + $0x768] sm:$0xff]  }
  0xc3   :  { %4809 = vmatmul.mubr.bf16.vlgmr.msra.gmra.mrb[20].mxu0 %v5683_v33  ;;  %v5662_v33 = vld [vmem:[#allocation2] ss:$0 sm:$0xff] }
  0xc4   :  { %4849 = vmatmul.mubr.bf16.vlgmr.msra.gmra.mrb[20].mxu1 %v5685_v35  ;;  %6504 = vmatpush3.bf16.msra.mxu0 %v7161_v39 }
  0xc5   :  { %6526 = vmatpush3.bf16.msra.mxu1 %v7162_v40  ;;  %6505 = vmatprep.subr.bf16.mxu0 %v7163_v41  ;;  %v7216_v40 = vld [vmem:[%s9201_s1 + $0x7e8] sm:$0xff]  }
  0xc6   :  { %6527 = vmatprep.subr.bf16.mxu1 %v7164_v42  ;;  %4888 = vmatprep.mubr.bf16.mxu0 %v5688_v8  ;;  %v7241_v8 = vld [vmem:[%s9201_s1 + $0x810] sm:$0xff]  }
  0xc7   :  { %4928 = vmatprep.mubr.bf16.mxu1 %v5690_v11  ;;  %v7244_v11 = vld [vmem:[%s9201_s1 + $0x8d8] sm:$0xff]  }
  0xc8   :  { %6506 = vmatpush3.bf16.msra.mxu0 %v7165_v43  ;;  %v7217_v43 = vld [vmem:[%s9201_s1 + $0x728] sm:$0xff]  }
  0xc9   :  { %6528 = vmatpush3.bf16.msra.mxu1 %v7166_v44  ;;  %6507 = vmatprep.subr.bf16.mxu0 %v7167_v45  ;;  %v7218_v45 = vld [vmem:[%s9201_s1 + $0x7a8] sm:$0xff]  }
  0xca   :  { %6529 = vmatprep.subr.bf16.mxu1 %v7168_v46 }
  0xcc   :  { %6508 = vmatpush3.bf16.msra.mxu0 %v7169_v47 }
  0xcd   :  { %6530 = vmatpush3.bf16.msra.mxu1 %v7170_v48  ;;  %6509 = vmatprep.subr.bf16.mxu0 %v7171_v49  ;;  %v7219_v48 = vld [vmem:[%s9201_s1 + $0x770] sm:$0xff]  }
  0xce   :  { %6531 = vmatprep.subr.bf16.mxu1 %v7172_v50  ;;  %v7220_v49 = vld [vmem:[%s9201_s1 + $0x7f0] sm:$0xff]  }
  0xcf   :  { %v7221_v50 = vld [vmem:[%s9201_s1 + $0x730] sm:$0xff]  }
  0xd0   :  { %6510 = vmatpush3.bf16.msra.mxu0 %v7173_v51  ;;  %v7222_v51 = vld [vmem:[%s9201_s1 + $0x7b0] sm:$0xff]  }
  0xd1   :  { %6532 = vmatpush3.bf16.msra.mxu1 %v7174_v52  ;;  %6511 = vmatprep.subr.bf16.mxu0 %v7175_v53  ;;  %v7223_v52 = vld [vmem:[%s9201_s1 + $0x778] sm:$0xff]  }
  0xd2   :  { %6533 = vmatprep.subr.bf16.mxu1 %v7176_v54  ;;  %v7224_v53 = vld [vmem:[%s9201_s1 + $0x7f8] sm:$0xff]  }
  0xd3   :  { %v7225_v54 = vld [vmem:[%s9201_s1 + $0x738] sm:$0xff]  }
  0xd4   :  { %6512 = vmatpush3.bf16.msra.mxu0 %v7177_v55  ;;  %v7226_v55 = vld [vmem:[%s9201_s1 + $0x7b8] sm:$0xff]  }
  0xd5   :  { %6534 = vmatpush3.bf16.msra.mxu1 %v7178_v56  ;;  %6513 = vmatprep.subr.bf16.mxu0 %v7179_v57  ;;  %v31_v56 = vld [vmem:[%s9202_s0 + $0x70] sm:$0xff]  ;;  %v32_v57 = vld [vmem:[%s9202_s0 + $0x78] sm:$0xff] }
  0xd6   :  { %6535 = vmatprep.subr.bf16.mxu1 %v7180_v58  ;;  %v5691_v58 = vcombine.low %v31_v56, %v31_v56 }
  0xd8   :  { %6514 = vmatpush3.bf16.msra.mxu0 %v7181_v59  ;;  %v5692_v59 = vcombine.high %v31_v56, %v31_v56  ;;  %v7275_v56 = vld [vmem:[%s9201_s1 + $0x950] sm:$0xff]  }
  0xd9   :  { %6536 = vmatpush3.bf16.msra.mxu1 %v7182_v60  ;;  %6515 = vmatprep.subr.bf16.mxu0 %v7183_v61  ;;  %v5693_v60 = vcombine.low %v32_v57, %v32_v57  ;;  %v5694_v61 = vcombine.high %v32_v57, %v32_v57  ;;  %v7276_v57 = vld [vmem:[%s9201_s1 + $0x9d0] sm:$0xff]  }
  0xda   :  { %6537 = vmatprep.subr.bf16.mxu1 %v7184_v62  ;;  %v7231_v62 = vld [vmem:[%s9201_s1 + $0x840] sm:$0xff]  }
  0xdc   :  { %6516 = vmatpush3.bf16.msra.mxu0 %v7185_v63  ;;  %v7232_v63 = vld [vmem:[%s9201_s1 + $0x8c0] sm:$0xff]  }
  0xdd   :  { %6538 = vmatpush3.bf16.msra.mxu1 %v7186_v0  ;;  %6517 = vmatprep.subr.bf16.mxu0 %v7187_v1  ;;  %v7233_v0 = vld [vmem:[%s9201_s1 + $0x800] sm:$0xff]  }
  0xde   :  { %6539 = vmatprep.subr.bf16.mxu1 %v7188_v2  ;;  %v7234_v1 = vld [vmem:[%s9201_s1 + $0x880] sm:$0xff]   ;;  %v7235_v2 = vld [vmem:[%s9201_s1 + $0x848] sm:$0xff]  }
  0xe0   :  { %6518 = vmatpush3.bf16.msra.mxu0 %v7189_v3  ;;  %v7236_v3 = vld [vmem:[%s9201_s1 + $0x8c8] sm:$0xff]  }
  0xe1   :  { %6540 = vmatpush3.bf16.msra.mxu1 %v7190_v4  ;;  %6547 = vmatprep.subr.bf16.mxu0 %v7195_v10  ;;  %v7237_v4 = vld [vmem:[%s9201_s1 + $0x808] sm:$0xff]   ;;  %v7243_v10 = vld [vmem:[%s9201_s1 + $0x858] sm:$0xff]  }
  0xe2   :  { %6569 = vmatprep.subr.bf16.mxu1 %v7196_v12  ;;  %v7245_v12 = vld [vmem:[%s9201_s1 + $0x818] sm:$0xff]  }
  0xe3   :  { %4889 = vmatmul.mubr.bf16.vlgmr.msra.gmra.mrb[24].mxu0 %v5687_v7  ;;  %v7240_v7 = vld [vmem:[%s9201_s1 + $0x8d0] sm:$0xff]  }
  0xe4   :  { %4929 = vmatmul.mubr.bf16.vlgmr.msra.gmra.mrb[24].mxu1 %v5689_v9  ;;  %6548 = vmatpush3.bf16.msra.mxu0 %v7197_v13  ;;  %v7242_v9 = vld [vmem:[%s9201_s1 + $0x890] sm:$0xff]   ;;  %v7246_v13 = vld [vmem:[%s9201_s1 + $0x898] sm:$0xff]  }
  0xe5   :  { %6570 = vmatpush3.bf16.msra.mxu1 %v7198_v14  ;;  %6549 = vmatprep.subr.bf16.mxu0 %v7199_v15  ;;  %v7247_v14 = vld [vmem:[%s9201_s1 + $0x860] sm:$0xff]  }
  0xe6   :  { %6571 = vmatprep.subr.bf16.mxu1 %v7200_v16  ;;  %4968 = vmatprep.mubr.bf16.mxu0 %v5692_v59  ;;  %v7248_v15 = vld [vmem:[%s9201_s1 + $0x8e0] sm:$0xff]   ;;  %v7278_v59 = vld [vmem:[%s9201_s1 + $0x990] sm:$0xff]  }
  0xe7   :  { %5008 = vmatprep.mubr.bf16.mxu1 %v5694_v61  ;;  %v7249_v16 = vld [vmem:[%s9201_s1 + $0x820] sm:$0xff]   ;;  %v7280_v61 = vld [vmem:[%s9201_s1 + $0x9d8] sm:$0xff]  }
  0xe8   :  { %6550 = vmatpush3.bf16.msra.mxu0 %v7201_v17 }
  0xe9   :  { %6572 = vmatpush3.bf16.msra.mxu1 %v7202_v18  ;;  %6551 = vmatprep.subr.bf16.mxu0 %v7203_v19  ;;  %v7250_v18 = vld [vmem:[%s9201_s1 + $0x8a0] sm:$0xff]  }
  0xea   :  { %6573 = vmatprep.subr.bf16.mxu1 %v7204_v20 }
  0xec   :  { %6552 = vmatpush3.bf16.msra.mxu0 %v7205_v21 }
  0xed   :  { %6574 = vmatpush3.bf16.msra.mxu1 %v7206_v22  ;;  %6553 = vmatprep.subr.bf16.mxu0 %v7207_v23 }
  0xee   :  { %6575 = vmatprep.subr.bf16.mxu1 %v7208_v24  ;;  %v7251_v24 = vld [vmem:[%s9201_s1 + $0x868] sm:$0xff]  }
  0xf0   :  { %6554 = vmatpush3.bf16.msra.mxu0 %v7209_v25 }
  0xf1   :  { %6576 = vmatpush3.bf16.msra.mxu1 %v7210_v26  ;;  %6555 = vmatprep.subr.bf16.mxu0 %v7211_v27  ;;  %v7252_v26 = vld [vmem:[%s9201_s1 + $0x8e8] sm:$0xff]  }
  0xf2   :  { %6577 = vmatprep.subr.bf16.mxu1 %v7212_v28 }
  0xf4   :  { %6556 = vmatpush3.bf16.msra.mxu0 %v7213_v29  ;;  %v7253_v29 = vld [vmem:[%s9201_s1 + $0x828] sm:$0xff]  }
  0xf5   :  { %6578 = vmatpush3.bf16.msra.mxu1 %v7214_v31  ;;  %6557 = vmatprep.subr.bf16.mxu0 %v7215_v38  ;;  %v7254_v31 = vld [vmem:[%s9201_s1 + $0x8a8] sm:$0xff]   ;;  %v7259_v38 = vld [vmem:[%s9201_s1 + $0x878] sm:$0xff]  }
  0xf6   :  { %v6255_v30 = vpop.f32.mrb[0].mxu0  ;;  %6579 = vmatprep.subr.bf16.mxu1 %v7216_v40  ;;  %v7261_v40 = vld [vmem:[%s9201_s1 + $0x838] sm:$0xff]  }
  0xf7   :  { %v6277_v32 = vpop.f32.mrb[0].mxu1  ;;  %v6256_v34 = vpop.f32.mrb[1].mxu0 }
  0xf8   :  { %v6278_v35 = vpop.f32.mrb[1].mxu1  ;;  %v6257_v36 = vadd.f32 %v6256_v34, %v6255_v30  ;;  %v6258_v39 = vpop.f32.mrb[2].mxu0  ;;  %6558 = vmatpush3.bf16.msra.mxu0 %v7217_v43  ;;  %v7255_v34 = vld [vmem:[%s9201_s1 + $0x870] sm:$0xff]   ;;  %v34_v43 = vld [vmem:[%s9202_s0 + $0x88] sm:$0xff] }
  0xf9   :  { %v6279_v37 = vadd.f32 %v6278_v35, %v6277_v32  ;;  %v6280_v41 = vpop.f32.mrb[2].mxu1  ;;  %v6259_v44 = vpop.f32.mrb[3].mxu0  ;;  %6580 = vmatpush3.bf16.msra.mxu1 %v7218_v45  ;;  %6559 = vmatprep.subr.bf16.mxu0 %v7219_v48  ;;  %v7256_v35 = vld [vmem:[%s9201_s1 + $0x8f0] sm:$0xff]   ;;  %v7260_v39 = vld [vmem:[%s9201_s1 + $0x8f8] sm:$0xff]   ;;  %v7267_v48 = vld [vmem:[%s9201_s1 + $0x940] sm:$0xff]  }
  0xfa   :  { %v4411_v42 = vadd.f32 %v6257_v36, %v5662_v33  ;;  %v6281_v46 = vpop.f32.mrb[3].mxu1  ;;  %6581 = vmatprep.subr.bf16.mxu1 %v7220_v49  ;;  %v7257_v36 = vld [vmem:[%s9201_s1 + $0x830] sm:$0xff]   ;;  %v7262_v41 = vld [vmem:[%s9201_s1 + $0x8b8] sm:$0xff]   ;;  %v7268_v49 = vld [vmem:[%s9201_s1 + $0x9c0] sm:$0xff]  }
  0xfb   :  { %v5697_v46 = vcombine.low %v34_v43, %v34_v43 }
  0xfc   :  { %v8328_v47 = vadd.f32 %v6279_v37, %v4411_v42  ;;  %6560 = vmatpush3.bf16.msra.mxu0 %v7221_v50  ;;  %v7258_v37 = vld [vmem:[%s9201_s1 + $0x8b0] sm:$0xff]   ;;  %v33_v42 = vld [vmem:[%s9202_s0 + $0x80] sm:$0xff] }
  0xfd   :  { %6582 = vmatpush3.bf16.msra.mxu1 %v7222_v51  ;;  %6561 = vmatprep.subr.bf16.mxu0 %v7223_v52  ;;  %v5695_v44 = vcombine.low %v33_v42, %v33_v42  ;;  %v5696_v45 = vcombine.high %v33_v42, %v33_v42  ;;  %v7269_v50 = vld [vmem:[%s9201_s1 + $0x900] sm:$0xff]   ;;  %v7271_v52 = vld [vmem:[%s9201_s1 + $0x948] sm:$0xff]   ;;  %v7311_v42 = vld [vmem:[%s9201_s1 + $0xa50] sm:$0xff]  }
  0xfe   :  { %6583 = vmatprep.subr.bf16.mxu1 %v7224_v53  ;;  %v7270_v51 = vld [vmem:[%s9201_s1 + $0x980] sm:$0xff]   ;;  %v7272_v53 = vld [vmem:[%s9201_s1 + $0x9c8] sm:$0xff]  }
 0x100   :  { %6562 = vmatpush3.bf16.msra.mxu0 %v7225_v54  ;;  %v7273_v54 = vld [vmem:[%s9201_s1 + $0x908] sm:$0xff]  }
 0x101   :  { %6584 = vmatpush3.bf16.msra.mxu1 %v7226_v55  ;;  %6591 = vmatprep.subr.bf16.mxu0 %v7231_v62  ;;  %v7274_v55 = vld [vmem:[%s9201_s1 + $0x988] sm:$0xff]   ;;  %v7281_v62 = vld [vmem:[%s9201_s1 + $0x918] sm:$0xff]  }
 0x102   :  { %6613 = vmatprep.subr.bf16.mxu1 %v7232_v63  ;;  %v7282_v63 = vld [vmem:[%s9201_s1 + $0x998] sm:$0xff]  }
 0x103   :  { %4969 = vmatmul.mubr.bf16.vlgmr.msra.gmra.mrb[28].mxu0 %v5691_v58  ;;  %v7277_v58 = vld [vmem:[%s9201_s1 + $0x910] sm:$0xff]  }
 0x104   :  { %5009 = vmatmul.mubr.bf16.vlgmr.msra.gmra.mrb[28].mxu1 %v5693_v60  ;;  %6592 = vmatpush3.bf16.msra.mxu0 %v7233_v0  ;;  %v7279_v60 = vld [vmem:[%s9201_s1 + $0x958] sm:$0xff]   ;;  %v7283_v0 = vld [vmem:[%s9201_s1 + $0x960] sm:$0xff]  }
 0x105   :  { %6614 = vmatpush3.bf16.msra.mxu1 %v7234_v1  ;;  %6593 = vmatprep.subr.bf16.mxu0 %v7235_v2  ;;  %v7284_v1 = vld [vmem:[%s9201_s1 + $0x9e0] sm:$0xff]  }
 0x106   :  { %6615 = vmatprep.subr.bf16.mxu1 %v7236_v3  ;;  %5048 = vmatprep.mubr.bf16.mxu0 %v5696_v45  ;;  %v7285_v3 = vld [vmem:[%s9201_s1 + $0x920] sm:$0xff]   ;;  %v7314_v45 = vld [vmem:[%s9201_s1 + $0xa90] sm:$0xff]  }
 0x108   :  { %6594 = vmatpush3.bf16.msra.mxu0 %v7237_v4 }
 0x109   :  { %6616 = vmatpush3.bf16.msra.mxu1 %v7238_v5  ;;  %6595 = vmatprep.subr.bf16.mxu0 %v7239_v6  ;;  %v7286_v5 = vld [vmem:[%s9201_s1 + $0x9a0] sm:$0xff]  }
 0x10a   :  { %6617 = vmatprep.subr.bf16.mxu1 %v7240_v7 }
 0x10c   :  { %6596 = vmatpush3.bf16.msra.mxu0 %v7241_v8 }
 0x10d   :  { %6618 = vmatpush3.bf16.msra.mxu1 %v7242_v9  ;;  %6597 = vmatprep.subr.bf16.mxu0 %v7243_v10  ;;  %v7287_v9 = vld [vmem:[%s9201_s1 + $0x968] sm:$0xff]  }
 0x10e   :  { %6619 = vmatprep.subr.bf16.mxu1 %v7244_v11  ;;  %v7288_v11 = vld [vmem:[%s9201_s1 + $0x9e8] sm:$0xff]  }
 0x110   :  { %6598 = vmatpush3.bf16.msra.mxu0 %v7245_v12 }
 0x111   :  { %6620 = vmatpush3.bf16.msra.mxu1 %v7246_v13  ;;  %6599 = vmatprep.subr.bf16.mxu0 %v7247_v14 }
 0x112   :  { %6621 = vmatprep.subr.bf16.mxu1 %v7248_v15  ;;  %v7289_v15 = vld [vmem:[%s9201_s1 + $0x928] sm:$0xff]  }
 0x114   :  { %6600 = vmatpush3.bf16.msra.mxu0 %v7249_v16  ;;  %v7290_v16 = vld [vmem:[%s9201_s1 + $0x9a8] sm:$0xff]  }
 0x115   :  { %6622 = vmatpush3.bf16.msra.mxu1 %v7250_v18  ;;  %6601 = vmatprep.subr.bf16.mxu0 %v7251_v24  ;;  %v7295_v24 = vld [vmem:[%s9201_s1 + $0x978] sm:$0xff]  }
 0x116   :  { %v6299_v17 = vpop.f32.mrb[4].mxu0  ;;  %6623 = vmatprep.subr.bf16.mxu1 %v7252_v26  ;;  %v7297_v26 = vld [vmem:[%s9201_s1 + $0x938] sm:$0xff]  }
 0x117   :  { %v6321_v19 = vpop.f32.mrb[4].mxu1  ;;  %v6300_v20 = vpop.f32.mrb[5].mxu0 }
 0x118   :  { %v6322_v21 = vpop.f32.mrb[5].mxu1  ;;  %v6301_v22 = vadd.f32 %v6300_v20, %v6299_v17  ;;  %v6302_v25 = vpop.f32.mrb[6].mxu0  ;;  %6602 = vmatpush3.bf16.msra.mxu0 %v7253_v29  ;;  %v7291_v20 = vld [vmem:[%s9201_s1 + $0x970] sm:$0xff]   ;;  %v36_v29 = vld [vmem:[%s9202_s0 + $0x98] sm:$0xff] }
 0x119   :  { %v6323_v23 = vadd.f32 %v6322_v21, %v6321_v19  ;;  %v6324_v27 = vpop.f32.mrb[6].mxu1  ;;  %v6303_v30 = vpop.f32.mrb[7].mxu0  ;;  %6624 = vmatpush3.bf16.msra.mxu1 %v7254_v31  ;;  %6603 = vmatprep.subr.bf16.mxu0 %v7255_v34  ;;  %v7292_v21 = vld [vmem:[%s9201_s1 + $0x9f0] sm:$0xff]   ;;  %v7296_v25 = vld [vmem:[%s9201_s1 + $0x9f8] sm:$0xff]   ;;  %v5702_v34 = vcombine.high %v36_v29, %v36_v29 }
 0x11a   :  { %v4491_v28 = vadd.f32 %v6301_v22, %v8328_v47  ;;  %v6325_v32 = vpop.f32.mrb[7].mxu1  ;;  %6625 = vmatprep.subr.bf16.mxu1 %v7256_v35  ;;  %v5698_v47 = vcombine.high %v34_v43, %v34_v43  ;;  %v7293_v22 = vld [vmem:[%s9201_s1 + $0x930] sm:$0xff]   ;;  %v7298_v27 = vld [vmem:[%s9201_s1 + $0x9b8] sm:$0xff]   ;;  %v7304_v35 = vld [vmem:[%s9201_s1 + $0xac0] sm:$0xff]  }
 0x11b   :  { %v5701_v32 = vcombine.low %v36_v29, %v36_v29  ;;  %v7312_v43 = vld [vmem:[%s9201_s1 + $0xad0] sm:$0xff]  }
 0x11c   :  { %v8433_v33 = vadd.f32 %v6323_v23, %v4491_v28  ;;  %6604 = vmatpush3.bf16.msra.mxu0 %v7257_v36  ;;  %5088 = vmatprep.mubr.bf16.mxu1 %v5698_v47  ;;  %v7294_v23 = vld [vmem:[%s9201_s1 + $0x9b0] sm:$0xff]   ;;  %v7305_v36 = vld [vmem:[%s9201_s1 + $0xa00] sm:$0xff]   ;;  %v7316_v47 = vld [vmem:[%s9201_s1 + $0xad8] sm:$0xff]  }
 0x11d   :  { %6626 = vmatpush3.bf16.msra.mxu1 %v7258_v37  ;;  %6605 = vmatprep.subr.bf16.mxu0 %v7259_v38  ;;  %v35_v28 = vld [vmem:[%s9202_s0 + $0x90] sm:$0xff]  ;;  %v7306_v37 = vld [vmem:[%s9201_s1 + $0xa80] sm:$0xff]   ;;  %v7307_v38 = vld [vmem:[%s9201_s1 + $0xa48] sm:$0xff]  }
 0x11e   :  { %6627 = vmatprep.subr.bf16.mxu1 %v7260_v39  ;;  %v5699_v30 = vcombine.low %v35_v28, %v35_v28  ;;  %v5700_v31 = vcombine.high %v35_v28, %v35_v28  ;;  %v7308_v39 = vld [vmem:[%s9201_s1 + $0xac8] sm:$0xff]   ;;  %v7347_v28 = vld [vmem:[%s9201_s1 + $0xb50] sm:$0xff]  }
 0x11f   :  { %v7348_v29 = vld [vmem:[%s9201_s1 + $0xbd0] sm:$0xff]  }
 0x120   :  { %6606 = vmatpush3.bf16.msra.mxu0 %v7261_v40  ;;  %v7309_v40 = vld [vmem:[%s9201_s1 + $0xa08] sm:$0xff]  }
 0x121   :  { %6628 = vmatpush3.bf16.msra.mxu1 %v7262_v41  ;;  %6635 = vmatprep.subr.bf16.mxu0 %v7267_v48  ;;  %v7310_v41 = vld [vmem:[%s9201_s1 + $0xa88] sm:$0xff]   ;;  %v7317_v48 = vld [vmem:[%s9201_s1 + $0xa18] sm:$0xff]  }
 0x122   :  { %6657 = vmatprep.subr.bf16.mxu1 %v7268_v49  ;;  %v7318_v49 = vld [vmem:[%s9201_s1 + $0xa98] sm:$0xff]  }
 0x123   :  { %5049 = vmatmul.mubr.bf16.vlgmr.msra.gmra.mrb[32].mxu0 %v5695_v44  ;;  %v7313_v44 = vld [vmem:[%s9201_s1 + $0xa10] sm:$0xff]  }
 0x124   :  { %5089 = vmatmul.mubr.bf16.vlgmr.msra.gmra.mrb[32].mxu1 %v5697_v46  ;;  %6636 = vmatpush3.bf16.msra.mxu0 %v7269_v50  ;;  %v7315_v46 = vld [vmem:[%s9201_s1 + $0xa58] sm:$0xff]   ;;  %v7319_v50 = vld [vmem:[%s9201_s1 + $0xa60] sm:$0xff]  }
 0x125   :  { %6658 = vmatpush3.bf16.msra.mxu1 %v7270_v51  ;;  %6637 = vmatprep.subr.bf16.mxu0 %v7271_v52  ;;  %v7320_v51 = vld [vmem:[%s9201_s1 + $0xae0] sm:$0xff]  }
 0x126   :  { %6659 = vmatprep.subr.bf16.mxu1 %v7272_v53  ;;  %5128 = vmatprep.mubr.bf16.mxu0 %v5700_v31  ;;  %v7321_v53 = vld [vmem:[%s9201_s1 + $0xa20] sm:$0xff]   ;;  %v7350_v31 = vld [vmem:[%s9201_s1 + $0xb90] sm:$0xff]  }
 0x127   :  { %5168 = vmatprep.mubr.bf16.mxu1 %v5702_v34  ;;  %v7353_v34 = vld [vmem:[%s9201_s1 + $0xb18] sm:$0xff]  }
 0x128   :  { %6638 = vmatpush3.bf16.msra.mxu0 %v7273_v54 }
 0x129   :  { %6660 = vmatpush3.bf16.msra.mxu1 %v7274_v55  ;;  %6639 = vmatprep.subr.bf16.mxu0 %v7275_v56  ;;  %v7322_v55 = vld [vmem:[%s9201_s1 + $0xaa0] sm:$0xff]  }
 0x12a   :  { %6661 = vmatprep.subr.bf16.mxu1 %v7276_v57 }
 0x12c   :  { %6640 = vmatpush3.bf16.msra.mxu0 %v7277_v58  ;;  %v7323_v58 = vld [vmem:[%s9201_s1 + $0xa68] sm:$0xff]  }
 0x12d   :  { %6662 = vmatpush3.bf16.msra.mxu1 %v7278_v59  ;;  %6641 = vmatprep.subr.bf16.mxu0 %v7279_v60 }
 0x12e   :  { %6663 = vmatprep.subr.bf16.mxu1 %v7280_v61  ;;  %v7324_v61 = vld [vmem:[%s9201_s1 + $0xae8] sm:$0xff]  }
 0x130   :  { %6642 = vmatpush3.bf16.msra.mxu0 %v7281_v62 }
 0x131   :  { %6664 = vmatpush3.bf16.msra.mxu1 %v7282_v63  ;;  %6643 = vmatprep.subr.bf16.mxu0 %v7283_v0  ;;  %v7325_v0 = vld [vmem:[%s9201_s1 + $0xa28] sm:$0xff]  }
 0x132   :  { %6665 = vmatprep.subr.bf16.mxu1 %v7284_v1 }
 0x134   :  { %6644 = vmatpush3.bf16.msra.mxu0 %v7285_v3 }
 0x135   :  { %6666 = vmatpush3.bf16.msra.mxu1 %v7286_v5  ;;  %6645 = vmatprep.subr.bf16.mxu0 %v7287_v9  ;;  %v7327_v5 = vld [vmem:[%s9201_s1 + $0xa70] sm:$0xff]  }
 0x136   :  { %v6343_v2 = vpop.f32.mrb[8].mxu0  ;;  %6667 = vmatprep.subr.bf16.mxu1 %v7288_v11  ;;  %v7330_v9 = vld [vmem:[%s9201_s1 + $0xab0] sm:$0xff]   ;;  %v7332_v11 = vld [vmem:[%s9201_s1 + $0xaf8] sm:$0xff]  }
 0x137   :  { %v6365_v4 = vpop.f32.mrb[8].mxu1  ;;  %v6344_v6 = vpop.f32.mrb[9].mxu0 }
 0x138   :  { %v6345_v7 = vadd.f32 %v6344_v6, %v6343_v2  ;;  %v6366_v8 = vpop.f32.mrb[9].mxu1  ;;  %v6346_v12 = vpop.f32.mrb[10].mxu0  ;;  %6646 = vmatpush3.bf16.msra.mxu0 %v7289_v15  ;;  %v7326_v2 = vld [vmem:[%s9201_s1 + $0xaa8] sm:$0xff]  }
 0x139   :  { %v6367_v10 = vadd.f32 %v6366_v8, %v6365_v4  ;;  %v6368_v14 = vpop.f32.mrb[10].mxu1  ;;  %v6347_v17 = vpop.f32.mrb[11].mxu0  ;;  %6668 = vmatpush3.bf16.msra.mxu1 %v7290_v16  ;;  %6647 = vmatprep.subr.bf16.mxu0 %v7291_v20  ;;  %v7329_v8 = vld [vmem:[%s9201_s1 + $0xa30] sm:$0xff]   ;;  %v7333_v12 = vld [vmem:[%s9201_s1 + $0xa38] sm:$0xff]   ;;  %v7339_v20 = vld [vmem:[%s9201_s1 + $0xb40] sm:$0xff]  }
 0x13a   :  { %v4571_v13 = vadd.f32 %v6345_v7, %v8433_v33  ;;  %v6369_v19 = vpop.f32.mrb[11].mxu1  ;;  %6669 = vmatprep.subr.bf16.mxu1 %v7292_v21  ;;  %v7303_v33 = vld [vmem:[%s9201_s1 + $0xa40] sm:$0xff]   ;;  %v7328_v7 = vld [vmem:[%s9201_s1 + $0xaf0] sm:$0xff]   ;;  %v38_v17 = vld [vmem:[%s9202_s0 + $0xa8] sm:$0xff] }
 0x13b   :  { %v37_v14 = vld [vmem:[%s9202_s0 + $0xa0] sm:$0xff]  ;;  %v5706_v19 = vcombine.high %v38_v17, %v38_v17 }
 0x13c   :  { %v8538_v18 = vadd.f32 %v6367_v10, %v4571_v13  ;;  %6648 = vmatpush3.bf16.msra.mxu0 %v7293_v22  ;;  %v7331_v10 = vld [vmem:[%s9201_s1 + $0xa78] sm:$0xff]   ;;  %v5703_v15 = vcombine.low %v37_v14, %v37_v14  ;;  %v5704_v16 = vcombine.high %v37_v14, %v37_v14  ;;  %v7340_v21 = vld [vmem:[%s9201_s1 + $0xbc0] sm:$0xff]   ;;  %v7383_v14 = vld [vmem:[%s9201_s1 + $0xc50] sm:$0xff]  }
 0x13d   :  { %6670 = vmatpush3.bf16.msra.mxu1 %v7294_v23  ;;  %6649 = vmatprep.subr.bf16.mxu0 %v7295_v24  ;;  %v7334_v13 = vld [vmem:[%s9201_s1 + $0xab8] sm:$0xff]   ;;  %v7341_v22 = vld [vmem:[%s9201_s1 + $0xb00] sm:$0xff]   ;;  %v7343_v24 = vld [vmem:[%s9201_s1 + $0xb48] sm:$0xff]  }
 0x13e   :  { %6671 = vmatprep.subr.bf16.mxu1 %v7296_v25  ;;  %v7342_v23 = vld [vmem:[%s9201_s1 + $0xb80] sm:$0xff]   ;;  %v7344_v25 = vld [vmem:[%s9201_s1 + $0xbc8] sm:$0xff]  }
 0x140   :  { %6650 = vmatpush3.bf16.msra.mxu0 %v7297_v26  ;;  %v7345_v26 = vld [vmem:[%s9201_s1 + $0xb08] sm:$0xff]  }
 0x141   :  { %6672 = vmatpush3.bf16.msra.mxu1 %v7298_v27  ;;  %6679 = vmatprep.subr.bf16.mxu0 %v7303_v33  ;;  %v7346_v27 = vld [vmem:[%s9201_s1 + $0xb88] sm:$0xff]   ;;  %v7352_v33 = vld [vmem:[%s9201_s1 + $0xbd8] sm:$0xff]  }
 0x142   :  { %6701 = vmatprep.subr.bf16.mxu1 %v7304_v35  ;;  %v7354_v35 = vld [vmem:[%s9201_s1 + $0xb98] sm:$0xff]  }
 0x143   :  { %5129 = vmatmul.mubr.bf16.vlgmr.msra.gmra.mrb[36].mxu0 %v5699_v30  ;;  %v7349_v30 = vld [vmem:[%s9201_s1 + $0xb10] sm:$0xff]  }
 0x144   :  { %5169 = vmatmul.mubr.bf16.vlgmr.msra.gmra.mrb[36].mxu1 %v5701_v32  ;;  %6680 = vmatpush3.bf16.msra.mxu0 %v7305_v36  ;;  %v7351_v32 = vld [vmem:[%s9201_s1 + $0xb58] sm:$0xff]   ;;  %v7355_v36 = vld [vmem:[%s9201_s1 + $0xb60] sm:$0xff]  }
 0x145   :  { %6702 = vmatpush3.bf16.msra.mxu1 %v7306_v37  ;;  %6681 = vmatprep.subr.bf16.mxu0 %v7307_v38  ;;  %v7356_v37 = vld [vmem:[%s9201_s1 + $0xbe0] sm:$0xff]  }
 0x146   :  { %6703 = vmatprep.subr.bf16.mxu1 %v7308_v39  ;;  %5208 = vmatprep.mubr.bf16.mxu0 %v5704_v16  ;;  %v7357_v39 = vld [vmem:[%s9201_s1 + $0xb20] sm:$0xff]   ;;  %v7385_v16 = vld [vmem:[%s9201_s1 + $0xc10] sm:$0xff]  }
 0x147   :  { %5248 = vmatprep.mubr.bf16.mxu1 %v5706_v19  ;;  %v7388_v19 = vld [vmem:[%s9201_s1 + $0xcd8] sm:$0xff]  }
 0x148   :  { %6682 = vmatpush3.bf16.msra.mxu0 %v7309_v40 }
 0x149   :  { %6704 = vmatpush3.bf16.msra.mxu1 %v7310_v41  ;;  %6683 = vmatprep.subr.bf16.mxu0 %v7311_v42  ;;  %v7358_v41 = vld [vmem:[%s9201_s1 + $0xba0] sm:$0xff]  }
 0x14a   :  { %6705 = vmatprep.subr.bf16.mxu1 %v7312_v43 }
 0x14c   :  { %6684 = vmatpush3.bf16.msra.mxu0 %v7313_v44  ;;  %v7359_v44 = vld [vmem:[%s9201_s1 + $0xb68] sm:$0xff]  }
 0x14d   :  { %6706 = vmatpush3.bf16.msra.mxu1 %v7314_v45  ;;  %6685 = vmatprep.subr.bf16.mxu0 %v7315_v46 }
 0x14e   :  { %6707 = vmatprep.subr.bf16.mxu1 %v7316_v47  ;;  %v7360_v47 = vld [vmem:[%s9201_s1 + $0xbe8] sm:$0xff]  }
 0x150   :  { %6686 = vmatpush3.bf16.msra.mxu0 %v7317_v48 }
 0x151   :  { %6708 = vmatpush3.bf16.msra.mxu1 %v7318_v49  ;;  %6687 = vmatprep.subr.bf16.mxu0 %v7319_v50  ;;  %v7361_v50 = vld [vmem:[%s9201_s1 + $0xb28] sm:$0xff]  }
 0x152   :  { %6709 = vmatprep.subr.bf16.mxu1 %v7320_v51 }
 0x154   :  { %6688 = vmatpush3.bf16.msra.mxu0 %v7321_v53 }
 0x155   :  { %6710 = vmatpush3.bf16.msra.mxu1 %v7322_v55  ;;  %6689 = vmatprep.subr.bf16.mxu0 %v7323_v58  ;;  %v7363_v55 = vld [vmem:[%s9201_s1 + $0xb70] sm:$0xff]  }
 0x156   :  { %v6387_v52 = vpop.f32.mrb[12].mxu0  ;;  %6711 = vmatprep.subr.bf16.mxu1 %v7324_v61  ;;  %v7365_v58 = vld [vmem:[%s9201_s1 + $0xb30] sm:$0xff]   ;;  %v7368_v61 = vld [vmem:[%s9201_s1 + $0xbf8] sm:$0xff]  }
 0x157   :  { %v6409_v54 = vpop.f32.mrb[12].mxu1  ;;  %v6388_v56 = vpop.f32.mrb[13].mxu0 }
 0x158   :  { %v6410_v57 = vpop.f32.mrb[13].mxu1  ;;  %v6389_v59 = vadd.f32 %v6388_v56, %v6387_v52  ;;  %v6390_v62 = vpop.f32.mrb[14].mxu0  ;;  %6690 = vmatpush3.bf16.msra.mxu0 %v7325_v0  ;;  %v7362_v52 = vld [vmem:[%s9201_s1 + $0xba8] sm:$0xff]   ;;  %v39_v0 = vld [vmem:[%s9202_s0 + $0xb0] sm:$0xff] }
 0x159   :  { %v6411_v60 = vadd.f32 %v6410_v57, %v6409_v54  ;;  %v6412_v63 = vpop.f32.mrb[14].mxu1  ;;  %v6391_v3 = vpop.f32.mrb[15].mxu0  ;;  %6712 = vmatpush3.bf16.msra.mxu1 %v7326_v2  ;;  %6691 = vmatprep.subr.bf16.mxu0 %v7327_v5  ;;  %v7364_v57 = vld [vmem:[%s9201_s1 + $0xbf0] sm:$0xff]   ;;  %v7369_v62 = vld [vmem:[%s9201_s1 + $0xb38] sm:$0xff]   ;;  %v5707_v2 = vcombine.low %v39_v0, %v39_v0 }
 0x15a   :  { %v4651_v1 = vadd.f32 %v6389_v59, %v8538_v18  ;;  %v6413_v4 = vpop.f32.mrb[15].mxu1  ;;  %6713 = vmatprep.subr.bf16.mxu1 %v7328_v7  ;;  %v5705_v18 = vcombine.low %v38_v17, %v38_v17  ;;  %v7366_v59 = vld [vmem:[%s9201_s1 + $0xbb0] sm:$0xff]   ;;  %v7370_v63 = vld [vmem:[%s9201_s1 + $0xbb8] sm:$0xff]   ;;  %v5708_v3 = vcombine.high %v39_v0, %v39_v0  ;;  %v7376_v7 = vld [vmem:[%s9201_s1 + $0xcc0] sm:$0xff]  }
 0x15b   :  { %v7386_v17 = vld [vmem:[%s9201_s1 + $0xc90] sm:$0xff]  }
 0x15c   :  { %v8646_v6 = vadd.f32 %v6411_v60, %v4651_v1  ;;  %6692 = vmatpush3.bf16.msra.mxu0 %v7329_v8  ;;  %v7367_v60 = vld [vmem:[%s9201_s1 + $0xb78] sm:$0xff]   ;;  %v7377_v8 = vld [vmem:[%s9201_s1 + $0xc00] sm:$0xff]   ;;  %v7419_v0 = vld [vmem:[%s9201_s1 + $0xd50] sm:$0xff]  }
 0x15d   :  { %6714 = vmatpush3.bf16.msra.mxu1 %v7330_v9  ;;  %6693 = vmatprep.subr.bf16.mxu0 %v7331_v10  ;;  %v40_v1 = vld [vmem:[%s9202_s0 + $0xb8] sm:$0xff]  ;;  %v7378_v9 = vld [vmem:[%s9201_s1 + $0xc80] sm:$0xff]   ;;  %v7379_v10 = vld [vmem:[%s9201_s1 + $0xc48] sm:$0xff]  }
 0x15e   :  { %6715 = vmatprep.subr.bf16.mxu1 %v7332_v11  ;;  %v5709_v4 = vcombine.low %v40_v1, %v40_v1  ;;  %v5710_v5 = vcombine.high %v40_v1, %v40_v1  ;;  %v7380_v11 = vld [vmem:[%s9201_s1 + $0xcc8] sm:$0xff]   ;;  %v7420_v1 = vld [vmem:[%s9201_s1 + $0xdd0] sm:$0xff]  }
 0x160   :  { %6694 = vmatpush3.bf16.msra.mxu0 %v7333_v12  ;;  %v7381_v12 = vld [vmem:[%s9201_s1 + $0xc08] sm:$0xff]  }
 0x161   :  { %6716 = vmatpush3.bf16.msra.mxu1 %v7334_v13  ;;  %6723 = vmatprep.subr.bf16.mxu0 %v7339_v20  ;;  %v7382_v13 = vld [vmem:[%s9201_s1 + $0xc88] sm:$0xff]   ;;  %v7389_v20 = vld [vmem:[%s9201_s1 + $0xc18] sm:$0xff]  }
 0x162   :  { %6745 = vmatprep.subr.bf16.mxu1 %v7340_v21  ;;  %v7390_v21 = vld [vmem:[%s9201_s1 + $0xc98] sm:$0xff]  }
 0x163   :  { %5209 = vmatmul.mubr.bf16.vlgmr.msra.gmra.mrb[40].mxu0 %v5703_v15  ;;  %v7384_v15 = vld [vmem:[%s9201_s1 + $0xcd0] sm:$0xff]  }
 0x164   :  { %5249 = vmatmul.mubr.bf16.vlgmr.msra.gmra.mrb[40].mxu1 %v5705_v18  ;;  %6724 = vmatpush3.bf16.msra.mxu0 %v7341_v22  ;;  %v7387_v18 = vld [vmem:[%s9201_s1 + $0xc58] sm:$0xff]   ;;  %v7391_v22 = vld [vmem:[%s9201_s1 + $0xc60] sm:$0xff]  }
 0x165   :  { %6746 = vmatpush3.bf16.msra.mxu1 %v7342_v23  ;;  %6725 = vmatprep.subr.bf16.mxu0 %v7343_v24  ;;  %v7392_v23 = vld [vmem:[%s9201_s1 + $0xce0] sm:$0xff]  }
 0x166   :  { %6747 = vmatprep.subr.bf16.mxu1 %v7344_v25  ;;  %5288 = vmatprep.mubr.bf16.mxu0 %v5708_v3  ;;  %v7393_v25 = vld [vmem:[%s9201_s1 + $0xc20] sm:$0xff]   ;;  %v7422_v3 = vld [vmem:[%s9201_s1 + $0xd90] sm:$0xff]  }
 0x167   :  { %5328 = vmatprep.mubr.bf16.mxu1 %v5710_v5  ;;  %v7424_v5 = vld [vmem:[%s9201_s1 + $0xdd8] sm:$0xff]  }
 0x168   :  { %6726 = vmatpush3.bf16.msra.mxu0 %v7345_v26 }
 0x169   :  { %6748 = vmatpush3.bf16.msra.mxu1 %v7346_v27  ;;  %6727 = vmatprep.subr.bf16.mxu0 %v7347_v28  ;;  %v7394_v27 = vld [vmem:[%s9201_s1 + $0xca0] sm:$0xff]  }
 0x16a   :  { %6749 = vmatprep.subr.bf16.mxu1 %v7348_v29 }
 0x16c   :  { %6728 = vmatpush3.bf16.msra.mxu0 %v7349_v30 }
 0x16d   :  { %6750 = vmatpush3.bf16.msra.mxu1 %v7350_v31  ;;  %6729 = vmatprep.subr.bf16.mxu0 %v7351_v32  ;;  %v7395_v31 = vld [vmem:[%s9201_s1 + $0xc68] sm:$0xff]  }
 0x16e   :  { %6751 = vmatprep.subr.bf16.mxu1 %v7352_v33  ;;  %v7396_v33 = vld [vmem:[%s9201_s1 + $0xce8] sm:$0xff]  }
 0x170   :  { %6730 = vmatpush3.bf16.msra.mxu0 %v7353_v34 }
 0x171   :  { %6752 = vmatpush3.bf16.msra.mxu1 %v7354_v35  ;;  %6731 = vmatprep.subr.bf16.mxu0 %v7355_v36 }
 0x172   :  { %6753 = vmatprep.subr.bf16.mxu1 %v7356_v37  ;;  %v7397_v37 = vld [vmem:[%s9201_s1 + $0xc28] sm:$0xff]  }
 0x174   :  { %6732 = vmatpush3.bf16.msra.mxu0 %v7357_v39 }
 0x175   :  { %6754 = vmatpush3.bf16.msra.mxu1 %v7358_v41  ;;  %6733 = vmatprep.subr.bf16.mxu0 %v7359_v44  ;;  %v7401_v44 = vld [vmem:[%s9201_s1 + $0xc30] sm:$0xff]  }
 0x176   :  { %v6431_v38 = vpop.f32.mrb[16].mxu0  ;;  %6755 = vmatprep.subr.bf16.mxu1 %v7360_v47  ;;  %v7404_v47 = vld [vmem:[%s9201_s1 + $0xcf8] sm:$0xff]  }
 0x177   :  { %v6453_v40 = vpop.f32.mrb[16].mxu1  ;;  %v6432_v42 = vpop.f32.mrb[17].mxu0 }
 0x178   :  { %v6454_v43 = vpop.f32.mrb[17].mxu1  ;;  %v6433_v45 = vadd.f32 %v6432_v42, %v6431_v38  ;;  %v6434_v48 = vpop.f32.mrb[18].mxu0  ;;  %6734 = vmatpush3.bf16.msra.mxu0 %v7361_v50  ;;  %v7398_v38 = vld [vmem:[%s9201_s1 + $0xca8] sm:$0xff]   ;;  %v7399_v42 = vld [vmem:[%s9201_s1 + $0xc70] sm:$0xff]   ;;  %v41_v50 = vld [vmem:[%s9202_s0 + $0xc0] sm:$0xff] }
 0x179   :  { %v6455_v46 = vadd.f32 %v6454_v43, %v6453_v40  ;;  %v6456_v49 = vpop.f32.mrb[18].mxu1  ;;  %v6435_v53 = vpop.f32.mrb[19].mxu0  ;;  %6756 = vmatpush3.bf16.msra.mxu1 %v7362_v52  ;;  %6735 = vmatprep.subr.bf16.mxu0 %v7363_v55  ;;  %v7400_v43 = vld [vmem:[%s9201_s1 + $0xcf0] sm:$0xff]   ;;  %v7405_v48 = vld [vmem:[%s9201_s1 + $0xc38] sm:$0xff]   ;;  %v5711_v52 = vcombine.low %v41_v50, %v41_v50  ;;  %v7411_v55 = vld [vmem:[%s9201_s1 + $0xd40] sm:$0xff]  }
 0x17a   :  { %v4731_v51 = vadd.f32 %v6433_v45, %v8646_v6  ;;  %v6457_v54 = vpop.f32.mrb[19].mxu1  ;;  %6757 = vmatprep.subr.bf16.mxu1 %v7364_v57  ;;  %v7375_v6 = vld [vmem:[%s9201_s1 + $0xc40] sm:$0xff]   ;;  %v7402_v45 = vld [vmem:[%s9201_s1 + $0xcb0] sm:$0xff]   ;;  %v7406_v49 = vld [vmem:[%s9201_s1 + $0xcb8] sm:$0xff]   ;;  %v5712_v53 = vcombine.high %v41_v50, %v41_v50 }
 0x17b   :  { %v7412_v57 = vld [vmem:[%s9201_s1 + $0xdc0] sm:$0xff]   ;;  %v7455_v50 = vld [vmem:[%s9201_s1 + $0xe50] sm:$0xff]  }
 0x17c   :  { %v8751_v56 = vadd.f32 %v6455_v46, %v4731_v51  ;;  %6736 = vmatpush3.bf16.msra.mxu0 %v7365_v58  ;;  %v7403_v46 = vld [vmem:[%s9201_s1 + $0xc78] sm:$0xff]   ;;  %v42_v51 = vld [vmem:[%s9202_s0 + $0xc8] sm:$0xff]  ;;  %v7413_v58 = vld [vmem:[%s9201_s1 + $0xd00] sm:$0xff]  }
 0x17d   :  { %6758 = vmatpush3.bf16.msra.mxu1 %v7366_v59  ;;  %6737 = vmatprep.subr.bf16.mxu0 %v7367_v60  ;;  %v5713_v54 = vcombine.low %v42_v51, %v42_v51  ;;  %v7414_v59 = vld [vmem:[%s9201_s1 + $0xd80] sm:$0xff]   ;;  %v7415_v60 = vld [vmem:[%s9201_s1 + $0xd48] sm:$0xff]  }
 0x17e   :  { %6759 = vmatprep.subr.bf16.mxu1 %v7368_v61  ;;  %v7416_v61 = vld [vmem:[%s9201_s1 + $0xdc8] sm:$0xff]  }
 0x180   :  { %6738 = vmatpush3.bf16.msra.mxu0 %v7369_v62  ;;  %v7417_v62 = vld [vmem:[%s9201_s1 + $0xd08] sm:$0xff]  }
 0x181   :  { %6760 = vmatpush3.bf16.msra.mxu1 %v7370_v63  ;;  %6767 = vmatprep.subr.bf16.mxu0 %v7375_v6  ;;  %v7418_v63 = vld [vmem:[%s9201_s1 + $0xd88] sm:$0xff]   ;;  %v7425_v6 = vld [vmem:[%s9201_s1 + $0xd18] sm:$0xff]  }
 0x182   :  { %6789 = vmatprep.subr.bf16.mxu1 %v7376_v7  ;;  %v7426_v7 = vld [vmem:[%s9201_s1 + $0xd98] sm:$0xff]  }
 0x183   :  { %5289 = vmatmul.mubr.bf16.vlgmr.msra.gmra.mrb[44].mxu0 %v5707_v2  ;;  %v7421_v2 = vld [vmem:[%s9201_s1 + $0xd10] sm:$0xff]  }
 0x184   :  { %5329 = vmatmul.mubr.bf16.vlgmr.msra.gmra.mrb[44].mxu1 %v5709_v4  ;;  %6768 = vmatpush3.bf16.msra.mxu0 %v7377_v8  ;;  %v7423_v4 = vld [vmem:[%s9201_s1 + $0xd58] sm:$0xff]   ;;  %v7427_v8 = vld [vmem:[%s9201_s1 + $0xd60] sm:$0xff]  }
 0x185   :  { %6790 = vmatpush3.bf16.msra.mxu1 %v7378_v9  ;;  %6769 = vmatprep.subr.bf16.mxu0 %v7379_v10  ;;  %v7428_v9 = vld [vmem:[%s9201_s1 + $0xde0] sm:$0xff]  }
 0x186   :  { %6791 = vmatprep.subr.bf16.mxu1 %v7380_v11  ;;  %5368 = vmatprep.mubr.bf16.mxu0 %v5712_v53  ;;  %v7429_v11 = vld [vmem:[%s9201_s1 + $0xd20] sm:$0xff]   ;;  %v7458_v53 = vld [vmem:[%s9201_s1 + $0xe90] sm:$0xff]  }
 0x188   :  { %6770 = vmatpush3.bf16.msra.mxu0 %v7381_v12 }
 0x189   :  { %6792 = vmatpush3.bf16.msra.mxu1 %v7382_v13  ;;  %6771 = vmatprep.subr.bf16.mxu0 %v7383_v14  ;;  %v7430_v13 = vld [vmem:[%s9201_s1 + $0xda0] sm:$0xff]  }
 0x18a   :  { %6793 = vmatprep.subr.bf16.mxu1 %v7384_v15 }
 0x18c   :  { %6772 = vmatpush3.bf16.msra.mxu0 %v7385_v16  ;;  %v7431_v16 = vld [vmem:[%s9201_s1 + $0xd68] sm:$0xff]  }
 0x18d   :  { %6794 = vmatpush3.bf16.msra.mxu1 %v7386_v17  ;;  %6773 = vmatprep.subr.bf16.mxu0 %v7387_v18 }
 0x18e   :  { %6795 = vmatprep.subr.bf16.mxu1 %v7388_v19  ;;  %v7432_v19 = vld [vmem:[%s9201_s1 + $0xde8] sm:$0xff]  }
 0x190   :  { %6774 = vmatpush3.bf16.msra.mxu0 %v7389_v20 }
 0x191   :  { %6796 = vmatpush3.bf16.msra.mxu1 %v7390_v21  ;;  %6775 = vmatprep.subr.bf16.mxu0 %v7391_v22  ;;  %v7433_v22 = vld [vmem:[%s9201_s1 + $0xd28] sm:$0xff]  }
 0x192   :  { %6797 = vmatprep.subr.bf16.mxu1 %v7392_v23 }
 0x194   :  { %6776 = vmatpush3.bf16.msra.mxu0 %v7393_v25 }
 0x195   :  { %6798 = vmatpush3.bf16.msra.mxu1 %v7394_v27  ;;  %6777 = vmatprep.subr.bf16.mxu0 %v7395_v31  ;;  %v7435_v27 = vld [vmem:[%s9201_s1 + $0xd70] sm:$0xff]  }
 0x196   :  { %v6475_v24 = vpop.f32.mrb[20].mxu0  ;;  %6799 = vmatprep.subr.bf16.mxu1 %v7396_v33  ;;  %v7438_v31 = vld [vmem:[%s9201_s1 + $0xdb0] sm:$0xff]   ;;  %v7440_v33 = vld [vmem:[%s9201_s1 + $0xdf8] sm:$0xff]  }
 0x197   :  { %v6497_v26 = vpop.f32.mrb[20].mxu1  ;;  %v6476_v28 = vpop.f32.mrb[21].mxu0 }
 0x198   :  { %v6477_v29 = vadd.f32 %v6476_v28, %v6475_v24  ;;  %v6498_v30 = vpop.f32.mrb[21].mxu1  ;;  %v6478_v34 = vpop.f32.mrb[22].mxu0  ;;  %6778 = vmatpush3.bf16.msra.mxu0 %v7397_v37  ;;  %v7434_v24 = vld [vmem:[%s9201_s1 + $0xda8] sm:$0xff]  }
 0x199   :  { %v6499_v32 = vadd.f32 %v6498_v30, %v6497_v26  ;;  %v6500_v36 = vpop.f32.mrb[22].mxu1  ;;  %v6479_v39 = vpop.f32.mrb[23].mxu0  ;;  %6800 = vmatpush3.bf16.msra.mxu1 %v7398_v38  ;;  %6779 = vmatprep.subr.bf16.mxu0 %v7399_v42  ;;  %v7437_v30 = vld [vmem:[%s9201_s1 + $0xd30] sm:$0xff]   ;;  %v7441_v34 = vld [vmem:[%s9201_s1 + $0xd38] sm:$0xff]   ;;  %v7447_v42 = vld [vmem:[%s9201_s1 + $0xe40] sm:$0xff]  }
 0x19a   :  { %v4811_v35 = vadd.f32 %v6477_v29, %v8751_v56  ;;  %v6501_v41 = vpop.f32.mrb[23].mxu1  ;;  %6801 = vmatprep.subr.bf16.mxu1 %v7400_v43  ;;  %v5714_v56 = vcombine.high %v42_v51, %v42_v51  ;;  %v7436_v29 = vld [vmem:[%s9201_s1 + $0xdf0] sm:$0xff]   ;;  %v44_v39 = vld [vmem:[%s9202_s0 + $0xd8] sm:$0xff]  ;;  %v7448_v43 = vld [vmem:[%s9201_s1 + $0xec0] sm:$0xff]  }
 0x19b   :  { %v43_v36 = vld [vmem:[%s9202_s0 + $0xd0] sm:$0xff]  ;;  %v5718_v41 = vcombine.high %v44_v39, %v44_v39 }
 0x19c   :  { %v8853_v40 = vadd.f32 %v6499_v32, %v4811_v35  ;;  %6780 = vmatpush3.bf16.msra.mxu0 %v7401_v44  ;;  %5408 = vmatprep.mubr.bf16.mxu1 %v5714_v56  ;;  %v7439_v32 = vld [vmem:[%s9201_s1 + $0xd78] sm:$0xff]   ;;  %v5715_v37 = vcombine.low %v43_v36, %v43_v36  ;;  %v5716_v38 = vcombine.high %v43_v36, %v43_v36  ;;  %v7449_v44 = vld [vmem:[%s9201_s1 + $0xe00] sm:$0xff]   ;;  %v7456_v51 = vld [vmem:[%s9201_s1 + $0xed0] sm:$0xff]  }
 0x19d   :  { %6802 = vmatpush3.bf16.msra.mxu1 %v7402_v45  ;;  %6781 = vmatprep.subr.bf16.mxu0 %v7403_v46  ;;  %v7442_v35 = vld [vmem:[%s9201_s1 + $0xdb8] sm:$0xff]   ;;  %v7450_v45 = vld [vmem:[%s9201_s1 + $0xe80] sm:$0xff]   ;;  %v7451_v46 = vld [vmem:[%s9201_s1 + $0xe48] sm:$0xff]  }
 0x19e   :  { %6803 = vmatprep.subr.bf16.mxu1 %v7404_v47  ;;  %v7452_v47 = vld [vmem:[%s9201_s1 + $0xec8] sm:$0xff]   ;;  %v7461_v56 = vld [vmem:[%s9201_s1 + $0xe18] sm:$0xff]   ;;  %v7491_v36 = vld [vmem:[%s9201_s1 + $0xf50] sm:$0xff]  }
 0x1a0   :  { %6782 = vmatpush3.bf16.msra.mxu0 %v7405_v48  ;;  %v7453_v48 = vld [vmem:[%s9201_s1 + $0xe08] sm:$0xff]  }
 0x1a1   :  { %6804 = vmatpush3.bf16.msra.mxu1 %v7406_v49  ;;  %6811 = vmatprep.subr.bf16.mxu0 %v7411_v55  ;;  %v7454_v49 = vld [vmem:[%s9201_s1 + $0xe88] sm:$0xff]   ;;  %v7460_v55 = vld [vmem:[%s9201_s1 + $0xed8] sm:$0xff]  }
 0x1a2   :  { %6833 = vmatprep.subr.bf16.mxu1 %v7412_v57  ;;  %v7462_v57 = vld [vmem:[%s9201_s1 + $0xe98] sm:$0xff]  }
 0x1a3   :  { %5369 = vmatmul.mubr.bf16.vlgmr.msra.gmra.mrb[48].mxu0 %v5711_v52  ;;  %v7457_v52 = vld [vmem:[%s9201_s1 + $0xe10] sm:$0xff]  }
 0x1a4   :  { %5409 = vmatmul.mubr.bf16.vlgmr.msra.gmra.mrb[48].mxu1 %v5713_v54  ;;  %6812 = vmatpush3.bf16.msra.mxu0 %v7413_v58  ;;  %v7459_v54 = vld [vmem:[%s9201_s1 + $0xe58] sm:$0xff]   ;;  %v7463_v58 = vld [vmem:[%s9201_s1 + $0xe60] sm:$0xff]  }
 0x1a5   :  { %6834 = vmatpush3.bf16.msra.mxu1 %v7414_v59  ;;  %6813 = vmatprep.subr.bf16.mxu0 %v7415_v60  ;;  %v7464_v59 = vld [vmem:[%s9201_s1 + $0xee0] sm:$0xff]  }
 0x1a6   :  { %6835 = vmatprep.subr.bf16.mxu1 %v7416_v61  ;;  %5448 = vmatprep.mubr.bf16.mxu0 %v5716_v38  ;;  %v7465_v61 = vld [vmem:[%s9201_s1 + $0xe20] sm:$0xff]   ;;  %v7493_v38 = vld [vmem:[%s9201_s1 + $0xf10] sm:$0xff]  }
 0x1a7   :  { %5488 = vmatprep.mubr.bf16.mxu1 %v5718_v41  ;;  %v7496_v41 = vld [vmem:[%s9201_s1 + $0xfd8] sm:$0xff]  }
 0x1a8   :  { %6814 = vmatpush3.bf16.msra.mxu0 %v7417_v62 }
 0x1a9   :  { %6836 = vmatpush3.bf16.msra.mxu1 %v7418_v63  ;;  %6815 = vmatprep.subr.bf16.mxu0 %v7419_v0  ;;  %v7466_v63 = vld [vmem:[%s9201_s1 + $0xea0] sm:$0xff]  }
 0x1aa   :  { %6837 = vmatprep.subr.bf16.mxu1 %v7420_v1 }
 0x1ac   :  { %6816 = vmatpush3.bf16.msra.mxu0 %v7421_v2  ;;  %v7467_v2 = vld [vmem:[%s9201_s1 + $0xe68] sm:$0xff]  }
 0x1ad   :  { %6838 = vmatpush3.bf16.msra.mxu1 %v7422_v3  ;;  %6817 = vmatprep.subr.bf16.mxu0 %v7423_v4 }
 0x1ae   :  { %6839 = vmatprep.subr.bf16.mxu1 %v7424_v5  ;;  %v7468_v5 = vld [vmem:[%s9201_s1 + $0xee8] sm:$0xff]  }
 0x1b0   :  { %6818 = vmatpush3.bf16.msra.mxu0 %v7425_v6 }
 0x1b1   :  { %6840 = vmatpush3.bf16.msra.mxu1 %v7426_v7  ;;  %6819 = vmatprep.subr.bf16.mxu0 %v7427_v8  ;;  %v7469_v8 = vld [vmem:[%s9201_s1 + $0xe28] sm:$0xff]  }
 0x1b2   :  { %6841 = vmatprep.subr.bf16.mxu1 %v7428_v9 }
 0x1b4   :  { %6820 = vmatpush3.bf16.msra.mxu0 %v7429_v11 }
 0x1b5   :  { %6842 = vmatpush3.bf16.msra.mxu1 %v7430_v13  ;;  %6821 = vmatprep.subr.bf16.mxu0 %v7431_v16  ;;  %v7471_v13 = vld [vmem:[%s9201_s1 + $0xe70] sm:$0xff]  }
 0x1b6   :  { %v6519_v10 = vpop.f32.mrb[24].mxu0  ;;  %6843 = vmatprep.subr.bf16.mxu1 %v7432_v19  ;;  %v7473_v16 = vld [vmem:[%s9201_s1 + $0xe30] sm:$0xff]   ;;  %v7476_v19 = vld [vmem:[%s9201_s1 + $0xef8] sm:$0xff]  }
 0x1b7   :  { %v6541_v12 = vpop.f32.mrb[24].mxu1  ;;  %v6520_v14 = vpop.f32.mrb[25].mxu0 }
 0x1b8   :  { %v6542_v15 = vpop.f32.mrb[25].mxu1  ;;  %v6521_v17 = vadd.f32 %v6520_v14, %v6519_v10  ;;  %v6522_v20 = vpop.f32.mrb[26].mxu0  ;;  %6822 = vmatpush3.bf16.msra.mxu0 %v7433_v22  ;;  %v7470_v10 = vld [vmem:[%s9201_s1 + $0xea8] sm:$0xff]   ;;  %v45_v22 = vld [vmem:[%s9202_s0 + $0xe0] sm:$0xff] }
 0x1b9   :  { %v6543_v18 = vadd.f32 %v6542_v15, %v6541_v12  ;;  %v6544_v21 = vpop.f32.mrb[26].mxu1  ;;  %v6523_v25 = vpop.f32.mrb[27].mxu0  ;;  %6844 = vmatpush3.bf16.msra.mxu1 %v7434_v24  ;;  %6823 = vmatprep.subr.bf16.mxu0 %v7435_v27  ;;  %v7472_v15 = vld [vmem:[%s9201_s1 + $0xef0] sm:$0xff]   ;;  %v7477_v20 = vld [vmem:[%s9201_s1 + $0xe38] sm:$0xff]   ;;  %v5719_v24 = vcombine.low %v45_v22, %v45_v22 }
 0x1ba   :  { %v4891_v23 = vadd.f32 %v6521_v17, %v8853_v40  ;;  %v6545_v26 = vpop.f32.mrb[27].mxu1  ;;  %6845 = vmatprep.subr.bf16.mxu1 %v7436_v29  ;;  %v5717_v40 = vcombine.low %v44_v39, %v44_v39  ;;  %v7474_v17 = vld [vmem:[%s9201_s1 + $0xeb0] sm:$0xff]   ;;  %v7478_v21 = vld [vmem:[%s9201_s1 + $0xeb8] sm:$0xff]   ;;  %v5720_v25 = vcombine.high %v45_v22, %v45_v22  ;;  %v7484_v29 = vld [vmem:[%s9201_s1 + $0xfc0] sm:$0xff]  }
 0x1bb   :  { %v7494_v39 = vld [vmem:[%s9201_s1 + $0xf90] sm:$0xff]  }
 0x1bc   :  { %v8961_v28 = vadd.f32 %v6543_v18, %v4891_v23  ;;  %6824 = vmatpush3.bf16.msra.mxu0 %v7437_v30  ;;  %v7475_v18 = vld [vmem:[%s9201_s1 + $0xe78] sm:$0xff]   ;;  %v46_v23 = vld [vmem:[%s9202_s0 + $0xe8] sm:$0xff]  ;;  %v7485_v30 = vld [vmem:[%s9201_s1 + $0xf00] sm:$0xff]  }
 0x1bd   :  { %6846 = vmatpush3.bf16.msra.mxu1 %v7438_v31  ;;  %6825 = vmatprep.subr.bf16.mxu0 %v7439_v32  ;;  %v5721_v26 = vcombine.low %v46_v23, %v46_v23  ;;  %v5722_v27 = vcombine.high %v46_v23, %v46_v23  ;;  %v7486_v31 = vld [vmem:[%s9201_s1 + $0xf80] sm:$0xff]   ;;  %v7487_v32 = vld [vmem:[%s9201_s1 + $0xf48] sm:$0xff]  }
 0x1be   :  { %6847 = vmatprep.subr.bf16.mxu1 %v7440_v33  ;;  %v7488_v33 = vld [vmem:[%s9201_s1 + $0xfc8] sm:$0xff]  }
 0x1c0   :  { %6826 = vmatpush3.bf16.msra.mxu0 %v7441_v34  ;;  %v7489_v34 = vld [vmem:[%s9201_s1 + $0xf08] sm:$0xff]  }
 0x1c1   :  { %6848 = vmatpush3.bf16.msra.mxu1 %v7442_v35  ;;  %6855 = vmatprep.subr.bf16.mxu0 %v7447_v42  ;;  %v7490_v35 = vld [vmem:[%s9201_s1 + $0xf88] sm:$0xff]   ;;  %v7497_v42 = vld [vmem:[%s9201_s1 + $0xf18] sm:$0xff]  }
 0x1c2   :  { %6877 = vmatprep.subr.bf16.mxu1 %v7448_v43  ;;  %v7498_v43 = vld [vmem:[%s9201_s1 + $0xf98] sm:$0xff]  }
 0x1c3   :  { %5449 = vmatmul.mubr.bf16.vlgmr.msra.gmra.mrb[52].mxu0 %v5715_v37  ;;  %v7492_v37 = vld [vmem:[%s9201_s1 + $0xfd0] sm:$0xff]  }
 0x1c4   :  { %5489 = vmatmul.mubr.bf16.vlgmr.msra.gmra.mrb[52].mxu1 %v5717_v40  ;;  %6856 = vmatpush3.bf16.msra.mxu0 %v7449_v44  ;;  %v7495_v40 = vld [vmem:[%s9201_s1 + $0xf58] sm:$0xff]   ;;  %v7499_v44 = vld [vmem:[%s9201_s1 + $0xf60] sm:$0xff]  }
 0x1c5   :  { %6878 = vmatpush3.bf16.msra.mxu1 %v7450_v45  ;;  %6857 = vmatprep.subr.bf16.mxu0 %v7451_v46  ;;  %v7500_v45 = vld [vmem:[%s9201_s1 + $0xfe0] sm:$0xff]  }
 0x1c6   :  { %6879 = vmatprep.subr.bf16.mxu1 %v7452_v47  ;;  %5528 = vmatprep.mubr.bf16.mxu0 %v5720_v25  ;;  %v7501_v46 = vld [vmem:[%s9201_s1 + $0xf20] sm:$0xff]  }
 0x1c7   :  { %5568 = vmatprep.mubr.bf16.mxu1 %v5722_v27 }
 0x1c8   :  { %6858 = vmatpush3.bf16.msra.mxu0 %v7453_v48  ;;  %v7502_v48 = vld [vmem:[%s9201_s1 + $0xfa0] sm:$0xff]  }
 0x1c9   :  { %6880 = vmatpush3.bf16.msra.mxu1 %v7454_v49  ;;  %6859 = vmatprep.subr.bf16.mxu0 %v7455_v50 }
 0x1ca   :  { %6881 = vmatprep.subr.bf16.mxu1 %v7456_v51 }
 0x1cc   :  { %6860 = vmatpush3.bf16.msra.mxu0 %v7457_v52 }
 0x1cd   :  { %6882 = vmatpush3.bf16.msra.mxu1 %v7458_v53  ;;  %6861 = vmatprep.subr.bf16.mxu0 %v7459_v54  ;;  %v7503_v54 = vld [vmem:[%s9201_s1 + $0xf68] sm:$0xff]  }
 0x1ce   :  { %6883 = vmatprep.subr.bf16.mxu1 %v7460_v55 }
 0x1d0   :  { %6862 = vmatpush3.bf16.msra.mxu0 %v7461_v56  ;;  %v7504_v56 = vld [vmem:[%s9201_s1 + $0xfe8] sm:$0xff]  }
 0x1d1   :  { %6884 = vmatpush3.bf16.msra.mxu1 %v7462_v57  ;;  %6863 = vmatprep.subr.bf16.mxu0 %v7463_v58 }
 0x1d2   :  { %6885 = vmatprep.subr.bf16.mxu1 %v7464_v59  ;;  %v7505_v59 = vld [vmem:[%s9201_s1 + $0xf28] sm:$0xff]  }
 0x1d4   :  { %6864 = vmatpush3.bf16.msra.mxu0 %v7465_v61  ;;  %v7506_v61 = vld [vmem:[%s9201_s1 + $0xfa8] sm:$0xff]  }
 0x1d5   :  { %6886 = vmatpush3.bf16.msra.mxu1 %v7466_v63  ;;  %6865 = vmatprep.subr.bf16.mxu0 %v7467_v2  ;;  %v7509_v2 = vld [vmem:[%s9201_s1 + $0xf30] sm:$0xff]  }
 0x1d6   :  { %v6563_v60 = vpop.f32.mrb[28].mxu0  ;;  %6887 = vmatprep.subr.bf16.mxu1 %v7468_v5  ;;  %v7512_v5 = vld [vmem:[%s9201_s1 + $0xff8] sm:$0xff]  }
 0x1d7   :  { %v6585_v62 = vpop.f32.mrb[28].mxu1  ;;  %v6564_v0 = vpop.f32.mrb[29].mxu0 }
 0x1d8   :  { %v6586_v1 = vpop.f32.mrb[29].mxu1  ;;  %v6565_v3 = vadd.f32 %v6564_v0, %v6563_v60  ;;  %v6566_v6 = vpop.f32.mrb[30].mxu0  ;;  %6866 = vmatpush3.bf16.msra.mxu0 %v7469_v8  ;;  %v7507_v0 = vld [vmem:[%s9201_s1 + $0xf70] sm:$0xff]  }
 0x1d9   :  { %v6587_v4 = vadd.f32 %v6586_v1, %v6585_v62  ;;  %v6588_v7 = vpop.f32.mrb[30].mxu1  ;;  %v6567_v11 = vpop.f32.mrb[31].mxu0  ;;  %6888 = vmatpush3.bf16.msra.mxu1 %v7470_v10  ;;  %6867 = vmatprep.subr.bf16.mxu0 %v7471_v13  ;;  %v7508_v1 = vld [vmem:[%s9201_s1 + $0xff0] sm:$0xff]   ;;  %v7513_v6 = vld [vmem:[%s9201_s1 + $0xf38] sm:$0xff]  }
 0x1da   :  { %v4971_v9 = vadd.f32 %v6565_v3, %v8961_v28  ;;  %v6589_v12 = vpop.f32.mrb[31].mxu1  ;;  %6889 = vmatprep.subr.bf16.mxu1 %v7472_v15  ;;  %v7483_v28 = vld [vmem:[%s9201_s1 + $0xf40] sm:$0xff]   ;;  %v7510_v3 = vld [vmem:[%s9201_s1 + $0xfb0] sm:$0xff]   ;;  %v7514_v7 = vld [vmem:[%s9201_s1 + $0xfb8] sm:$0xff]  }
 0x1db   :  { %v47_v8 = vld [vmem:[%s9202_s0 + $0xf0] sm:$0xff] }
 0x1dc   :  { %v9066_v14 = vadd.f32 %v6587_v4, %v4971_v9  ;;  %6868 = vmatpush3.bf16.msra.mxu0 %v7473_v16  ;;  %v7511_v4 = vld [vmem:[%s9201_s1 + $0xf78] sm:$0xff]   ;;  %v5723_v10 = vcombine.low %v47_v8, %v47_v8  ;;  %v5724_v11 = vcombine.high %v47_v8, %v47_v8 }
 0x1dd   :  { %6890 = vmatpush3.bf16.msra.mxu1 %v7474_v17  ;;  %6869 = vmatprep.subr.bf16.mxu0 %v7475_v18  ;;  %v48_v9 = vld [vmem:[%s9202_s0 + $0xf8] sm:$0xff] }
 0x1de   :  { %6891 = vmatprep.subr.bf16.mxu1 %v7476_v19  ;;  %v5725_v12 = vcombine.low %v48_v9, %v48_v9  ;;  %v5726_v13 = vcombine.high %v48_v9, %v48_v9 }
 0x1e0   :  { %6870 = vmatpush3.bf16.msra.mxu0 %v7477_v20 }
 0x1e1   :  { %6892 = vmatpush3.bf16.msra.mxu1 %v7478_v21  ;;  %6899 = vmatprep.subr.bf16.mxu0 %v7483_v28 }
 0x1e2   :  { %6921 = vmatprep.subr.bf16.mxu1 %v7484_v29 }
 0x1e3   :  { %5529 = vmatmul.mubr.bf16.vlgmr.msra.gmra.mrb[56].mxu0 %v5719_v24 }
 0x1e4   :  { %5569 = vmatmul.mubr.bf16.vlgmr.msra.gmra.mrb[56].mxu1 %v5721_v26  ;;  %6900 = vmatpush3.bf16.msra.mxu0 %v7485_v30 }
 0x1e5   :  { %6922 = vmatpush3.bf16.msra.mxu1 %v7486_v31  ;;  %6901 = vmatprep.subr.bf16.mxu0 %v7487_v32 }
 0x1e6   :  { %6923 = vmatprep.subr.bf16.mxu1 %v7488_v33  ;;  %5608 = vmatprep.mubr.bf16.mxu0 %v5724_v11 }
 0x1e7   :  { %5648 = vmatprep.mubr.bf16.mxu1 %v5726_v13 }
 0x1e8   :  { %6902 = vmatpush3.bf16.msra.mxu0 %v7489_v34 }
 0x1e9   :  { %6924 = vmatpush3.bf16.msra.mxu1 %v7490_v35  ;;  %6903 = vmatprep.subr.bf16.mxu0 %v7491_v36 }
 0x1ea   :  { %6925 = vmatprep.subr.bf16.mxu1 %v7492_v37 }
 0x1ec   :  { %6904 = vmatpush3.bf16.msra.mxu0 %v7493_v38 }
 0x1ed   :  { %6926 = vmatpush3.bf16.msra.mxu1 %v7494_v39  ;;  %6905 = vmatprep.subr.bf16.mxu0 %v7495_v40 }
 0x1ee   :  { %6927 = vmatprep.subr.bf16.mxu1 %v7496_v41 }
 0x1f0   :  { %6906 = vmatpush3.bf16.msra.mxu0 %v7497_v42 }
 0x1f1   :  { %6928 = vmatpush3.bf16.msra.mxu1 %v7498_v43  ;;  %6907 = vmatprep.subr.bf16.mxu0 %v7499_v44 }
 0x1f2   :  { %6929 = vmatprep.subr.bf16.mxu1 %v7500_v45 }
 0x1f4   :  { %6908 = vmatpush3.bf16.msra.mxu0 %v7501_v46 }
 0x1f5   :  { %6930 = vmatpush3.bf16.msra.mxu1 %v7502_v48  ;;  %6909 = vmatprep.subr.bf16.mxu0 %v7503_v54 }
 0x1f6   :  { %v6607_v47 = vpop.f32.mrb[32].mxu0  ;;  %6931 = vmatprep.subr.bf16.mxu1 %v7504_v56 }
 0x1f7   :  { %v6629_v49 = vpop.f32.mrb[32].mxu1  ;;  %v6608_v50 = vpop.f32.mrb[33].mxu0 }
 0x1f8   :  { %v6630_v51 = vpop.f32.mrb[33].mxu1  ;;  %v6609_v52 = vadd.f32 %v6608_v50, %v6607_v47  ;;  %v6610_v55 = vpop.f32.mrb[34].mxu0  ;;  %6910 = vmatpush3.bf16.msra.mxu0 %v7505_v59 }
 0x1f9   :  { %v6631_v53 = vadd.f32 %v6630_v51, %v6629_v49  ;;  %v6632_v57 = vpop.f32.mrb[34].mxu1  ;;  %v6611_v60 = vpop.f32.mrb[35].mxu0  ;;  %6932 = vmatpush3.bf16.msra.mxu1 %v7506_v61  ;;  %6911 = vmatprep.subr.bf16.mxu0 %v7507_v0 }
 0x1fa   :  { %v5051_v58 = vadd.f32 %v6609_v52, %v9066_v14  ;;  %v6633_v62 = vpop.f32.mrb[35].mxu1  ;;  %6933 = vmatprep.subr.bf16.mxu1 %v7508_v1 }
 0x1fc   :  { %v5091_v63 = vadd.f32 %v6631_v53, %v5051_v58  ;;  %6912 = vmatpush3.bf16.msra.mxu0 %v7509_v2 }
 0x1fd   :  { %6934 = vmatpush3.bf16.msra.mxu1 %v7510_v3  ;;  %6913 = vmatprep.subr.bf16.mxu0 %v7511_v4 }
 0x1fe   :  { %6935 = vmatprep.subr.bf16.mxu1 %v7512_v5 }
 0x200   :  { %6914 = vmatpush3.bf16.msra.mxu0 %v7513_v6 }
 0x201   :  { %6936 = vmatpush3.bf16.msra.mxu1 %v7514_v7 }
 0x203   :  { %5609 = vmatmul.mubr.bf16.vlgmr.msra.gmra.mrb[60].mxu0 %v5723_v10 }
 0x204   :  { %5649 = vmatmul.mubr.bf16.vlgmr.msra.gmra.mrb[60].mxu1 %v5725_v12 }
 0x216   :  { %v6651_v14 = vpop.f32.mrb[36].mxu0 }
 0x217   :  { %v6673_v15 = vpop.f32.mrb[36].mxu1  ;;  %v6652_v16 = vpop.f32.mrb[37].mxu0 }
 0x218   :  { %v6653_v17 = vadd.f32 %v6652_v16, %v6651_v14  ;;  %v6674_v18 = vpop.f32.mrb[37].mxu1  ;;  %v6654_v19 = vpop.f32.mrb[38].mxu0 }
 0x219   :  { %v6675_v20 = vadd.f32 %v6674_v18, %v6673_v15  ;;  %v6676_v21 = vpop.f32.mrb[38].mxu1  ;;  %v6655_v22 = vpop.f32.mrb[39].mxu0 }
 0x21a   :  { %v5131_v23 = vadd.f32 %v6653_v17, %v5091_v63  ;;  %v6677_v24 = vpop.f32.mrb[39].mxu1 }
 0x21c   :  { %v5171_v25 = vadd.f32 %v6675_v20, %v5131_v23 }
 0x236   :  { %v6695_v26 = vpop.f32.mrb[40].mxu0 }
 0x237   :  { %v6717_v27 = vpop.f32.mrb[40].mxu1  ;;  %v6696_v28 = vpop.f32.mrb[41].mxu0 }
 0x238   :  { %v6718_v29 = vpop.f32.mrb[41].mxu1  ;;  %v6697_v30 = vadd.f32 %v6696_v28, %v6695_v26  ;;  %v6698_v32 = vpop.f32.mrb[42].mxu0 }
 0x239   :  { %v6719_v31 = vadd.f32 %v6718_v29, %v6717_v27  ;;  %v6720_v33 = vpop.f32.mrb[42].mxu1  ;;  %v6699_v34 = vpop.f32.mrb[43].mxu0 }
 0x23a   :  { %v6721_v35 = vpop.f32.mrb[43].mxu1  ;;  %v5211_v36 = vadd.f32 %v6697_v30, %v5171_v25 }
 0x23c   :  { %v5251_v37 = vadd.f32 %v6719_v31, %v5211_v36 }
 0x256   :  { %v6739_v38 = vpop.f32.mrb[44].mxu0 }
 0x257   :  { %v6761_v39 = vpop.f32.mrb[44].mxu1  ;;  %v6740_v40 = vpop.f32.mrb[45].mxu0 }
 0x258   :  { %v6741_v41 = vadd.f32 %v6740_v40, %v6739_v38  ;;  %v6762_v42 = vpop.f32.mrb[45].mxu1  ;;  %v6742_v43 = vpop.f32.mrb[46].mxu0 }
 0x259   :  { %v6763_v44 = vadd.f32 %v6762_v42, %v6761_v39  ;;  %v6764_v45 = vpop.f32.mrb[46].mxu1  ;;  %v6743_v46 = vpop.f32.mrb[47].mxu0 }
 0x25a   :  { %v5291_v47 = vadd.f32 %v6741_v41, %v5251_v37  ;;  %v6765_v48 = vpop.f32.mrb[47].mxu1 }
 0x25c   :  { %v5331_v49 = vadd.f32 %v6763_v44, %v5291_v47 }
 0x276   :  { %v6783_v50 = vpop.f32.mrb[48].mxu0 }
 0x277   :  { %v6805_v51 = vpop.f32.mrb[48].mxu1  ;;  %v6784_v52 = vpop.f32.mrb[49].mxu0 }
 0x278   :  { %v6785_v53 = vadd.f32 %v6784_v52, %v6783_v50  ;;  %v6806_v54 = vpop.f32.mrb[49].mxu1  ;;  %v6786_v55 = vpop.f32.mrb[50].mxu0 }
 0x279   :  { %v6807_v56 = vadd.f32 %v6806_v54, %v6805_v51  ;;  %v6808_v57 = vpop.f32.mrb[50].mxu1  ;;  %v6787_v58 = vpop.f32.mrb[51].mxu0 }
 0x27a   :  { %v5371_v59 = vadd.f32 %v6785_v53, %v5331_v49  ;;  %v6809_v60 = vpop.f32.mrb[51].mxu1 }
 0x27c   :  { %v5411_v61 = vadd.f32 %v6807_v56, %v5371_v59 }
 0x296   :  { %v6827_v62 = vpop.f32.mrb[52].mxu0 }
 0x297   :  { %v6849_v63 = vpop.f32.mrb[52].mxu1  ;;  %v6828_v0 = vpop.f32.mrb[53].mxu0 }
 0x298   :  { %v6850_v1 = vpop.f32.mrb[53].mxu1  ;;  %v6829_v2 = vadd.f32 %v6828_v0, %v6827_v62  ;;  %v6830_v4 = vpop.f32.mrb[54].mxu0 }
 0x299   :  { %v6851_v3 = vadd.f32 %v6850_v1, %v6849_v63  ;;  %v6852_v5 = vpop.f32.mrb[54].mxu1  ;;  %v6831_v6 = vpop.f32.mrb[55].mxu0 }
 0x29a   :  { %v6853_v7 = vpop.f32.mrb[55].mxu1  ;;  %v5451_v8 = vadd.f32 %v6829_v2, %v5411_v61 }
 0x29c   :  { %v5491_v9 = vadd.f32 %v6851_v3, %v5451_v8 }
 0x2b6   :  { %v6871_v10 = vpop.f32.mrb[56].mxu0 }
 0x2b7   :  { %v6893_v11 = vpop.f32.mrb[56].mxu1  ;;  %v6872_v12 = vpop.f32.mrb[57].mxu0 }
 0x2b8   :  { %v6873_v13 = vadd.f32 %v6872_v12, %v6871_v10  ;;  %v6894_v14 = vpop.f32.mrb[57].mxu1  ;;  %v6874_v15 = vpop.f32.mrb[58].mxu0 }
 0x2b9   :  { %v6895_v16 = vadd.f32 %v6894_v14, %v6893_v11  ;;  %v6896_v17 = vpop.f32.mrb[58].mxu1  ;;  %v6875_v18 = vpop.f32.mrb[59].mxu0 }
 0x2ba   :  { %v5531_v19 = vadd.f32 %v6873_v13, %v5491_v9  ;;  %v6897_v20 = vpop.f32.mrb[59].mxu1 }
 0x2bc   :  { %v5571_v21 = vadd.f32 %v6895_v16, %v5531_v19 }
 0x2d6   :  { %v6915_v22 = vpop.f32.mrb[60].mxu0 }
 0x2d7   :  { %v6937_v23 = vpop.f32.mrb[60].mxu1  ;;  %v6916_v24 = vpop.f32.mrb[61].mxu0 }
 0x2d8   :  { %v6917_v25 = vadd.f32 %v6916_v24, %v6915_v22  ;;  %v6938_v26 = vpop.f32.mrb[61].mxu1  ;;  %v6918_v27 = vpop.f32.mrb[62].mxu0 }
 0x2d9   :  { %v6939_v28 = vadd.f32 %v6938_v26, %v6937_v23  ;;  %v6940_v29 = vpop.f32.mrb[62].mxu1  ;;  %v6919_v30 = vpop.f32.mrb[63].mxu0 }
 0x2da   :  { %v5611_v31 = vadd.f32 %v6917_v25, %v5571_v21  ;;  %v6941_v32 = vpop.f32.mrb[63].mxu1 }
 0x2dc   :  { %v5651_v33 = vadd.f32 %v6939_v28, %v5611_v31 }
 0x2de   :  { %5657 = vst.msk [vmem:[%s9204_s3] sm:$0xff] %vm5656_vm0, %v5651_v33 }

</bundles_post_ra>
